<compile_context>
chip_gen: v5e
topology: v5e:2x2
jax: 0.10.0
libtpu: 0.0.40
codegen_flags: <defaults>
</compile_context>

<pallas_src>
import functools
import math

import jax
import jax.numpy as jnp
from jax.experimental import pallas as pl
from jax.experimental.pallas import tpu as pltpu


# ----------------------------- shared helpers ------------------------------
def _layer_norm(x, gamma, beta, eps=1e-5):
    mu = jnp.mean(x, axis=-1, keepdims=True)
    var = jnp.mean((x - mu) ** 2, axis=-1, keepdims=True)
    return (x - mu) * jax.lax.rsqrt(var + eps) * gamma + beta


def _layer_norm_noaffine(x, eps=1e-5):
    mu = jnp.mean(x, axis=-1, keepdims=True)
    var = jnp.mean((x - mu) ** 2, axis=-1, keepdims=True)
    return (x - mu) * jax.lax.rsqrt(var + eps)


def _softmax(x):
    m = jnp.max(x, axis=-1, keepdims=True)
    e = jnp.exp(x - m)
    return e / jnp.sum(e, axis=-1, keepdims=True)


# ------------------------------- the kernel ---------------------------------
def partial_encoder_kernel(
    # per-tile data inputs
    xcol_ref, m3_ref, msel_ref,
    # h_layer (hx = feature_embedding @ W1_emb + b1, batch-invariant, (D, Hh))
    hx_ref, w1x_ref, g1_ref, bt1_ref, w2_ref, b2_ref, g2_ref, bt2_ref,
    # TransformerEncoderLayer (QKV fused, single WO)
    wqkv_ref, bqkv_ref, wo_ref, bo_ref,
    ln1g_ref, ln1b_ref, wf1_ref, bf1_ref, wf2_ref, bf2_ref, ln2g_ref, ln2b_ref,
    # fused scvi FCLayers encoder MLP
    ew1_ref, eb1_ref, ew2_ref, eb2_ref,
    # output (lane-dense, padded to 128 lanes)
    out_ref,
    *, n_heads,
):
    f32 = jnp.float32
    bf16 = jnp.bfloat16

    TB = m3_ref.shape[0]
    D = m3_ref.shape[2]
    N = TB * D
    HH = hx_ref.shape[1]
    C = wo_ref.shape[0]
    dh = C // n_heads

    xcol = xcol_ref[...]                                 # (N, 1)  x[b, d] flattened
    m3 = m3_ref[...]                                     # (TB, 1, D) mask (key layout)

    # ---------------- h_layer (per-feature MLP), batch-flattened -------------
    h1 = (xcol * w1x_ref[...]).reshape(TB, D, HH) + hx_ref[...]   # bcast over batch
    h1 = h1.reshape(N, HH)
    h1 = jnp.maximum(_layer_norm(h1, g1_ref[...], bt1_ref[...]), 0.0)
    h2 = jnp.dot(h1.astype(bf16), w2_ref[...], preferred_element_type=f32)
    h2 = h2 + b2_ref[...]
    hf = jnp.maximum(_layer_norm(h2, g2_ref[...], bt2_ref[...]), 0.0)      # (N, C)
    hf_b = hf.astype(bf16)

    # -------- TransformerEncoderLayer (post-norm, ReLU, dropout = 0) ---------
    # Single fused QKV projection: (N, C) @ (C, 3C) -> (N, 3C).
    qkv = jnp.dot(hf_b, wqkv_ref[...], preferred_element_type=f32) + bqkv_ref[...]
    qkv3 = qkv.reshape(TB, D, 3 * C)

    scale = 1.0 / math.sqrt(dh)
    key_bias = jnp.broadcast_to(jnp.where(m3 > 0.0, 0.0, -1e30), (TB, D, D))

    heads = []
    for h in range(n_heads):                             # statically unrolled
        qh = qkv3[:, :, h * dh:(h + 1) * dh].astype(bf16)
        kh = qkv3[:, :, C + h * dh:C + (h + 1) * dh].astype(bf16)
        vh = qkv3[:, :, 2 * C + h * dh:2 * C + (h + 1) * dh].astype(bf16)
        s = jnp.einsum("bqd,bkd->bqk", qh, kh,
                       preferred_element_type=f32) * scale + key_bias
        smax = jnp.max(s, axis=-1, keepdims=True)
        e = jnp.exp(s - smax)
        p = e * pl.reciprocal(jnp.sum(e, axis=-1, keepdims=True), approx=True)
        heads.append(jnp.einsum("bqk,bkd->bqd", p.astype(bf16), vh,
                                preferred_element_type=f32))          # (TB, D, dh)
    o_all = jnp.concatenate(heads, axis=-1).reshape(N, C)             # (N, C)
    attn = jnp.dot(o_all.astype(bf16), wo_ref[...],
                   preferred_element_type=f32) + bo_ref[...]

    src = _layer_norm(hf + attn, ln1g_ref[...], ln1b_ref[...])
    ff = jnp.dot(src.astype(bf16), wf1_ref[...], preferred_element_type=f32)
    ff = jnp.maximum(ff + bf1_ref[...], 0.0)
    ff = jnp.dot(ff.astype(bf16), wf2_ref[...], preferred_element_type=f32)
    ff = ff + bf2_ref[...]
    tr = _layer_norm(src + ff, ln2g_ref[...], ln2b_ref[...])          # (N, C)

    # ---------------------- masked mean pooling over D -----------------------
    # MXU: per-tile block-diagonal selector (TB, N) @ (N, C) -> (TB, C).
    num = jnp.dot(msel_ref[...].astype(bf16), tr.astype(bf16),
                  preferred_element_type=f32)                          # (TB, C)
    den = jnp.sum(m3, axis=-1) + 1e-8                                  # (TB, 1)
    c = num / den                                                      # exact divide

    # ------ fused scvi FCLayers: (Linear -> LN(no affine) -> ReLU) x 2 -------
    hmid = jnp.dot(c.astype(bf16), ew1_ref[...], preferred_element_type=f32)
    hmid = jnp.maximum(_layer_norm_noaffine(hmid + eb1_ref[...]), 0.0)
    o = jnp.dot(hmid.astype(bf16), ew2_ref[...], preferred_element_type=f32)
    o = jnp.maximum(_layer_norm_noaffine(o + eb2_ref[...]), 0.0)       # (TB, 2L)

    # Lane-dense store: pad to the full 128-lane output block.
    pad = out_ref.shape[1] - o.shape[1]
    out_ref[...] = jnp.concatenate([o, jnp.zeros((TB, pad), f32)], axis=-1)


# ------------------------------- wrapper ------------------------------------
def partial_encoder_forward(x, mask, params, n_heads, tile_b=8):
    f32, bf16 = jnp.float32, jnp.bfloat16
    B, D = x.shape
    C = params["feature_embedding"].shape[1]
    two_l = params["e_w2"].shape[1]
    OUT_PAD = 128  # lane-dense output block width

    # tile_b=8 -> M = tile_b*D = 128 and (for B=16) 2 grid tiles, so both v7x
    # TensorCores are used. On v6e with larger B, raise tile_b to 16-32.
    n_tiles = pl.cdiv(B, tile_b)
    B_pad = n_tiles * tile_b

    x_p = jnp.asarray(x, f32)
    m_p = jnp.asarray(mask, f32)
    if B_pad != B:
        x_p = jnp.pad(x_p, ((0, B_pad - B), (0, 0)))
        m_p = jnp.pad(m_p, ((0, B_pad - B), (0, 0)))

    # Glue reshapes (XLA side): x[b,d] flattened onto the sublane axis of the
    # (tile_b*D, hidden) activation slabs; mask also as (B, 1, D) key layout.
    xcol = x_p.reshape(B_pad * D, 1)
    m3 = m_p.reshape(B_pad, 1, D)

    # Per-tile block-diagonal pooling selector:
    #   msel[r, (r % tile_b)*D + d] = mask[r, d]
    # so that inside a tile  num = msel_tile @ tr_tile  is the masked sum.
    local = jnp.arange(B_pad) % tile_b
    onehot = jax.nn.one_hot(local, tile_b, dtype=f32)                  # (B_pad, tile_b)
    msel = (onehot[:, :, None] * m_p[:, None, :]).reshape(B_pad, tile_b * D)

    # Hoisted batch-invariant h_layer term (NOT tiled; broadcast in-kernel).
    hx = (params["feature_embedding"].astype(f32) @ params["h_w1e"].astype(f32)
          + params["h_b1"].astype(f32))                                # (D, Hh)

    # Fused QKV weights / biases.
    wqkv = jnp.concatenate(
        [params["wq"], params["wk"], params["wv"]], axis=1).astype(bf16)   # (C, 3C)
    bqkv = jnp.concatenate(
        [params["bq"], params["bk"], params["bv"]], axis=1).astype(f32)    # (1, 3C)

    weight_args = [
        hx,
        params["h_w1x"].astype(f32), params["h_g1"], params["h_bt1"],
        params["h_w2"].astype(bf16), params["h_b2"], params["h_g2"], params["h_bt2"],
        wqkv, bqkv,
        params["wo"].astype(bf16), params["bo"],
        params["ln1_g"], params["ln1_b"],
        params["wf1"].astype(bf16), params["bf1"],
        params["wf2"].astype(bf16), params["bf2"],
        params["ln2_g"], params["ln2_b"],
        params["e_w1"].astype(bf16), params["e_b1"],
        params["e_w2"].astype(bf16), params["e_b2"],
    ]

    def full_spec(a):
        return pl.BlockSpec(a.shape, lambda i, nd=a.ndim: (0,) * nd)

    in_specs = [
        pl.BlockSpec((tile_b * D, 1), lambda i: (i, 0)),        # xcol
        pl.BlockSpec((tile_b, 1, D), lambda i: (i, 0, 0)),      # m3
        pl.BlockSpec((tile_b, tile_b * D), lambda i: (i, 0)),   # msel
    ] + [full_spec(a) for a in weight_args]

    out = pl.pallas_call(
        functools.partial(partial_encoder_kernel, n_heads=n_heads),
        out_shape=jax.ShapeDtypeStruct((B_pad, OUT_PAD), f32),
        grid=(n_tiles,),
        in_specs=in_specs,
        out_specs=pl.BlockSpec((tile_b, OUT_PAD), lambda i: (i, 0)),
        compiler_params=pltpu.CompilerParams(
            dimension_semantics=("parallel",)),
    )(xcol, m3, msel, *weight_args)

    mu, logvar = jnp.split(out[:B, :two_l], 2, axis=-1)
    return mu, logvar


# --------------------------- pure-JAX reference ------------------------------
def reference_forward(x, mask, params, n_heads):
    B, D = x.shape
    E = params["feature_embedding"]
    C = E.shape[1]

    x_flat = x.reshape(-1, 1)
    Eb = jnp.broadcast_to(E[None], (B, D, C)).reshape(-1, C)
    h1 = x_flat * params["h_w1x"] + Eb @ params["h_w1e"] + params["h_b1"]
    h1 = jnp.maximum(_layer_norm(h1, params["h_g1"], params["h_bt1"]), 0.0)
    h2 = h1 @ params["h_w2"] + params["h_b2"]
    h_out = jnp.maximum(_layer_norm(h2, params["h_g2"], params["h_bt2"]), 0.0)
    h_out = h_out.reshape(B, D, C)

    q = h_out @ params["wq"] + params["bq"]
    k = h_out @ params["wk"] + params["bk"]
    v = h_out @ params["wv"] + params["bv"]
    dh = C // n_heads

    def split_heads(t):
        return t.reshape(B, D, n_heads, dh).transpose(0, 2, 1, 3)

    qh, kh, vh = map(split_heads, (q, k, v))
    s = jnp.einsum("bhqd,bhkd->bhqk", qh, kh) / math.sqrt(dh)
    bias = jnp.where(mask > 0, 0.0, -1e30)[:, None, None, :]
    p = _softmax(s + bias)
    o = jnp.einsum("bhqk,bhkd->bhqd", p, vh).transpose(0, 2, 1, 3).reshape(B, D, C)
    attn = o @ params["wo"] + params["bo"]

    src = _layer_norm(h_out + attn, params["ln1_g"], params["ln1_b"])
    ff = jnp.maximum(src @ params["wf1"] + params["bf1"], 0.0) @ params["wf2"] + params["bf2"]
    tr = _layer_norm(src + ff, params["ln2_g"], params["ln2_b"])

    me = mask[..., None].astype(jnp.float32)
    c = (tr * me).sum(axis=1) / (me.sum(axis=1) + 1e-8)

    h = jnp.maximum(_layer_norm_noaffine(c @ params["e_w1"] + params["e_b1"]), 0.0)
    out = jnp.maximum(_layer_norm_noaffine(h @ params["e_w2"] + params["e_b2"]), 0.0)
    return jnp.split(out, 2, axis=-1)


# ------------------------------ params init ---------------------------------
def init_params(key, input_dim, code_dim, h_hidden, enc_hidden, latent_dim, ff_dim):
    ks = jax.random.split(key, 16)

    def w(k, shape, scale=0.05):
        return jax.random.normal(k, shape, jnp.float32) * scale

    p = {}
    p["feature_embedding"] = jax.random.normal(ks[0], (input_dim, code_dim), jnp.float32)
    # h_layer: Linear(1+C, Hh) split into x column / embedding part, then Linear(Hh, C)
    p["h_w1x"] = w(ks[1], (1, h_hidden))
    p["h_w1e"] = w(ks[2], (code_dim, h_hidden))
    p["h_b1"] = w(ks[3], (1, h_hidden))
    p["h_g1"] = jnp.ones((1, h_hidden), jnp.float32)
    p["h_bt1"] = jnp.zeros((1, h_hidden), jnp.float32)
    p["h_w2"] = w(ks[4], (h_hidden, code_dim))
    p["h_b2"] = w(ks[5], (1, code_dim))
    p["h_g2"] = jnp.ones((1, code_dim), jnp.float32)
    p["h_bt2"] = jnp.zeros((1, code_dim), jnp.float32)
    # TransformerEncoderLayer
    p["wq"] = w(ks[6], (code_dim, code_dim))
    p["wk"] = w(ks[7], (code_dim, code_dim))
    p["wv"] = w(ks[8], (code_dim, code_dim))
    p["bq"] = jnp.zeros((1, code_dim), jnp.float32)
    p["bk"] = jnp.zeros((1, code_dim), jnp.float32)
    p["bv"] = jnp.zeros((1, code_dim), jnp.float32)
    p["wo"] = w(ks[9], (code_dim, code_dim))
    p["bo"] = jnp.zeros((1, code_dim), jnp.float32)
    p["ln1_g"] = jnp.ones((1, code_dim), jnp.float32)
    p["ln1_b"] = jnp.zeros((1, code_dim), jnp.float32)
    p["wf1"] = w(ks[10], (code_dim, ff_dim))
    p["bf1"] = w(ks[11], (1, ff_dim))
    p["wf2"] = w(ks[12], (ff_dim, code_dim))
    p["bf2"] = jnp.zeros((1, code_dim), jnp.float32)
    p["ln2_g"] = jnp.ones((1, code_dim), jnp.float32)
    p["ln2_b"] = jnp.zeros((1, code_dim), jnp.float32)
    # encoder_mlp (FCLayers, 2 layers, LayerNorm no-affine, ReLU)
    p["e_w1"] = w(ks[13], (code_dim, enc_hidden))
    p["e_b1"] = w(ks[14], (1, enc_hidden))
    p["e_w2"] = w(ks[15], (enc_hidden, 2 * latent_dim))
    p["e_b2"] = jnp.zeros((1, 2 * latent_dim), jnp.float32)
    return p


if __name__ == "__main__":
    B = 16
    input_dim = 16          # number of features == transformer sequence length
    code_dim = 32
    h_hidden_dim = 32
    encoder_hidden_dim = 32
    latent_dim = 8
    n_heads = 4
    ff_dim = 4 * code_dim
    tile_b = 8              # M = tile_b*D = 128; 2 grid tiles (both v7x TCs busy)

    key = jax.random.PRNGKey(0)
    kx, km, kp = jax.random.split(key, 3)
    x = jax.random.normal(kx, (B, input_dim), jnp.float32)
    mask = (jax.random.uniform(km, (B, input_dim)) > 0.3).astype(jnp.float32)
    mask = mask.at[:, 0].set(1.0)   # ensure every sample has >= 1 observed feature

    params = init_params(kp, input_dim, code_dim, h_hidden_dim,
                         encoder_hidden_dim, latent_dim, ff_dim)

    mu, logvar = partial_encoder_forward(x, mask, params, n_heads, tile_b=tile_b)
    jax.block_until_ready((mu, logvar))

    mu_ref, logvar_ref = reference_forward(x, mask, params, n_heads)
    assert mu.shape == (B, latent_dim) and logvar.shape == (B, latent_dim)
    assert bool(jnp.all(jnp.isfinite(mu))) and bool(jnp.all(jnp.isfinite(logvar)))
    err = max(float(jnp.max(jnp.abs(mu - mu_ref))),
              float(jnp.max(jnp.abs(logvar - logvar_ref))))
    # Tolerance accounts for bf16 MXU operands + approx softmax reciprocal vs.
    # the pure-f32 reference (statistics/residuals/pool-divide are f32/exact).
    assert err < 5e-2, f"kernel/reference mismatch: max abs err = {err}"

    print("KERNEL_OK")
</pallas_src>

<mosaic_0001>
module attributes {stable_mosaic.version = 11 : i64} {
  func.func @partial_encoder_kernel(%arg0: i32, %arg1: memref<128x1xf32, #tpu.memory_space<vmem>>, %arg2: memref<8x1x16xf32, #tpu.memory_space<vmem>>, %arg3: memref<8x128xf32, #tpu.memory_space<vmem>>, %arg4: memref<16x32xf32, #tpu.memory_space<vmem>>, %arg5: memref<1x32xf32, #tpu.memory_space<vmem>>, %arg6: memref<1x32xf32, #tpu.memory_space<vmem>>, %arg7: memref<1x32xf32, #tpu.memory_space<vmem>>, %arg8: memref<32x32xbf16, #tpu.memory_space<vmem>>, %arg9: memref<1x32xf32, #tpu.memory_space<vmem>>, %arg10: memref<1x32xf32, #tpu.memory_space<vmem>>, %arg11: memref<1x32xf32, #tpu.memory_space<vmem>>, %arg12: memref<32x96xbf16, #tpu.memory_space<vmem>>, %arg13: memref<1x96xf32, #tpu.memory_space<vmem>>, %arg14: memref<32x32xbf16, #tpu.memory_space<vmem>>, %arg15: memref<1x32xf32, #tpu.memory_space<vmem>>, %arg16: memref<1x32xf32, #tpu.memory_space<vmem>>, %arg17: memref<1x32xf32, #tpu.memory_space<vmem>>, %arg18: memref<32x128xbf16, #tpu.memory_space<vmem>>, %arg19: memref<1x128xf32, #tpu.memory_space<vmem>>, %arg20: memref<128x32xbf16, #tpu.memory_space<vmem>>, %arg21: memref<1x32xf32, #tpu.memory_space<vmem>>, %arg22: memref<1x32xf32, #tpu.memory_space<vmem>>, %arg23: memref<1x32xf32, #tpu.memory_space<vmem>>, %arg24: memref<32x32xbf16, #tpu.memory_space<vmem>>, %arg25: memref<1x32xf32, #tpu.memory_space<vmem>>, %arg26: memref<32x16xbf16, #tpu.memory_space<vmem>>, %arg27: memref<1x16xf32, #tpu.memory_space<vmem>>, %arg28: memref<8x128xf32, #tpu.memory_space<vmem>>) attributes {dimension_semantics = [#tpu.dimension_semantics<parallel>], iteration_bounds = array<i64: 2>, scalar_prefetch = 0 : i64, scratch_operands = 0 : i64, tpu.core_type = #tpu.core_type<tc>, window_params = [{transform_indices = @transform_0, window_bounds = array<i64: 128, 1>}, {transform_indices = @transform_1, window_bounds = array<i64: 8, 1, 16>}, {transform_indices = @transform_2, window_bounds = array<i64: 8, 128>}, {pipeline_mode = #tpu.pipeline_mode<synchronous>, transform_indices = @transform_3, window_bounds = array<i64: 16, 32>}, {pipeline_mode = #tpu.pipeline_mode<synchronous>, transform_indices = @transform_4, window_bounds = array<i64: 1, 32>}, {pipeline_mode = #tpu.pipeline_mode<synchronous>, transform_indices = @transform_5, window_bounds = array<i64: 1, 32>}, {pipeline_mode = #tpu.pipeline_mode<synchronous>, transform_indices = @transform_6, window_bounds = array<i64: 1, 32>}, {pipeline_mode = #tpu.pipeline_mode<synchronous>, transform_indices = @transform_7, window_bounds = array<i64: 32, 32>}, {pipeline_mode = #tpu.pipeline_mode<synchronous>, transform_indices = @transform_8, window_bounds = array<i64: 1, 32>}, {pipeline_mode = #tpu.pipeline_mode<synchronous>, transform_indices = @transform_9, window_bounds = array<i64: 1, 32>}, {pipeline_mode = #tpu.pipeline_mode<synchronous>, transform_indices = @transform_10, window_bounds = array<i64: 1, 32>}, {pipeline_mode = #tpu.pipeline_mode<synchronous>, transform_indices = @transform_11, window_bounds = array<i64: 32, 96>}, {pipeline_mode = #tpu.pipeline_mode<synchronous>, transform_indices = @transform_12, window_bounds = array<i64: 1, 96>}, {pipeline_mode = #tpu.pipeline_mode<synchronous>, transform_indices = @transform_13, window_bounds = array<i64: 32, 32>}, {pipeline_mode = #tpu.pipeline_mode<synchronous>, transform_indices = @transform_14, window_bounds = array<i64: 1, 32>}, {pipeline_mode = #tpu.pipeline_mode<synchronous>, transform_indices = @transform_15, window_bounds = array<i64: 1, 32>}, {pipeline_mode = #tpu.pipeline_mode<synchronous>, transform_indices = @transform_16, window_bounds = array<i64: 1, 32>}, {pipeline_mode = #tpu.pipeline_mode<synchronous>, transform_indices = @transform_17, window_bounds = array<i64: 32, 128>}, {pipeline_mode = #tpu.pipeline_mode<synchronous>, transform_indices = @transform_18, window_bounds = array<i64: 1, 128>}, {pipeline_mode = #tpu.pipeline_mode<synchronous>, transform_indices = @transform_19, window_bounds = array<i64: 128, 32>}, {pipeline_mode = #tpu.pipeline_mode<synchronous>, transform_indices = @transform_20, window_bounds = array<i64: 1, 32>}, {pipeline_mode = #tpu.pipeline_mode<synchronous>, transform_indices = @transform_21, window_bounds = array<i64: 1, 32>}, {pipeline_mode = #tpu.pipeline_mode<synchronous>, transform_indices = @transform_22, window_bounds = array<i64: 1, 32>}, {pipeline_mode = #tpu.pipeline_mode<synchronous>, transform_indices = @transform_23, window_bounds = array<i64: 32, 32>}, {pipeline_mode = #tpu.pipeline_mode<synchronous>, transform_indices = @transform_24, window_bounds = array<i64: 1, 32>}, {pipeline_mode = #tpu.pipeline_mode<synchronous>, transform_indices = @transform_25, window_bounds = array<i64: 32, 16>}, {pipeline_mode = #tpu.pipeline_mode<synchronous>, transform_indices = @transform_26, window_bounds = array<i64: 1, 16>}, {transform_indices = @transform_27, window_bounds = array<i64: 8, 128>}]} {
    %c0 = arith.constant 0 : index
    %c0_0 = arith.constant 0 : index
    %0 = vector.load %arg1[%c0, %c0_0] : memref<128x1xf32, #tpu.memory_space<vmem>>, vector<128x1xf32>
    %c0_1 = arith.constant 0 : index
    %c0_2 = arith.constant 0 : index
    %c0_3 = arith.constant 0 : index
    %1 = vector.load %arg2[%c0_1, %c0_2, %c0_3] : memref<8x1x16xf32, #tpu.memory_space<vmem>>, vector<8x1x16xf32>
    %c0_4 = arith.constant 0 : index
    %c0_5 = arith.constant 0 : index
    %2 = vector.load %arg5[%c0_4, %c0_5] : memref<1x32xf32, #tpu.memory_space<vmem>>, vector<1x32xf32>
    %3 = vector.broadcast %0 : vector<128x1xf32> to vector<128x32xf32>
    %4 = vector.broadcast %2 : vector<1x32xf32> to vector<128x32xf32>
    %5 = arith.mulf %3, %4 : vector<128x32xf32>
    %6 = vector.shape_cast %5 : vector<128x32xf32> to vector<8x16x32xf32>
    %c0_6 = arith.constant 0 : index
    %c0_7 = arith.constant 0 : index
    %7 = vector.load %arg4[%c0_6, %c0_7] : memref<16x32xf32, #tpu.memory_space<vmem>>, vector<16x32xf32>
    %8 = vector.shape_cast %7 : vector<16x32xf32> to vector<1x16x32xf32>
    %9 = vector.broadcast %8 : vector<1x16x32xf32> to vector<8x16x32xf32>
    %10 = arith.addf %6, %9 : vector<8x16x32xf32>
    %11 = vector.shape_cast %10 : vector<8x16x32xf32> to vector<128x32xf32>
    %c0_8 = arith.constant 0 : index
    %c0_9 = arith.constant 0 : index
    %12 = vector.load %arg6[%c0_8, %c0_9] : memref<1x32xf32, #tpu.memory_space<vmem>>, vector<1x32xf32>
    %c0_10 = arith.constant 0 : index
    %c0_11 = arith.constant 0 : index
    %13 = vector.load %arg7[%c0_10, %c0_11] : memref<1x32xf32, #tpu.memory_space<vmem>>, vector<1x32xf32>
    %cst = arith.constant dense<0.000000e+00> : vector<128xf32>
    %14 = vector.multi_reduction <add>, %11, %cst [1] : vector<128x32xf32> to vector<128xf32>
    %15 = vector.shape_cast %14 : vector<128xf32> to vector<128x1xf32>
    %cst_12 = arith.constant 3.200000e+01 : f32
    %16 = vector.broadcast %cst_12 : f32 to vector<128x1xf32>
    %17 = arith.divf %15, %16 : vector<128x1xf32>
    %18 = vector.broadcast %17 : vector<128x1xf32> to vector<128x32xf32>
    %19 = arith.subf %11, %18 : vector<128x32xf32>
    %20 = arith.mulf %19, %19 : vector<128x32xf32>
    %cst_13 = arith.constant dense<0.000000e+00> : vector<128xf32>
    %21 = vector.multi_reduction <add>, %20, %cst_13 [1] : vector<128x32xf32> to vector<128xf32>
    %22 = vector.shape_cast %21 : vector<128xf32> to vector<128x1xf32>
    %cst_14 = arith.constant 3.200000e+01 : f32
    %23 = vector.broadcast %cst_14 : f32 to vector<128x1xf32>
    %24 = arith.divf %22, %23 : vector<128x1xf32>
    %25 = vector.broadcast %17 : vector<128x1xf32> to vector<128x32xf32>
    %26 = arith.subf %11, %25 : vector<128x32xf32>
    %cst_15 = arith.constant 9.99999974E-6 : f32
    %27 = vector.broadcast %cst_15 : f32 to vector<128x1xf32>
    %28 = arith.addf %24, %27 : vector<128x1xf32>
    %29 = math.rsqrt %28 : vector<128x1xf32>
    %30 = vector.broadcast %29 : vector<128x1xf32> to vector<128x32xf32>
    %31 = arith.mulf %26, %30 : vector<128x32xf32>
    %32 = vector.broadcast %12 : vector<1x32xf32> to vector<128x32xf32>
    %33 = arith.mulf %31, %32 : vector<128x32xf32>
    %34 = vector.broadcast %13 : vector<1x32xf32> to vector<128x32xf32>
    %35 = arith.addf %33, %34 : vector<128x32xf32>
    %cst_16 = arith.constant 0.000000e+00 : f32
    %36 = vector.broadcast %cst_16 : f32 to vector<128x32xf32>
    %37 = arith.maximumf %35, %36 : vector<128x32xf32>
    %38 = arith.truncf %37 : vector<128x32xf32> to vector<128x32xbf16>
    %c0_17 = arith.constant 0 : index
    %c0_18 = arith.constant 0 : index
    %39 = vector.load %arg8[%c0_17, %c0_18] : memref<32x32xbf16, #tpu.memory_space<vmem>>, vector<32x32xbf16>
    %cst_19 = arith.constant dense<0.000000e+00> : vector<128x32xf32>
    %40 = tpu.matmul %38, %39, %cst_19 {dimension_numbers = #tpu.dot_dimension_numbers<[1], [0], [0], [1], [0, 0, 1, 1], [], []>} : vector<128x32xbf16>, vector<32x32xbf16>, vector<128x32xf32> -> vector<128x32xf32>
    %c0_20 = arith.constant 0 : index
    %c0_21 = arith.constant 0 : index
    %41 = vector.load %arg9[%c0_20, %c0_21] : memref<1x32xf32, #tpu.memory_space<vmem>>, vector<1x32xf32>
    %42 = vector.broadcast %41 : vector<1x32xf32> to vector<128x32xf32>
    %43 = arith.addf %40, %42 : vector<128x32xf32>
    %c0_22 = arith.constant 0 : index
    %c0_23 = arith.constant 0 : index
    %44 = vector.load %arg10[%c0_22, %c0_23] : memref<1x32xf32, #tpu.memory_space<vmem>>, vector<1x32xf32>
    %c0_24 = arith.constant 0 : index
    %c0_25 = arith.constant 0 : index
    %45 = vector.load %arg11[%c0_24, %c0_25] : memref<1x32xf32, #tpu.memory_space<vmem>>, vector<1x32xf32>
    %cst_26 = arith.constant dense<0.000000e+00> : vector<128xf32>
    %46 = vector.multi_reduction <add>, %43, %cst_26 [1] : vector<128x32xf32> to vector<128xf32>
    %47 = vector.shape_cast %46 : vector<128xf32> to vector<128x1xf32>
    %cst_27 = arith.constant 3.200000e+01 : f32
    %48 = vector.broadcast %cst_27 : f32 to vector<128x1xf32>
    %49 = arith.divf %47, %48 : vector<128x1xf32>
    %50 = vector.broadcast %49 : vector<128x1xf32> to vector<128x32xf32>
    %51 = arith.subf %43, %50 : vector<128x32xf32>
    %52 = arith.mulf %51, %51 : vector<128x32xf32>
    %cst_28 = arith.constant dense<0.000000e+00> : vector<128xf32>
    %53 = vector.multi_reduction <add>, %52, %cst_28 [1] : vector<128x32xf32> to vector<128xf32>
    %54 = vector.shape_cast %53 : vector<128xf32> to vector<128x1xf32>
    %cst_29 = arith.constant 3.200000e+01 : f32
    %55 = vector.broadcast %cst_29 : f32 to vector<128x1xf32>
    %56 = arith.divf %54, %55 : vector<128x1xf32>
    %57 = vector.broadcast %49 : vector<128x1xf32> to vector<128x32xf32>
    %58 = arith.subf %43, %57 : vector<128x32xf32>
    %cst_30 = arith.constant 9.99999974E-6 : f32
    %59 = vector.broadcast %cst_30 : f32 to vector<128x1xf32>
    %60 = arith.addf %56, %59 : vector<128x1xf32>
    %61 = math.rsqrt %60 : vector<128x1xf32>
    %62 = vector.broadcast %61 : vector<128x1xf32> to vector<128x32xf32>
    %63 = arith.mulf %58, %62 : vector<128x32xf32>
    %64 = vector.broadcast %44 : vector<1x32xf32> to vector<128x32xf32>
    %65 = arith.mulf %63, %64 : vector<128x32xf32>
    %66 = vector.broadcast %45 : vector<1x32xf32> to vector<128x32xf32>
    %67 = arith.addf %65, %66 : vector<128x32xf32>
    %cst_31 = arith.constant 0.000000e+00 : f32
    %68 = vector.broadcast %cst_31 : f32 to vector<128x32xf32>
    %69 = arith.maximumf %67, %68 : vector<128x32xf32>
    %70 = arith.truncf %69 : vector<128x32xf32> to vector<128x32xbf16>
    %c0_32 = arith.constant 0 : index
    %c0_33 = arith.constant 0 : index
    %71 = vector.load %arg12[%c0_32, %c0_33] : memref<32x96xbf16, #tpu.memory_space<vmem>>, vector<32x96xbf16>
    %cst_34 = arith.constant dense<0.000000e+00> : vector<128x96xf32>
    %72 = tpu.matmul %70, %71, %cst_34 {dimension_numbers = #tpu.dot_dimension_numbers<[1], [0], [0], [1], [0, 0, 1, 1], [], []>} : vector<128x32xbf16>, vector<32x96xbf16>, vector<128x96xf32> -> vector<128x96xf32>
    %c0_35 = arith.constant 0 : index
    %c0_36 = arith.constant 0 : index
    %73 = vector.load %arg13[%c0_35, %c0_36] : memref<1x96xf32, #tpu.memory_space<vmem>>, vector<1x96xf32>
    %74 = vector.broadcast %73 : vector<1x96xf32> to vector<128x96xf32>
    %75 = arith.addf %72, %74 : vector<128x96xf32>
    %76 = vector.shape_cast %75 : vector<128x96xf32> to vector<8x16x96xf32>
    %cst_37 = arith.constant 0.000000e+00 : f32
    %77 = vector.broadcast %cst_37 : f32 to vector<8x1x16xf32>
    %78 = arith.cmpf ogt, %1, %77 : vector<8x1x16xf32>
    %cst_38 = arith.constant 0.000000e+00 : f32
    %cst_39 = arith.constant -1.000000e+30 : f32
    %79 = vector.broadcast %cst_38 : f32 to vector<8x1x16xf32>
    %80 = vector.broadcast %cst_39 : f32 to vector<8x1x16xf32>
    %81 = arith.select %78, %79, %80 : vector<8x1x16xi1>, vector<8x1x16xf32>
    %82 = vector.shape_cast %81 : vector<8x1x16xf32> to vector<8x1x16xf32>
    %83 = vector.broadcast %82 : vector<8x1x16xf32> to vector<8x16x16xf32>
    %84 = vector.extract_strided_slice %76 {offsets = [0, 0, 0], sizes = [8, 16, 8], strides = [1, 1, 1]} : vector<8x16x96xf32> to vector<8x16x8xf32>
    %85 = arith.truncf %84 : vector<8x16x8xf32> to vector<8x16x8xbf16>
    %86 = vector.extract_strided_slice %76 {offsets = [0, 0, 32], sizes = [8, 16, 8], strides = [1, 1, 1]} : vector<8x16x96xf32> to vector<8x16x8xf32>
    %87 = arith.truncf %86 : vector<8x16x8xf32> to vector<8x16x8xbf16>
    %88 = vector.extract_strided_slice %76 {offsets = [0, 0, 64], sizes = [8, 16, 8], strides = [1, 1, 1]} : vector<8x16x96xf32> to vector<8x16x8xf32>
    %89 = arith.truncf %88 : vector<8x16x8xf32> to vector<8x16x8xbf16>
    "tpu.trace_start"() <{level = 10 : i32, message = "bqd,bkd->bqk"}> : () -> ()
    %cst_40 = arith.constant dense<0.000000e+00> : vector<8x16x16xf32>
    %90 = tpu.matmul %85, %87, %cst_40 {dimension_numbers = #tpu.dot_dimension_numbers<[2], [2], [1], [1], [0, 0, 0, 1, 1, 1], [0], [0]>} : vector<8x16x8xbf16>, vector<8x16x8xbf16>, vector<8x16x16xf32> -> vector<8x16x16xf32>
    "tpu.trace_stop"() : () -> ()
    %cst_41 = arith.constant 0.353553385 : f32
    %91 = vector.broadcast %cst_41 : f32 to vector<8x16x16xf32>
    %92 = arith.mulf %90, %91 : vector<8x16x16xf32>
    %93 = arith.addf %92, %83 : vector<8x16x16xf32>
    %cst_42 = arith.constant dense<0xFF800000> : vector<8x16xf32>
    %94 = vector.multi_reduction <maximumf>, %93, %cst_42 [2] : vector<8x16x16xf32> to vector<8x16xf32>
    %95 = vector.shape_cast %94 : vector<8x16xf32> to vector<8x16x1xf32>
    %96 = vector.broadcast %95 : vector<8x16x1xf32> to vector<8x16x16xf32>
    %97 = arith.subf %93, %96 : vector<8x16x16xf32>
    %98 = math.exp %97 : vector<8x16x16xf32>
    %cst_43 = arith.constant dense<0.000000e+00> : vector<8x16xf32>
    %99 = vector.multi_reduction <add>, %98, %cst_43 [2] : vector<8x16x16xf32> to vector<8x16xf32>
    %100 = vector.shape_cast %99 : vector<8x16xf32> to vector<8x16x1xf32>
    %101 = tpu.reciprocal %100 {approx = true} : vector<8x16x1xf32> -> vector<8x16x1xf32>
    %102 = vector.broadcast %101 : vector<8x16x1xf32> to vector<8x16x16xf32>
    %103 = arith.mulf %98, %102 : vector<8x16x16xf32>
    %104 = arith.truncf %103 : vector<8x16x16xf32> to vector<8x16x16xbf16>
    "tpu.trace_start"() <{level = 10 : i32, message = "bqk,bkd->bqd"}> : () -> ()
    %cst_44 = arith.constant dense<0.000000e+00> : vector<8x16x8xf32>
    %105 = tpu.matmul %104, %89, %cst_44 {dimension_numbers = #tpu.dot_dimension_numbers<[2], [1], [1], [2], [0, 0, 0, 1, 1, 2], [0], [0]>} : vector<8x16x16xbf16>, vector<8x16x8xbf16>, vector<8x16x8xf32> -> vector<8x16x8xf32>
    "tpu.trace_stop"() : () -> ()
    %106 = vector.extract_strided_slice %76 {offsets = [0, 0, 8], sizes = [8, 16, 8], strides = [1, 1, 1]} : vector<8x16x96xf32> to vector<8x16x8xf32>
    %107 = arith.truncf %106 : vector<8x16x8xf32> to vector<8x16x8xbf16>
    %108 = vector.extract_strided_slice %76 {offsets = [0, 0, 40], sizes = [8, 16, 8], strides = [1, 1, 1]} : vector<8x16x96xf32> to vector<8x16x8xf32>
    %109 = arith.truncf %108 : vector<8x16x8xf32> to vector<8x16x8xbf16>
    %110 = vector.extract_strided_slice %76 {offsets = [0, 0, 72], sizes = [8, 16, 8], strides = [1, 1, 1]} : vector<8x16x96xf32> to vector<8x16x8xf32>
    %111 = arith.truncf %110 : vector<8x16x8xf32> to vector<8x16x8xbf16>
    "tpu.trace_start"() <{level = 10 : i32, message = "bqd,bkd->bqk"}> : () -> ()
    %cst_45 = arith.constant dense<0.000000e+00> : vector<8x16x16xf32>
    %112 = tpu.matmul %107, %109, %cst_45 {dimension_numbers = #tpu.dot_dimension_numbers<[2], [2], [1], [1], [0, 0, 0, 1, 1, 1], [0], [0]>} : vector<8x16x8xbf16>, vector<8x16x8xbf16>, vector<8x16x16xf32> -> vector<8x16x16xf32>
    "tpu.trace_stop"() : () -> ()
    %cst_46 = arith.constant 0.353553385 : f32
    %113 = vector.broadcast %cst_46 : f32 to vector<8x16x16xf32>
    %114 = arith.mulf %112, %113 : vector<8x16x16xf32>
    %115 = arith.addf %114, %83 : vector<8x16x16xf32>
    %cst_47 = arith.constant dense<0xFF800000> : vector<8x16xf32>
    %116 = vector.multi_reduction <maximumf>, %115, %cst_47 [2] : vector<8x16x16xf32> to vector<8x16xf32>
    %117 = vector.shape_cast %116 : vector<8x16xf32> to vector<8x16x1xf32>
    %118 = vector.broadcast %117 : vector<8x16x1xf32> to vector<8x16x16xf32>
    %119 = arith.subf %115, %118 : vector<8x16x16xf32>
    %120 = math.exp %119 : vector<8x16x16xf32>
    %cst_48 = arith.constant dense<0.000000e+00> : vector<8x16xf32>
    %121 = vector.multi_reduction <add>, %120, %cst_48 [2] : vector<8x16x16xf32> to vector<8x16xf32>
    %122 = vector.shape_cast %121 : vector<8x16xf32> to vector<8x16x1xf32>
    %123 = tpu.reciprocal %122 {approx = true} : vector<8x16x1xf32> -> vector<8x16x1xf32>
    %124 = vector.broadcast %123 : vector<8x16x1xf32> to vector<8x16x16xf32>
    %125 = arith.mulf %120, %124 : vector<8x16x16xf32>
    %126 = arith.truncf %125 : vector<8x16x16xf32> to vector<8x16x16xbf16>
    "tpu.trace_start"() <{level = 10 : i32, message = "bqk,bkd->bqd"}> : () -> ()
    %cst_49 = arith.constant dense<0.000000e+00> : vector<8x16x8xf32>
    %127 = tpu.matmul %126, %111, %cst_49 {dimension_numbers = #tpu.dot_dimension_numbers<[2], [1], [1], [2], [0, 0, 0, 1, 1, 2], [0], [0]>} : vector<8x16x16xbf16>, vector<8x16x8xbf16>, vector<8x16x8xf32> -> vector<8x16x8xf32>
    "tpu.trace_stop"() : () -> ()
    %128 = vector.extract_strided_slice %76 {offsets = [0, 0, 16], sizes = [8, 16, 8], strides = [1, 1, 1]} : vector<8x16x96xf32> to vector<8x16x8xf32>
    %129 = arith.truncf %128 : vector<8x16x8xf32> to vector<8x16x8xbf16>
    %130 = vector.extract_strided_slice %76 {offsets = [0, 0, 48], sizes = [8, 16, 8], strides = [1, 1, 1]} : vector<8x16x96xf32> to vector<8x16x8xf32>
    %131 = arith.truncf %130 : vector<8x16x8xf32> to vector<8x16x8xbf16>
    %132 = vector.extract_strided_slice %76 {offsets = [0, 0, 80], sizes = [8, 16, 8], strides = [1, 1, 1]} : vector<8x16x96xf32> to vector<8x16x8xf32>
    %133 = arith.truncf %132 : vector<8x16x8xf32> to vector<8x16x8xbf16>
    "tpu.trace_start"() <{level = 10 : i32, message = "bqd,bkd->bqk"}> : () -> ()
    %cst_50 = arith.constant dense<0.000000e+00> : vector<8x16x16xf32>
    %134 = tpu.matmul %129, %131, %cst_50 {dimension_numbers = #tpu.dot_dimension_numbers<[2], [2], [1], [1], [0, 0, 0, 1, 1, 1], [0], [0]>} : vector<8x16x8xbf16>, vector<8x16x8xbf16>, vector<8x16x16xf32> -> vector<8x16x16xf32>
    "tpu.trace_stop"() : () -> ()
    %cst_51 = arith.constant 0.353553385 : f32
    %135 = vector.broadcast %cst_51 : f32 to vector<8x16x16xf32>
    %136 = arith.mulf %134, %135 : vector<8x16x16xf32>
    %137 = arith.addf %136, %83 : vector<8x16x16xf32>
    %cst_52 = arith.constant dense<0xFF800000> : vector<8x16xf32>
    %138 = vector.multi_reduction <maximumf>, %137, %cst_52 [2] : vector<8x16x16xf32> to vector<8x16xf32>
    %139 = vector.shape_cast %138 : vector<8x16xf32> to vector<8x16x1xf32>
    %140 = vector.broadcast %139 : vector<8x16x1xf32> to vector<8x16x16xf32>
    %141 = arith.subf %137, %140 : vector<8x16x16xf32>
    %142 = math.exp %141 : vector<8x16x16xf32>
    %cst_53 = arith.constant dense<0.000000e+00> : vector<8x16xf32>
    %143 = vector.multi_reduction <add>, %142, %cst_53 [2] : vector<8x16x16xf32> to vector<8x16xf32>
    %144 = vector.shape_cast %143 : vector<8x16xf32> to vector<8x16x1xf32>
    %145 = tpu.reciprocal %144 {approx = true} : vector<8x16x1xf32> -> vector<8x16x1xf32>
    %146 = vector.broadcast %145 : vector<8x16x1xf32> to vector<8x16x16xf32>
    %147 = arith.mulf %142, %146 : vector<8x16x16xf32>
    %148 = arith.truncf %147 : vector<8x16x16xf32> to vector<8x16x16xbf16>
    "tpu.trace_start"() <{level = 10 : i32, message = "bqk,bkd->bqd"}> : () -> ()
    %cst_54 = arith.constant dense<0.000000e+00> : vector<8x16x8xf32>
    %149 = tpu.matmul %148, %133, %cst_54 {dimension_numbers = #tpu.dot_dimension_numbers<[2], [1], [1], [2], [0, 0, 0, 1, 1, 2], [0], [0]>} : vector<8x16x16xbf16>, vector<8x16x8xbf16>, vector<8x16x8xf32> -> vector<8x16x8xf32>
    "tpu.trace_stop"() : () -> ()
    %150 = vector.extract_strided_slice %76 {offsets = [0, 0, 24], sizes = [8, 16, 8], strides = [1, 1, 1]} : vector<8x16x96xf32> to vector<8x16x8xf32>
    %151 = arith.truncf %150 : vector<8x16x8xf32> to vector<8x16x8xbf16>
    %152 = vector.extract_strided_slice %76 {offsets = [0, 0, 56], sizes = [8, 16, 8], strides = [1, 1, 1]} : vector<8x16x96xf32> to vector<8x16x8xf32>
    %153 = arith.truncf %152 : vector<8x16x8xf32> to vector<8x16x8xbf16>
    %154 = vector.extract_strided_slice %76 {offsets = [0, 0, 88], sizes = [8, 16, 8], strides = [1, 1, 1]} : vector<8x16x96xf32> to vector<8x16x8xf32>
    %155 = arith.truncf %154 : vector<8x16x8xf32> to vector<8x16x8xbf16>
    "tpu.trace_start"() <{level = 10 : i32, message = "bqd,bkd->bqk"}> : () -> ()
    %cst_55 = arith.constant dense<0.000000e+00> : vector<8x16x16xf32>
    %156 = tpu.matmul %151, %153, %cst_55 {dimension_numbers = #tpu.dot_dimension_numbers<[2], [2], [1], [1], [0, 0, 0, 1, 1, 1], [0], [0]>} : vector<8x16x8xbf16>, vector<8x16x8xbf16>, vector<8x16x16xf32> -> vector<8x16x16xf32>
    "tpu.trace_stop"() : () -> ()
    %cst_56 = arith.constant 0.353553385 : f32
    %157 = vector.broadcast %cst_56 : f32 to vector<8x16x16xf32>
    %158 = arith.mulf %156, %157 : vector<8x16x16xf32>
    %159 = arith.addf %158, %83 : vector<8x16x16xf32>
    %cst_57 = arith.constant dense<0xFF800000> : vector<8x16xf32>
    %160 = vector.multi_reduction <maximumf>, %159, %cst_57 [2] : vector<8x16x16xf32> to vector<8x16xf32>
    %161 = vector.shape_cast %160 : vector<8x16xf32> to vector<8x16x1xf32>
    %162 = vector.broadcast %161 : vector<8x16x1xf32> to vector<8x16x16xf32>
    %163 = arith.subf %159, %162 : vector<8x16x16xf32>
    %164 = math.exp %163 : vector<8x16x16xf32>
    %cst_58 = arith.constant dense<0.000000e+00> : vector<8x16xf32>
    %165 = vector.multi_reduction <add>, %164, %cst_58 [2] : vector<8x16x16xf32> to vector<8x16xf32>
    %166 = vector.shape_cast %165 : vector<8x16xf32> to vector<8x16x1xf32>
    %167 = tpu.reciprocal %166 {approx = true} : vector<8x16x1xf32> -> vector<8x16x1xf32>
    %168 = vector.broadcast %167 : vector<8x16x1xf32> to vector<8x16x16xf32>
    %169 = arith.mulf %164, %168 : vector<8x16x16xf32>
    %170 = arith.truncf %169 : vector<8x16x16xf32> to vector<8x16x16xbf16>
    "tpu.trace_start"() <{level = 10 : i32, message = "bqk,bkd->bqd"}> : () -> ()
    %cst_59 = arith.constant dense<0.000000e+00> : vector<8x16x8xf32>
    %171 = tpu.matmul %170, %155, %cst_59 {dimension_numbers = #tpu.dot_dimension_numbers<[2], [1], [1], [2], [0, 0, 0, 1, 1, 2], [0], [0]>} : vector<8x16x16xbf16>, vector<8x16x8xbf16>, vector<8x16x8xf32> -> vector<8x16x8xf32>
    "tpu.trace_stop"() : () -> ()
    %172 = tpu.concatenate %105, %127, %149, %171 in 2 : vector<8x16x8xf32>, vector<8x16x8xf32>, vector<8x16x8xf32>, vector<8x16x8xf32> -> vector<8x16x32xf32>
    %173 = vector.shape_cast %172 : vector<8x16x32xf32> to vector<128x32xf32>
    %174 = arith.truncf %173 : vector<128x32xf32> to vector<128x32xbf16>
    %c0_60 = arith.constant 0 : index
    %c0_61 = arith.constant 0 : index
    %175 = vector.load %arg14[%c0_60, %c0_61] : memref<32x32xbf16, #tpu.memory_space<vmem>>, vector<32x32xbf16>
    %cst_62 = arith.constant dense<0.000000e+00> : vector<128x32xf32>
    %176 = tpu.matmul %174, %175, %cst_62 {dimension_numbers = #tpu.dot_dimension_numbers<[1], [0], [0], [1], [0, 0, 1, 1], [], []>} : vector<128x32xbf16>, vector<32x32xbf16>, vector<128x32xf32> -> vector<128x32xf32>
    %c0_63 = arith.constant 0 : index
    %c0_64 = arith.constant 0 : index
    %177 = vector.load %arg15[%c0_63, %c0_64] : memref<1x32xf32, #tpu.memory_space<vmem>>, vector<1x32xf32>
    %178 = vector.broadcast %177 : vector<1x32xf32> to vector<128x32xf32>
    %179 = arith.addf %176, %178 : vector<128x32xf32>
    %180 = arith.addf %69, %179 : vector<128x32xf32>
    %c0_65 = arith.constant 0 : index
    %c0_66 = arith.constant 0 : index
    %181 = vector.load %arg16[%c0_65, %c0_66] : memref<1x32xf32, #tpu.memory_space<vmem>>, vector<1x32xf32>
    %c0_67 = arith.constant 0 : index
    %c0_68 = arith.constant 0 : index
    %182 = vector.load %arg17[%c0_67, %c0_68] : memref<1x32xf32, #tpu.memory_space<vmem>>, vector<1x32xf32>
    %cst_69 = arith.constant dense<0.000000e+00> : vector<128xf32>
    %183 = vector.multi_reduction <add>, %180, %cst_69 [1] : vector<128x32xf32> to vector<128xf32>
    %184 = vector.shape_cast %183 : vector<128xf32> to vector<128x1xf32>
    %cst_70 = arith.constant 3.200000e+01 : f32
    %185 = vector.broadcast %cst_70 : f32 to vector<128x1xf32>
    %186 = arith.divf %184, %185 : vector<128x1xf32>
    %187 = vector.broadcast %186 : vector<128x1xf32> to vector<128x32xf32>
    %188 = arith.subf %180, %187 : vector<128x32xf32>
    %189 = arith.mulf %188, %188 : vector<128x32xf32>
    %cst_71 = arith.constant dense<0.000000e+00> : vector<128xf32>
    %190 = vector.multi_reduction <add>, %189, %cst_71 [1] : vector<128x32xf32> to vector<128xf32>
    %191 = vector.shape_cast %190 : vector<128xf32> to vector<128x1xf32>
    %cst_72 = arith.constant 3.200000e+01 : f32
    %192 = vector.broadcast %cst_72 : f32 to vector<128x1xf32>
    %193 = arith.divf %191, %192 : vector<128x1xf32>
    %194 = vector.broadcast %186 : vector<128x1xf32> to vector<128x32xf32>
    %195 = arith.subf %180, %194 : vector<128x32xf32>
    %cst_73 = arith.constant 9.99999974E-6 : f32
    %196 = vector.broadcast %cst_73 : f32 to vector<128x1xf32>
    %197 = arith.addf %193, %196 : vector<128x1xf32>
    %198 = math.rsqrt %197 : vector<128x1xf32>
    %199 = vector.broadcast %198 : vector<128x1xf32> to vector<128x32xf32>
    %200 = arith.mulf %195, %199 : vector<128x32xf32>
    %201 = vector.broadcast %181 : vector<1x32xf32> to vector<128x32xf32>
    %202 = arith.mulf %200, %201 : vector<128x32xf32>
    %203 = vector.broadcast %182 : vector<1x32xf32> to vector<128x32xf32>
    %204 = arith.addf %202, %203 : vector<128x32xf32>
    %205 = arith.truncf %204 : vector<128x32xf32> to vector<128x32xbf16>
    %c0_74 = arith.constant 0 : index
    %c0_75 = arith.constant 0 : index
    %206 = vector.load %arg18[%c0_74, %c0_75] : memref<32x128xbf16, #tpu.memory_space<vmem>>, vector<32x128xbf16>
    %cst_76 = arith.constant dense<0.000000e+00> : vector<128x128xf32>
    %207 = tpu.matmul %205, %206, %cst_76 {dimension_numbers = #tpu.dot_dimension_numbers<[1], [0], [0], [1], [0, 0, 1, 1], [], []>} : vector<128x32xbf16>, vector<32x128xbf16>, vector<128x128xf32> -> vector<128x128xf32>
    %c0_77 = arith.constant 0 : index
    %c0_78 = arith.constant 0 : index
    %208 = vector.load %arg19[%c0_77, %c0_78] : memref<1x128xf32, #tpu.memory_space<vmem>>, vector<1x128xf32>
    %209 = vector.broadcast %208 : vector<1x128xf32> to vector<128x128xf32>
    %210 = arith.addf %207, %209 : vector<128x128xf32>
    %cst_79 = arith.constant 0.000000e+00 : f32
    %211 = vector.broadcast %cst_79 : f32 to vector<128x128xf32>
    %212 = arith.maximumf %210, %211 : vector<128x128xf32>
    %213 = arith.truncf %212 : vector<128x128xf32> to vector<128x128xbf16>
    %c0_80 = arith.constant 0 : index
    %c0_81 = arith.constant 0 : index
    %214 = vector.load %arg20[%c0_80, %c0_81] : memref<128x32xbf16, #tpu.memory_space<vmem>>, vector<128x32xbf16>
    %cst_82 = arith.constant dense<0.000000e+00> : vector<128x32xf32>
    %215 = tpu.matmul %213, %214, %cst_82 {dimension_numbers = #tpu.dot_dimension_numbers<[1], [0], [0], [1], [0, 0, 1, 1], [], []>} : vector<128x128xbf16>, vector<128x32xbf16>, vector<128x32xf32> -> vector<128x32xf32>
    %c0_83 = arith.constant 0 : index
    %c0_84 = arith.constant 0 : index
    %216 = vector.load %arg21[%c0_83, %c0_84] : memref<1x32xf32, #tpu.memory_space<vmem>>, vector<1x32xf32>
    %217 = vector.broadcast %216 : vector<1x32xf32> to vector<128x32xf32>
    %218 = arith.addf %215, %217 : vector<128x32xf32>
    %219 = arith.addf %204, %218 : vector<128x32xf32>
    %c0_85 = arith.constant 0 : index
    %c0_86 = arith.constant 0 : index
    %220 = vector.load %arg22[%c0_85, %c0_86] : memref<1x32xf32, #tpu.memory_space<vmem>>, vector<1x32xf32>
    %c0_87 = arith.constant 0 : index
    %c0_88 = arith.constant 0 : index
    %221 = vector.load %arg23[%c0_87, %c0_88] : memref<1x32xf32, #tpu.memory_space<vmem>>, vector<1x32xf32>
    %cst_89 = arith.constant dense<0.000000e+00> : vector<128xf32>
    %222 = vector.multi_reduction <add>, %219, %cst_89 [1] : vector<128x32xf32> to vector<128xf32>
    %223 = vector.shape_cast %222 : vector<128xf32> to vector<128x1xf32>
    %cst_90 = arith.constant 3.200000e+01 : f32
    %224 = vector.broadcast %cst_90 : f32 to vector<128x1xf32>
    %225 = arith.divf %223, %224 : vector<128x1xf32>
    %226 = vector.broadcast %225 : vector<128x1xf32> to vector<128x32xf32>
    %227 = arith.subf %219, %226 : vector<128x32xf32>
    %228 = arith.mulf %227, %227 : vector<128x32xf32>
    %cst_91 = arith.constant dense<0.000000e+00> : vector<128xf32>
    %229 = vector.multi_reduction <add>, %228, %cst_91 [1] : vector<128x32xf32> to vector<128xf32>
    %230 = vector.shape_cast %229 : vector<128xf32> to vector<128x1xf32>
    %cst_92 = arith.constant 3.200000e+01 : f32
    %231 = vector.broadcast %cst_92 : f32 to vector<128x1xf32>
    %232 = arith.divf %230, %231 : vector<128x1xf32>
    %233 = vector.broadcast %225 : vector<128x1xf32> to vector<128x32xf32>
    %234 = arith.subf %219, %233 : vector<128x32xf32>
    %cst_93 = arith.constant 9.99999974E-6 : f32
    %235 = vector.broadcast %cst_93 : f32 to vector<128x1xf32>
    %236 = arith.addf %232, %235 : vector<128x1xf32>
    %237 = math.rsqrt %236 : vector<128x1xf32>
    %238 = vector.broadcast %237 : vector<128x1xf32> to vector<128x32xf32>
    %239 = arith.mulf %234, %238 : vector<128x32xf32>
    %240 = vector.broadcast %220 : vector<1x32xf32> to vector<128x32xf32>
    %241 = arith.mulf %239, %240 : vector<128x32xf32>
    %242 = vector.broadcast %221 : vector<1x32xf32> to vector<128x32xf32>
    %243 = arith.addf %241, %242 : vector<128x32xf32>
    %c0_94 = arith.constant 0 : index
    %c0_95 = arith.constant 0 : index
    %244 = vector.load %arg3[%c0_94, %c0_95] : memref<8x128xf32, #tpu.memory_space<vmem>>, vector<8x128xf32>
    %245 = arith.truncf %244 : vector<8x128xf32> to vector<8x128xbf16>
    %246 = arith.truncf %243 : vector<128x32xf32> to vector<128x32xbf16>
    %cst_96 = arith.constant dense<0.000000e+00> : vector<8x32xf32>
    %247 = tpu.matmul %245, %246, %cst_96 {dimension_numbers = #tpu.dot_dimension_numbers<[1], [0], [0], [1], [0, 0, 1, 1], [], []>} : vector<8x128xbf16>, vector<128x32xbf16>, vector<8x32xf32> -> vector<8x32xf32>
    %cst_97 = arith.constant dense<0.000000e+00> : vector<8x1xf32>
    %248 = vector.multi_reduction <add>, %1, %cst_97 [2] : vector<8x1x16xf32> to vector<8x1xf32>
    %cst_98 = arith.constant 9.99999993E-9 : f32
    %249 = vector.broadcast %cst_98 : f32 to vector<8x1xf32>
    %250 = arith.addf %248, %249 : vector<8x1xf32>
    %251 = vector.broadcast %250 : vector<8x1xf32> to vector<8x32xf32>
    %252 = arith.divf %247, %251 : vector<8x32xf32>
    %253 = arith.truncf %252 : vector<8x32xf32> to vector<8x32xbf16>
    %c0_99 = arith.constant 0 : index
    %c0_100 = arith.constant 0 : index
    %254 = vector.load %arg24[%c0_99, %c0_100] : memref<32x32xbf16, #tpu.memory_space<vmem>>, vector<32x32xbf16>
    %cst_101 = arith.constant dense<0.000000e+00> : vector<8x32xf32>
    %255 = tpu.matmul %253, %254, %cst_101 {dimension_numbers = #tpu.dot_dimension_numbers<[1], [0], [0], [1], [0, 0, 1, 1], [], []>} : vector<8x32xbf16>, vector<32x32xbf16>, vector<8x32xf32> -> vector<8x32xf32>
    %c0_102 = arith.constant 0 : index
    %c0_103 = arith.constant 0 : index
    %256 = vector.load %arg25[%c0_102, %c0_103] : memref<1x32xf32, #tpu.memory_space<vmem>>, vector<1x32xf32>
    %257 = vector.broadcast %256 : vector<1x32xf32> to vector<8x32xf32>
    %258 = arith.addf %255, %257 : vector<8x32xf32>
    %cst_104 = arith.constant dense<0.000000e+00> : vector<8xf32>
    %259 = vector.multi_reduction <add>, %258, %cst_104 [1] : vector<8x32xf32> to vector<8xf32>
    %260 = vector.shape_cast %259 : vector<8xf32> to vector<8x1xf32>
    %cst_105 = arith.constant 3.200000e+01 : f32
    %261 = vector.broadcast %cst_105 : f32 to vector<8x1xf32>
    %262 = arith.divf %260, %261 : vector<8x1xf32>
    %263 = vector.broadcast %262 : vector<8x1xf32> to vector<8x32xf32>
    %264 = arith.subf %258, %263 : vector<8x32xf32>
    %265 = arith.mulf %264, %264 : vector<8x32xf32>
    %cst_106 = arith.constant dense<0.000000e+00> : vector<8xf32>
    %266 = vector.multi_reduction <add>, %265, %cst_106 [1] : vector<8x32xf32> to vector<8xf32>
    %267 = vector.shape_cast %266 : vector<8xf32> to vector<8x1xf32>
    %cst_107 = arith.constant 3.200000e+01 : f32
    %268 = vector.broadcast %cst_107 : f32 to vector<8x1xf32>
    %269 = arith.divf %267, %268 : vector<8x1xf32>
    %270 = vector.broadcast %262 : vector<8x1xf32> to vector<8x32xf32>
    %271 = arith.subf %258, %270 : vector<8x32xf32>
    %cst_108 = arith.constant 9.99999974E-6 : f32
    %272 = vector.broadcast %cst_108 : f32 to vector<8x1xf32>
    %273 = arith.addf %269, %272 : vector<8x1xf32>
    %274 = math.rsqrt %273 : vector<8x1xf32>
    %275 = vector.broadcast %274 : vector<8x1xf32> to vector<8x32xf32>
    %276 = arith.mulf %271, %275 : vector<8x32xf32>
    %cst_109 = arith.constant 0.000000e+00 : f32
    %277 = vector.broadcast %cst_109 : f32 to vector<8x32xf32>
    %278 = arith.maximumf %276, %277 : vector<8x32xf32>
    %279 = arith.truncf %278 : vector<8x32xf32> to vector<8x32xbf16>
    %c0_110 = arith.constant 0 : index
    %c0_111 = arith.constant 0 : index
    %280 = vector.load %arg26[%c0_110, %c0_111] : memref<32x16xbf16, #tpu.memory_space<vmem>>, vector<32x16xbf16>
    %cst_112 = arith.constant dense<0.000000e+00> : vector<8x16xf32>
    %281 = tpu.matmul %279, %280, %cst_112 {dimension_numbers = #tpu.dot_dimension_numbers<[1], [0], [0], [1], [0, 0, 1, 1], [], []>} : vector<8x32xbf16>, vector<32x16xbf16>, vector<8x16xf32> -> vector<8x16xf32>
    %c0_113 = arith.constant 0 : index
    %c0_114 = arith.constant 0 : index
    %282 = vector.load %arg27[%c0_113, %c0_114] : memref<1x16xf32, #tpu.memory_space<vmem>>, vector<1x16xf32>
    %283 = vector.broadcast %282 : vector<1x16xf32> to vector<8x16xf32>
    %284 = arith.addf %281, %283 : vector<8x16xf32>
    %cst_115 = arith.constant dense<0.000000e+00> : vector<8xf32>
    %285 = vector.multi_reduction <add>, %284, %cst_115 [1] : vector<8x16xf32> to vector<8xf32>
    %286 = vector.shape_cast %285 : vector<8xf32> to vector<8x1xf32>
    %cst_116 = arith.constant 1.600000e+01 : f32
    %287 = vector.broadcast %cst_116 : f32 to vector<8x1xf32>
    %288 = arith.divf %286, %287 : vector<8x1xf32>
    %289 = vector.broadcast %288 : vector<8x1xf32> to vector<8x16xf32>
    %290 = arith.subf %284, %289 : vector<8x16xf32>
    %291 = arith.mulf %290, %290 : vector<8x16xf32>
    %cst_117 = arith.constant dense<0.000000e+00> : vector<8xf32>
    %292 = vector.multi_reduction <add>, %291, %cst_117 [1] : vector<8x16xf32> to vector<8xf32>
    %293 = vector.shape_cast %292 : vector<8xf32> to vector<8x1xf32>
    %cst_118 = arith.constant 1.600000e+01 : f32
    %294 = vector.broadcast %cst_118 : f32 to vector<8x1xf32>
    %295 = arith.divf %293, %294 : vector<8x1xf32>
    %296 = vector.broadcast %288 : vector<8x1xf32> to vector<8x16xf32>
    %297 = arith.subf %284, %296 : vector<8x16xf32>
    %cst_119 = arith.constant 9.99999974E-6 : f32
    %298 = vector.broadcast %cst_119 : f32 to vector<8x1xf32>
    %299 = arith.addf %295, %298 : vector<8x1xf32>
    %300 = math.rsqrt %299 : vector<8x1xf32>
    %301 = vector.broadcast %300 : vector<8x1xf32> to vector<8x16xf32>
    %302 = arith.mulf %297, %301 : vector<8x16xf32>
    %cst_120 = arith.constant 0.000000e+00 : f32
    %303 = vector.broadcast %cst_120 : f32 to vector<8x16xf32>
    %304 = arith.maximumf %302, %303 : vector<8x16xf32>
    %cst_121 = arith.constant 0.000000e+00 : f32
    %305 = vector.broadcast %cst_121 : f32 to vector<8x112xf32>
    %306 = tpu.concatenate %304, %305 in 1 : vector<8x16xf32>, vector<8x112xf32> -> vector<8x128xf32>
    %c0_122 = arith.constant 0 : index
    %c0_123 = arith.constant 0 : index
    %307 = vector.load %arg28[%c0_122, %c0_123] : memref<8x128xf32, #tpu.memory_space<vmem>>, vector<8x128xf32>
    tpu.vector_store %arg28[%c0_122, %c0_123], %306 {strides = array<i32>} : memref<8x128xf32, #tpu.memory_space<vmem>>, vector<8x128xf32>,
    return
  }
  func.func @transform_0(%arg0: i32) -> (i32, i32) {
    %c0_i32 = arith.constant 0 : i32
    %c0_i32_0 = arith.constant 0 : i32
    return %arg0, %c0_i32 : i32, i32
  }
  func.func @transform_1(%arg0: i32) -> (i32, i32, i32) {
    %c0_i32 = arith.constant 0 : i32
    %c0_i32_0 = arith.constant 0 : i32
    %c0_i32_1 = arith.constant 0 : i32
    return %arg0, %c0_i32, %c0_i32_0 : i32, i32, i32
  }
  func.func @transform_2(%arg0: i32) -> (i32, i32) {
    %c0_i32 = arith.constant 0 : i32
    %c0_i32_0 = arith.constant 0 : i32
    return %arg0, %c0_i32 : i32, i32
  }
  func.func @transform_3(%arg0: i32) -> (i32, i32) {
    %c0_i32 = arith.constant 0 : i32
    %c0_i32_0 = arith.constant 0 : i32
    %c0_i32_1 = arith.constant 0 : i32
    return %c0_i32, %c0_i32_0 : i32, i32
  }
  func.func @transform_4(%arg0: i32) -> (i32, i32) {
    %c0_i32 = arith.constant 0 : i32
    %c0_i32_0 = arith.constant 0 : i32
    %c0_i32_1 = arith.constant 0 : i32
    return %c0_i32, %c0_i32_0 : i32, i32
  }
  func.func @transform_5(%arg0: i32) -> (i32, i32) {
    %c0_i32 = arith.constant 0 : i32
    %c0_i32_0 = arith.constant 0 : i32
    %c0_i32_1 = arith.constant 0 : i32
    return %c0_i32, %c0_i32_0 : i32, i32
  }
  func.func @transform_6(%arg0: i32) -> (i32, i32) {
    %c0_i32 = arith.constant 0 : i32
    %c0_i32_0 = arith.constant 0 : i32
    %c0_i32_1 = arith.constant 0 : i32
    return %c0_i32, %c0_i32_0 : i32, i32
  }
  func.func @transform_7(%arg0: i32) -> (i32, i32) {
    %c0_i32 = arith.constant 0 : i32
    %c0_i32_0 = arith.constant 0 : i32
    %c0_i32_1 = arith.constant 0 : i32
    return %c0_i32, %c0_i32_0 : i32, i32
  }
  func.func @transform_8(%arg0: i32) -> (i32, i32) {
    %c0_i32 = arith.constant 0 : i32
    %c0_i32_0 = arith.constant 0 : i32
    %c0_i32_1 = arith.constant 0 : i32
    return %c0_i32, %c0_i32_0 : i32, i32
  }
  func.func @transform_9(%arg0: i32) -> (i32, i32) {
    %c0_i32 = arith.constant 0 : i32
    %c0_i32_0 = arith.constant 0 : i32
    %c0_i32_1 = arith.constant 0 : i32
    return %c0_i32, %c0_i32_0 : i32, i32
  }
  func.func @transform_10(%arg0: i32) -> (i32, i32) {
    %c0_i32 = arith.constant 0 : i32
    %c0_i32_0 = arith.constant 0 : i32
    %c0_i32_1 = arith.constant 0 : i32
    return %c0_i32, %c0_i32_0 : i32, i32
  }
  func.func @transform_11(%arg0: i32) -> (i32, i32) {
    %c0_i32 = arith.constant 0 : i32
    %c0_i32_0 = arith.constant 0 : i32
    %c0_i32_1 = arith.constant 0 : i32
    return %c0_i32, %c0_i32_0 : i32, i32
  }
  func.func @transform_12(%arg0: i32) -> (i32, i32) {
    %c0_i32 = arith.constant 0 : i32
    %c0_i32_0 = arith.constant 0 : i32
    %c0_i32_1 = arith.constant 0 : i32
    return %c0_i32, %c0_i32_0 : i32, i32
  }
  func.func @transform_13(%arg0: i32) -> (i32, i32) {
    %c0_i32 = arith.constant 0 : i32
    %c0_i32_0 = arith.constant 0 : i32
    %c0_i32_1 = arith.constant 0 : i32
    return %c0_i32, %c0_i32_0 : i32, i32
  }
  func.func @transform_14(%arg0: i32) -> (i32, i32) {
    %c0_i32 = arith.constant 0 : i32
    %c0_i32_0 = arith.constant 0 : i32
    %c0_i32_1 = arith.constant 0 : i32
    return %c0_i32, %c0_i32_0 : i32, i32
  }
  func.func @transform_15(%arg0: i32) -> (i32, i32) {
    %c0_i32 = arith.constant 0 : i32
    %c0_i32_0 = arith.constant 0 : i32
    %c0_i32_1 = arith.constant 0 : i32
    return %c0_i32, %c0_i32_0 : i32, i32
  }
  func.func @transform_16(%arg0: i32) -> (i32, i32) {
    %c0_i32 = arith.constant 0 : i32
    %c0_i32_0 = arith.constant 0 : i32
    %c0_i32_1 = arith.constant 0 : i32
    return %c0_i32, %c0_i32_0 : i32, i32
  }
  func.func @transform_17(%arg0: i32) -> (i32, i32) {
    %c0_i32 = arith.constant 0 : i32
    %c0_i32_0 = arith.constant 0 : i32
    %c0_i32_1 = arith.constant 0 : i32
    return %c0_i32, %c0_i32_0 : i32, i32
  }
  func.func @transform_18(%arg0: i32) -> (i32, i32) {
    %c0_i32 = arith.constant 0 : i32
    %c0_i32_0 = arith.constant 0 : i32
    %c0_i32_1 = arith.constant 0 : i32
    return %c0_i32, %c0_i32_0 : i32, i32
  }
  func.func @transform_19(%arg0: i32) -> (i32, i32) {
    %c0_i32 = arith.constant 0 : i32
    %c0_i32_0 = arith.constant 0 : i32
    %c0_i32_1 = arith.constant 0 : i32
    return %c0_i32, %c0_i32_0 : i32, i32
  }
  func.func @transform_20(%arg0: i32) -> (i32, i32) {
    %c0_i32 = arith.constant 0 : i32
    %c0_i32_0 = arith.constant 0 : i32
    %c0_i32_1 = arith.constant 0 : i32
    return %c0_i32, %c0_i32_0 : i32, i32
  }
  func.func @transform_21(%arg0: i32) -> (i32, i32) {
    %c0_i32 = arith.constant 0 : i32
    %c0_i32_0 = arith.constant 0 : i32
    %c0_i32_1 = arith.constant 0 : i32
    return %c0_i32, %c0_i32_0 : i32, i32
  }
  func.func @transform_22(%arg0: i32) -> (i32, i32) {
    %c0_i32 = arith.constant 0 : i32
    %c0_i32_0 = arith.constant 0 : i32
    %c0_i32_1 = arith.constant 0 : i32
    return %c0_i32, %c0_i32_0 : i32, i32
  }
  func.func @transform_23(%arg0: i32) -> (i32, i32) {
    %c0_i32 = arith.constant 0 : i32
    %c0_i32_0 = arith.constant 0 : i32
    %c0_i32_1 = arith.constant 0 : i32
    return %c0_i32, %c0_i32_0 : i32, i32
  }
  func.func @transform_24(%arg0: i32) -> (i32, i32) {
    %c0_i32 = arith.constant 0 : i32
    %c0_i32_0 = arith.constant 0 : i32
    %c0_i32_1 = arith.constant 0 : i32
    return %c0_i32, %c0_i32_0 : i32, i32
  }
  func.func @transform_25(%arg0: i32) -> (i32, i32) {
    %c0_i32 = arith.constant 0 : i32
    %c0_i32_0 = arith.constant 0 : i32
    %c0_i32_1 = arith.constant 0 : i32
    return %c0_i32, %c0_i32_0 : i32, i32
  }
  func.func @transform_26(%arg0: i32) -> (i32, i32) {
    %c0_i32 = arith.constant 0 : i32
    %c0_i32_0 = arith.constant 0 : i32
    %c0_i32_1 = arith.constant 0 : i32
    return %c0_i32, %c0_i32_0 : i32, i32
  }
  func.func @transform_27(%arg0: i32) -> (i32, i32) {
    %c0_i32 = arith.constant 0 : i32
    %c0_i32_0 = arith.constant 0 : i32
    return %arg0, %c0_i32 : i32, i32
  }
}

</mosaic_0001>

<bundles_post_ra>
// kernel: tpu_custom_call.1
= control target key start
LH: loop header
LB: loop body
LE: loop exit
PB: predicated region body
PF: predicated region fallthrough
CT: control target
= control target key end

     0   :  { %s10513_s0 = inlined_call_operand.vmem [shape: f32[256,1], index: 0, kind: input, shape index: {}]   ;;  %s10514_s1 = inlined_call_operand.vmem [shape: f32[16,1,16], index: 1, kind: input, shape index: {}]   ;;  %s10515_s2 = inlined_call_operand.vmem [shape: f32[16,128], index: 2, kind: input, shape index: {}]   ;;  %s10516_s3 = inlined_call_operand.vmem [shape: f32[16,32], index: 3, kind: input, shape index: {}]   ;;  %s10517_s4 = inlined_call_operand.vmem [shape: f32[1,32], index: 4, kind: input, shape index: {}]   ;;  %s10518_s5 = inlined_call_operand.vmem [shape: f32[1,32], index: 5, kind: input, shape index: {}]   ;;  %s10519_s6 = inlined_call_operand.vmem [shape: f32[1,32], index: 6, kind: input, shape index: {}]   ;;  %s10520_s7 = inlined_call_operand.vmem [shape: bf16[32,32], index: 7, kind: input, shape index: {}]   ;;  %s10521_s8 = inlined_call_operand.vmem [shape: f32[1,32], index: 8, kind: input, shape index: {}]   ;;  %s10522_s9 = inlined_call_operand.vmem [shape: f32[1,32], index: 9, kind: input, shape index: {}]   ;;  %s10523_s10 = inlined_call_operand.vmem [shape: f32[1,32], index: 10, kind: input, shape index: {}]   ;;  %s10524_s11 = inlined_call_operand.vmem [shape: bf16[32,96], index: 11, kind: input, shape index: {}]   ;;  %s10525_s12 = inlined_call_operand.vmem [shape: f32[1,96], index: 12, kind: input, shape index: {}]   ;;  %s10526_s13 = inlined_call_operand.vmem [shape: bf16[32,32], index: 13, kind: input, shape index: {}]   ;;  %s10527_s14 = inlined_call_operand.vmem [shape: f32[1,32], index: 14, kind: input, shape index: {}]   ;;  %s10528_s15 = inlined_call_operand.vmem [shape: f32[1,32], index: 15, kind: input, shape index: {}]   ;;  %s10529_s16 = inlined_call_operand.vmem [shape: f32[1,32], index: 16, kind: input, shape index: {}]   ;;  %s10530_s17 = inlined_call_operand.vmem [shape: bf16[32,128], index: 17, kind: input, shape index: {}]   ;;  %s10531_s18 = inlined_call_operand.vmem [shape: f32[1,128], index: 18, kind: input, shape index: {}]   ;;  %s10532_s19 = inlined_call_operand.vmem [shape: bf16[128,32], index: 19, kind: input, shape index: {}]   ;;  %s10533_s20 = inlined_call_operand.vmem [shape: f32[1,32], index: 20, kind: input, shape index: {}]   ;;  %s10534_s21 = inlined_call_operand.vmem [shape: f32[1,32], index: 21, kind: input, shape index: {}]   ;;  %s10535_s22 = inlined_call_operand.vmem [shape: f32[1,32], index: 22, kind: input, shape index: {}]   ;;  %s10536_s23 = inlined_call_operand.vmem [shape: bf16[32,32], index: 23, kind: input, shape index: {}]   ;;  %s10537_s24 = inlined_call_operand.vmem [shape: f32[1,32], index: 24, kind: input, shape index: {}]   ;;  %s10538_s25 = inlined_call_operand.vmem [shape: bf16[32,16], index: 25, kind: input, shape index: {}]   ;;  %s10539_s26 = inlined_call_operand.vmem [shape: f32[1,16], index: 26, kind: input, shape index: {}]   ;;  %s10540_s27 = inlined_call_operand.hbm [shape: f32[16,128], index: 27, kind: output, shape index: {}]  }
   0x1   :  { %10587 = sst [smem:[#allocation44_spill]] %s10513_s0 }
   0x2   :  { %10588 = sst [smem:[#allocation45_spill]] %s10514_s1 }
   0x3   :  { %10589 = sst [smem:[#allocation46_spill]] %s10515_s2 }
   0x4   :  { %10590 = sst [smem:[#allocation47_spill]] %s10516_s3 }
   0x5   :  { %10591 = sst [smem:[#allocation48_spill]] %s10517_s4 }
   0x6   :  { %10592 = sst [smem:[#allocation49_spill]] %s10518_s5 }
   0x7   :  { %10593 = sst [smem:[#allocation50_spill]] %s10519_s6 }
   0x8   :  { %10594 = sst [smem:[#allocation51_spill]] %s10520_s7 }
   0x9   :  { %10595 = sst [smem:[#allocation52_spill]] %s10521_s8 }
   0xa   :  { %10596 = sst [smem:[#allocation53_spill]] %s10522_s9 }
   0xb   :  { %10597 = sst [smem:[#allocation54_spill]] %s10523_s10 }
   0xc   :  { %10598 = sst [smem:[#allocation55_spill]] %s10524_s11 }
   0xd   :  { %10599 = sst [smem:[#allocation56_spill]] %s10525_s12 }
   0xe   :  { %10600 = sst [smem:[#allocation57_spill]] %s10526_s13 }
   0xf   :  { %10601 = sst [smem:[#allocation58_spill]] %s10527_s14 }
  0x10   :  { %10602 = sst [smem:[#allocation59_spill]] %s10528_s15 }
  0x11   :  { %32 = vsyncpa [#allocation3], 0 }
  0x12   :  { %34 = vsyncpa [#allocation3 + $0x1], 0  ;;  %s7328_s7 = smov 0   ;;  %s7330_s4 = smov 0  }
  0x13   :  { %s7332_s8 = smov 0   ;;  %s7334_s30 = smov 0  }
  0x14 LB: > { %s7349_s9 = sadd.s32 4294967295, %s7168_s30   ;;  %s6297_s5 = sadd.s32 4294967294, %s7168_s30   ;;  %s7168_s30 = sphi %s7334_s30, %s10746_s30   ;;  %s7164_s8 = sphi %s7332_s8, %s10745_s8   ;;  %s7160_s4 = sphi %s7330_s4, %s10744_s4   ;;  %s7156_s7 = sphi %s7328_s7, %s10743_s7  }
  0x15   : > { %s7353_s28 = sadd.s32 1, %s7168_s30   ;;  %s629_s0 = sadd.s32 1, %s7164_s8 }
  0x16   : > { %s626_s10 = ssub.s32 %s7168_s30, %s7353_s28  ;;  %p639_p0 = scmp.ne.s32.totalorder %s7164_s8, %s7160_s4 }
  0x17   : > { %p627_p1 = scmp.eq.s32.totalorder %s626_s10, 0  ;;  %p640_p2 = scmp.eq.s32.totalorder %s7349_s9, 1 }
  0x18   : > { %p645_p3 = scmp.ne.s32.totalorder %s7160_s4, %s7156_s7  ;;  %p646_p4 = scmp.eq.s32.totalorder %s6297_s5, 1 }
  0x19   : > { %s7364_s29 = scalar_select %p627_p1, %s7164_s8, %s629_s0  }
  0x1a   : > { %p7366_p5 = por %p640_p2, %p639_p0  ;;  %p7370_p6 = por %p646_p4, %p645_p3 }
  0x1b   : > { %10603 = sst [smem:[#allocation5_spill]] %s7364_s29  ;;  %p6300_p7 = scmp.ge.s32.totalorder %s7168_s30, 1 }
  0x1c   : > { %p760_p8 = scmp.lt.s32.totalorder %s7168_s30, 3 }
  0x1e   : > { %p761_p9 = pnand %p6300_p7, %p760_p8 }
  0x20   : > { %764 = sbr.rel (%p761_p9) target bundleno = 5785 (0x1699), region = 128 }
  0x25   : > { %s6302_s11 = sshll.u32 %s7349_s9, 4  ;;  %v7170_v0 = vmov 0   ;;  %s10606_s0 = sld [smem:[#allocation44_spill]]  ;;  %vm1000_vm0 = vcmask 261120   ;;  %v7171_v53 = vmov 32.0  }
  0x26   : > { %6566 = vset.pattern.permute.xlu1 %v7170_v0  ;;  %6565 = vset.pattern.permute.xlu0 %v7170_v0  ;;  %p841_p10 = scmp.lt.s32.totalorder %s6302_s11, 31  ;;  %s10607_s3 = sld [smem:[#allocation48_spill]]  ;;  %6704 = vrcp.f32 %v7171_v53 }
  0x27   : > { %6567 = vset.pattern.permute.xlu2 %v7170_v0  ;;  %s10608_s29 = sld [smem:[#allocation47_spill]]  ;;  %p851_p12 = scmp.lt.s32.totalorder %s7349_s9, 1 }
  0x28   : > { %s10748_s11 = smov (!%p841_p10, %s6302_s11), 31  ;;  %s10610_s5 = sld [smem:[#allocation51_spill]] }
  0x29   : > { %s6303_s2 = sshll.u32 %s10748_s11, 3  ;;  %s10625_s12 = sld [smem:[#allocation56_spill]] }
  0x2a   : > { %s10548_s11 = smov 96   ;;  %s10667_s13 = sld [smem:[#allocation57_spill]] }
  0x2b   : > { %s7380_s10 = scalar_lea.vmem %s10606_s0, %s6303_s2  ;;  %s10612_s2 = sld [smem:[#allocation50_spill]] }
  0x2c   : > { %v858_v1 = vld [vmem:[%s7380_s10 + $0x10] sm:$0xff]  ;;  %v856_v2 = vld [vmem:[%s7380_s10] sm:$0xff]  ;;  %v859_v4 = vld [vmem:[%s7380_s10 + $0x18] sm:$0xff]  ;;  %v6705_v54 = vpop.eup %6704  ;;  %s10613_s0 = sld [smem:[#allocation52_spill]] }
  0x2d   : > { %893 = vperm.xlu1 %6566, %v858_v1   ;;  %883 = vperm.xlu0 %6565, %v856_v2   ;;  %v860_v3 = vld [vmem:[%s7380_s10 + $0x20] sm:$0xff]  ;;  %v857_v5 = vld [vmem:[%s7380_s10 + $0x8] sm:$0xff]  ;;  %v862_v9 = vld [vmem:[%s7380_s10 + $0x30] sm:$0xff]  ;;  %v1050_v55 = vmul.f32 32.0, %v6705_v54  ;;  %vm1054_vm1 = vweird.f32 %v6705_v54  ;;  %s10680_s14 = sld [smem:[#allocation58_spill]] }
  0x2e   : > { %903 = vperm.xlu2 %6567, %v860_v3   ;;  %v861_v6 = vld [vmem:[%s7380_s10 + $0x28] sm:$0xff]  ;;  %v864_v8 = vld [vmem:[%s7380_s10 + $0x40] sm:$0xff]  ;;  %v867_v10 = vld [vmem:[%s7380_s10 + $0x58] sm:$0xff]  ;;  %s10718_s15 = sld [smem:[#allocation59_spill]] }
  0x2f   : > { %v865_v7 = vld [vmem:[%s7380_s10 + $0x48] sm:$0xff]  ;;  %v866_v11 = vld [vmem:[%s7380_s10 + $0x50] sm:$0xff]  ;;  %v863_v12 = vld [vmem:[%s7380_s10 + $0x38] sm:$0xff]  ;;  %v1051_v56 = vsub.f32 1.0, %v1050_v55 }
  0x30   : > { %v868_v13 = vld [vmem:[%s7380_s10 + $0x60] sm:$0xff]  ;;  %v7421_v31 = vld [vmem:[%s10608_s29 + $0x8] sm:$0xff] }
  0x31   : > { %v7398_v16 = vld [vmem:[%s10607_s3] ss:$0 sm:$0xff]  ;;  %v1052_v57 = vmul.f32 %v6705_v54, %v1051_v56  ;;  %s10611_s3 = sld [smem:[#allocation49_spill]] }
  0x32   : > { %v7403_v19 = vld [vmem:[%s10608_s29] sm:$0xff] }
  0x33   : > { %v1053_v60 = vadd.f32 %v6705_v54, %v1052_v57 }
  0x35   : > { %898 = vperm.xlu1 %6566, %v859_v4   ;;  %888 = vperm.xlu0 %6565, %v857_v5   ;;  %v7455_v61 = vsel %vm1054_vm1, %v6705_v54, %v1053_v60 }
  0x36   : > { %908 = vperm.xlu2 %6567, %v861_v6   ;;  %10609 = vst [vmem:[#allocation6_spill] sm:$0xff] %v7455_v61 }
  0x3d   : > { %928 = vperm.xlu0 %6565, %v865_v7   ;;  %923 = vperm.xlu1 %6566, %v864_v8  }
  0x3e   : > { %913 = vperm.xlu2 %6567, %v862_v9  }
  0x45   : > { %938 = vperm.xlu0 %6565, %v867_v10   ;;  %933 = vperm.xlu1 %6566, %v866_v11  }
  0x46   : > { %918 = vperm.xlu2 %6567, %v863_v12  }
  0x4e   : > { %943 = vperm.xlu2 %6567, %v868_v13  }
  0x88   : > { %v904_v14 = vpop.permute.xlu2 %903 }
  0x89   : > { %v968_v22 = vmul.f32 %v7398_v16, %v904_v14 }
  0x8b   : > { %v7416_v27 = vadd.f32 %v7403_v19, %v968_v22  ;;  %v869_v22 = vld [vmem:[%s7380_s10 + $0x68] sm:$0xff] }
  0x8d   : > { %v1013_v34 = vsel %vm1000_vm0, %v7416_v27, 0.0 }
  0x90   : > { %v909_v15 = vpop.permute.xlu2 %908 }
  0x91   : > { %v969_v35 = vmul.f32 %v7398_v16, %v909_v15 }
  0x93   : > { %v7434_v41 = vadd.f32 %v7421_v31, %v969_v35 }
  0x95   : > { %v1016_v46 = vsel %vm1000_vm0, %v7434_v41, 0.0 }
  0x98   : > { %v914_v28 = vpop.permute.xlu2 %913 }
  0x99   : > { %v970_v38 = vmul.f32 %v7398_v16, %v914_v28 }
  0x9b   : > { %v7437_v42 = vadd.f32 %v7403_v19, %v970_v38 }
  0x9d   : > { %v1019_v47 = vsel %vm1000_vm0, %v7437_v42, 0.0 }
  0x9f   : > { %v894_v17 = vpop.permute.xlu1 %893  ;;  %v884_v18 = vpop.permute.xlu0 %883 }
  0xa0   : > { %v966_v20 = vmul.f32 %v7398_v16, %v894_v17  ;;  %v964_v21 = vmul.f32 %v7398_v16, %v884_v18  ;;  %v919_v44 = vpop.permute.xlu2 %918 }
  0xa1   : > { %v971_v49 = vmul.f32 %v7398_v16, %v919_v44 }
  0xa2   : > { %v7409_v23 = vadd.f32 %v7403_v19, %v966_v20  ;;  %v982_v24 = vadd.f32 %v7403_v19, %v964_v21 }
  0xa3   : > { %v7451_v51 = vadd.f32 %v7421_v31, %v971_v49 }
  0xa4   : > { %v1007_v25 = vsel %vm1000_vm0, %v7409_v23, 0.0  ;;  %v1001_v26 = vsel %vm1000_vm0, %v982_v24, 0.0 }
  0xa5   : > { %1008 = vadd.xlane.f32.xlu2 %v1007_v25  ;;  %1002 = vadd.xlane.f32.xlu0 %v1001_v26  ;;  %v1022_v52 = vsel %vm1000_vm0, %v7451_v51, 0.0  ;;  %v871_v25 = vld [vmem:[%s7380_s10 + $0x78] sm:$0xff] }
  0xa7   : > { %v899_v29 = vpop.permute.xlu1 %898  ;;  %v889_v30 = vpop.permute.xlu0 %888 }
  0xa8   : > { %v967_v32 = vmul.f32 %v7398_v16, %v899_v29  ;;  %v965_v33 = vmul.f32 %v7398_v16, %v889_v30  ;;  %v944_v0 = vpop.permute.xlu2 %943 }
  0xaa   : > { %v985_v36 = vadd.f32 %v7421_v31, %v967_v32  ;;  %v983_v37 = vadd.f32 %v7421_v31, %v965_v33 }
  0xac   : > { %v1010_v39 = vsel %vm1000_vm0, %v985_v36, 0.0  ;;  %v1004_v40 = vsel %vm1000_vm0, %v983_v37, 0.0 }
  0xad   : > { %1014 = vadd.xlane.f32.xlu2 %v1013_v34  ;;  %1011 = vadd.xlane.f32.xlu0 %v1010_v39 }
  0xae   : > { %1005 = vadd.xlane.f32.xlu1 %v1004_v40 }
  0xaf   : > { %v929_v43 = vpop.permute.xlu0 %928  ;;  %v924_v58 = vpop.permute.xlu1 %923 }
  0xb0   : > { %v973_v45 = vmul.f32 %v7398_v16, %v929_v43 }
  0xb2   : > { %v7445_v48 = vadd.f32 %v7421_v31, %v973_v45 }
  0xb4   : > { %v1028_v50 = vsel %vm1000_vm0, %v7445_v48, 0.0 }
  0xb5   : > { %1017 = vadd.xlane.f32.xlu2 %v1016_v46  ;;  %1020 = vadd.xlane.f32.xlu0 %v1019_v47 }
  0xb6   : > { %1029 = vadd.xlane.f32.xlu1 %v1028_v50 }
  0xb7   : > { %v939_v59 = vpop.permute.xlu0 %938  ;;  %v934_v63 = vpop.permute.xlu1 %933 }
  0xb8   : > { %v974_v32 = vmul.f32 %v7398_v16, %v934_v63  ;;  %v975_v39 = vmul.f32 %v7398_v16, %v939_v59 }
  0xba   : > { %v7515_v49 = vadd.f32 %v7421_v31, %v975_v39 }
  0xbd   : > { %1023 = vadd.xlane.f32.xlu2 %v1022_v52 }
 0x118   : > { %v1003_v62 = vpop.xlane.xlu0 %1002  ;;  %v1009_v6 = vpop.xlane.xlu2 %1008 }
 0x119   : > { %v1056_v1 = vmul.f32 %v7455_v61, %v1003_v62  ;;  %v1058_v11 = vmul.f32 %v7455_v61, %v1009_v6 }
 0x11b   : > { %v7458_v2 = vsub.f32 %v982_v24, %v1056_v1  ;;  %v7476_v17 = vsub.f32 %v7409_v23, %v1058_v11  ;;  %v870_v24 = vld [vmem:[%s7380_s10 + $0x70] sm:$0xff]  ;;  %v972_v23 = vmul.f32 %v7398_v16, %v924_v58  ;;  %s10614_s10 = sld [smem:[#allocation55_spill]] }
 0x11d   : > { %v1088_v3 = vmul.f32 %v7458_v2, %v7458_v2  ;;  %v1090_v20 = vmul.f32 %v7476_v17, %v7476_v17  ;;  %v7488_v29 = vadd.f32 %v7403_v19, %v972_v23 }
 0x11f   : > { %v1104_v4 = vsel %vm1000_vm0, %v1088_v3, 0.0  ;;  %v1110_v21 = vsel %vm1000_vm0, %v1090_v20, 0.0  ;;  %v1025_v33 = vsel %vm1000_vm0, %v7488_v29, 0.0 }
 0x120   : > { %1105 = vadd.xlane.f32.xlu2 %v1104_v4  ;;  %v1012_v5 = vpop.xlane.xlu0 %1011  ;;  %v1015_v26 = vpop.xlane.xlu2 %1014 }
 0x121   : > { %v1006_v7 = vpop.xlane.xlu1 %1005  ;;  %v1059_v8 = vmul.f32 %v7455_v61, %v1012_v5  ;;  %v1060_v28 = vmul.f32 %v7455_v61, %v1015_v26  ;;  %v6488_v5 = vld [vmem:[%s10610_s5] sm:$0xff] }
 0x122   : > { %v1057_v9 = vmul.f32 %v7455_v61, %v1006_v7 }
 0x123   : > { %v7465_v10 = vsub.f32 %v985_v36, %v1059_v8  ;;  %v7491_v30 = vsub.f32 %v7416_v27, %v1060_v28  ;;  %v7499_v36 = vadd.f32 %v7403_v19, %v974_v32 }
 0x124   : > { %v7468_v12 = vsub.f32 %v983_v37, %v1057_v9  ;;  %v976_v37 = vmul.f32 %v7398_v16, %v944_v0 }
 0x125   : > { %v1091_v13 = vmul.f32 %v7465_v10, %v7465_v10  ;;  %v1092_v34 = vmul.f32 %v7491_v30, %v7491_v30  ;;  %v1031_v40 = vsel %vm1000_vm0, %v7499_v36, 0.0 }
 0x126   : > { %v1089_v14 = vmul.f32 %v7468_v12, %v7468_v12  ;;  %v7508_v44 = vadd.f32 %v7403_v19, %v976_v37 }
 0x127   : > { %v1113_v15 = vsel %vm1000_vm0, %v1091_v13, 0.0  ;;  %v1116_v38 = vsel %vm1000_vm0, %v1092_v34, 0.0 }
 0x128   : > { %v1107_v18 = vsel %vm1000_vm0, %v1089_v14, 0.0  ;;  %1114 = vadd.xlane.f32.xlu0 %v1113_v15  ;;  %v1018_v35 = vpop.xlane.xlu2 %1017  ;;  %v1021_v43 = vpop.xlane.xlu0 %1020  ;;  %v1037_v50 = vsel %vm1000_vm0, %v7508_v44, 0.0 }
 0x129   : > { %1108 = vadd.xlane.f32.xlu1 %v1107_v18  ;;  %v1061_v27 = vmul.f32 %v7455_v61, %v1018_v35  ;;  %v1030_v46 = vpop.xlane.xlu1 %1029  ;;  %v1062_v47 = vmul.f32 %v7455_v61, %v1021_v43 }
 0x12a   : > { %v1065_v52 = vmul.f32 %v7455_v61, %v1030_v46 }
 0x12b   : > { %v7511_v45 = vsub.f32 %v7434_v41, %v1061_v27  ;;  %v7523_v54 = vsub.f32 %v7437_v42, %v1062_v47  ;;  %v1034_v41 = vsel %vm1000_vm0, %v7515_v49, 0.0  ;;  %v7564_v47 = vld [vmem:[%s10611_s3] ss:$0 sm:$0xff]  ;;  %s10615_s3 = sld [smem:[#allocation53_spill]] }
 0x12c   : > { %v7528_v56 = vsub.f32 %v7445_v48, %v1065_v52 }
 0x12d   : > { %v1093_v53 = vmul.f32 %v7511_v45, %v7511_v45  ;;  %v1094_v59 = vmul.f32 %v7523_v54, %v7523_v54 }
 0x12e   : > { %v1097_v42 = vmul.f32 %v7528_v56, %v7528_v56 }
 0x12f   : > { %v1119_v57 = vsel %vm1000_vm0, %v1093_v53, 0.0  ;;  %v1122_v62 = vsel %vm1000_vm0, %v1094_v59, 0.0 }
 0x130   : > { %v1024_v55 = vpop.xlane.xlu2 %1023  ;;  %v1131_v48 = vsel %vm1000_vm0, %v1097_v42, 0.0  ;;  %v7574_v42 = vld [vmem:[%s10612_s2] ss:$0 sm:$0xff]  ;;  %s7173_s2 = smov 64  }
 0x131   : > { %1111 = vadd.xlane.f32.xlu1 %v1110_v21  ;;  %v1063_v58 = vmul.f32 %v7455_v61, %v1024_v55 }
 0x133   : > { %v7537_v60 = vsub.f32 %v7451_v51, %v1063_v58  ;;  %v6489_v51 = vld [vmem:[%s10610_s5 + $0x8] sm:$0xff]  ;;  %s8148_s5 = sshll.u32 %s7349_s9, 3  ;;  %s10750_s9 = smov (!%p851_p12, %s7349_s9), 1 }
 0x134   : > { %1472 = vmatpush.bf16.msra.mxu0 %v6489_v51  ;;  %p847_p11 = scmp.lt.s32.totalorder %s8148_s5, 15 }
 0x135   : > { %v1095_v63 = vmul.f32 %v7537_v60, %v7537_v60 }
 0x137   : > { %v1125_v0 = vsel %vm1000_vm0, %v1095_v63, 0.0 }
 0x138   : > { %948 = vperm.xlu2 %6567, %v869_v22   ;;  %1473 = vmatpush.bf16.msra.mxu0 %v6488_v5 }
 0x13c   : > { %953 = vperm.xlu0 %6565, %v870_v24  }
 0x14a   : > { %958 = vperm.xlu1 %6566, %v871_v25  }
 0x161   : > { %1026 = vadd.xlane.f32.xlu2 %v1025_v33 }
 0x166   : > { %1117 = vadd.xlane.f32.xlu0 %v1116_v38 }
 0x169   : > { %1032 = vadd.xlane.f32.xlu2 %v1031_v40 }
 0x16e   : > { %1038 = vadd.xlane.f32.xlu0 %v1037_v50 }
 0x171   : > { %1035 = vadd.xlane.f32.xlu2 %v1034_v41 }
 0x174   : > { %1120 = vadd.xlane.f32.xlu1 %v1119_v57 }
 0x179   : > { %1123 = vadd.xlane.f32.xlu2 %v1122_v62 }
 0x17c   : > { %1132 = vadd.xlane.f32.xlu1 %v1131_v48 }
 0x181   : > { %1126 = vadd.xlane.f32.xlu2 %v1125_v0 }
 0x193   : > { %v1106_v1 = vpop.xlane.xlu2 %1105 }
 0x194   : > { %v1152_v3 = vmul.f32 %v1106_v1, %v7455_v61 }
 0x196   : > { %v1168_v4 = vadd.f32 1e-05, %v1152_v3 }
 0x198   : > { %6706 = vrsqrt.f32 %v1168_v4  ;;  %vm1190_vm3 = vweird.f32 %v1168_v4 }
 0x19b   : > { %v949_v6 = vpop.permute.xlu2 %948  ;;  %v1115_v7 = vpop.xlane.xlu0 %1114 }
 0x19c   : > { %v1109_v8 = vpop.xlane.xlu1 %1108  ;;  %v977_v9 = vmul.f32 %v7398_v16, %v949_v6  ;;  %v1155_v11 = vmul.f32 %v1115_v7, %v7455_v61 }
 0x19d   : > { %v1153_v13 = vmul.f32 %v1109_v8, %v7455_v61 }
 0x19e   : > { %v6707_v14 = vpop.eup %6706  ;;  %v1171_v15 = vadd.f32 1e-05, %v1155_v11  ;;  %v7555_v18 = vadd.f32 %v7421_v31, %v977_v9 }
 0x19f   : > { %v1185_v20 = vmul.f32 %v6707_v14, %v1168_v4  ;;  %v1169_v21 = vadd.f32 1e-05, %v1153_v13  ;;  %vm1191_vm2 = vweird.f32 %v6707_v14 }
 0x1a0   : > { %6708 = vrsqrt.f32 %v1171_v15  ;;  %v1040_v22 = vsel %vm1000_vm0, %v7555_v18, 0.0  ;;  %vm1192_vm4 = vmor %vm1190_vm3, %vm1191_vm2  ;;  %vm1220_vm10 = vweird.f32 %v1171_v15 }
 0x1a1   : > { %v1186_v24 = vmul.f32 %v6707_v14, %v1185_v20  ;;  %6710 = vrsqrt.f32 %v1169_v21  ;;  %1041 = vadd.xlane.f32.xlu2 %v1040_v22  ;;  %vm1200_vm6 = vweird.f32 %v1169_v21 }
 0x1a3   : > { %v1187_v25 = vmul.f32 0.5, %v1186_v24 }
 0x1a4   : > { %v1112_v26 = vpop.xlane.xlu1 %1111 }
 0x1a5   : > { %v1188_v23 = vsub.f32 1.5, %v1187_v25  ;;  %v1154_v28 = vmul.f32 %v1112_v26, %v7455_v61 }
 0x1a6   : > { %v6709_v32 = vpop.eup %6708 }
 0x1a7   : > { %v6711_v33 = vpop.eup %6710  ;;  %v1189_v34 = vmul.f32 %v6707_v14, %v1188_v23  ;;  %v1215_v35 = vmul.f32 %v6709_v32, %v1171_v15  ;;  %v1170_v37 = vadd.f32 1e-05, %v1154_v28  ;;  %vm1221_vm8 = vweird.f32 %v6709_v32 }
 0x1a8   : > { %v1195_v38 = vmul.f32 %v6711_v33, %v1169_v21  ;;  %vm1201_vm5 = vweird.f32 %v6711_v33  ;;  %vm1222_vm11 = vmor %vm1220_vm10, %vm1221_vm8 }
 0x1a9   : > { %6712 = vrsqrt.f32 %v1170_v37  ;;  %v1193_v27 = vsel %vm1192_vm4, %v6707_v14, %v1189_v34  ;;  %v1216_v40 = vmul.f32 %v6709_v32, %v1215_v35  ;;  %vm1202_vm7 = vmor %vm1200_vm6, %vm1201_vm5  ;;  %vm1210_vm12 = vweird.f32 %v1170_v37 }
 0x1aa   : > { %v1196_v39 = vmul.f32 %v6711_v33, %v1195_v38  ;;  %v1344_v46 = vmul.f32 %v1193_v27, %v7458_v2 }
 0x1ab   : > { %v1217_v52 = vmul.f32 0.5, %v1216_v40 }
 0x1ac   : > { %v1197_v43 = vmul.f32 0.5, %v1196_v39  ;;  %v1363_v2 = vmul.f32 %v7564_v47, %v1344_v46 }
 0x1ad   : > { %v1218_v48 = vsub.f32 1.5, %v1217_v52 }
 0x1ae   : > { %v1198_v50 = vsub.f32 1.5, %v1197_v43  ;;  %v954_v53 = vpop.permute.xlu0 %953  ;;  %v1382_v51 = vadd.f32 %v7574_v42, %v1363_v2 }
 0x1af   : > { %v6713_v41 = vpop.eup %6712  ;;  %v978_v55 = vmul.f32 %v7398_v16, %v954_v53  ;;  %v1219_v4 = vmul.f32 %v6709_v32, %v1218_v48 }
 0x1b0   : > { %v1199_v57 = vmul.f32 %v6711_v33, %v1198_v50  ;;  %v1205_v58 = vmul.f32 %v6713_v41, %v1170_v37  ;;  %vm1211_vm9 = vweird.f32 %v6713_v41  ;;  %v1398_v8 = vmax.f32 %v1382_v51, 0.0 }
 0x1b1   : > { %v7568_v59 = vadd.f32 %v7403_v19, %v978_v55  ;;  %vm1212_vm13 = vmor %vm1210_vm12, %vm1211_vm9 }
 0x1b2   : > { %v1203_v62 = vsel %vm1202_vm7, %v6711_v33, %v1199_v57  ;;  %v1206_v63 = vmul.f32 %v6713_v41, %v1205_v58 }
 0x1b3   : > { %v1043_v0 = vsel %vm1000_vm0, %v7568_v59, 0.0  ;;  %v1345_v1 = vmul.f32 %v1203_v62, %v7468_v12  ;;  %v1223_v12 = vsel %vm1222_vm11, %v6709_v32, %v1219_v4 }
 0x1b4   : > { %v1207_v3 = vmul.f32 0.5, %v1206_v63  ;;  %1044 = vadd.xlane.f32.xlu2 %v1043_v0  ;;  %v1347_v20 = vmul.f32 %v1223_v12, %v7465_v10 }
 0x1b5   : > { %v1364_v19 = vmul.f32 %v7564_v47, %v1345_v1 }
 0x1b6   : > { %v1208_v5 = vsub.f32 1.5, %v1207_v3  ;;  %v1366_v15 = vmul.f32 %v7564_v47, %v1347_v20 }
 0x1b7   : > { %v1383_v6 = vadd.f32 %v7574_v42, %v1364_v19 }
 0x1b8   : > { %v1209_v7 = vmul.f32 %v6713_v41, %v1208_v5  ;;  %v1385_v24 = vadd.f32 %v7574_v42, %v1366_v15 }
 0x1b9   : > { %v1399_v9 = vmax.f32 %v1383_v6, 0.0 }
 0x1ba   : > { %v1213_v11 = vsel %vm1212_vm13, %v6713_v41, %v1209_v7  ;;  %v1401_v26 = vmax.f32 %v1385_v24, 0.0 }
 0x1bb   : > { %v1414_v13 = vpack.c.bf16 %v1399_v9, %v1398_v8  ;;  %v1346_v14 = vmul.f32 %v1213_v11, %v7476_v17 }
 0x1bc   : > { %v959_v10 = vpop.permute.xlu1 %958 }
 0x1bd   : > { %6314 = vmatmul.msk.bf16.vlgmr.msra.gmra.mxu0 %vm1000_vm0, %v1414_v13  ;;  %v1365_v21 = vmul.f32 %v7564_v47, %v1346_v14  ;;  %v979_v37 = vmul.f32 %v7398_v16, %v959_v10 }
 0x1bf   : > { %v1384_v22 = vadd.f32 %v7574_v42, %v1365_v21  ;;  %v7604_v43 = vadd.f32 %v7421_v31, %v979_v37 }
 0x1c1   : > { %v1400_v25 = vmax.f32 %v1384_v22, 0.0  ;;  %v1046_v53 = vsel %vm1000_vm0, %v7604_v43, 0.0 }
 0x1c3   : > { %v1415_v23 = vpack.c.bf16 %v1401_v26, %v1400_v25 }
 0x1cd   : > { %6315 = vmatmul.msk.bf16.gmra.mxu0 %vm1000_vm0, %v1415_v23 }
 0x1d4   : > { %v1027_v28 = vpop.xlane.xlu2 %1026 }
 0x1d5   : > { %v1064_v17 = vmul.f32 %v7455_v61, %v1027_v28 }
 0x1d7   : > { %v7592_v32 = vsub.f32 %v7488_v29, %v1064_v17 }
 0x1d9   : > { %v1118_v33 = vpop.xlane.xlu0 %1117  ;;  %v1096_v34 = vmul.f32 %v7592_v32, %v7592_v32 }
 0x1da   : > { %v1156_v35 = vmul.f32 %v1118_v33, %v7455_v61 }
 0x1db   : > { %v1128_v38 = vsel %vm1000_vm0, %v1096_v34, 0.0 }
 0x1dc   : > { %v1172_v27 = vadd.f32 1e-05, %v1156_v35  ;;  %v1033_v39 = vpop.xlane.xlu2 %1032  ;;  %1129 = vadd.xlane.f32.xlu0 %v1128_v38 }
 0x1dd   : > { %v1066_v40 = vmul.f32 %v7455_v61, %v1033_v39 }
 0x1de   : > { %6714 = vrsqrt.f32 %v1172_v27  ;;  %vm1230_vm15 = vweird.f32 %v1172_v27 }
 0x1df   : > { %v7601_v29 = vsub.f32 %v7499_v36, %v1066_v40 }
 0x1e1   : > { %v1039_v46 = vpop.xlane.xlu0 %1038  ;;  %v1098_v50 = vmul.f32 %v7601_v29, %v7601_v29 }
 0x1e2   : > { %v1068_v16 = vmul.f32 %v7455_v61, %v1039_v46 }
 0x1e3   : > { %v1134_v52 = vsel %vm1000_vm0, %v1098_v50, 0.0 }
 0x1e4   : > { %v6715_v41 = vpop.eup %6714  ;;  %v7613_v55 = vsub.f32 %v7508_v44, %v1068_v16  ;;  %1135 = vadd.xlane.f32.xlu1 %v1134_v52  ;;  %v1036_v36 = vpop.xlane.xlu2 %1035  ;;  %1047 = vadd.xlane.f32.xlu0 %v1046_v53 }
 0x1e5   : > { %v1225_v31 = vmul.f32 %v6715_v41, %v1172_v27  ;;  %v1067_v57 = vmul.f32 %v7455_v61, %v1036_v36  ;;  %vm1231_vm14 = vweird.f32 %v6715_v41 }
 0x1e6   : > { %v1100_v48 = vmul.f32 %v7613_v55, %v7613_v55  ;;  %vm1232_vm1 = vmor %vm1230_vm15, %vm1231_vm14 }
 0x1e7   : > { %v1226_v58 = vmul.f32 %v6715_v41, %v1225_v31  ;;  %v7617_v2 = vsub.f32 %v7515_v49, %v1067_v57  ;;  %v1121_v62 = vpop.xlane.xlu1 %1120 }
 0x1e8   : > { %v1157_v63 = vmul.f32 %v1121_v62, %v7455_v61  ;;  %v1140_v19 = vsel %vm1000_vm0, %v1100_v48, 0.0 }
 0x1e9   : > { %v1227_v0 = vmul.f32 0.5, %v1226_v58  ;;  %v1099_v44 = vmul.f32 %v7617_v2, %v7617_v2 }
 0x1ea   : > { %v1173_v1 = vadd.f32 1e-05, %v1157_v63 }
 0x1eb   : > { %v1137_v3 = vsel %vm1000_vm0, %v1099_v44, 0.0  ;;  %v1228_v49 = vsub.f32 1.5, %v1227_v0 }
 0x1ec   : > { %6716 = vrsqrt.f32 %v1173_v1  ;;  %v1124_v51 = vpop.xlane.xlu2 %1123  ;;  %1138 = vadd.xlane.f32.xlu2 %v1137_v3  ;;  %1141 = vadd.xlane.f32.xlu0 %v1140_v19  ;;  %vm1240_vm3 = vweird.f32 %v1173_v1 }
 0x1ed   : > { %v1158_v4 = vmul.f32 %v1124_v51, %v7455_v61  ;;  %v1229_v6 = vmul.f32 %v6715_v41, %v1228_v49 }
 0x1ef   : > { %v1174_v5 = vadd.f32 1e-05, %v1158_v4  ;;  %v1233_v12 = vsel %vm1232_vm1, %v6715_v41, %v1229_v6  ;;  %v1133_v6 = vpop.xlane.xlu1 %1132 }
 0x1f0   : > { %v1348_v22 = vmul.f32 %v1233_v12, %v7491_v30 }
 0x1f1   : > { %6718 = vrsqrt.f32 %v1174_v5  ;;  %vm1250_vm6 = vweird.f32 %v1174_v5 }
 0x1f2   : > { %v6717_v7 = vpop.eup %6716  ;;  %v1367_v28 = vmul.f32 %v7564_v47, %v1348_v22 }
 0x1f3   : > { %v1235_v8 = vmul.f32 %v6717_v7, %v1173_v1  ;;  %vm1241_vm2 = vweird.f32 %v6717_v7 }
 0x1f4   : > { %v1127_v9 = vpop.xlane.xlu2 %1126  ;;  %vm1242_vm4 = vmor %vm1240_vm3, %vm1241_vm2  ;;  %v1386_v30 = vadd.f32 %v7574_v42, %v1367_v28 }
 0x1f5   : > { %v1236_v11 = vmul.f32 %v6717_v7, %v1235_v8  ;;  %v1159_v13 = vmul.f32 %v1127_v9, %v7455_v61  ;;  %v1161_v8 = vmul.f32 %v1133_v6, %v7455_v61 }
 0x1f6   : > { %v1402_v46 = vmax.f32 %v1386_v30, 0.0 }
 0x1f7   : > { %v6719_v14 = vpop.eup %6718  ;;  %v1237_v20 = vmul.f32 0.5, %v1236_v11  ;;  %v1175_v21 = vadd.f32 1e-05, %v1159_v13 }
 0x1f8   : > { %v1245_v15 = vmul.f32 %v6719_v14, %v1174_v5  ;;  %vm1251_vm5 = vweird.f32 %v6719_v14 }
 0x1f9   : > { %v1238_v24 = vsub.f32 1.5, %v1237_v20  ;;  %6720 = vrsqrt.f32 %v1175_v21  ;;  %vm1252_vm7 = vmor %vm1250_vm6, %vm1251_vm5  ;;  %vm1260_vm9 = vweird.f32 %v1175_v21 }
 0x1fa   : > { %v1246_v25 = vmul.f32 %v6719_v14, %v1245_v15 }
 0x1fb   : > { %v1239_v26 = vmul.f32 %v6717_v7, %v1238_v24 }
 0x1fc   : > { %v1247_v23 = vmul.f32 0.5, %v1246_v25 }
 0x1fd   : > { %v1243_v17 = vsel %vm1242_vm4, %v6717_v7, %v1239_v26  ;;  %v7659_v7 = vld [vmem:[%s10613_s0] ss:$0 sm:$0xff]  ;;  %s10546_s0 = smov 120  }
 0x1fe   : > { %v1248_v10 = vsub.f32 1.5, %v1247_v23  ;;  %v1349_v33 = vmul.f32 %v1243_v17, %v7511_v45 }
 0x1ff   : > { %v6721_v34 = vpop.eup %6720 }
 0x200   : > { %v1255_v35 = vmul.f32 %v6721_v34, %v1175_v21  ;;  %v1368_v37 = vmul.f32 %v7564_v47, %v1349_v33  ;;  %v1249_v38 = vmul.f32 %v6719_v14, %v1248_v10  ;;  %vm1261_vm8 = vweird.f32 %v6721_v34 }
 0x201   : > { %vm1262_vm10 = vmor %vm1260_vm9, %vm1261_vm8 }
 0x202   : > { %v1256_v27 = vmul.f32 %v6721_v34, %v1255_v35  ;;  %v1387_v39 = vadd.f32 %v7574_v42, %v1368_v37  ;;  %v1253_v16 = vsel %vm1252_vm7, %v6719_v14, %v1249_v38 }
 0x203   : > { %v1350_v41 = vmul.f32 %v1253_v16, %v7523_v54 }
 0x204   : > { %v1257_v40 = vmul.f32 0.5, %v1256_v27  ;;  %v1403_v50 = vmax.f32 %v1387_v39, 0.0 }
 0x205   : > { %v1369_v57 = vmul.f32 %v7564_v47, %v1350_v41 }
 0x206   : > { %v1258_v52 = vsub.f32 1.5, %v1257_v40  ;;  %v1416_v45 = vpack.c.bf16 %v1403_v50, %v1402_v46 }
 0x207   : > { %v1388_v48 = vadd.f32 %v7574_v42, %v1369_v57 }
 0x208   : > { %v1259_v53 = vmul.f32 %v6721_v34, %v1258_v52  ;;  %6316 = vmatmul.msk.bf16.gmra.mxu0 %vm1000_vm0, %v1416_v45 }
 0x209   : > { %v1404_v44 = vmax.f32 %v1388_v48, 0.0 }
 0x20a   : > { %v1263_v36 = vsel %vm1262_vm10, %v6721_v34, %v1259_v53 }
 0x20b   : > { %v1351_v31 = vmul.f32 %v1263_v36, %v7537_v60 }
 0x20d   : > { %v1370_v58 = vmul.f32 %v7564_v47, %v1351_v31 }
 0x20f   : > { %v1389_v62 = vadd.f32 %v7574_v42, %v1370_v58 }
 0x211   : > { %v1405_v63 = vmax.f32 %v1389_v62, 0.0 }
 0x213   : > { %v1417_v3 = vpack.c.bf16 %v1405_v63, %v1404_v44 }
 0x214   : > { %v1042_v0 = vpop.xlane.xlu2 %1041 }
 0x215   : > { %v1069_v1 = vmul.f32 %v7455_v61, %v1042_v0 }
 0x217   : > { %v7643_v54 = vsub.f32 %v7555_v18, %v1069_v1 }
 0x218   : > { %6317 = vmatmul.msk.bf16.gmra.mxu0 %vm1000_vm0, %v1417_v3 }
 0x219   : > { %v1101_v60 = vmul.f32 %v7643_v54, %v7643_v54 }
 0x21b   : > { %v1143_v19 = vsel %vm1000_vm0, %v1101_v60, 0.0 }
 0x21c   : > { %1144 = vadd.xlane.f32.xlu1 %v1143_v19 }
 0x227   : > { %v1045_v51 = vpop.xlane.xlu2 %1044 }
 0x228   : > { %v1070_v49 = vmul.f32 %v7455_v61, %v1045_v51 }
 0x22a   : > { %v7651_v4 = vsub.f32 %v7568_v59, %v1070_v49  ;;  %v1177_v59 = vadd.f32 1e-05, %v1161_v8 }
 0x22c   : > { %v1102_v5 = vmul.f32 %v7651_v4, %v7651_v4  ;;  %6722 = vrsqrt.f32 %v1177_v59  ;;  %vm1280_vm12 = vweird.f32 %v1177_v59 }
 0x22e   : > { %v1146_v18 = vsel %vm1000_vm0, %v1102_v5, 0.0 }
 0x22f   : > { %1147 = vadd.xlane.f32.xlu2 %v1146_v18 }
 0x232   : > { %v6723_v21 = vpop.eup %6722 }
 0x233   : > { %v1275_v15 = vmul.f32 %v6723_v21, %v1177_v59  ;;  %vm1281_vm11 = vweird.f32 %v6723_v21 }
 0x234   : > { %vm1282_vm13 = vmor %vm1280_vm12, %vm1281_vm11 }
 0x235   : > { %v1276_v24 = vmul.f32 %v6723_v21, %v1275_v15 }
 0x237   : > { %v1277_v23 = vmul.f32 0.5, %v1276_v24 }
 0x239   : > { %v1278_v33 = vsub.f32 1.5, %v1277_v23 }
 0x23a   : > { %v1475_v9 = vpop.f32.mrf.mxu0 }
 0x23b   : > { %v7663_v12 = vadd.f32 %v7659_v7, %v1475_v9  ;;  %v1279_v27 = vmul.f32 %v6723_v21, %v1278_v33 }
 0x23d   : > { %v1517_v11 = vsel %vm1000_vm0, %v7663_v12, 0.0  ;;  %v1283_v52 = vsel %vm1282_vm13, %v6723_v21, %v1279_v27 }
 0x23e   : > { %1518 = vadd.xlane.f32.xlu1 %v1517_v11  ;;  %v1353_v57 = vmul.f32 %v1283_v52, %v7528_v56 }
 0x240   : > { %v1372_v44 = vmul.f32 %v7564_v47, %v1353_v57 }
 0x242   : > { %v1477_v13 = vpop.f32.mrf.mxu0  ;;  %v1391_v49 = vadd.f32 %v7574_v42, %v1372_v44 }
 0x243   : > { %v7668_v14 = vadd.f32 %v7659_v7, %v1477_v13 }
 0x244   : > { %v1407_v11 = vmax.f32 %v1391_v49, 0.0 }
 0x245   : > { %v1520_v20 = vsel %vm1000_vm0, %v7668_v14, 0.0 }
 0x246   : > { %1521 = vadd.xlane.f32.xlu2 %v1520_v20 }
 0x24a   : > { %v1480_v22 = vpop.f32.mrf.mxu0 }
 0x24b   : > { %v7689_v62 = vadd.f32 %v7659_v7, %v1480_v22 }
 0x24d   : > { %v1523_v60 = vsel %vm1000_vm0, %v7689_v62, 0.0 }
 0x24f   : > { %v1130_v25 = vpop.xlane.xlu0 %1129 }
 0x250   : > { %v1160_v26 = vmul.f32 %v1130_v25, %v7455_v61 }
 0x252   : > { %v1176_v28 = vadd.f32 1e-05, %v1160_v26  ;;  %v1482_v17 = vpop.f32.mrf.mxu0 }
 0x253   : > { %v7674_v10 = vadd.f32 %v7659_v7, %v1482_v17 }
 0x254   : > { %6724 = vrsqrt.f32 %v1176_v28  ;;  %vm1270_vm15 = vweird.f32 %v1176_v28 }
 0x255   : > { %v1526_v34 = vsel %vm1000_vm0, %v7674_v10, 0.0 }
 0x256   : > { %1527 = vadd.xlane.f32.xlu1 %v1526_v34 }
 0x257   : > { %v1136_v35 = vpop.xlane.xlu1 %1135  ;;  %v1048_v37 = vpop.xlane.xlu0 %1047 }
 0x258   : > { %v1162_v30 = vmul.f32 %v1136_v35, %v7455_v61  ;;  %v1071_v38 = vmul.f32 %v7455_v61, %v1048_v37 }
 0x25a   : > { %v6725_v39 = vpop.eup %6724  ;;  %v1178_v40 = vadd.f32 1e-05, %v1162_v30  ;;  %v7681_v46 = vsub.f32 %v7604_v43, %v1071_v38 }
 0x25b   : > { %v1265_v50 = vmul.f32 %v6725_v39, %v1176_v28  ;;  %vm1271_vm14 = vweird.f32 %v6725_v39 }
 0x25c   : > { %6726 = vrsqrt.f32 %v1178_v40  ;;  %v1103_v16 = vmul.f32 %v7681_v46, %v7681_v46  ;;  %vm1272_vm1 = vmor %vm1270_vm15, %vm1271_vm14  ;;  %vm1290_vm3 = vweird.f32 %v1178_v40 }
 0x25d   : > { %v1266_v45 = vmul.f32 %v6725_v39, %v1265_v50 }
 0x25e   : > { %v1149_v53 = vsel %vm1000_vm0, %v1103_v16, 0.0 }
 0x25f   : > { %v1267_v41 = vmul.f32 0.5, %v1266_v45  ;;  %v1139_v36 = vpop.xlane.xlu2 %1138  ;;  %1150 = vadd.xlane.f32.xlu0 %v1149_v53  ;;  %v1142_v23 = vpop.xlane.xlu0 %1141 }
 0x260   : > { %v1163_v31 = vmul.f32 %v1139_v36, %v7455_v61  ;;  %v1164_v17 = vmul.f32 %v1142_v23, %v7455_v61 }
 0x261   : > { %v1268_v43 = vsub.f32 1.5, %v1267_v41 }
 0x262   : > { %v6727_v58 = vpop.eup %6726  ;;  %v1179_v48 = vadd.f32 1e-05, %v1163_v31 }
 0x263   : > { %v1269_v63 = vmul.f32 %v6725_v39, %v1268_v43  ;;  %v1285_v0 = vmul.f32 %v6727_v58, %v1178_v40  ;;  %vm1291_vm2 = vweird.f32 %v6727_v58 }
 0x264   : > { %6728 = vrsqrt.f32 %v1179_v48  ;;  %vm1292_vm4 = vmor %vm1290_vm3, %vm1291_vm2  ;;  %vm1300_vm6 = vweird.f32 %v1179_v48 }
 0x265   : > { %v1273_v1 = vsel %vm1272_vm1, %v6725_v39, %v1269_v63  ;;  %v1286_v3 = vmul.f32 %v6727_v58, %v1285_v0 }
 0x266   : > { %v1352_v56 = vmul.f32 %v1273_v1, %v7592_v32 }
 0x267   : > { %v1287_v19 = vmul.f32 0.5, %v1286_v3  ;;  %1524 = vadd.xlane.f32.xlu0 %v1523_v60 }
 0x268   : > { %v1371_v51 = vmul.f32 %v7564_v47, %v1352_v56 }
 0x269   : > { %v1288_v5 = vsub.f32 1.5, %v1287_v19 }
 0x26a   : > { %v6729_v18 = vpop.eup %6728  ;;  %v1390_v6 = vadd.f32 %v7574_v42, %v1371_v51 }
 0x26b   : > { %v1289_v8 = vmul.f32 %v6727_v58, %v1288_v5  ;;  %v1295_v9 = vmul.f32 %v6729_v18, %v1179_v48  ;;  %vm1301_vm5 = vweird.f32 %v6729_v18 }
 0x26c   : > { %v1406_v59 = vmax.f32 %v1390_v6, 0.0  ;;  %vm1302_vm7 = vmor %vm1300_vm6, %vm1301_vm5 }
 0x26d   : > { %v1293_v13 = vsel %vm1292_vm4, %v6727_v58, %v1289_v8  ;;  %v1296_v20 = vmul.f32 %v6729_v18, %v1295_v9 }
 0x26e   : > { %v1418_v32 = vpack.c.bf16 %v1407_v11, %v1406_v59  ;;  %v1354_v15 = vmul.f32 %v1293_v13, %v7601_v29  ;;  %v1180_v29 = vadd.f32 1e-05, %v1164_v17 }
 0x26f   : > { %v1297_v21 = vmul.f32 0.5, %v1296_v20 }
 0x270   : > { %6318 = vmatmul.msk.bf16.gmra.mxu0 %vm1000_vm0, %v1418_v32  ;;  %v1373_v25 = vmul.f32 %v7564_v47, %v1354_v15  ;;  %6730 = vrsqrt.f32 %v1180_v29  ;;  %vm1310_vm9 = vweird.f32 %v1180_v29 }
 0x271   : > { %v1298_v22 = vsub.f32 1.5, %v1297_v21 }
 0x272   : > { %v1392_v34 = vadd.f32 %v7574_v42, %v1373_v25 }
 0x273   : > { %v1299_v24 = vmul.f32 %v6729_v18, %v1298_v22 }
 0x274   : > { %v1408_v37 = vmax.f32 %v1392_v34, 0.0 }
 0x275   : > { %v1303_v26 = vsel %vm1302_vm7, %v6729_v18, %v1299_v24 }
 0x276   : > { %v1355_v28 = vmul.f32 %v1303_v26, %v7617_v2  ;;  %v6731_v39 = vpop.eup %6730 }
 0x277   : > { %v1305_v50 = vmul.f32 %v6731_v39, %v1180_v29  ;;  %vm1311_vm8 = vweird.f32 %v6731_v39 }
 0x278   : > { %v1374_v33 = vmul.f32 %v7564_v47, %v1355_v28  ;;  %vm1312_vm10 = vmor %vm1310_vm9, %vm1311_vm8 }
 0x279   : > { %v1306_v16 = vmul.f32 %v6731_v39, %v1305_v50 }
 0x27a   : > { %v1393_v35 = vadd.f32 %v7574_v42, %v1374_v33 }
 0x27b   : > { %v1307_v31 = vmul.f32 0.5, %v1306_v16 }
 0x27c   : > { %v1409_v30 = vmax.f32 %v1393_v35, 0.0 }
 0x27d   : > { %v1308_v43 = vsub.f32 1.5, %v1307_v31 }
 0x27e   : > { %v1419_v38 = vpack.c.bf16 %v1409_v30, %v1408_v37 }
 0x27f   : > { %v1309_v0 = vmul.f32 %v6731_v39, %v1308_v43 }
 0x280   : > { %6319 = vmatmul.msk.bf16.gmra.mxu0 %vm1000_vm0, %v1419_v38 }
 0x281   : > { %v1313_v3 = vsel %vm1312_vm10, %v6731_v39, %v1309_v0 }
 0x282   : > { %v1356_v19 = vmul.f32 %v1313_v3, %v7613_v55 }
 0x284   : > { %v1375_v5 = vmul.f32 %v7564_v47, %v1356_v19 }
 0x285   : > { %v1485_v27 = vpop.f32.mrf.mxu0 }
 0x286   : > { %v7708_v40 = vadd.f32 %v7659_v7, %v1485_v27  ;;  %v1394_v9 = vadd.f32 %v7574_v42, %v1375_v5 }
 0x288   : > { %v1529_v2 = vsel %vm1000_vm0, %v7708_v40, 0.0  ;;  %v1410_v11 = vmax.f32 %v1394_v9, 0.0 }
 0x289   : > { %1530 = vadd.xlane.f32.xlu2 %v1529_v2 }
 0x28d   : > { %v1487_v52 = vpop.f32.mrf.mxu0 }
 0x28e   : > { %v7713_v45 = vadd.f32 %v7659_v7, %v1487_v52 }
 0x28f   : > { %v1145_v53 = vpop.xlane.xlu1 %1144 }
 0x290   : > { %v1165_v41 = vmul.f32 %v1145_v53, %v7455_v61  ;;  %v1532_v36 = vsel %vm1000_vm0, %v7713_v45, 0.0 }
 0x291   : > { %1533 = vadd.xlane.f32.xlu0 %v1532_v36 }
 0x292   : > { %v1181_v57 = vadd.f32 1e-05, %v1165_v41 }
 0x294   : > { %6732 = vrsqrt.f32 %v1181_v57  ;;  %vm1320_vm12 = vweird.f32 %v1181_v57 }
 0x295   : > { %v1490_v58 = vpop.f32.mrf.mxu0 }
 0x296   : > { %v7719_v48 = vadd.f32 %v7659_v7, %v1490_v58 }
 0x298   : > { %v1535_v63 = vsel %vm1000_vm0, %v7719_v48, 0.0 }
 0x299   : > { %1536 = vadd.xlane.f32.xlu0 %v1535_v63 }
 0x29a   : > { %v6733_v44 = vpop.eup %6732 }
 0x29b   : > { %v1315_v1 = vmul.f32 %v6733_v44, %v1181_v57  ;;  %vm1321_vm11 = vweird.f32 %v6733_v44 }
 0x29c   : > { %vm1322_vm13 = vmor %vm1320_vm12, %vm1321_vm11 }
 0x29d   : > { %v1316_v60 = vmul.f32 %v6733_v44, %v1315_v1  ;;  %v1492_v24 = vpop.f32.mrf.mxu0 }
 0x29e   : > { %v7740_v28 = vadd.f32 %v7659_v7, %v1492_v24 }
 0x29f   : > { %v1317_v56 = vmul.f32 0.5, %v1316_v60 }
 0x2a0   : > { %v1538_v34 = vsel %vm1000_vm0, %v7740_v28, 0.0 }
 0x2a1   : > { %v1318_v51 = vsub.f32 1.5, %v1317_v56 }
 0x2a2   : > { %v1148_v55 = vpop.xlane.xlu2 %1147 }
 0x2a3   : > { %v1319_v49 = vmul.f32 %v6733_v44, %v1318_v51  ;;  %v1166_v23 = vmul.f32 %v1148_v55, %v7455_v61 }
 0x2a5   : > { %v1323_v18 = vsel %vm1322_vm13, %v6733_v44, %v1319_v49  ;;  %v1182_v33 = vadd.f32 1e-05, %v1166_v23 }
 0x2a6   : > { %v1357_v6 = vmul.f32 %v1323_v18, %v7643_v54 }
 0x2a7   : > { %6734 = vrsqrt.f32 %v1182_v33  ;;  %vm1330_vm15 = vweird.f32 %v1182_v33 }
 0x2a8   : > { %v1376_v8 = vmul.f32 %v7564_v47, %v1357_v6 }
 0x2aa   : > { %v1395_v59 = vadd.f32 %v7574_v42, %v1376_v8 }
 0x2ac   : > { %v1411_v13 = vmax.f32 %v1395_v59, 0.0 }
 0x2ad   : > { %v6735_v29 = vpop.eup %6734 }
 0x2ae   : > { %v1420_v20 = vpack.c.bf16 %v1411_v13, %v1410_v11  ;;  %v1325_v38 = vmul.f32 %v6735_v29, %v1182_v33  ;;  %vm1331_vm14 = vweird.f32 %v6735_v29 }
 0x2af   : > { %vm1332_vm1 = vmor %vm1330_vm15, %vm1331_vm14 }
 0x2b0   : > { %6320 = vmatmul.msk.bf16.gmra.mxu0 %vm1000_vm0, %v1420_v20  ;;  %v1326_v39 = vmul.f32 %v6735_v29, %v1325_v38 }
 0x2b1   : > { %v1519_v32 = vpop.xlane.xlu1 %1518 }
 0x2b2   : > { %v1565_v21 = vmul.f32 %v1519_v32, %v7455_v61  ;;  %v1327_v52 = vmul.f32 0.5, %v1326_v39 }
 0x2b4   : > { %v7732_v15 = vsub.f32 %v7663_v12, %v1565_v21  ;;  %v1328_v41 = vsub.f32 1.5, %v1327_v52 }
 0x2b6   : > { %v1597_v54 = vmul.f32 %v7732_v15, %v7732_v15  ;;  %v1329_v57 = vmul.f32 %v6735_v29, %v1328_v41  ;;  %v6490_v41 = vld [vmem:[%s10614_s10] sm:$0xff] }
 0x2b8   : > { %v1613_v22 = vsel %vm1000_vm0, %v1597_v54, 0.0  ;;  %v1333_v0 = vsel %vm1332_vm1, %v6735_v29, %v1329_v57 }
 0x2b9   : > { %1614 = vadd.xlane.f32.xlu1 %v1613_v22  ;;  %v1522_v25 = vpop.xlane.xlu2 %1521  ;;  %v1358_v60 = vmul.f32 %v1333_v0, %v7651_v4 }
 0x2ba   : > { %v1566_v26 = vmul.f32 %v1522_v25, %v7455_v61 }
 0x2bc   : > { %v7743_v17 = vsub.f32 %v7668_v14, %v1566_v26 }
 0x2be   : > { %v1598_v12 = vmul.f32 %v7743_v17, %v7743_v17 }
 0x2c0   : > { %v1616_v35 = vsel %vm1000_vm0, %v1598_v12, 0.0 }
 0x2c1   : > { %1539 = vadd.xlane.f32.xlu1 %v1538_v34  ;;  %1617 = vadd.xlane.f32.xlu2 %v1616_v35 }
 0x2c9   : > { %v1528_v37 = vpop.xlane.xlu1 %1527 }
 0x2ca   : > { %v1568_v30 = vmul.f32 %v1528_v37, %v7455_v61 }
 0x2cc   : > { %v7752_v14 = vsub.f32 %v7674_v10, %v1568_v30 }
 0x2ce   : > { %v1600_v27 = vmul.f32 %v7752_v14, %v7752_v14 }
 0x2d0   : > { %v1622_v2 = vsel %vm1000_vm0, %v1600_v27, 0.0 }
 0x2d1   : > { %1623 = vadd.xlane.f32.xlu0 %v1622_v2  ;;  %v6491_v2 = vld [vmem:[%s10614_s10 + $0x8] sm:$0xff]  ;;  %s10616_s10 = sld [smem:[#allocation54_spill]] }
 0x2d2   : > { %v1151_v50 = vpop.xlane.xlu0 %1150  ;;  %1981 = vmatpush.bf16.msra.mxu1 %v6491_v2 }
 0x2d3   : > { %v1167_v16 = vmul.f32 %v1151_v50, %v7455_v61 }
 0x2d5   : > { %v1183_v53 = vadd.f32 1e-05, %v1167_v16 }
 0x2d6   : > { %1982 = vmatpush.bf16.msra.mxu1 %v6490_v41 }
 0x2d7   : > { %6736 = vrsqrt.f32 %v1183_v53  ;;  %vm1340_vm3 = vweird.f32 %v1183_v53 }
 0x2da   : > { %v1525_v36 = vpop.xlane.xlu0 %1524 }
 0x2db   : > { %v1567_v31 = vmul.f32 %v1525_v36, %v7455_v61 }
 0x2dd   : > { %v6737_v10 = vpop.eup %6736  ;;  %v7760_v43 = vsub.f32 %v7689_v62, %v1567_v31  ;;  %v1377_v62 = vmul.f32 %v7564_v47, %v1358_v60 }
 0x2de   : > { %v1335_v58 = vmul.f32 %v6737_v10, %v1183_v53  ;;  %vm1341_vm2 = vweird.f32 %v6737_v10 }
 0x2df   : > { %v1599_v63 = vmul.f32 %v7760_v43, %v7760_v43  ;;  %vm1342_vm4 = vmor %vm1340_vm3, %vm1341_vm2  ;;  %v1396_v18 = vadd.f32 %v7574_v42, %v1377_v62 }
 0x2e0   : > { %v1336_v44 = vmul.f32 %v6737_v10, %v1335_v58 }
 0x2e1   : > { %v1619_v1 = vsel %vm1000_vm0, %v1599_v63, 0.0  ;;  %v1412_v4 = vmax.f32 %v1396_v18, 0.0 }
 0x2e2   : > { %v1337_v3 = vmul.f32 0.5, %v1336_v44  ;;  %1620 = vadd.xlane.f32.xlu2 %v1619_v1 }
 0x2e4   : > { %v1338_v56 = vsub.f32 1.5, %v1337_v3 }
 0x2e6   : > { %v1339_v19 = vmul.f32 %v6737_v10, %v1338_v56 }
 0x2e8   : > { %v1343_v51 = vsel %vm1342_vm4, %v6737_v10, %v1339_v19 }
 0x2e9   : > { %v1359_v49 = vmul.f32 %v1343_v51, %v7681_v46 }
 0x2eb   : > { %v1378_v5 = vmul.f32 %v7564_v47, %v1359_v49 }
 0x2ed   : > { %v1495_v6 = vpop.f32.mrf.mxu0  ;;  %v1397_v8 = vadd.f32 %v7574_v42, %v1378_v5 }
 0x2ee   : > { %v7772_v9 = vadd.f32 %v7659_v7, %v1495_v6 }
 0x2ef   : > { %v1413_v59 = vmax.f32 %v1397_v8, 0.0 }
 0x2f0   : > { %v1541_v11 = vsel %vm1000_vm0, %v7772_v9, 0.0 }
 0x2f1   : > { %1542 = vadd.xlane.f32.xlu1 %v1541_v11  ;;  %v1421_v13 = vpack.c.bf16 %v1413_v59, %v1412_v4 }
 0x2f3   : > { %6321 = vmatmul.msk.bf16.gmra.mxu0 %vm1000_vm0, %v1421_v13 }
 0x2f5   : > { %v1497_v46 = vpop.f32.mrf.mxu0 }
 0x2f6   : > { %v7778_v47 = vadd.f32 %v7659_v7, %v1497_v46  ;;  %v7843_v46 = vld [vmem:[%s10615_s3] ss:$0 sm:$0xff]  ;;  %s7174_s3 = smov 88  }
 0x2f8   : > { %v1544_v20 = vsel %vm1000_vm0, %v7778_v47, 0.0 }
 0x2f9   : > { %1545 = vadd.xlane.f32.xlu2 %v1544_v20 }
 0x2fc   : > { %v1531_v42 = vpop.xlane.xlu2 %1530 }
 0x2fd   : > { %v1569_v55 = vmul.f32 %v1531_v42, %v7455_v61  ;;  %v1500_v32 = vpop.f32.mrf.mxu0 }
 0x2fe   : > { %v7784_v21 = vadd.f32 %v7659_v7, %v1500_v32 }
 0x2ff   : > { %v7787_v54 = vsub.f32 %v7708_v40, %v1569_v55 }
 0x300   : > { %v1547_v22 = vsel %vm1000_vm0, %v7784_v21, 0.0 }
 0x301   : > { %1548 = vadd.xlane.f32.xlu2 %v1547_v22  ;;  %v1601_v24 = vmul.f32 %v7787_v54, %v7787_v54  ;;  %v7849_v22 = vld [vmem:[%s10616_s10] ss:$0 sm:$0xff]  ;;  %s848_s10 = scalar_select %p847_p11, %s8148_s5, 15 }
 0x303   : > { %v1625_v25 = vsel %vm1000_vm0, %v1601_v24, 0.0 }
 0x304   : > { %1626 = vadd.xlane.f32.xlu0 %v1625_v25  ;;  %v1534_v26 = vpop.xlane.xlu0 %1533 }
 0x305   : > { %v1570_v23 = vmul.f32 %v1534_v26, %v7455_v61  ;;  %v1502_v12 = vpop.f32.mrf.mxu0 }
 0x306   : > { %v7799_v40 = vadd.f32 %v7659_v7, %v1502_v12 }
 0x307   : > { %v7796_v33 = vsub.f32 %v7713_v45, %v1570_v23 }
 0x308   : > { %v1550_v35 = vsel %vm1000_vm0, %v7799_v40, 0.0 }
 0x309   : > { %v1602_v34 = vmul.f32 %v7796_v33, %v7796_v33 }
 0x30b   : > { %v1628_v29 = vsel %vm1000_vm0, %v1602_v34, 0.0 }
 0x30c   : > { %1551 = vadd.xlane.f32.xlu0 %v1550_v35  ;;  %1629 = vadd.xlane.f32.xlu1 %v1628_v29  ;;  %v1537_v37 = vpop.xlane.xlu0 %1536 }
 0x30d   : > { %v1571_v30 = vmul.f32 %v1537_v37, %v7455_v61 }
 0x30f   : > { %v7808_v38 = vsub.f32 %v7719_v48, %v1571_v30 }
 0x311   : > { %v1603_v45 = vmul.f32 %v7808_v38, %v7808_v38 }
 0x313   : > { %v1631_v27 = vsel %vm1000_vm0, %v1603_v45, 0.0 }
 0x314   : > { %1632 = vadd.xlane.f32.xlu1 %v1631_v27 }
 0x32c   : > { %v1615_v39 = vpop.xlane.xlu1 %1614 }
 0x32d   : > { %v1661_v50 = vmul.f32 %v1615_v39, %v7455_v61  ;;  %v1505_v16 = vpop.f32.mrf.mxu0 }
 0x32e   : > { %v7818_v52 = vadd.f32 %v7659_v7, %v1505_v16 }
 0x32f   : > { %v1677_v48 = vadd.f32 1e-05, %v1661_v50 }
 0x330   : > { %v1553_v53 = vsel %vm1000_vm0, %v7818_v52, 0.0 }
 0x331   : > { %6738 = vrsqrt.f32 %v1677_v48  ;;  %1554 = vadd.xlane.f32.xlu0 %v1553_v53  ;;  %vm1699_vm6 = vweird.f32 %v1677_v48 }
 0x334   : > { %v1540_v36 = vpop.xlane.xlu1 %1539  ;;  %v1618_v31 = vpop.xlane.xlu2 %1617 }
 0x335   : > { %v1572_v57 = vmul.f32 %v1540_v36, %v7455_v61  ;;  %v1662_v10 = vmul.f32 %v1618_v31, %v7455_v61  ;;  %v1507_v58 = vpop.f32.mrf.mxu0 }
 0x336   : > { %v7828_v63 = vadd.f32 %v7659_v7, %v1507_v58 }
 0x337   : > { %v6739_v0 = vpop.eup %6738  ;;  %v7831_v44 = vsub.f32 %v7740_v28, %v1572_v57  ;;  %v1678_v1 = vadd.f32 1e-05, %v1662_v10 }
 0x338   : > { %v1694_v3 = vmul.f32 %v6739_v0, %v1677_v48  ;;  %v1556_v60 = vsel %vm1000_vm0, %v7828_v63, 0.0  ;;  %vm1700_vm5 = vweird.f32 %v6739_v0 }
 0x339   : > { %6740 = vrsqrt.f32 %v1678_v1  ;;  %1557 = vadd.xlane.f32.xlu1 %v1556_v60  ;;  %v1604_v56 = vmul.f32 %v7831_v44, %v7831_v44  ;;  %vm1701_vm7 = vmor %vm1699_vm6, %vm1700_vm5  ;;  %vm1709_vm9 = vweird.f32 %v1678_v1 }
 0x33a   : > { %v1695_v19 = vmul.f32 %v6739_v0, %v1694_v3 }
 0x33b   : > { %v1634_v62 = vsel %vm1000_vm0, %v1604_v56, 0.0 }
 0x33c   : > { %v1696_v51 = vmul.f32 0.5, %v1695_v19  ;;  %1635 = vadd.xlane.f32.xlu2 %v1634_v62 }
 0x33e   : > { %v1697_v49 = vsub.f32 1.5, %v1696_v51 }
 0x33f   : > { %v6741_v5 = vpop.eup %6740 }
 0x340   : > { %v1698_v28 = vmul.f32 %v6739_v0, %v1697_v49  ;;  %v1704_v18 = vmul.f32 %v6741_v5, %v1678_v1  ;;  %vm1710_vm8 = vweird.f32 %v6741_v5 }
 0x341   : > { %vm1711_vm10 = vmor %vm1709_vm9, %vm1710_vm8 }
 0x342   : > { %v1702_v6 = vsel %vm1701_vm7, %v6739_v0, %v1698_v28  ;;  %v1705_v8 = vmul.f32 %v6741_v5, %v1704_v18 }
 0x343   : > { %v1853_v13 = vmul.f32 %v1702_v6, %v7732_v15 }
 0x344   : > { %v1706_v4 = vmul.f32 0.5, %v1705_v8  ;;  %v1624_v59 = vpop.xlane.xlu0 %1623 }
 0x345   : > { %v1664_v11 = vmul.f32 %v1624_v59, %v7455_v61  ;;  %v1872_v32 = vmul.f32 %v7843_v46, %v1853_v13 }
 0x346   : > { %v1707_v20 = vsub.f32 1.5, %v1706_v4 }
 0x347   : > { %v1680_v42 = vadd.f32 1e-05, %v1664_v11  ;;  %v7854_v26 = vadd.f32 %v7849_v22, %v1872_v32 }
 0x348   : > { %v1708_v55 = vmul.f32 %v6741_v5, %v1707_v20 }
 0x349   : > { %6742 = vrsqrt.f32 %v1680_v42  ;;  %10617 = vst [vmem:[#allocation7_spill] sm:$0xff] %v7854_v26  ;;  %v10565_v35 = vmax.f32 %v7854_v26, 0.0  ;;  %vm1729_vm12 = vweird.f32 %v1680_v42 }
 0x34a   : > { %v1712_v15 = vsel %vm1711_vm10, %v6741_v5, %v1708_v55 }
 0x34b   : > { %v1854_v24 = vmul.f32 %v1712_v15, %v7743_v17 }
 0x34d   : > { %v1873_v25 = vmul.f32 %v7843_v46, %v1854_v24 }
 0x34f   : > { %v6743_v23 = vpop.eup %6742  ;;  %v7857_v12 = vadd.f32 %v7849_v22, %v1873_v25 }
 0x350   : > { %v1724_v34 = vmul.f32 %v6743_v23, %v1680_v42  ;;  %vm1730_vm11 = vweird.f32 %v6743_v23 }
 0x351   : > { %10618 = vst [vmem:[#allocation8_spill] sm:$0xff] %v7857_v12  ;;  %v10564_v29 = vmax.f32 %v7857_v12, 0.0  ;;  %vm1731_vm13 = vmor %vm1729_vm12, %vm1730_vm11 }
 0x352   : > { %v1725_v37 = vmul.f32 %v6743_v23, %v1724_v34 }
 0x353   : > { %v1923_v17 = vpack.c.bf16 %v10564_v29, %v10565_v35 }
 0x354   : > { %v1726_v27 = vmul.f32 0.5, %v1725_v37 }
 0x355   : > { %6330 = vmatmul.msk.bf16.vlgmr.msra.gmra.mxu1 %vm1000_vm0, %v1923_v17  ;;  %v1621_v30 = vpop.xlane.xlu2 %1620 }
 0x356   : > { %v1663_v45 = vmul.f32 %v1621_v30, %v7455_v61  ;;  %v1727_v2 = vsub.f32 1.5, %v1726_v27 }
 0x358   : > { %v1679_v39 = vadd.f32 1e-05, %v1663_v45  ;;  %v1728_v50 = vmul.f32 %v6743_v23, %v1727_v2 }
 0x35a   : > { %6744 = vrsqrt.f32 %v1679_v39  ;;  %v1732_v53 = vsel %vm1731_vm13, %v6743_v23, %v1728_v50  ;;  %vm1719_vm15 = vweird.f32 %v1679_v39 }
 0x35b   : > { %v1856_v10 = vmul.f32 %v1732_v53, %v7752_v14 }
 0x35d   : > { %v1875_v60 = vmul.f32 %v7843_v46, %v1856_v10 }
 0x35f   : > { %v7880_v49 = vadd.f32 %v7849_v22, %v1875_v60 }
 0x360   : > { %v6745_v16 = vpop.eup %6744 }
 0x361   : > { %v1714_v48 = vmul.f32 %v6745_v16, %v1679_v39  ;;  %vm1720_vm14 = vweird.f32 %v6745_v16  ;;  %10619 = vst [vmem:[#allocation9_spill] sm:$0xff] %v7880_v49  ;;  %v10562_v4 = vmax.f32 %v7880_v49, 0.0 }
 0x362   : > { %vm1721_vm1 = vmor %vm1719_vm15, %vm1720_vm14 }
 0x363   : > { %v1715_v41 = vmul.f32 %v6745_v16, %v1714_v48 }
 0x364   : > { %v1543_v36 = vpop.xlane.xlu1 %1542 }
 0x365   : > { %v1716_v31 = vmul.f32 0.5, %v1715_v41  ;;  %v1573_v57 = vmul.f32 %v1543_v36, %v7455_v61 }
 0x367   : > { %v1717_v58 = vsub.f32 1.5, %v1716_v31  ;;  %v7870_v0 = vsub.f32 %v7772_v9, %v1573_v57 }
 0x369   : > { %v1718_v1 = vmul.f32 %v6745_v16, %v1717_v58  ;;  %v1605_v3 = vmul.f32 %v7870_v0, %v7870_v0 }
 0x36b   : > { %v1722_v56 = vsel %vm1721_vm1, %v6745_v16, %v1718_v1  ;;  %v1637_v19 = vsel %vm1000_vm0, %v1605_v3, 0.0 }
 0x36c   : > { %1638 = vadd.xlane.f32.xlu2 %v1637_v19  ;;  %v1546_v62 = vpop.xlane.xlu2 %1545  ;;  %v1855_v14 = vmul.f32 %v1722_v56, %v7760_v43 }
 0x36d   : > { %v1574_v51 = vmul.f32 %v1546_v62, %v7455_v61 }
 0x36e   : > { %v1874_v9 = vmul.f32 %v7843_v46, %v1855_v14 }
 0x36f   : > { %v7883_v5 = vsub.f32 %v7778_v47, %v1574_v51 }
 0x370   : > { %v1510_v28 = vpop.f32.mrf.mxu0  ;;  %v7886_v18 = vadd.f32 %v7849_v22, %v1874_v9 }
 0x371   : > { %v7889_v6 = vadd.f32 %v7659_v7, %v1510_v28  ;;  %v1606_v43 = vmul.f32 %v7883_v5, %v7883_v5 }
 0x372   : > { %10620 = vst [vmem:[#allocation10_spill] sm:$0xff] %v7886_v18  ;;  %v10563_v8 = vmax.f32 %v7886_v18, 0.0 }
 0x373   : > { %v1640_v59 = vsel %vm1000_vm0, %v1606_v43, 0.0  ;;  %v1559_v47 = vsel %vm1000_vm0, %v7889_v6, 0.0 }
 0x374   : > { %1641 = vadd.xlane.f32.xlu0 %v1640_v59  ;;  %v1549_v11 = vpop.xlane.xlu2 %1548  ;;  %1560 = vadd.xlane.f32.xlu1 %v1559_v47  ;;  %v1924_v13 = vpack.c.bf16 %v10562_v4, %v10563_v8 }
 0x375   : > { %v1575_v20 = vmul.f32 %v1549_v11, %v7455_v61 }
 0x376   : > { %6331 = vmatmul.msk.bf16.gmra.mxu1 %vm1000_vm0, %v1924_v13 }
 0x377   : > { %v7905_v42 = vsub.f32 %v7784_v21, %v1575_v20  ;;  %v1627_v55 = vpop.xlane.xlu0 %1626 }
 0x378   : > { %v1665_v32 = vmul.f32 %v1627_v55, %v7455_v61  ;;  %v1512_v15 = vpop.f32.mrf.mxu0 }
 0x379   : > { %v7909_v24 = vadd.f32 %v7659_v7, %v1512_v15  ;;  %v1607_v25 = vmul.f32 %v7905_v42, %v7905_v42 }
 0x37a   : > { %v1681_v23 = vadd.f32 1e-05, %v1665_v32 }
 0x37b   : > { %v1562_v34 = vsel %vm1000_vm0, %v7909_v24, 0.0  ;;  %v1643_v37 = vsel %vm1000_vm0, %v1607_v25, 0.0 }
 0x37c   : > { %6746 = vrsqrt.f32 %v1681_v23  ;;  %1563 = vadd.xlane.f32.xlu2 %v1562_v34  ;;  %1644 = vadd.xlane.f32.xlu0 %v1643_v37  ;;  %vm1739_vm3 = vweird.f32 %v1681_v23 }
 0x37f   : > { %v1630_v21 = vpop.xlane.xlu1 %1629  ;;  %v1552_v17 = vpop.xlane.xlu0 %1551 }
 0x380   : > { %v1666_v30 = vmul.f32 %v1630_v21, %v7455_v61  ;;  %v1576_v45 = vmul.f32 %v1552_v17, %v7455_v61 }
 0x382   : > { %v6747_v7 = vpop.eup %6746  ;;  %v1682_v27 = vadd.f32 1e-05, %v1666_v30  ;;  %v7919_v39 = vsub.f32 %v7799_v40, %v1576_v45 }
 0x383   : > { %v1734_v2 = vmul.f32 %v6747_v7, %v1681_v23  ;;  %vm1740_vm2 = vweird.f32 %v6747_v7 }
 0x384   : > { %6748 = vrsqrt.f32 %v1682_v27  ;;  %v1608_v50 = vmul.f32 %v7919_v39, %v7919_v39  ;;  %vm1741_vm4 = vmor %vm1739_vm3, %vm1740_vm2  ;;  %vm1749_vm6 = vweird.f32 %v1682_v27 }
 0x385   : > { %v1735_v16 = vmul.f32 %v6747_v7, %v1734_v2 }
 0x386   : > { %v1646_v48 = vsel %vm1000_vm0, %v1608_v50, 0.0 }
 0x387   : > { %v1736_v53 = vmul.f32 0.5, %v1735_v16  ;;  %1647 = vadd.xlane.f32.xlu1 %v1646_v48  ;;  %v1633_v62 = vpop.xlane.xlu1 %1632 }
 0x388   : > { %v1667_v51 = vmul.f32 %v1633_v62, %v7455_v61  ;;  %v7977_v62 = vld [vmem:[%s10625_s12] ss:$0 sm:$0xff]  ;;  %s10634_s12 = sld [smem:[#allocation45_spill]] }
 0x389   : > { %v1737_v41 = vsub.f32 1.5, %v1736_v53 }
 0x38a   : > { %v6749_v36 = vpop.eup %6748  ;;  %v1683_v43 = vadd.f32 1e-05, %v1667_v51 }
 0x38b   : > { %v1738_v31 = vmul.f32 %v6747_v7, %v1737_v41  ;;  %v1744_v57 = vmul.f32 %v6749_v36, %v1682_v27  ;;  %vm1750_vm5 = vweird.f32 %v6749_v36 }
 0x38c   : > { %vm1751_vm7 = vmor %vm1749_vm6, %vm1750_vm5  ;;  %6750 = vrsqrt.f32 %v1683_v43  ;;  %vm1759_vm9 = vweird.f32 %v1683_v43 }
 0x38d   : > { %v1742_v10 = vsel %vm1741_vm4, %v6747_v7, %v1738_v31  ;;  %v1745_v40 = vmul.f32 %v6749_v36, %v1744_v57 }
 0x38e   : > { %v1857_v1 = vmul.f32 %v1742_v10, %v7787_v54  ;;  %s8155_s29 = scalar_lea.vmem %s10634_s12, %s848_s10  ;;  %s10635_s12 = smov 96  }
 0x38f   : > { %v1746_v58 = vmul.f32 0.5, %v1745_v40  ;;  %s7180_s10 = smov 48  }
 0x390   : > { %v1876_v56 = vmul.f32 %v7843_v46, %v1857_v1 }
 0x391   : > { %v1747_v3 = vsub.f32 1.5, %v1746_v58 }
 0x392   : > { %v7930_v28 = vadd.f32 %v7849_v22, %v1876_v56  ;;  %v6751_v20 = vpop.eup %6750 }
 0x393   : > { %v1748_v60 = vmul.f32 %v6749_v36, %v1747_v3  ;;  %v1754_v32 = vmul.f32 %v6751_v20, %v1683_v43  ;;  %vm1760_vm8 = vweird.f32 %v6751_v20 }
 0x394   : > { %10621 = vst [vmem:[#allocation11_spill] sm:$0xff] %v7930_v28  ;;  %v10561_v59 = vmax.f32 %v7930_v28, 0.0  ;;  %vm1761_vm10 = vmor %vm1759_vm9, %vm1760_vm8 }
 0x395   : > { %v1752_v19 = vsel %vm1751_vm7, %v6749_v36, %v1748_v60  ;;  %v1755_v34 = vmul.f32 %v6751_v20, %v1754_v32 }
 0x396   : > { %v1858_v14 = vmul.f32 %v1752_v19, %v7796_v33 }
 0x397   : > { %v1756_v45 = vmul.f32 0.5, %v1755_v34 }
 0x398   : > { %v1877_v9 = vmul.f32 %v7843_v46, %v1858_v14 }
 0x399   : > { %v1757_v2 = vsub.f32 1.5, %v1756_v45 }
 0x39a   : > { %v7933_v54 = vadd.f32 %v7849_v22, %v1877_v9 }
 0x39b   : > { %v1758_v50 = vmul.f32 %v6751_v20, %v1757_v2 }
 0x39c   : > { %10622 = vst [vmem:[#allocation12_spill] sm:$0xff] %v7933_v54  ;;  %v10560_v47 = vmax.f32 %v7933_v54, 0.0 }
 0x39e   : > { %v1925_v33 = vpack.c.bf16 %v10560_v47, %v10561_v59 }
 0x3a0   : > { %6332 = vmatmul.msk.bf16.gmra.mxu1 %vm1000_vm0, %v1925_v33 }
 0x3a4   : > { %v1555_v11 = vpop.xlane.xlu0 %1554 }
 0x3a5   : > { %v1577_v13 = vmul.f32 %v1555_v11, %v7455_v61 }
 0x3a7   : > { %v7944_v55 = vsub.f32 %v7818_v52, %v1577_v13 }
 0x3a9   : > { %v1609_v15 = vmul.f32 %v7944_v55, %v7944_v55 }
 0x3ab   : > { %v1649_v25 = vsel %vm1000_vm0, %v1609_v15, 0.0 }
 0x3ac   : > { %v1558_v23 = vpop.xlane.xlu1 %1557  ;;  %1650 = vadd.xlane.f32.xlu2 %v1649_v25 }
 0x3ad   : > { %v1578_v37 = vmul.f32 %v1558_v23, %v7455_v61 }
 0x3af   : > { %v7951_v21 = vsub.f32 %v7828_v63, %v1578_v37  ;;  %v1636_v17 = vpop.xlane.xlu2 %1635  ;;  %v1762_v63 = vsel %vm1761_vm10, %v6751_v20, %v1758_v50 }
 0x3b0   : > { %v1668_v30 = vmul.f32 %v1636_v17, %v7455_v61  ;;  %v1859_v36 = vmul.f32 %v1762_v63, %v7808_v38 }
 0x3b1   : > { %v1610_v52 = vmul.f32 %v7951_v21, %v7951_v21 }
 0x3b2   : > { %v1684_v7 = vadd.f32 1e-05, %v1668_v30  ;;  %v1878_v10 = vmul.f32 %v7843_v46, %v1859_v36 }
 0x3b3   : > { %v1652_v27 = vsel %vm1000_vm0, %v1610_v52, 0.0 }
 0x3b4   : > { %6752 = vrsqrt.f32 %v1684_v7  ;;  %1653 = vadd.xlane.f32.xlu0 %v1652_v27  ;;  %vm1769_vm12 = vweird.f32 %v1684_v7  ;;  %v7962_v3 = vadd.f32 %v7849_v22, %v1878_v10 }
 0x3b6   : > { %10623 = vst [vmem:[#allocation13_spill] sm:$0xff] %v7962_v3  ;;  %v10559_v38 = vmax.f32 %v7962_v3, 0.0 }
 0x3ba   : > { %v6753_v16 = vpop.eup %6752 }
 0x3bb   : > { %v1764_v48 = vmul.f32 %v6753_v16, %v1684_v7  ;;  %vm1770_vm11 = vweird.f32 %v6753_v16 }
 0x3bc   : > { %vm1771_vm13 = vmor %vm1769_vm12, %vm1770_vm11 }
 0x3bd   : > { %v1765_v53 = vmul.f32 %v6753_v16, %v1764_v48 }
 0x3bf   : > { %v1766_v41 = vmul.f32 0.5, %v1765_v53 }
 0x3c1   : > { %v1767_v31 = vsub.f32 1.5, %v1766_v41 }
 0x3c3   : > { %v1768_v57 = vmul.f32 %v6753_v16, %v1767_v31 }
 0x3c5   : > { %v1772_v40 = vsel %vm1771_vm13, %v6753_v16, %v1768_v57 }
 0x3c6   : > { %v1860_v58 = vmul.f32 %v1772_v40, %v7831_v44 }
 0x3c8   : > { %v1879_v1 = vmul.f32 %v7843_v46, %v1860_v58 }
 0x3ca   : > { %v7965_v60 = vadd.f32 %v7849_v22, %v1879_v1 }
 0x3cc   : > { %10624 = vst [vmem:[#allocation14_spill] sm:$0xff] %v7965_v60  ;;  %v10558_v56 = vmax.f32 %v7965_v60, 0.0 }
 0x3ce   : > { %v1926_v19 = vpack.c.bf16 %v10558_v56, %v10559_v38 }
 0x3d0   : > { %6333 = vmatmul.msk.bf16.gmra.mxu1 %vm1000_vm0, %v1926_v19 }
 0x3d2   : > { %v1984_v44 = vpop.f32.mrf.mxu1 }
 0x3d3   : > { %v1985_v14 = vadd.f32 %v7977_v62, %v1984_v44 }
 0x3d5   : > { %v2064_v9 = vpack.c.bf16 %v1985_v14, %v1985_v14 }
 0x3d7   : > { %v2082_v11 = vunpack.c.l.b16 %v2064_v9 }
 0x3da   : > { %v1986_v51 = vpop.f32.mrf.mxu1 }
 0x3db   : > { %v1987_v43 = vadd.f32 %v7977_v62, %v1986_v51 }
 0x3dd   : > { %v2065_v33 = vpack.c.bf16 %v1987_v43, %v1987_v43 }
 0x3df   : > { %v2083_v13 = vunpack.c.l.b16 %v2065_v33  ;;  %v1639_v20 = vpop.xlane.xlu2 %1638 }
 0x3e0   : > { %v1669_v32 = vmul.f32 %v1639_v20, %v7455_v61 }
 0x3e1   : > { %v7982_v15 = vpack.c.b16 %v2083_v13, %v2082_v11 }
 0x3e2   : > { %v1685_v25 = vadd.f32 1e-05, %v1669_v32 }
 0x3e3   : > { %2085 = vrot.lane.b32.xlu0 %v7982_v15, %s10548_s11 }
 0x3e4   : > { %6754 = vrsqrt.f32 %v1685_v25  ;;  %vm1779_vm15 = vweird.f32 %v1685_v25 }
 0x3e7   : > { %v1561_v23 = vpop.xlane.xlu1 %1560  ;;  %v1642_v34 = vpop.xlane.xlu0 %1641 }
 0x3e8   : > { %v1579_v37 = vmul.f32 %v1561_v23, %v7455_v61  ;;  %v1670_v17 = vmul.f32 %v1642_v34, %v7455_v61 }
 0x3ea   : > { %v6755_v30 = vpop.eup %6754  ;;  %v7989_v45 = vsub.f32 %v7889_v6, %v1579_v37  ;;  %v1686_v52 = vadd.f32 1e-05, %v1670_v17 }
 0x3eb   : > { %v1774_v7 = vmul.f32 %v6755_v30, %v1685_v25  ;;  %vm1780_vm14 = vweird.f32 %v6755_v30 }
 0x3ec   : > { %6756 = vrsqrt.f32 %v1686_v52  ;;  %v1611_v27 = vmul.f32 %v7989_v45, %v7989_v45  ;;  %vm1781_vm1 = vmor %vm1779_vm15, %vm1780_vm14  ;;  %vm1789_vm3 = vweird.f32 %v1686_v52 }
 0x3ed   : > { %v1775_v2 = vmul.f32 %v6755_v30, %v1774_v7 }
 0x3ee   : > { %v1655_v50 = vsel %vm1000_vm0, %v1611_v27, 0.0 }
 0x3ef   : > { %v1776_v16 = vmul.f32 0.5, %v1775_v2  ;;  %v1564_v48 = vpop.xlane.xlu2 %1563  ;;  %1656 = vadd.xlane.f32.xlu1 %v1655_v50  ;;  %v1645_v63 = vpop.xlane.xlu0 %1644 }
 0x3f0   : > { %v1580_v53 = vmul.f32 %v1564_v48, %v7455_v61  ;;  %v1671_v41 = vmul.f32 %v1645_v63, %v7455_v61 }
 0x3f1   : > { %v1777_v36 = vsub.f32 1.5, %v1776_v16 }
 0x3f2   : > { %v6757_v6 = vpop.eup %6756  ;;  %v7997_v31 = vsub.f32 %v7909_v24, %v1580_v53  ;;  %v1687_v57 = vadd.f32 1e-05, %v1671_v41 }
 0x3f3   : > { %v1778_v10 = vmul.f32 %v6755_v30, %v1777_v36  ;;  %v1784_v40 = vmul.f32 %v6757_v6, %v1686_v52  ;;  %v1989_v58 = vpop.f32.mrf.mxu1  ;;  %vm1790_vm2 = vweird.f32 %v6757_v6 }
 0x3f4   : > { %6758 = vrsqrt.f32 %v1687_v57  ;;  %v1612_v1 = vmul.f32 %v7997_v31, %v7997_v31  ;;  %v1990_v20 = vadd.f32 %v7977_v62, %v1989_v58  ;;  %vm1791_vm4 = vmor %vm1789_vm3, %vm1790_vm2  ;;  %vm1799_vm6 = vweird.f32 %v1687_v57 }
 0x3f5   : > { %v1782_v19 = vsel %vm1781_vm1, %v6755_v30, %v1778_v10  ;;  %v1785_v44 = vmul.f32 %v6757_v6, %v1784_v40  ;;  %vm2087_vm2 = vcmask 64512  }
 0x3f6   : > { %v1658_v14 = vsel %vm1000_vm0, %v1612_v1, 0.0  ;;  %v1861_v9 = vmul.f32 %v1782_v19, %v7870_v0  ;;  %v2066_v27 = vpack.c.bf16 %v1990_v20, %v1990_v20 }
 0x3f7   : > { %v1786_v51 = vmul.f32 0.5, %v1785_v44  ;;  %1659 = vadd.xlane.f32.xlu2 %v1658_v14 }
 0x3f8   : > { %v1880_v34 = vmul.f32 %v7843_v46, %v1861_v9  ;;  %v2110_v53 = vunpack.c.l.b16 %v2066_v27 }
 0x3f9   : > { %v1787_v24 = vsub.f32 1.5, %v1786_v51 }
 0x3fa   : > { %v6759_v43 = vpop.eup %6758  ;;  %v1648_v33 = vpop.xlane.xlu1 %1647  ;;  %v8010_v50 = vadd.f32 %v7849_v22, %v1880_v34 }
 0x3fb   : > { %v1788_v11 = vmul.f32 %v6757_v6, %v1787_v24  ;;  %v1794_v13 = vmul.f32 %v6759_v43, %v1687_v57  ;;  %v1672_v32 = vmul.f32 %v1648_v33, %v7455_v61  ;;  %v1991_v25 = vpop.f32.mrf.mxu1  ;;  %vm1800_vm5 = vweird.f32 %v6759_v43 }
 0x3fc   : > { %v1992_v23 = vadd.f32 %v7977_v62, %v1991_v25  ;;  %10626 = vst [vmem:[#allocation15_spill] sm:$0xff] %v8010_v50  ;;  %v10557_v36 = vmax.f32 %v8010_v50, 0.0  ;;  %vm1801_vm7 = vmor %vm1799_vm6, %vm1800_vm5 }
 0x3fd   : > { %v1792_v37 = vsel %vm1791_vm4, %v6757_v6, %v1788_v11  ;;  %v1795_v17 = vmul.f32 %v6759_v43, %v1794_v13  ;;  %v1688_v0 = vadd.f32 1e-05, %v1672_v32 }
 0x3fe   : > { %v2067_v30 = vpack.c.bf16 %v1992_v23, %v1992_v23  ;;  %v1862_v7 = vmul.f32 %v1792_v37, %v7883_v5 }
 0x3ff   : > { %v1796_v52 = vmul.f32 0.5, %v1795_v17  ;;  %6760 = vrsqrt.f32 %v1688_v0  ;;  %vm1809_vm9 = vweird.f32 %v1688_v0 }
 0x400   : > { %v1881_v2 = vmul.f32 %v7843_v46, %v1862_v7  ;;  %v2111_v48 = vunpack.c.l.b16 %v2067_v30 }
 0x401   : > { %v1797_v16 = vsub.f32 1.5, %v1796_v52 }
 0x402   : > { %v8013_v63 = vadd.f32 %v7849_v22, %v1881_v2  ;;  %v8017_v40 = vpack.c.b16 %v2111_v48, %v2110_v53 }
 0x403   : > { %v1798_v41 = vmul.f32 %v6759_v43, %v1797_v16 }
 0x404   : > { %10627 = vst [vmem:[#allocation16_spill] sm:$0xff] %v8013_v63  ;;  %v10556_v5 = vmax.f32 %v8013_v63, 0.0 }
 0x405   : > { %v6761_v6 = vpop.eup %6760  ;;  %v1802_v1 = vsel %vm1801_vm7, %v6759_v43, %v1798_v41 }
 0x406   : > { %v1804_v10 = vmul.f32 %v6761_v6, %v1688_v0  ;;  %v1927_v58 = vpack.c.bf16 %v10556_v5, %v10557_v36  ;;  %v1863_v14 = vmul.f32 %v1802_v1, %v7905_v42  ;;  %vm1810_vm8 = vweird.f32 %v6761_v6 }
 0x407   : > { %vm1811_vm10 = vmor %vm1809_vm9, %vm1810_vm8 }
 0x408   : > { %v1805_v19 = vmul.f32 %v6761_v6, %v1804_v10  ;;  %2113 = vrot.lane.b32.xlu1 %v8017_v40, %s10548_s11  ;;  %6334 = vmatmul.msk.bf16.gmra.mxu1 %vm1000_vm0, %v1927_v58  ;;  %v1882_v9 = vmul.f32 %v7843_v46, %v1863_v14 }
 0x40a   : > { %v1806_v44 = vmul.f32 0.5, %v1805_v19  ;;  %v8031_v11 = vadd.f32 %v7849_v22, %v1882_v9 }
 0x40c   : > { %v1807_v57 = vsub.f32 1.5, %v1806_v44  ;;  %10628 = vst [vmem:[#allocation17_spill] sm:$0xff] %v8031_v11  ;;  %v10555_v42 = vmax.f32 %v8031_v11, 0.0 }
 0x40e   : > { %v1808_v51 = vmul.f32 %v6761_v6, %v1807_v57 }
 0x410   : > { %v1812_v24 = vsel %vm1811_vm10, %v6761_v6, %v1808_v51  ;;  %vm2329_vm10 = vcmask 130048  }
 0x411   : > { %v1864_v33 = vmul.f32 %v1812_v24, %v7919_v39 }
 0x413   : > { %v1883_v43 = vmul.f32 %v7843_v46, %v1864_v33 }
 0x415   : > { %v8034_v13 = vadd.f32 %v7849_v22, %v1883_v43 }
 0x417   : > { %10629 = vst [vmem:[#allocation18_spill] sm:$0xff] %v8034_v13  ;;  %v10554_v20 = vmax.f32 %v8034_v13, 0.0 }
 0x419   : > { %v1928_v32 = vpack.c.bf16 %v10554_v20, %v10555_v42 }
 0x41b   : > { %6335 = vmatmul.msk.bf16.gmra.mxu1 %vm1000_vm0, %v1928_v32 }
 0x41d   : > { %v1994_v39 = vpop.f32.mrf.mxu1 }
 0x41e   : > { %v1995_v34 = vadd.f32 %v7977_v62, %v1994_v39 }
 0x41f   : > { %v1651_v25 = vpop.xlane.xlu2 %1650 }
 0x420   : > { %v1673_v23 = vmul.f32 %v1651_v25, %v7455_v61  ;;  %v2068_v0 = vpack.c.bf16 %v1995_v34, %v1995_v34 }
 0x422   : > { %v1689_v37 = vadd.f32 1e-05, %v1673_v23  ;;  %v2137_v16 = vunpack.c.l.b16 %v2068_v0 }
 0x424   : > { %6762 = vrsqrt.f32 %v1689_v37  ;;  %vm1819_vm12 = vweird.f32 %v1689_v37 }
 0x425   : > { %v1996_v17 = vpop.f32.mrf.mxu1 }
 0x426   : > { %v1997_v30 = vadd.f32 %v7977_v62, %v1996_v17 }
 0x427   : > { %v1654_v7 = vpop.xlane.xlu0 %1653 }
 0x428   : > { %v2069_v52 = vpack.c.bf16 %v1997_v30, %v1997_v30  ;;  %v1674_v27 = vmul.f32 %v1654_v7, %v7455_v61 }
 0x42a   : > { %v6763_v2 = vpop.eup %6762  ;;  %v2138_v48 = vunpack.c.l.b16 %v2069_v52  ;;  %v1690_v53 = vadd.f32 1e-05, %v1674_v27 }
 0x42b   : > { %v1814_v41 = vmul.f32 %v6763_v2, %v1689_v37  ;;  %vm1820_vm11 = vweird.f32 %v6763_v2 }
 0x42c   : > { %v8047_v6 = vpack.c.b16 %v2138_v48, %v2137_v16  ;;  %6764 = vrsqrt.f32 %v1690_v53  ;;  %vm1821_vm13 = vmor %vm1819_vm12, %vm1820_vm11  ;;  %vm1829_vm15 = vweird.f32 %v1690_v53 }
 0x42d   : > { %v1815_v10 = vmul.f32 %v6763_v2, %v1814_v41 }
 0x42e   : > { %2140 = vrot.lane.b32.xlu0 %v8047_v6, %s10548_s11 }
 0x42f   : > { %v1816_v58 = vmul.f32 0.5, %v1815_v10 }
 0x431   : > { %v1817_v1 = vsub.f32 1.5, %v1816_v58 }
 0x432   : > { %v6765_v19 = vpop.eup %6764 }
 0x433   : > { %v1818_v44 = vmul.f32 %v6763_v2, %v1817_v1  ;;  %v1824_v14 = vmul.f32 %v6765_v19, %v1690_v53  ;;  %vm1830_vm14 = vweird.f32 %v6765_v19 }
 0x434   : > { %vm1831_vm1 = vmor %vm1829_vm15, %vm1830_vm14 }
 0x435   : > { %v1822_v57 = vsel %vm1821_vm13, %v6763_v2, %v1818_v44  ;;  %v1825_v51 = vmul.f32 %v6765_v19, %v1824_v14 }
 0x436   : > { %v1865_v24 = vmul.f32 %v1822_v57, %v7944_v55 }
 0x437   : > { %v1826_v9 = vmul.f32 0.5, %v1825_v51 }
 0x438   : > { %v1884_v32 = vmul.f32 %v7843_v46, %v1865_v24 }
 0x439   : > { %v1827_v33 = vsub.f32 1.5, %v1826_v9 }
 0x43a   : > { %v8056_v34 = vadd.f32 %v7849_v22, %v1884_v32 }
 0x43b   : > { %v1828_v43 = vmul.f32 %v6765_v19, %v1827_v33 }
 0x43c   : > { %10630 = vst [vmem:[#allocation19_spill] sm:$0xff] %v8056_v34  ;;  %v10553_v55 = vmax.f32 %v8056_v34, 0.0  ;;  %v879_v34 = vld [vmem:[%s8155_s29 + $0x7] sm:$0x1] }
 0x43d   : > { %v1832_v39 = vsel %vm1831_vm1, %v6765_v19, %v1828_v43 }
 0x43e   : > { %v1866_v25 = vmul.f32 %v1832_v39, %v7951_v21 }
 0x440   : > { %v1885_v23 = vmul.f32 %v7843_v46, %v1866_v25 }
 0x442   : > { %v8059_v37 = vadd.f32 %v7849_v22, %v1885_v23 }
 0x444   : > { %10631 = vst [vmem:[#allocation20_spill] sm:$0xff] %v8059_v37  ;;  %v10552_v17 = vmax.f32 %v8059_v37, 0.0 }
 0x446   : > { %v1929_v0 = vpack.c.bf16 %v10552_v17, %v10553_v55 }
 0x448   : > { %6336 = vmatmul.msk.bf16.gmra.mxu1 %vm1000_vm0, %v1929_v0 }
 0x44d   : > { %v1999_v21 = vpop.f32.mrf.mxu1 }
 0x44e   : > { %v2000_v30 = vadd.f32 %v7977_v62, %v1999_v21 }
 0x450   : > { %v2070_v27 = vpack.c.bf16 %v2000_v30, %v2000_v30 }
 0x452   : > { %v2164_v53 = vunpack.c.l.b16 %v2070_v27 }
 0x455   : > { %v2001_v7 = vpop.f32.mrf.mxu1  ;;  %v2086_v52 = vpop.permute.xlu0 %2085 }
 0x456   : > { %v2002_v2 = vadd.f32 %v7977_v62, %v2001_v7  ;;  %v2092_v16 = vsel %vm2087_vm2, %v2086_v52, 0 }
 0x457   : > { %2101 = vmatpush.bf16.xpose.msra.mxu3 %v2092_v16 }
 0x458   : > { %v2071_v48 = vpack.c.bf16 %v2002_v2, %v2002_v2 }
 0x45a   : > { %v2165_v41 = vunpack.c.l.b16 %v2071_v48 }
 0x45c   : > { %v8071_v10 = vpack.c.b16 %v2165_v41, %v2164_v53 }
 0x45e   : > { %2167 = vrot.lane.b32.xlu2 %v8071_v10, %s10548_s11  ;;  %6338 = vmatmul.msk.bf16.vlgmr.msra.gmra.mxu3 %vm2087_vm2, %v7982_v15 }
 0x462   : > { %v1657_v58 = vpop.xlane.xlu1 %1656 }
 0x463   : > { %v1675_v1 = vmul.f32 %v1657_v58, %v7455_v61 }
 0x465   : > { %v1691_v19 = vadd.f32 1e-05, %v1675_v1 }
 0x467   : > { %6766 = vrsqrt.f32 %v1691_v19  ;;  %vm1839_vm4 = vweird.f32 %v1691_v19 }
 0x46a   : > { %v1660_v44 = vpop.xlane.xlu2 %1659 }
 0x46b   : > { %v1676_v14 = vmul.f32 %v1660_v44, %v7455_v61 }
 0x46d   : > { %v6767_v57 = vpop.eup %6766  ;;  %v1692_v51 = vadd.f32 1e-05, %v1676_v14 }
 0x46e   : > { %v1834_v9 = vmul.f32 %v6767_v57, %v1691_v19  ;;  %vm1840_vm3 = vweird.f32 %v6767_v57 }
 0x46f   : > { %6768 = vrsqrt.f32 %v1692_v51  ;;  %vm1841_vm5 = vmor %vm1839_vm4, %vm1840_vm3  ;;  %vm1849_vm7 = vweird.f32 %v1692_v51  ;;  %vm2031_vm3 = vcmp.gt.f32.partialorder %v879_v34, 0.0  ;;  %vm4794_vm4 = vcmask 195584  }
 0x470   : > { %v1835_v24 = vmul.f32 %v6767_v57, %v1834_v9 }
 0x472   : > { %v1836_v33 = vmul.f32 0.5, %v1835_v24 }
 0x474   : > { %v1837_v43 = vsub.f32 1.5, %v1836_v33 }
 0x475   : > { %v6769_v32 = vpop.eup %6768 }
 0x476   : > { %v1838_v39 = vmul.f32 %v6767_v57, %v1837_v43  ;;  %v1844_v25 = vmul.f32 %v6769_v32, %v1692_v51  ;;  %vm1850_vm6 = vweird.f32 %v6769_v32 }
 0x477   : > { %vm1851_vm8 = vmor %vm1849_vm7, %vm1850_vm6 }
 0x478   : > { %v1842_v23 = vsel %vm1841_vm5, %v6767_v57, %v1838_v39  ;;  %v1845_v0 = vmul.f32 %v6769_v32, %v1844_v25 }
 0x479   : > { %v1867_v52 = vmul.f32 %v1842_v23, %v7989_v45 }
 0x47a   : > { %v1846_v21 = vmul.f32 0.5, %v1845_v0  ;;  %v2114_v30 = vpop.permute.xlu1 %2113 }
 0x47b   : > { %v2119_v7 = vsel %vm2087_vm2, %v2114_v30, 0  ;;  %v1886_v16 = vmul.f32 %v7843_v46, %v1867_v52 }
 0x47c   : > { %v1847_v27 = vsub.f32 1.5, %v1846_v21  ;;  %2128 = vmatpush.bf16.xpose.msrb.mxu3 %v2119_v7 }
 0x47d   : > { %v8087_v58 = vadd.f32 %v7849_v22, %v1886_v16 }
 0x47e   : > { %v1848_v2 = vmul.f32 %v6769_v32, %v1847_v27 }
 0x47f   : > { %10632 = vst [vmem:[#allocation21_spill] sm:$0xff] %v8087_v58  ;;  %v10551_v19 = vmax.f32 %v8087_v58, 0.0 }
 0x480   : > { %v1852_v48 = vsel %vm1851_vm8, %v6769_v32, %v1848_v2 }
 0x481   : > { %v1868_v53 = vmul.f32 %v1852_v48, %v7997_v31 }
 0x483   : > { %6339 = vmatmul.msk.bf16.vlgmr.msrb.gmra.mxu3 %vm2087_vm2, %v8017_v40  ;;  %v1887_v41 = vmul.f32 %v7843_v46, %v1868_v53 }
 0x485   : > { %v2004_v45 = vpop.f32.mrf.mxu1  ;;  %v8090_v1 = vadd.f32 %v7849_v22, %v1887_v41 }
 0x486   : > { %v2005_v14 = vadd.f32 %v7977_v62, %v2004_v45 }
 0x487   : > { %10633 = vst [vmem:[#allocation22_spill] sm:$0xff] %v8090_v1  ;;  %v10550_v44 = vmax.f32 %v8090_v1, 0.0 }
 0x488   : > { %v2072_v57 = vpack.c.bf16 %v2005_v14, %v2005_v14 }
 0x489   : > { %v1930_v31 = vpack.c.bf16 %v10550_v44, %v10551_v19 }
 0x48a   : > { %v2191_v22 = vunpack.c.l.b16 %v2072_v57 }
 0x48b   : > { %6337 = vmatmul.msk.bf16.gmra.mxu1 %vm1000_vm0, %v1930_v31 }
 0x48d   : > { %v2006_v46 = vpop.f32.mrf.mxu1 }
 0x48e   : > { %v2007_v51 = vadd.f32 %v7977_v62, %v2006_v46 }
 0x490   : > { %v2073_v9 = vpack.c.bf16 %v2007_v51, %v2007_v51 }
 0x492   : > { %v2192_v24 = vunpack.c.l.b16 %v2073_v9 }
 0x494   : > { %v8101_v33 = vpack.c.b16 %v2192_v24, %v2191_v22  ;;  %v873_v22 = vld [vmem:[%s8155_s29 + $0x1] sm:$0x1] }
 0x495   : > { %vm2025_vm9 = vcmp.gt.f32.partialorder %v873_v22, 0.0 }
 0x496   : > { %2194 = vrot.lane.b32.xlu0 %v8101_v33, %s10548_s11 }
 0x498   : > { %v2009_v43 = vpop.f32.mrf.mxu1 }
 0x499   : > { %v2010_v32 = vadd.f32 %v7977_v62, %v2009_v43  ;;  %v10567_v43 = vmov -1e+30  }
 0x49b   : > { %v2074_v23 = vpack.c.bf16 %v2010_v32, %v2010_v32  ;;  %v2033_v32 = vsel %vm2025_vm9, 0.0, %v10567_v43 }
 0x49d   : > { %v2218_v7 = vunpack.c.l.b16 %v2074_v23 }
 0x49e   : > { %2527 = vrot.lane.b32.xlu0 %v7982_v15, %s7173_s2 }
 0x4a0   : > { %v2011_v39 = vpop.f32.mrf.mxu1  ;;  %v2141_v25 = vpop.permute.xlu0 %2140 }
 0x4a1   : > { %v2012_v0 = vadd.f32 %v7977_v62, %v2011_v39  ;;  %v2146_v21 = vsel %vm2087_vm2, %v2141_v25, 0  ;;  %v8161_v39 = vperm.slane %v2033_v32, 0 }
 0x4a2   : > { %2155 = vmatpush.bf16.xpose.msra.mxu2 %v2146_v21 }
 0x4a3   : > { %v2075_v30 = vpack.c.bf16 %v2012_v0, %v2012_v0 }
 0x4a5   : > { %v2219_v52 = vunpack.c.l.b16 %v2075_v30 }
 0x4a7   : > { %v8110_v27 = vpack.c.b16 %v2219_v52, %v2218_v7 }
 0x4a9   : > { %2652 = vrot.lane.b32.xlu0 %v8110_v27, %s7173_s2  ;;  %2221 = vrot.lane.b32.xlu1 %v8110_v27, %s10548_s11 }
 0x4aa   : > { %6340 = vmatmul.msk.bf16.vlgmr.msra.gmra.mxu2 %vm2087_vm2, %v8047_v6 }
 0x4b1   : > { %2724 = vrot.lane.b32.xlu0 %v7982_v15, %s7174_s3 }
 0x4b8   : > { %v2168_v2 = vpop.permute.xlu2 %2167 }
 0x4b9   : > { %v2173_v16 = vsel %vm2087_vm2, %v2168_v2, 0  ;;  %2722 = vrot.lane.b32.xlu0 %v7982_v15, %s10546_s0 }
 0x4ba   : > { %2182 = vmatpush.bf16.xpose.msra.mxu3 %v2173_v16 }
 0x4c1   : > { %2748 = vrot.lane.b32.xlu0 %v8017_v40, %s7174_s3  ;;  %6341 = vmatmul.msk.bf16.vlgmr.msra.gmra.mxu3 %vm2087_vm2, %v8071_v10 }
 0x4c5   : > { %v2014_v48 = vpop.f32.mrf.mxu1 }
 0x4c6   : > { %v2015_v53 = vadd.f32 %v7977_v62, %v2014_v48 }
 0x4c8   : > { %v2076_v45 = vpack.c.bf16 %v2015_v53, %v2015_v53 }
 0x4c9   : > { %2746 = vrot.lane.b32.xlu0 %v8017_v40, %s10546_s0  ;;  %s7179_s0 = smov 80  }
 0x4ca   : > { %v2245_v46 = vunpack.c.l.b16 %v2076_v45 }
 0x4cd   : > { %v2016_v41 = vpop.f32.mrf.mxu1 }
 0x4ce   : > { %v2017_v31 = vadd.f32 %v7977_v62, %v2016_v41 }
 0x4d0   : > { %v2077_v14 = vpack.c.bf16 %v2017_v31, %v2017_v31 }
 0x4d1   : > { %2796 = vrot.lane.b32.xlu0 %v8071_v10, %s7174_s3 }
 0x4d2   : > { %v2246_v57 = vunpack.c.l.b16 %v2077_v14 }
 0x4d4   : > { %v8133_v51 = vpack.c.b16 %v2246_v57, %v2245_v46 }
 0x4d6   : > { %2248 = vrot.lane.b32.xlu1 %v8133_v51, %s10548_s11  ;;  %s10636_s11 = smov 120  }
 0x4d9   : > { %2868 = vrot.lane.b32.xlu0 %v8133_v51, %s7174_s3 }
 0x4de   : > { %2602 = vrot.lane.b32.xlu1 %v8071_v10, %s7173_s2 }
 0x4e1   : > { %2844 = vrot.lane.b32.xlu0 %v8110_v27, %s7174_s3  ;;  %v2103_v9 = vpop.f32.mrf.mxu3 }
 0x4e6   : > { %2627 = vrot.lane.b32.xlu1 %v8101_v33, %s7173_s2 }
 0x4e9   : > { %v8158_v24 = vpop.f32.mrf.mxu3 }
 0x4ea   : > { %v2298_v20 = vmul.f32 0.35355338, %v8158_v24 }
 0x4ee   : > { %2820 = vrot.lane.b32.xlu1 %v8101_v33, %s7174_s3 }
 0x506   : > { %v2130_v25 = vpop.f32.mrf.mxu3 }
 0x507   : > { %v2299_v23 = vmul.f32 0.35355338, %v2130_v25 }
 0x508   : > { %v2019_v0 = vpop.f32.mrf.mxu1  ;;  %v2195_v21 = vpop.permute.xlu0 %2194 }
 0x509   : > { %v2200_v30 = vsel %vm2087_vm2, %v2195_v21, 0  ;;  %v8165_v7 = vadd.f32 %v2299_v23, %v8161_v39  ;;  %v2020_v2 = vadd.f32 %v7977_v62, %v2019_v0  ;;  %v874_v0 = vld [vmem:[%s8155_s29 + $0x2] sm:$0x1]  ;;  %v872_v21 = vld [vmem:[%s8155_s29] sm:$0x1] }
 0x50a   : > { %2209 = vmatpush.bf16.xpose.msrb.mxu2 %v2200_v30  ;;  %vm2026_vm11 = vcmp.gt.f32.partialorder %v874_v0, 0.0  ;;  %vm2024_vm12 = vcmp.gt.f32.partialorder %v872_v21, 0.0 }
 0x50b   : > { %v2336_v52 = vsel %vm2329_vm10, %v8165_v7, -inf  ;;  %v2078_v48 = vpack.c.bf16 %v2020_v2, %v2020_v2 }
 0x50c   : > { %2337 = vmax.xlane.f32.xlu0 %v2336_v52  ;;  %v2034_v52 = vsel %vm2026_vm11, 0.0, %v10567_v43 }
 0x50d   : > { %v2272_v31 = vunpack.c.l.b16 %v2078_v48  ;;  %v8201_v48 = vperm.slane %v2034_v52, 0 }
 0x50e   : > { %v2132_v21 = vpop.f32.mrf.mxu3 }
 0x510   : > { %v2021_v16 = vpop.f32.mrf.mxu1  ;;  %v2528_v45 = vpop.permute.xlu0 %2527 }
 0x511   : > { %v2022_v53 = vadd.f32 %v7977_v62, %v2021_v16  ;;  %6342 = vmatmul.msk.bf16.vlgmr.msrb.gmra.mxu2 %vm2087_vm2, %v8101_v33 }
 0x513   : > { %v2079_v41 = vpack.c.bf16 %v2022_v53, %v2022_v53  ;;  %v2032_v53 = vsel %vm2024_vm12, 0.0, %v10567_v43 }
 0x515   : > { %v2273_v14 = vunpack.c.l.b16 %v2079_v41 }
 0x517   : > { %v8173_v46 = vpack.c.b16 %v2273_v14, %v2272_v31  ;;  %v2297_v31 = vmul.f32 0.35355338, %v2103_v9 }
 0x519   : > { %2275 = vrot.lane.b32.xlu2 %v8173_v46, %s10635_s12  ;;  %2702 = vrot.lane.b32.xlu1 %v8173_v46, %s7173_s2  ;;  %s7181_s12 = smov 72  }
 0x51b   : > { %v2222_v57 = vpop.permute.xlu1 %2221  ;;  %v8179_v22 = vpop.permute.xlu0 %2652 }
 0x51c   : > { %v2227_v62 = vsel %vm2087_vm2, %v2222_v57, 0  ;;  %v8211_v57 = vperm.slane %v2032_v53, 0 }
 0x51d   : > { %2236 = vmatpush.bf16.xpose.msrb.mxu3 %v2227_v62  ;;  %v875_v62 = vld [vmem:[%s8155_s29 + $0x3] sm:$0x1] }
 0x51e   : > { %vm2027_vm13 = vcmp.gt.f32.partialorder %v875_v62, 0.0  ;;  %v8217_v52 = vadd.f32 %v2297_v31, %v8211_v57  ;;  %v8254_v36 = vadd.f32 %v2298_v20, %v8211_v57 }
 0x520   : > { %v2330_v9 = vsel %vm2329_vm10, %v8217_v52, -inf }
 0x521   : > { %2552 = vrot.lane.b32.xlu2 %v8017_v40, %s7173_s2 }
 0x523   : > { %v8184_v32 = vpop.permute.xlu0 %2724 }
 0x524   : > { %6343 = vmatmul.msk.bf16.vlgmr.msrb.gmra.mxu3 %vm2087_vm2, %v8110_v27 }
 0x529   : > { %2577 = vrot.lane.b32.xlu2 %v8047_v6, %s7173_s2 }
 0x52b   : > { %v8190_v25 = vpop.permute.xlu0 %2722 }
 0x52d   : > { %v8192_v23 = vpop.f32.mrf.mxu2 }
 0x531   : > { %2677 = vrot.lane.b32.xlu2 %v8133_v51, %s7173_s2  ;;  %s7177_s2 = smov 56  }
 0x533   : > { %v8198_v30 = vpop.permute.xlu0 %2748 }
 0x535   : > { %v2159_v2 = vpop.f32.mrf.mxu2 }
 0x536   : > { %v2302_v16 = vmul.f32 0.35355338, %v2159_v2  ;;  %v2035_v2 = vsel %vm2027_vm13, 0.0, %v10567_v43 }
 0x537   : > { %v8226_v53 = vperm.slane %v2035_v2, 0 }
 0x538   : > { %v8205_v41 = vadd.f32 %v2302_v16, %v8201_v48 }
 0x539   : > { %2772 = vrot.lane.b32.xlu2 %v8047_v6, %s7174_s3 }
 0x53a   : > { %v2345_v14 = vsel %vm2329_vm10, %v8205_v41, -inf }
 0x53b   : > { %2346 = vmax.xlane.f32.xlu0 %v2345_v14  ;;  %v8214_v0 = vpop.permute.xlu0 %2746 }
 0x541   : > { %2770 = vrot.lane.b32.xlu2 %v8047_v6, %s10636_s11 }
 0x543   : > { %v8224_v16 = vpop.permute.xlu0 %2796  ;;  %2331 = vmax.xlane.f32.xlu1 %v2330_v9 }
 0x544   : > { %v2184_v14 = vpop.f32.mrf.mxu3 }
 0x545   : > { %v2303_v44 = vmul.f32 0.35355338, %v2184_v14 }
 0x547   : > { %v8229_v62 = vadd.f32 %v2303_v44, %v8226_v53 }
 0x548   : > { %v2249_v31 = vpop.permute.xlu1 %2248 }
 0x549   : > { %v2254_v19 = vsel %vm2087_vm2, %v2249_v31, 0  ;;  %2818 = vrot.lane.b32.xlu2 %v8101_v33, %s10636_s11  ;;  %v2348_v17 = vsel %vm2329_vm10, %v8229_v62, -inf }
 0x54a   : > { %2349 = vmax.xlane.f32.xlu0 %v2348_v17  ;;  %2263 = vmatpush.bf16.xpose.msra.mxu2 %v2254_v19 }
 0x54b   : > { %v8236_v55 = vpop.permute.xlu0 %2868 }
 0x54c   : > { %v2186_v2 = vpop.f32.mrf.mxu3 }
 0x54d   : > { %v2304_v9 = vmul.f32 0.35355338, %v2186_v2 }
 0x54f   : > { %v8239_v14 = vadd.f32 %v2304_v9, %v8226_v53 }
 0x550   : > { %v2603_v44 = vpop.permute.xlu1 %2602 }
 0x551   : > { %2794 = vrot.lane.b32.xlu2 %v8071_v10, %s10636_s11  ;;  %v2351_v31 = vsel %vm2329_vm10, %v8239_v14, -inf  ;;  %6344 = vmatmul.msk.bf16.vlgmr.msra.gmra.mxu2 %vm2087_vm2, %v8133_v51 }
 0x552   : > { %2540 = vmatpush.bf16.msrb.mxu2 %v2528_v45  ;;  %2352 = vmax.xlane.f32.xlu1 %v2351_v31  ;;  %v2300_v31 = vmul.f32 0.35355338, %v2132_v21 }
 0x553   : > { %v2845_v17 = vpop.permute.xlu0 %2844 }
 0x554   : > { %v2850_v19 = vsel %vm2087_vm2, %v2845_v17, 0  ;;  %v2333_v17 = vsel %vm2329_vm10, %v8254_v36, -inf  ;;  %v8261_v24 = vadd.f32 %v2300_v31, %v8161_v39 }
 0x555   : > { %2859 = vmatpush.bf16.xpose.msrb.mxu1 %v2850_v19 }
 0x558   : > { %v8248_v45 = vpop.permute.xlu1 %2627 }
 0x560   : > { %v2821_v2 = vpop.permute.xlu1 %2820 }
 0x561   : > { %v2826_v9 = vsel %vm2087_vm2, %v2821_v2, 0 }
 0x562   : > { %2835 = vmatpush.bf16.xpose.msrb.mxu0 %v2826_v9  ;;  %v876_v9 = vld [vmem:[%s8155_s29 + $0x4] sm:$0x1] }
 0x563   : > { %vm2028_vm14 = vcmp.gt.f32.partialorder %v876_v9, 0.0  ;;  %v877_v9 = vld [vmem:[%s8155_s29 + $0x5] sm:$0x1] }
 0x564   : > { %vm2029_vm15 = vcmp.gt.f32.partialorder %v877_v9, 0.0 }
 0x573   : > { %v2276_v42 = vpop.permute.xlu2 %2275 }
 0x574   : > { %v2281_v5 = vsel %vm2087_vm2, %v2276_v42, 0  ;;  %v2339_v42 = vsel %vm2329_vm10, %v8261_v24, -inf }
 0x575   : > { %2290 = vmatpush.bf16.xpose.msra.mxu3 %v2281_v5  ;;  %v2301_v5 = vmul.f32 0.35355338, %v8192_v23  ;;  %v2036_v23 = vsel %vm2028_vm14, 0.0, %v10567_v43 }
 0x577   : > { %v8267_v21 = vadd.f32 %v2301_v5, %v8201_v48 }
 0x579   : > { %v2342_v2 = vsel %vm2329_vm10, %v8267_v21, -inf }
 0x57a   : > { %2334 = vmax.xlane.f32.xlu2 %v2333_v17  ;;  %v8277_v17 = vperm.slane %v2036_v23, 0 }
 0x57b   : > { %v2553_v19 = vpop.permute.xlu2 %2552 }
 0x57c   : > { %6345 = vmatmul.msk.bf16.vlgmr.msra.gmra.mxu3 %vm2087_vm2, %v8173_v46 }
 0x57d   : > { %2565 = vmatpush.bf16.msrb.mxu3 %v2553_v19 }
 0x581   : > { %2615 = vmatpush.bf16.msra.mxu3 %v2603_v44 }
 0x582   : > { %2340 = vmax.xlane.f32.xlu2 %v2339_v42 }
 0x583   : > { %v2578_v20 = vpop.permute.xlu2 %2577 }
 0x584   : > { %2590 = vmatpush.bf16.msra.mxu2 %v2578_v20 }
 0x58a   : > { %2343 = vmax.xlane.f32.xlu2 %v2342_v2 }
 0x58b   : > { %v8272_v31 = vpop.permute.xlu2 %2677 }
 0x593   : > { %v8275_v44 = vpop.permute.xlu2 %2772 }
 0x594   : > { %v2211_v19 = vpop.f32.mrf.mxu2 }
 0x595   : > { %v2305_v42 = vmul.f32 0.35355338, %v2211_v19 }
 0x597   : > { %v8280_v5 = vadd.f32 %v2305_v42, %v8277_v17  ;;  %v2037_v42 = vsel %vm2029_vm15, 0.0, %v10567_v43 }
 0x599   : > { %v2354_v20 = vsel %vm2329_vm10, %v8280_v5, -inf }
 0x59a   : > { %2355 = vmax.xlane.f32.xlu0 %v2354_v20  ;;  %v8294_v20 = vperm.slane %v2037_v42, 0 }
 0x59b   : > { %v8284_v2 = vpop.permute.xlu2 %2770 }
 0x59c   : > { %v2213_v56 = vpop.f32.mrf.mxu2 }
 0x59d   : > { %v2306_v38 = vmul.f32 0.35355338, %v2213_v56 }
 0x59f   : > { %v8288_v47 = vadd.f32 %v2306_v38, %v8277_v17 }
 0x5a1   : > { %v2357_v23 = vsel %vm2329_vm10, %v8288_v47, -inf }
 0x5a2   : > { %2358 = vmax.xlane.f32.xlu1 %v2357_v23 }
 0x5a3   : > { %v2819_v19 = vpop.permute.xlu2 %2818 }
 0x5a4   : > { %6358 = vmatmul.msk.bf16.vlgmr.msrb.gmra.mxu0 %vm2087_vm2, %v2819_v19  ;;  %v878_v19 = vld [vmem:[%s8155_s29 + $0x6] sm:$0x1] }
 0x5a5   : > { %vm2030_vm1 = vcmp.gt.f32.partialorder %v878_v19, 0.0 }
 0x5a7   : > { %v2238_v59 = vpop.f32.mrf.mxu3 }
 0x5a8   : > { %v2307_v4 = vmul.f32 0.35355338, %v2238_v59  ;;  %v2038_v59 = vsel %vm2030_vm1, 0.0, %v10567_v43 }
 0x5a9   : > { %v8308_v42 = vperm.slane %v2038_v59, 0 }
 0x5aa   : > { %v8297_v56 = vadd.f32 %v2307_v4, %v8294_v20 }
 0x5ab   : > { %v8320_v59 = vpop.permute.xlu2 %2794 }
 0x5ac   : > { %v2360_v38 = vsel %vm2329_vm10, %v8297_v56, -inf }
 0x5ad   : > { %2361 = vmax.xlane.f32.xlu1 %v2360_v38 }
 0x5af   : > { %v2240_v9 = vpop.f32.mrf.mxu3 }
 0x5b0   : > { %v2308_v8 = vmul.f32 0.35355338, %v2240_v9 }
 0x5b2   : > { %v8302_v23 = vadd.f32 %v2308_v8, %v8294_v20 }
 0x5b4   : > { %v2363_v29 = vsel %vm2329_vm10, %v8302_v23, -inf }
 0x5b5   : > { %2364 = vmax.xlane.f32.xlu2 %v2363_v29 }
 0x5d4   : > { %v2265_v4 = vpop.f32.mrf.mxu2 }
 0x5d5   : > { %v2309_v35 = vmul.f32 0.35355338, %v2265_v4  ;;  %v2338_v4 = vpop.xlane.xlu0 %2337 }
 0x5d6   : > { %v2380_v58 = vsub.f32 %v8165_v7, %v2338_v4 }
 0x5d7   : > { %v8311_v1 = vadd.f32 %v2309_v35, %v8308_v42 }
 0x5d9   : > { %v2366_v8 = vsel %vm2329_vm10, %v8311_v1, -inf }
 0x5da   : > { %2367 = vmax.xlane.f32.xlu0 %v2366_v8  ;;  %v2398_v8 = vmul.f32 1.442695, %v2380_v58 }
 0x5dc   : > { %v2267_v38 = vpop.f32.mrf.mxu2 }
 0x5dd   : > { %v2310_v9 = vmul.f32 0.35355338, %v2267_v38 }
 0x5df   : > { %v8316_v29 = vadd.f32 %v2310_v9, %v8308_v42  ;;  %v8327_v9 = vpop.permute.xlu1 %2702 }
 0x5e1   : > { %v2369_v19 = vsel %vm2329_vm10, %v8316_v29, -inf }
 0x5e2   : > { %2370 = vmax.xlane.f32.xlu1 %v2369_v19 }
 0x5ed   : > { %v2335_v43 = vpop.xlane.xlu2 %2334 }
 0x5ee   : > { %v2379_v35 = vsub.f32 %v8254_v36, %v2335_v43  ;;  %v10637_v36 = vmov -1e+30  }
 0x5ef   : > { %v2039_v43 = vsel %vm2031_vm3, 0.0, %v10637_v36 }
 0x5f0   : > { %v2396_v37 = vmul.f32 1.442695, %v2379_v35  ;;  %v2332_v35 = vpop.xlane.xlu1 %2331 }
 0x5f2   : > { %6770 = vpow2.f32 %v2396_v37  ;;  %v8335_v37 = vperm.slane %v2039_v43, 0 }
 0x5f3   : > { %6772 = vpow2.f32 %v2398_v8 }
 0x5f5   : > { %v2341_v13 = vpop.xlane.xlu2 %2340 }
 0x5f6   : > { %v2381_v11 = vsub.f32 %v8261_v24, %v2341_v13 }
 0x5f8   : > { %v8325_v38 = vpop.eup %6770  ;;  %v2400_v58 = vmul.f32 1.442695, %v2381_v11  ;;  %v2347_v11 = vpop.xlane.xlu0 %2346 }
 0x5f9   : > { %v2429_v19 = vsel %vm2329_vm10, %v8325_v38, 0.0  ;;  %v8333_v7 = vpop.eup %6772 }
 0x5fa   : > { %2430 = vadd.xlane.f32.xlu1 %v2429_v19  ;;  %v2432_v63 = vsel %vm2329_vm10, %v8333_v7, 0.0  ;;  %v2378_v19 = vsub.f32 %v8217_v52, %v2332_v35  ;;  %6774 = vpow2.f32 %v2400_v58 }
 0x5fc   : > { %v2394_v24 = vmul.f32 1.442695, %v2378_v19 }
 0x5fe   : > { %6776 = vpow2.f32 %v2394_v24 }
 0x5ff   : > { %v2292_v4 = vpop.f32.mrf.mxu3 }
 0x600   : > { %v2311_v8 = vmul.f32 0.35355338, %v2292_v4  ;;  %v8345_v50 = vpop.eup %6774 }
 0x601   : > { %v2435_v52 = vsel %vm2329_vm10, %v8345_v50, 0.0 }
 0x602   : > { %2433 = vadd.xlane.f32.xlu1 %v2432_v63  ;;  %v8340_v34 = vadd.f32 %v2311_v8, %v8335_v37  ;;  %v2383_v63 = vsub.f32 %v8205_v41, %v2347_v11  ;;  %v2350_v8 = vpop.xlane.xlu0 %2349 }
 0x604   : > { %v2372_v13 = vsel %vm2329_vm10, %v8340_v34, -inf  ;;  %v2404_v35 = vmul.f32 1.442695, %v2383_v63  ;;  %v8355_v19 = vpop.eup %6776  ;;  %v2353_v63 = vpop.xlane.xlu1 %2352 }
 0x605   : > { %2373 = vmax.xlane.f32.xlu2 %v2372_v13  ;;  %v2384_v13 = vsub.f32 %v8229_v62, %v2350_v8 }
 0x606   : > { %6778 = vpow2.f32 %v2404_v35 }
 0x607   : > { %v2294_v36 = vpop.f32.mrf.mxu3  ;;  %v2406_v41 = vmul.f32 1.442695, %v2384_v13  ;;  %v2344_v13 = vpop.xlane.xlu2 %2343 }
 0x608   : > { %v2312_v43 = vmul.f32 0.35355338, %v2294_v36  ;;  %v2426_v36 = vsel %vm2329_vm10, %v8355_v19, 0.0 }
 0x609   : > { %6780 = vpow2.f32 %v2406_v41  ;;  %v2382_v41 = vsub.f32 %v8267_v21, %v2344_v13 }
 0x60a   : > { %v8348_v4 = vadd.f32 %v2312_v43, %v8335_v37 }
 0x60b   : > { %v2402_v60 = vmul.f32 1.442695, %v2382_v41 }
 0x60c   : > { %v2375_v58 = vsel %vm2329_vm10, %v8348_v4, -inf  ;;  %v8360_v24 = vpop.eup %6778 }
 0x60d   : > { %2436 = vadd.xlane.f32.xlu2 %v2435_v52  ;;  %2376 = vmax.xlane.f32.xlu0 %v2375_v58  ;;  %v2441_v11 = vsel %vm2329_vm10, %v8360_v24, 0.0  ;;  %v2385_v52 = vsub.f32 %v8239_v14, %v2353_v63  ;;  %v2356_v35 = vpop.xlane.xlu0 %2355 }
 0x60f   : > { %v8366_v43 = vpop.eup %6780  ;;  %v2408_v58 = vmul.f32 1.442695, %v2385_v52 }
 0x610   : > { %v2444_v62 = vsel %vm2329_vm10, %v8366_v43, 0.0 }
 0x611   : > { %6782 = vpow2.f32 %v2408_v58 }
 0x615   : > { %2427 = vadd.xlane.f32.xlu0 %v2426_v36  ;;  %v2359_v8 = vpop.xlane.xlu1 %2358  ;;  %v2386_v36 = vsub.f32 %v8280_v5, %v2356_v35 }
 0x617   : > { %v8377_v3 = vpop.eup %6782 }
 0x618   : > { %v2447_v63 = vsel %vm2329_vm10, %v8377_v3, 0.0 }
 0x61b   : > { %2842 = vrot.lane.b32.xlu1 %v8110_v27, %s10636_s11 }
 0x61d   : > { %2442 = vadd.xlane.f32.xlu0 %v2441_v11  ;;  %v2410_v11 = vmul.f32 1.442695, %v2386_v36 }
 0x61f   : > { %6784 = vpow2.f32 %v2410_v11 }
 0x620   : > { %v2362_v61 = vpop.xlane.xlu1 %2361  ;;  %6786 = vpow2.f32 %v2402_v60 }
 0x621   : > { %v2388_v14 = vsub.f32 %v8297_v56, %v2362_v61 }
 0x623   : > { %v2414_v52 = vmul.f32 1.442695, %v2388_v14 }
 0x625   : > { %2866 = vrot.lane.b32.xlu2 %v8133_v51, %s10636_s11  ;;  %2445 = vadd.xlane.f32.xlu0 %v2444_v62  ;;  %v2387_v62 = vsub.f32 %v8288_v47, %v2359_v8  ;;  %v8383_v5 = vpop.eup %6784  ;;  %6788 = vpow2.f32 %v2414_v52  ;;  %v2837_v8 = vpop.f32.mrf.mxu0 }
 0x626   : > { %v8385_v35 = vpop.eup %6786  ;;  %v2450_v61 = vsel %vm2329_vm10, %v8383_v5, 0.0  ;;  %v2922_v11 = vmul.f32 0.35355338, %v2837_v8 }
 0x627   : > { %v2412_v58 = vmul.f32 1.442695, %v2387_v62  ;;  %v2438_v47 = vsel %vm2329_vm10, %v8385_v35, 0.0 }
 0x628   : > { %v2365_v21 = vpop.xlane.xlu2 %2364 }
 0x629   : > { %6790 = vpow2.f32 %v2412_v58  ;;  %v2389_v13 = vsub.f32 %v8302_v23, %v2365_v21 }
 0x62b   : > { %v2416_v60 = vmul.f32 1.442695, %v2389_v13  ;;  %v8392_v56 = vpop.eup %6788  ;;  %v8403_v13 = vadd.f32 %v2922_v11, %v8277_v17 }
 0x62c   : > { %v2456_v23 = vsel %vm2329_vm10, %v8392_v56, 0.0 }
 0x62d   : > { %6792 = vpow2.f32 %v2416_v60 }
 0x62f   : > { %v8394_v41 = vpop.eup %6790 }
 0x639   : > { %2892 = vrot.lane.b32.xlu0 %v8173_v46, %s7174_s3  ;;  %s7178_s3 = smov 112  }
 0x645   : > { %2448 = vadd.xlane.f32.xlu1 %v2447_v63  ;;  %v2453_v63 = vsel %vm2329_vm10, %v8394_v41, 0.0 }
 0x64d   : > { %2451 = vadd.xlane.f32.xlu1 %v2450_v61  ;;  %v2368_v36 = vpop.xlane.xlu0 %2367  ;;  %v8405_v61 = vpop.eup %6792 }
 0x64e   : > { %2439 = vadd.xlane.f32.xlu2 %v2438_v47  ;;  %v2390_v14 = vsub.f32 %v8311_v1, %v2368_v36  ;;  %v2970_v1 = vsel %vm2329_vm10, %v8403_v13, -inf  ;;  %v2459_v47 = vsel %vm2329_vm10, %v8405_v61, 0.0 }
 0x650   : > { %v2418_v58 = vmul.f32 1.442695, %v2390_v14 }
 0x655   : > { %v2371_v62 = vpop.xlane.xlu1 %2370  ;;  %2457 = vadd.xlane.f32.xlu1 %v2456_v23 }
 0x656   : > { %v2391_v52 = vsub.f32 %v8316_v29, %v2371_v62  ;;  %2454 = vadd.xlane.f32.xlu2 %v2453_v63 }
 0x658   : > { %v2420_v21 = vmul.f32 1.442695, %v2391_v52  ;;  %v2839_v52 = vpop.f32.mrf.mxu0 }
 0x65a   : > { %6794 = vpow2.f32 %v2420_v21 }
 0x65b   : > { %6796 = vpow2.f32 %v2418_v58 }
 0x65d   : > { %2971 = vmax.xlane.f32.xlu1 %v2970_v1 }
 0x65e   : > { %2460 = vadd.xlane.f32.xlu2 %v2459_v47 }
 0x660   : > { %v8411_v60 = vpop.eup %6794 }
 0x661   : > { %v8413_v29 = vpop.eup %6796  ;;  %v2465_v8 = vsel %vm2329_vm10, %v8411_v60, 0.0 }
 0x662   : > { %v2462_v36 = vsel %vm2329_vm10, %v8413_v29, 0.0 }
 0x665   : > { %2466 = vadd.xlane.f32.xlu1 %v2465_v8 }
 0x666   : > { %2463 = vadd.xlane.f32.xlu2 %v2462_v36  ;;  %v2923_v36 = vmul.f32 0.35355338, %v2839_v52 }
 0x66d   : > { %v2431_v11 = vpop.xlane.xlu1 %2430 }
 0x675   : > { %v2434_v14 = vpop.xlane.xlu1 %2433 }
 0x676   : > { %6798 = vrcp.f32 %v2434_v14 }
 0x678   : > { %v2374_v23 = vpop.xlane.xlu2 %2373 }
 0x679   : > { %v2392_v62 = vsub.f32 %v8340_v34, %v2374_v23 }
 0x67b   : > { %v2422_v63 = vmul.f32 1.442695, %v2392_v62  ;;  %v8429_v62 = vadd.f32 %v2923_v36, %v8277_v17 }
 0x67c   : > { %v6799_v1 = vpop.eup %6798 }
 0x67d   : > { %6800 = vpow2.f32 %v2422_v63  ;;  %v2492_v34 = vmul.f32 %v6799_v1, %v8333_v7  ;;  %v2973_v7 = vsel %vm2329_vm10, %v8429_v62, -inf }
 0x67e   : > { %2890 = vrot.lane.b32.xlu2 %v8173_v46, %s10636_s11  ;;  %s7182_s11 = smov 104  }
 0x67f   : > { %v2508_v63 = vpack.c.bf16 %v2492_v34, %v2492_v34 }
 0x680   : > { %v2437_v58 = vpop.xlane.xlu2 %2436  ;;  %v2377_v21 = vpop.xlane.xlu0 %2376 }
 0x681   : > { %6802 = vrcp.f32 %v2437_v58  ;;  %v2393_v47 = vsub.f32 %v8348_v4, %v2377_v21 }
 0x682   : > { %6804 = vrcp.f32 %v2431_v11 }
 0x683   : > { %v8423_v8 = vpop.eup %6800  ;;  %v2424_v54 = vmul.f32 1.442695, %v2393_v47 }
 0x684   : > { %v2468_v14 = vsel %vm2329_vm10, %v8423_v8, 0.0 }
 0x685   : > { %6806 = vpow2.f32 %v2424_v54  ;;  %2469 = vadd.xlane.f32.xlu0 %v2468_v14  ;;  %v2549_v54 = vunpack.c.l.b16 %v2508_v63 }
 0x687   : > { %v6803_v23 = vpop.eup %6802 }
 0x688   : > { %v2493_v58 = vmul.f32 %v6803_v23, %v8345_v50  ;;  %v2428_v4 = vpop.xlane.xlu0 %2427  ;;  %v6805_v21 = vpop.eup %6804 }
 0x689   : > { %6808 = vrcp.f32 %v2428_v4  ;;  %v2491_v1 = vmul.f32 %v6805_v21, %v8325_v38 }
 0x68a   : > { %v2509_v52 = vpack.c.bf16 %v2493_v58, %v2493_v58 }
 0x68b   : > { %v8432_v11 = vpop.eup %6806  ;;  %v2507_v23 = vpack.c.bf16 %v2491_v1, %v2491_v1  ;;  %v8445_v1 = vpop.permute.xlu2 %2866 }
 0x68c   : > { %v2550_v47 = vunpack.c.l.b16 %v2509_v52  ;;  %v2471_v36 = vsel %vm2329_vm10, %v8432_v11, 0.0 }
 0x68d   : > { %v2843_v14 = vpop.permute.xlu1 %2842  ;;  %2974 = vmax.xlane.f32.xlu0 %v2973_v7  ;;  %2472 = vadd.xlane.f32.xlu1 %v2471_v36  ;;  %v2525_v63 = vunpack.c.l.b16 %v2507_v23 }
 0x68e   : > { %v2551_v50 = vpack.c.b16 %v2550_v47, %v2549_v54  ;;  %6359 = vmatmul.msk.bf16.vlgmr.msrb.gmra.mxu1 %vm2087_vm2, %v2843_v14 }
 0x68f   : > { %v6809_v34 = vpop.eup %6808 }
 0x690   : > { %v2490_v58 = vmul.f32 %v6809_v34, %v8355_v19  ;;  %6347 = vmatmul.msk.bf16.vlgmr.msrb.gmra.mxu3 %vm2329_vm10, %v2551_v50  ;;  %v2443_v52 = vpop.xlane.xlu0 %2442 }
 0x691   : > { %2665 = vmatpush.bf16.msrb.mxu3 %v8179_v22 }
 0x692   : > { %v2506_v38 = vpack.c.bf16 %v2490_v58, %v2490_v58 }
 0x694   : > { %v2524_v4 = vunpack.c.l.b16 %v2506_v38 }
 0x696   : > { %v2526_v21 = vpack.c.b16 %v2525_v63, %v2524_v4 }
 0x698   : > { %6346 = vmatmul.msk.bf16.vlgmr.msrb.gmra.mxu2 %vm2329_vm10, %v2526_v21  ;;  %v2446_v7 = vpop.xlane.xlu0 %2445 }
 0x699   : > { %2640 = vmatpush.bf16.msrb.mxu2 %v8248_v45  ;;  %6810 = vrcp.f32 %v2446_v7 }
 0x69f   : > { %v6811_v47 = vpop.eup %6810 }
 0x6a0   : > { %v2496_v19 = vmul.f32 %v6811_v47, %v8366_v43 }
 0x6a2   : > { %v2512_v36 = vpack.c.bf16 %v2496_v19, %v2496_v19 }
 0x6a4   : > { %v2599_v45 = vunpack.c.l.b16 %v2512_v36 }
 0x6b8   : > { %v2449_v54 = vpop.xlane.xlu1 %2448 }
 0x6b9   : > { %6812 = vrcp.f32 %v2449_v54 }
 0x6ba   : > { %6814 = vrcp.f32 %v2443_v52 }
 0x6bf   : > { %v6813_v22 = vpop.eup %6812 }
 0x6c0   : > { %v2497_v14 = vmul.f32 %v6813_v22, %v8377_v3  ;;  %v2452_v50 = vpop.xlane.xlu1 %2451  ;;  %v6815_v23 = vpop.eup %6814 }
 0x6c1   : > { %v2440_v34 = vpop.xlane.xlu2 %2439  ;;  %v2495_v63 = vmul.f32 %v6815_v23, %v8360_v24 }
 0x6c2   : > { %v2513_v58 = vpack.c.bf16 %v2497_v14, %v2497_v14  ;;  %6816 = vrcp.f32 %v2440_v34 }
 0x6c3   : > { %v2511_v52 = vpack.c.bf16 %v2495_v63, %v2495_v63 }
 0x6c4   : > { %v2600_v38 = vunpack.c.l.b16 %v2513_v58 }
 0x6c5   : > { %v2575_v47 = vunpack.c.l.b16 %v2511_v52 }
 0x6c6   : > { %v2601_v4 = vpack.c.b16 %v2600_v38, %v2599_v45 }
 0x6c8   : > { %v6817_v21 = vpop.eup %6816  ;;  %v2458_v7 = vpop.xlane.xlu1 %2457  ;;  %6349 = vmatmul.msk.bf16.vlgmr.msra.gmra.mxu3 %vm2329_vm10, %v2601_v4 }
 0x6c9   : > { %v2494_v43 = vmul.f32 %v6817_v21, %v8385_v35  ;;  %2715 = vmatpush.bf16.msra.mxu3 %v8327_v9  ;;  %v2455_v3 = vpop.xlane.xlu2 %2454 }
 0x6ca   : > { %6818 = vrcp.f32 %v2455_v3 }
 0x6cb   : > { %6820 = vrcp.f32 %v2452_v50  ;;  %v2510_v54 = vpack.c.bf16 %v2494_v43, %v2494_v43 }
 0x6cc   : > { %6822 = vrcp.f32 %v2458_v7 }
 0x6cd   : > { %v2574_v19 = vunpack.c.l.b16 %v2510_v54 }
 0x6cf   : > { %v2576_v22 = vpack.c.b16 %v2575_v47, %v2574_v19 }
 0x6d0   : > { %v6819_v36 = vpop.eup %6818  ;;  %v8453_v24 = vpop.xlane.xlu1 %2971 }
 0x6d1   : > { %v6821_v14 = vpop.eup %6820  ;;  %v2461_v34 = vpop.xlane.xlu2 %2460  ;;  %6348 = vmatmul.msk.bf16.vlgmr.msra.gmra.mxu2 %vm2329_vm10, %v2576_v22  ;;  %v2499_v9 = vmul.f32 %v6819_v36, %v8394_v41  ;;  %v2778_v22 = vsel %vm2087_vm2, %v8275_v44, 0 }
 0x6d2   : > { %v6823_v23 = vpop.eup %6822  ;;  %6824 = vrcp.f32 %v2461_v34  ;;  %2690 = vmatpush.bf16.msra.mxu2 %v8272_v31  ;;  %v2498_v35 = vmul.f32 %v6821_v14, %v8383_v5 }
 0x6d3   : > { %v2500_v50 = vmul.f32 %v6823_v23, %v8392_v56  ;;  %v2515_v58 = vpack.c.bf16 %v2499_v9, %v2499_v9  ;;  %v2730_v56 = vsel %vm2087_vm2, %v8184_v32, 0  ;;  %v2874_v32 = vsel %vm2087_vm2, %v8236_v55, 0 }
 0x6d4   : > { %v2514_v63 = vpack.c.bf16 %v2498_v35, %v2498_v35 }
 0x6d5   : > { %v2516_v4 = vpack.c.bf16 %v2500_v50, %v2500_v50  ;;  %v2625_v52 = vunpack.c.l.b16 %v2515_v58  ;;  %v2893_v50 = vpop.permute.xlu0 %2892 }
 0x6d6   : > { %v2624_v3 = vunpack.c.l.b16 %v2514_v63 }
 0x6d7   : > { %v2649_v31 = vunpack.c.l.b16 %v2516_v4 }
 0x6d8   : > { %v6825_v45 = vpop.eup %6824  ;;  %v2467_v38 = vpop.xlane.xlu1 %2466  ;;  %v2626_v47 = vpack.c.b16 %v2625_v52, %v2624_v3 }
 0x6d9   : > { %v2501_v21 = vmul.f32 %v6825_v45, %v8405_v61  ;;  %6826 = vrcp.f32 %v2467_v38  ;;  %v2464_v7 = vpop.xlane.xlu2 %2463 }
 0x6da   : > { %6828 = vrcp.f32 %v2464_v7 }
 0x6db   : > { %v2517_v43 = vpack.c.bf16 %v2501_v21, %v2501_v21 }
 0x6dd   : > { %v2650_v54 = vunpack.c.l.b16 %v2517_v43 }
 0x6df   : > { %v6827_v41 = vpop.eup %6826  ;;  %v2651_v5 = vpack.c.b16 %v2650_v54, %v2649_v31 }
 0x6e0   : > { %v6829_v19 = vpop.eup %6828  ;;  %v2503_v61 = vmul.f32 %v6827_v41, %v8411_v60 }
 0x6e1   : > { %6350 = vmatmul.msk.bf16.vlgmr.msrb.gmra.mxu2 %vm2329_vm10, %v2626_v47  ;;  %6351 = vmatmul.msk.bf16.vlgmr.msrb.gmra.mxu3 %vm2329_vm10, %v2651_v5  ;;  %v2502_v36 = vmul.f32 %v6829_v19, %v8413_v29 }
 0x6e2   : > { %2739 = vmatpush.bf16.xpose.msrb.mxu3 %v2730_v56  ;;  %2787 = vmatpush.bf16.xpose.msrb.mxu2 %v2778_v22  ;;  %v2519_v14 = vpack.c.bf16 %v2503_v61, %v2503_v61  ;;  %v2891_v61 = vpop.permute.xlu2 %2890 }
 0x6e3   : > { %v2518_v34 = vpack.c.bf16 %v2502_v36, %v2502_v36 }
 0x6e4   : > { %v2675_v23 = vunpack.c.l.b16 %v2519_v14 }
 0x6e5   : > { %v2674_v9 = vunpack.c.l.b16 %v2518_v34 }
 0x6e7   : > { %v2676_v35 = vpack.c.b16 %v2675_v23, %v2674_v9 }
 0x6f1   : > { %6352 = vmatmul.msk.bf16.vlgmr.msra.gmra.mxu2 %vm2329_vm10, %v2676_v35 }
 0x6f2   : > { %2883 = vmatpush.bf16.xpose.msra.mxu2 %v2874_v32 }
 0x6f8   : > { %v2470_v44 = vpop.xlane.xlu0 %2469 }
 0x6f9   : > { %6830 = vrcp.f32 %v2470_v44 }
 0x6ff   : > { %v6831_v38 = vpop.eup %6830 }
 0x700   : > { %v2473_v58 = vpop.xlane.xlu1 %2472  ;;  %v2975_v45 = vpop.xlane.xlu0 %2974  ;;  %v2504_v63 = vmul.f32 %v6831_v38, %v8423_v8  ;;  %v3002_v8 = vsub.f32 %v8403_v13, %v8453_v24 }
 0x701   : > { %6832 = vrcp.f32 %v2473_v58  ;;  %v3003_v60 = vsub.f32 %v8429_v62, %v2975_v45  ;;  %6356 = vmatmul.msk.bf16.vlgmr.msrb.gmra.mxu2 %vm2087_vm2, %v8284_v2 }
 0x702   : > { %v2520_v55 = vpack.c.bf16 %v2504_v63, %v2504_v63  ;;  %v3026_v5 = vmul.f32 1.442695, %v3002_v8 }
 0x703   : > { %v3028_v29 = vmul.f32 1.442695, %v3003_v60 }
 0x704   : > { %v2699_v3 = vunpack.c.l.b16 %v2520_v55 }
 0x705   : > { %6834 = vpow2.f32 %v3028_v29 }
 0x706   : > { %6836 = vpow2.f32 %v3026_v5 }
 0x707   : > { %v6833_v4 = vpop.eup %6832 }
 0x708   : > { %v2505_v21 = vmul.f32 %v6833_v4, %v8432_v11  ;;  %v2754_v11 = vsel %vm2087_vm2, %v8198_v30, 0  ;;  %v2802_v30 = vsel %vm2087_vm2, %v8224_v16, 0  ;;  %v2898_v16 = vsel %vm2087_vm2, %v2893_v50, 0 }
 0x70a   : > { %v2521_v7 = vpack.c.bf16 %v2505_v21, %v2505_v21 }
 0x70b   : > { %v8477_v52 = vpop.eup %6834  ;;  %v2861_v43 = vpop.f32.mrf.mxu1 }
 0x70c   : > { %v2700_v31 = vunpack.c.l.b16 %v2521_v7  ;;  %v2924_v54 = vmul.f32 0.35355338, %v2861_v43  ;;  %v3069_v62 = vsel %vm2329_vm10, %v8477_v52, 0.0  ;;  %v8492_v24 = vpop.eup %6836 }
 0x70d   : > { %3070 = vadd.xlane.f32.xlu2 %v3069_v62 }
 0x70e   : > { %v2701_v2 = vpack.c.b16 %v2700_v31, %v2699_v3  ;;  %v2940_v41 = vadd.f32 %v2924_v54, %v8294_v20 }
 0x710   : > { %6353 = vmatmul.msk.bf16.vlgmr.msra.gmra.mxu3 %vm2329_vm10, %v2701_v2  ;;  %v2976_v47 = vsel %vm2329_vm10, %v2940_v41, -inf }
 0x711   : > { %2763 = vmatpush.bf16.xpose.msra.mxu3 %v2754_v11  ;;  %2977 = vmax.xlane.f32.xlu1 %v2976_v47 }
 0x712   : > { %6360 = vmatmul.msk.bf16.vlgmr.msra.gmra.mxu2 %vm2087_vm2, %v8445_v1  ;;  %v3066_v1 = vsel %vm2329_vm10, %v8492_v24, 0.0 }
 0x713   : > { %v2863_v19 = vpop.f32.mrf.mxu1  ;;  %v8534_v14 = vpop.f32.mrf.mxu3 }
 0x714   : > { %v2925_v56 = vmul.f32 0.35355338, %v2863_v19  ;;  %10642 = vst [vmem:[#allocation27_spill] sm:$0xff] %v8534_v14 }
 0x716   : > { %v2941_v22 = vadd.f32 %v2925_v56, %v8294_v20 }
 0x718   : > { %v2979_v13 = vsel %vm2329_vm10, %v2941_v22, -inf }
 0x719   : > { %2980 = vmax.xlane.f32.xlu0 %v2979_v13 }
 0x71b   : > { %v8538_v23 = vpop.f32.mrf.mxu3 }
 0x71c   : > { %10644 = vst [vmem:[#allocation29_spill] sm:$0xff] %v8538_v23 }
 0x720   : > { %6354 = vmatmul.msk.bf16.vlgmr.msrb.gmra.mxu3 %vm2087_vm2, %v8190_v25  ;;  %v8519_v25 = vpop.f32.mrf.mxu2 }
 0x721   : > { %2811 = vmatpush.bf16.xpose.msrb.mxu3 %v2802_v30  ;;  %3067 = vadd.xlane.f32.xlu0 %v3066_v1  ;;  %10638 = vst [vmem:[#allocation23_spill] sm:$0xff] %v8519_v25 }
 0x725   : > { %3243 = vrot.lane.b32.xlu2 %v8101_v33, %s7177_s2 }
 0x72a   : > { %3143 = vrot.lane.b32.xlu1 %v7982_v15, %s7177_s2 }
 0x72d   : > { %3218 = vrot.lane.b32.xlu2 %v8071_v10, %s7177_s2 }
 0x730   : > { %6355 = vmatmul.msk.bf16.vlgmr.msra.gmra.mxu3 %vm2087_vm2, %v8214_v0  ;;  %v8523_v0 = vpop.f32.mrf.mxu2 }
 0x731   : > { %2907 = vmatpush.bf16.xpose.msra.mxu3 %v2898_v16  ;;  %10639 = vst [vmem:[#allocation24_spill] sm:$0xff] %v8523_v0 }
 0x732   : > { %3193 = vrot.lane.b32.xlu1 %v8047_v6, %s7177_s2 }
 0x735   : > { %3168 = vrot.lane.b32.xlu0 %v8017_v40, %s7177_s2  ;;  %3268 = vrot.lane.b32.xlu2 %v8110_v27, %s7177_s2 }
 0x73d   : > { %3338 = vrot.lane.b32.xlu2 %v7982_v15, %s7178_s3 }
 0x740   : > { %6357 = vmatmul.msk.bf16.vlgmr.msrb.gmra.mxu3 %vm2087_vm2, %v8320_v59 }
 0x745   : > { %3388 = vrot.lane.b32.xlu2 %v8047_v6, %s7179_s0 }
 0x74b   : > { %v8542_v35 = vpop.f32.mrf.mxu3 }
 0x74c   : > { %10646 = vst [vmem:[#allocation31_spill] sm:$0xff] %v8542_v35 }
 0x74d   : > { %3364 = vrot.lane.b32.xlu2 %v8017_v40, %s7179_s0 }
 0x750   : > { %6361 = vmatmul.msk.bf16.vlgmr.msra.gmra.mxu3 %vm2087_vm2, %v2891_v61 }
 0x753   : > { %v8546_v32 = vpop.f32.mrf.mxu3 }
 0x754   : > { %v8528_v36 = vpop.f32.mrf.mxu2  ;;  %10648 = vst [vmem:[#allocation33_spill] sm:$0xff] %v8546_v32 }
 0x755   : > { %10640 = vst [vmem:[#allocation25_spill] sm:$0xff] %v8528_v36  ;;  %3436 = vrot.lane.b32.xlu2 %v8101_v33, %s7179_s0 }
 0x75c   : > { %v8532_v59 = vpop.f32.mrf.mxu2 }
 0x75d   : > { %10641 = vst [vmem:[#allocation26_spill] sm:$0xff] %v8532_v59 }
 0x764   : > { %v8536_v34 = vpop.f32.mrf.mxu2  ;;  %v8552_v45 = vpop.f32.mrf.mxu3 }
 0x765   : > { %10643 = vst [vmem:[#allocation28_spill] sm:$0xff] %v8536_v34 }
 0x766   : > { %10650 = vst [vmem:[#allocation35_spill] sm:$0xff] %v8552_v45 }
 0x76c   : > { %v8540_v9 = vpop.f32.mrf.mxu2  ;;  %v8559_v43 = vpop.f32.mrf.mxu3 }
 0x76d   : > { %10645 = vst [vmem:[#allocation30_spill] sm:$0xff] %v8540_v9 }
 0x76e   : > { %10651 = vst [vmem:[#allocation36_spill] sm:$0xff] %v8559_v43 }
 0x774   : > { %v8544_v50 = vpop.f32.mrf.mxu2 }
 0x775   : > { %10647 = vst [vmem:[#allocation32_spill] sm:$0xff] %v8544_v50 }
 0x77c   : > { %v8548_v44 = vpop.f32.mrf.mxu2 }
 0x77d   : > { %10649 = vst [vmem:[#allocation34_spill] sm:$0xff] %v8548_v44 }
 0x780   : > { %v8550_v58 = vpop.xlane.xlu2 %3070 }
 0x784   : > { %v2978_v38 = vpop.xlane.xlu1 %2977  ;;  %v2789_v60 = vpop.f32.mrf.mxu2 }
 0x785   : > { %v3004_v29 = vsub.f32 %v2940_v41, %v2978_v38  ;;  %v2918_v63 = vmul.f32 0.35355338, %v2789_v60 }
 0x787   : > { %v3030_v4 = vmul.f32 1.442695, %v3004_v29  ;;  %v8555_v55 = vadd.f32 %v2918_v63, %v8201_v48 }
 0x788   : > { %v3244_v21 = vpop.permute.xlu2 %3243 }
 0x789   : > { %6838 = vpow2.f32 %v3030_v4  ;;  %v2958_v7 = vsel %vm2329_vm10, %v8555_v55, -inf }
 0x78a   : > { %2959 = vmax.xlane.f32.xlu2 %v2958_v7 }
 0x78c   : > { %v2791_v3 = vpop.f32.mrf.mxu2  ;;  %v2981_v31 = vpop.xlane.xlu0 %2980 }
 0x78d   : > { %v3005_v54 = vsub.f32 %v2941_v22, %v2981_v31 }
 0x78f   : > { %v8561_v62 = vpop.eup %6838  ;;  %v3032_v2 = vmul.f32 1.442695, %v3005_v54 }
 0x790   : > { %v3219_v41 = vpop.permute.xlu2 %3218  ;;  %v3072_v8 = vsel %vm2329_vm10, %v8561_v62, 0.0 }
 0x791   : > { %6840 = vpow2.f32 %v3032_v2  ;;  %3073 = vadd.xlane.f32.xlu1 %v3072_v8  ;;  %3231 = vmatpush.bf16.msrb.mxu3 %v3219_v41 }
 0x793   : > { %v8565_v11 = vpop.f32.mrf.mxu3 }
 0x794   : > { %10652 = vst [vmem:[#allocation37_spill] sm:$0xff] %v8565_v11  ;;  %v8573_v1 = vpop.xlane.xlu0 %3067 }
 0x795   : > { %v2885_v47 = vpop.f32.mrf.mxu2 }
 0x797   : > { %v8567_v5 = vpop.eup %6840 }
 0x798   : > { %v3075_v19 = vsel %vm2329_vm10, %v8567_v5, 0.0  ;;  %v3269_v63 = vpop.permute.xlu2 %3268 }
 0x799   : > { %3076 = vadd.xlane.f32.xlu0 %v3075_v19 }
 0x79b   : > { %v8571_v56 = vpop.f32.mrf.mxu3 }
 0x79c   : > { %10653 = vst [vmem:[#allocation38_spill] sm:$0xff] %v8571_v56  ;;  %v3144_v22 = vpop.permute.xlu1 %3143 }
 0x79d   : > { %v2887_v13 = vpop.f32.mrf.mxu2  ;;  %3156 = vmatpush.bf16.msra.mxu0 %v3144_v22 }
 0x79e   : > { %v2927_v30 = vmul.f32 0.35355338, %v2887_v13  ;;  %v2919_v13 = vmul.f32 0.35355338, %v2791_v3 }
 0x7a0   : > { %v8576_v16 = vadd.f32 %v2927_v30, %v8308_v42 }
 0x7a1   : > { %3256 = vmatpush.bf16.msrb.mxu0 %v3244_v21 }
 0x7a2   : > { %v2985_v61 = vsel %vm2329_vm10, %v8576_v16, -inf }
 0x7a3   : > { %2986 = vmax.xlane.f32.xlu2 %v2985_v61  ;;  %v2741_v38 = vpop.f32.mrf.mxu3  ;;  %v2926_v61 = vmul.f32 0.35355338, %v2885_v47  ;;  %v8607_v47 = vpop.permute.xlu2 %3338 }
 0x7a4   : > { %v3194_v60 = vpop.permute.xlu1 %3193 }
 0x7a5   : > { %3206 = vmatpush.bf16.msrb.mxu2 %v3194_v60  ;;  %v8595_v60 = vadd.f32 %v2919_v13, %v8201_v48 }
 0x7a7   : > { %v3169_v29 = vpop.permute.xlu0 %3168 }
 0x7a8   : > { %3181 = vmatpush.bf16.msra.mxu1 %v3169_v29  ;;  %v8598_v29 = vadd.f32 %v2926_v61, %v8308_v42 }
 0x7aa   : > { %3340 = vrot.lane.b32.xlu1 %v7982_v15, %s7179_s0  ;;  %v2982_v3 = vsel %vm2329_vm10, %v8598_v29, -inf }
 0x7ab   : > { %v2743_v4 = vpop.f32.mrf.mxu3 }
 0x7ac   : > { %3281 = vmatpush.bf16.msrb.mxu1 %v3269_v63  ;;  %v2914_v63 = vmul.f32 0.35355338, %v2741_v38 }
 0x7ad   : > { %3293 = vrot.lane.b32.xlu0 %v8133_v51, %s7177_s2 }
 0x7b3   : > { %v2765_v21 = vpop.f32.mrf.mxu3 }
 0x7bb   : > { %v2767_v7 = vpop.f32.mrf.mxu3 }
 0x7bc   : > { %v2917_v31 = vmul.f32 0.35355338, %v2767_v7 }
 0x7be   : > { %v8585_v54 = vadd.f32 %v2917_v31, %v8161_v39  ;;  %v2961_v31 = vsel %vm2329_vm10, %v8595_v60, -inf }
 0x7c0   : > { %v2955_v2 = vsel %vm2329_vm10, %v8585_v54, -inf }
 0x7c1   : > { %2956 = vmax.xlane.f32.xlu2 %v2955_v2 }
 0x7c3   : > { %v2813_v41 = vpop.f32.mrf.mxu3 }
 0x7c4   : > { %v2920_v8 = vmul.f32 0.35355338, %v2813_v41  ;;  %v2915_v41 = vmul.f32 0.35355338, %v2743_v4 }
 0x7c6   : > { %v8590_v19 = vadd.f32 %v2920_v8, %v8226_v53  ;;  %v8615_v13 = vadd.f32 %v2915_v41, %v8211_v57 }
 0x7c8   : > { %v2964_v22 = vsel %vm2329_vm10, %v8590_v19, -inf }
 0x7c9   : > { %2965 = vmax.xlane.f32.xlu2 %v2964_v22  ;;  %v8610_v22 = vadd.f32 %v2914_v63, %v8211_v57 }
 0x7cb   : > { %v2815_v30 = vpop.f32.mrf.mxu3  ;;  %v2946_v61 = vsel %vm2329_vm10, %v8610_v22, -inf }
 0x7cc   : > { %v2921_v4 = vmul.f32 0.35355338, %v2815_v30 }
 0x7ce   : > { %v8622_v63 = vadd.f32 %v2921_v4, %v8226_v53 }
 0x7d0   : > { %v2967_v30 = vsel %vm2329_vm10, %v8622_v63, -inf }
 0x7d3   : > { %v2909_v7 = vpop.f32.mrf.mxu3 }
 0x7d4   : > { %v2928_v2 = vmul.f32 0.35355338, %v2909_v7  ;;  %2962 = vmax.xlane.f32.xlu1 %v2961_v31  ;;  %v2916_v7 = vmul.f32 0.35355338, %v2765_v21  ;;  %v2949_v31 = vsel %vm2329_vm10, %v8615_v13, -inf }
 0x7d6   : > { %v8603_v8 = vadd.f32 %v2928_v2, %v8335_v37 }
 0x7d7   : > { %2983 = vmax.xlane.f32.xlu0 %v2982_v3  ;;  %v8624_v3 = vpop.permute.xlu2 %3388 }
 0x7d8   : > { %v2988_v38 = vsel %vm2329_vm10, %v8603_v8, -inf }
 0x7d9   : > { %2989 = vmax.xlane.f32.xlu2 %v2988_v38  ;;  %v8627_v38 = vadd.f32 %v2916_v7, %v8161_v39 }
 0x7db   : > { %v2911_v2 = vpop.f32.mrf.mxu3  ;;  %v2952_v21 = vsel %vm2329_vm10, %v8627_v38, -inf }
 0x7dc   : > { %2947 = vmax.xlane.f32.xlu1 %v2946_v61  ;;  %v2929_v41 = vmul.f32 0.35355338, %v2911_v2 }
 0x7de   : > { %v8634_v61 = vadd.f32 %v2929_v41, %v8335_v37 }
 0x7df   : > { %2950 = vmax.xlane.f32.xlu0 %v2949_v31  ;;  %v8636_v4 = vpop.permute.xlu2 %3364 }
 0x7e0   : > { %v2991_v31 = vsel %vm2329_vm10, %v8634_v61, -inf }
 0x7e4   : > { %2968 = vmax.xlane.f32.xlu1 %v2967_v30 }
 0x7e7   : > { %2953 = vmax.xlane.f32.xlu0 %v2952_v21  ;;  %v8640_v7 = vpop.permute.xlu2 %3436 }
 0x7ec   : > { %2992 = vmax.xlane.f32.xlu1 %v2991_v31 }
 0x7fd   : > { %v2960_v2 = vpop.xlane.xlu2 %2959 }
 0x7fe   : > { %v2998_v11 = vsub.f32 %v8555_v55, %v2960_v2 }
 0x800   : > { %v3018_v56 = vmul.f32 1.442695, %v2998_v11 }
 0x802   : > { %6842 = vpow2.f32 %v3018_v56 }
 0x804   : > { %v8656_v2 = vpop.xlane.xlu1 %3073 }
 0x805   : > { %3362 = vrot.lane.b32.xlu1 %v8017_v40, %s7178_s3 }
 0x808   : > { %v8645_v30 = vpop.eup %6842 }
 0x809   : > { %v3054_v41 = vsel %vm2329_vm10, %v8645_v30, 0.0 }
 0x80a   : > { %3055 = vadd.xlane.f32.xlu0 %v3054_v41 }
 0x80c   : > { %v8649_v21 = vpop.xlane.xlu0 %3076 }
 0x816   : > { %v2987_v28 = vpop.xlane.xlu2 %2986 }
 0x817   : > { %v3007_v31 = vsub.f32 %v8576_v16, %v2987_v28 }
 0x819   : > { %v3036_v18 = vmul.f32 1.442695, %v3007_v31 }
 0x81b   : > { %6844 = vpow2.f32 %v3036_v18 }
 0x81c   : > { %v8659_v26 = vpop.permute.xlu1 %3340 }
 0x81f   : > { %v3294_v49 = vpop.permute.xlu0 %3293 }
 0x820   : > { %3306 = vmatpush.bf16.msra.mxu2 %v3294_v49 }
 0x821   : > { %v8652_v55 = vpop.eup %6844 }
 0x822   : > { %v3081_v11 = vsel %vm2329_vm10, %v8652_v55, 0.0 }
 0x82f   : > { %3082 = vadd.xlane.f32.xlu1 %v3081_v11 }
 0x834   : > { %v2957_v56 = vpop.xlane.xlu2 %2956 }
 0x83c   : > { %v2966_v12 = vpop.xlane.xlu2 %2965 }
 0x83d   : > { %v3000_v41 = vsub.f32 %v8590_v19, %v2966_v12 }
 0x83f   : > { %v3022_v50 = vmul.f32 1.442695, %v3000_v41 }
 0x841   : > { %6846 = vpow2.f32 %v3022_v50 }
 0x847   : > { %v8661_v28 = vpop.eup %6846  ;;  %v2963_v49 = vpop.xlane.xlu1 %2962 }
 0x848   : > { %v2999_v18 = vsub.f32 %v8595_v60, %v2963_v49  ;;  %v3060_v16 = vsel %vm2329_vm10, %v8661_v28, 0.0 }
 0x849   : > { %3061 = vadd.xlane.f32.xlu1 %v3060_v16 }
 0x84a   : > { %v3020_v31 = vmul.f32 1.442695, %v2999_v18  ;;  %v2984_v11 = vpop.xlane.xlu0 %2983 }
 0x84b   : > { %v3006_v44 = vsub.f32 %v8598_v29, %v2984_v11 }
 0x84c   : > { %6848 = vpow2.f32 %v3020_v31 }
 0x84d   : > { %v3034_v45 = vmul.f32 1.442695, %v3006_v44 }
 0x84f   : > { %v2948_v12 = vpop.xlane.xlu1 %2947  ;;  %6850 = vpow2.f32 %v3034_v45 }
 0x850   : > { %v2994_v19 = vsub.f32 %v8610_v22, %v2948_v12 }
 0x852   : > { %v8668_v41 = vpop.eup %6848  ;;  %v3010_v50 = vmul.f32 1.442695, %v2994_v19  ;;  %v2951_v43 = vpop.xlane.xlu0 %2950 }
 0x853   : > { %v2995_v60 = vsub.f32 %v8615_v13, %v2951_v43  ;;  %v3057_v49 = vsel %vm2329_vm10, %v8668_v41, 0.0 }
 0x854   : > { %6852 = vpow2.f32 %v3010_v50  ;;  %3058 = vadd.xlane.f32.xlu2 %v3057_v49 }
 0x855   : > { %v3012_v18 = vmul.f32 1.442695, %v2995_v60  ;;  %v8673_v16 = vpop.eup %6850 }
 0x856   : > { %v3078_v45 = vsel %vm2329_vm10, %v8673_v16, 0.0 }
 0x857   : > { %6854 = vpow2.f32 %v3012_v18  ;;  %v2969_v13 = vpop.xlane.xlu1 %2968 }
 0x85a   : > { %v8675_v29 = vpop.eup %6852  ;;  %v2954_v19 = vpop.xlane.xlu0 %2953 }
 0x85b   : > { %v3042_v44 = vsel %vm2329_vm10, %v8675_v29, 0.0  ;;  %v2996_v60 = vsub.f32 %v8627_v38, %v2954_v19 }
 0x85c   : > { %3043 = vadd.xlane.f32.xlu0 %v3042_v44  ;;  %3079 = vadd.xlane.f32.xlu2 %v3078_v45  ;;  %v2997_v44 = vsub.f32 %v8585_v54, %v2957_v56  ;;  %v2990_v54 = vpop.xlane.xlu2 %2989 }
 0x85d   : > { %v8681_v43 = vpop.eup %6854  ;;  %v3014_v18 = vmul.f32 1.442695, %v2996_v60 }
 0x85e   : > { %v3045_v22 = vsel %vm2329_vm10, %v8681_v43, 0.0 }
 0x85f   : > { %v2993_v31 = vpop.xlane.xlu1 %2992 }
 0x860   : > { %v3009_v11 = vsub.f32 %v8634_v61, %v2993_v31  ;;  %v3016_v61 = vmul.f32 1.442695, %v2997_v44 }
 0x862   : > { %3410 = vrot.lane.b32.xlu1 %v8071_v10, %s7178_s3  ;;  %v3040_v12 = vmul.f32 1.442695, %v3009_v11  ;;  %v3001_v11 = vsub.f32 %v8622_v63, %v2969_v13 }
 0x864   : > { %3046 = vadd.xlane.f32.xlu2 %v3045_v22  ;;  %6856 = vpow2.f32 %v3040_v12 }
 0x865   : > { %6858 = vpow2.f32 %v3014_v18 }
 0x866   : > { %6860 = vpow2.f32 %v3016_v61  ;;  %v3008_v61 = vsub.f32 %v8603_v8, %v2990_v54 }
 0x86a   : > { %v8692_v50 = vpop.eup %6856 }
 0x86b   : > { %v3087_v49 = vsel %vm2329_vm10, %v8692_v50, 0.0  ;;  %v8698_v45 = vpop.eup %6858 }
 0x86c   : > { %v3048_v22 = vsel %vm2329_vm10, %v8698_v45, 0.0  ;;  %v8702_v31 = vpop.eup %6860 }
 0x86d   : > { %v3051_v38 = vsel %vm2329_vm10, %v8702_v31, 0.0 }
 0x870   : > { %3386 = vrot.lane.b32.xlu0 %v8047_v6, %s7178_s3 }
 0x877   : > { %v8719_v12 = vpop.permute.xlu1 %3362 }
 0x87c   : > { %3318 = vrot.lane.b32.xlu2 %v8173_v46, %s7177_s2  ;;  %s7183_s2 = smov 40  }
 0x87d   : > { %v3056_v56 = vpop.xlane.xlu0 %3055 }
 0x87e   : > { %6862 = vrcp.f32 %v3056_v56 }
 0x884   : > { %v6863_v60 = vpop.eup %6862 }
 0x885   : > { %v3110_v18 = vmul.f32 %v6863_v60, %v8645_v30 }
 0x88c   : > { %3088 = vadd.xlane.f32.xlu1 %v3087_v49  ;;  %v3024_v49 = vmul.f32 1.442695, %v3001_v11 }
 0x89a   : > { %3049 = vadd.xlane.f32.xlu0 %v3048_v22 }
 0x8a2   : > { %v3083_v22 = vpop.xlane.xlu1 %3082 }
 0x8a5   : > { %3508 = vrot.lane.b32.xlu1 %v8173_v46, %s7179_s0  ;;  %3052 = vadd.xlane.f32.xlu2 %v3051_v38  ;;  %v3126_v38 = vpack.c.bf16 %v3110_v18, %v3110_v18 }
 0x8a7   : > { %v3190_v11 = vunpack.c.l.b16 %v3126_v38 }
 0x8ad   : > { %3859 = vrot.lane.b32.xlu1 %v8101_v33, %s7180_s10 }
 0x8ae   : > { %3484 = vrot.lane.b32.xlu0 %v8133_v51, %s7179_s0 }
 0x8b5   : > { %3884 = vrot.lane.b32.xlu1 %v8110_v27, %s7180_s10 }
 0x8bd   : > { %3434 = vrot.lane.b32.xlu2 %v8101_v33, %s7178_s3 }
 0x8c5   : > { %3412 = vrot.lane.b32.xlu2 %v8071_v10, %s7179_s0 }
 0x8c7   : > { %v3059_v19 = vpop.xlane.xlu2 %3058 }
 0x8c8   : > { %6864 = vrcp.f32 %v3059_v19  ;;  %v3038_v19 = vmul.f32 1.442695, %v3008_v61 }
 0x8c9   : > { %6866 = vpow2.f32 %v3024_v49 }
 0x8cd   : > { %3460 = vrot.lane.b32.xlu2 %v8110_v27, %s7179_s0  ;;  %s7185_s0 = smov 8  }
 0x8ce   : > { %v6865_v44 = vpop.eup %6864 }
 0x8cf   : > { %v3111_v56 = vmul.f32 %v6865_v44, %v8668_v41  ;;  %v3080_v63 = vpop.xlane.xlu2 %3079  ;;  %v3044_v13 = vpop.xlane.xlu0 %3043  ;;  %v3394_v41 = vsel %vm2087_vm2, %v8624_v3, 0 }
 0x8d0   : > { %6868 = vrcp.f32 %v3080_v63  ;;  %v8726_v60 = vpop.eup %6866 }
 0x8d1   : > { %6870 = vrcp.f32 %v3083_v22  ;;  %v3127_v34 = vpack.c.bf16 %v3111_v56, %v3111_v56  ;;  %v3063_v18 = vsel %vm2329_vm10, %v8726_v60, 0.0 }
 0x8d2   : > { %6872 = vrcp.f32 %v3044_v13 }
 0x8d3   : > { %v3191_v30 = vunpack.c.l.b16 %v3127_v34  ;;  %6874 = vpow2.f32 %v3038_v19 }
 0x8d5   : > { %v3192_v9 = vpack.c.b16 %v3191_v30, %v3190_v11  ;;  %3458 = vrot.lane.b32.xlu2 %v8110_v27, %s7178_s3 }
 0x8d6   : > { %v6869_v8 = vpop.eup %6868 }
 0x8d7   : > { %v6871_v54 = vpop.eup %6870  ;;  %v3047_v49 = vpop.xlane.xlu2 %3046  ;;  %6364 = vmatmul.msk.bf16.vlgmr.msrb.gmra.mxu2 %vm2329_vm10, %v3192_v9  ;;  %v3118_v34 = vmul.f32 %v6869_v8, %v8673_v16 }
 0x8d8   : > { %v6873_v44 = vpop.eup %6872  ;;  %6876 = vrcp.f32 %v3047_v49  ;;  %3403 = vmatpush.bf16.xpose.msrb.mxu2 %v3394_v41  ;;  %3064 = vadd.xlane.f32.xlu0 %v3063_v18  ;;  %v3119_v61 = vmul.f32 %v6871_v54, %v8652_v55  ;;  %v3346_v49 = vsel %vm2087_vm2, %v8659_v26, 0 }
 0x8d9   : > { %v3106_v22 = vmul.f32 %v6873_v44, %v8675_v29  ;;  %v8738_v38 = vpop.eup %6874  ;;  %v3134_v56 = vpack.c.bf16 %v3118_v34, %v3118_v34  ;;  %6878 = vrcp.f32 %v8573_v1 }
 0x8da   : > { %v3135_v3 = vpack.c.bf16 %v3119_v61, %v3119_v61  ;;  %v3084_v11 = vsel %vm2329_vm10, %v8738_v38, 0.0  ;;  %6880 = vrcp.f32 %v8550_v58 }
 0x8db   : > { %v3122_v63 = vpack.c.bf16 %v3106_v22, %v3106_v22  ;;  %v3290_v55 = vunpack.c.l.b16 %v3134_v56 }
 0x8dc   : > { %v3291_v29 = vunpack.c.l.b16 %v3135_v3 }
 0x8dd   : > { %3759 = vrot.lane.b32.xlu2 %v7982_v15, %s7180_s10  ;;  %v3140_v30 = vunpack.c.l.b16 %v3122_v63 }
 0x8de   : > { %v6877_v9 = vpop.eup %6876  ;;  %v3292_v54 = vpack.c.b16 %v3291_v29, %v3290_v55 }
 0x8df   : > { %v3107_v13 = vmul.f32 %v6877_v9, %v8681_v43  ;;  %v3319_v19 = vpop.permute.xlu2 %3318  ;;  %v6879_v43 = vpop.eup %6878  ;;  %v3442_v9 = vsel %vm2087_vm2, %v8640_v7, 0 }
 0x8e0   : > { %3331 = vmatpush.bf16.msra.mxu3 %v3319_v19  ;;  %3085 = vadd.xlane.f32.xlu0 %v3084_v11  ;;  %v6881_v1 = vpop.eup %6880  ;;  %v3114_v58 = vmul.f32 %v6879_v43, %v8492_v24 }
 0x8e1   : > { %v3123_v16 = vpack.c.bf16 %v3107_v13, %v3107_v13  ;;  %v3115_v18 = vmul.f32 %v6881_v1, %v8477_v52  ;;  %v3062_v13 = vpop.xlane.xlu1 %3061 }
 0x8e2   : > { %v3130_v44 = vpack.c.bf16 %v3114_v58, %v3114_v58  ;;  %v3387_v56 = vpop.permute.xlu0 %3386 }
 0x8e3   : > { %v3141_v8 = vunpack.c.l.b16 %v3123_v16  ;;  %v3131_v34 = vpack.c.bf16 %v3115_v18, %v3115_v18 }
 0x8e4   : > { %v3240_v61 = vunpack.c.l.b16 %v3130_v44 }
 0x8e5   : > { %v3142_v41 = vpack.c.b16 %v3141_v8, %v3140_v30  ;;  %3784 = vrot.lane.b32.xlu2 %v8017_v40, %s7180_s10  ;;  %v3241_v22 = vunpack.c.l.b16 %v3131_v34 }
 0x8e7   : > { %6362 = vmatmul.msk.bf16.vlgmr.msra.gmra.mxu0 %vm2329_vm10, %v3142_v41  ;;  %6368 = vmatmul.msk.bf16.vlgmr.msra.gmra.mxu2 %vm2329_vm10, %v3292_v54  ;;  %v3242_v26 = vpack.c.b16 %v3241_v22, %v3240_v61 }
 0x8e8   : > { %3355 = vmatpush.bf16.xpose.msra.mxu0 %v3346_v49 }
 0x8e9   : > { %v8775_v41 = vpop.permute.xlu1 %3410 }
 0x8ed   : > { %3956 = vrot.lane.b32.xlu2 %v7982_v15, %s7181_s12 }
 0x8f4   : > { %3482 = vrot.lane.b32.xlu0 %v8133_v51, %s7178_s3 }
 0x8f7   : > { %6366 = vmatmul.msk.bf16.vlgmr.msrb.gmra.mxu0 %vm2329_vm10, %v3242_v26  ;;  %6372 = vmatmul.msk.bf16.vlgmr.msrb.gmra.mxu2 %vm2087_vm2, %v3387_v56 }
 0x8f8   : > { %3451 = vmatpush.bf16.xpose.msrb.mxu0 %v3442_v9 }
 0x8fc   : > { %3506 = vrot.lane.b32.xlu0 %v8173_v46, %s7178_s3  ;;  %s7184_s3 = smov 16  }
 0x904   : > { %3809 = vrot.lane.b32.xlu0 %v8047_v6, %s7180_s10 }
 0x907   : > { %6370 = vmatmul.msk.bf16.vlgmr.msra.gmra.mxu0 %vm2087_vm2, %v8607_v47 }
 0x90d   : > { %v3050_v52 = vpop.xlane.xlu0 %3049 }
 0x90e   : > { %6882 = vrcp.f32 %v3050_v52 }
 0x914   : > { %v6883_v3 = vpop.eup %6882 }
 0x915   : > { %v3108_v7 = vmul.f32 %v6883_v3, %v8698_v45 }
 0x917   : > { %v3124_v19 = vpack.c.bf16 %v3108_v7, %v3108_v7 }
 0x918   : > { %v3053_v24 = vpop.xlane.xlu2 %3052 }
 0x919   : > { %6884 = vrcp.f32 %v3053_v24  ;;  %v3165_v30 = vunpack.c.l.b16 %v3124_v19 }
 0x91a   : > { %6886 = vrcp.f32 %v8649_v21 }
 0x91b   : > { %6888 = vrcp.f32 %v8656_v2  ;;  %v3089_v2 = vpop.xlane.xlu1 %3088 }
 0x91c   : > { %6890 = vrcp.f32 %v3062_v13 }
 0x91f   : > { %v6885_v63 = vpop.eup %6884 }
 0x920   : > { %v3109_v11 = vmul.f32 %v6885_v63, %v8702_v31  ;;  %v3435_v55 = vpop.permute.xlu2 %3434  ;;  %v3485_v16 = vpop.permute.xlu0 %3484  ;;  %v3370_v31 = vsel %vm2087_vm2, %v8636_v4, 0 }
 0x921   : > { %v3490_v29 = vsel %vm2087_vm2, %v3485_v16, 0  ;;  %6374 = vmatmul.msk.bf16.vlgmr.msrb.gmra.mxu0 %vm2087_vm2, %v3435_v55  ;;  %v6887_v54 = vpop.eup %6886 }
 0x922   : > { %v3125_v47 = vpack.c.bf16 %v3109_v11, %v3109_v11  ;;  %3499 = vmatpush.bf16.xpose.msra.mxu2 %v3490_v29  ;;  %v6889_v21 = vpop.eup %6888  ;;  %v3117_v49 = vmul.f32 %v6887_v54, %v8567_v5 }
 0x923   : > { %v3116_v1 = vmul.f32 %v6889_v21, %v8561_v62  ;;  %v3509_v26 = vpop.permute.xlu1 %3508  ;;  %v6891_v24 = vpop.eup %6890 }
 0x924   : > { %v3166_v8 = vunpack.c.l.b16 %v3125_v47  ;;  %v3133_v58 = vpack.c.bf16 %v3117_v49, %v3117_v49  ;;  %v3112_v3 = vmul.f32 %v6891_v24, %v8661_v28 }
 0x925   : > { %v3132_v18 = vpack.c.bf16 %v3116_v1, %v3116_v1 }
 0x926   : > { %v3167_v45 = vpack.c.b16 %v3166_v8, %v3165_v30  ;;  %v3266_v34 = vunpack.c.l.b16 %v3133_v58  ;;  %v3128_v63 = vpack.c.bf16 %v3112_v3, %v3112_v3 }
 0x927   : > { %v3265_v61 = vunpack.c.l.b16 %v3132_v18 }
 0x928   : > { %v3413_v43 = vpop.permute.xlu2 %3412  ;;  %6363 = vmatmul.msk.bf16.vlgmr.msra.gmra.mxu1 %vm2329_vm10, %v3167_v45  ;;  %v3215_v16 = vunpack.c.l.b16 %v3128_v63 }
 0x929   : > { %3379 = vmatpush.bf16.xpose.msra.mxu1 %v3370_v31  ;;  %v3267_v22 = vpack.c.b16 %v3266_v34, %v3265_v61  ;;  %v3418_v28 = vsel %vm2087_vm2, %v3413_v43, 0 }
 0x92b   : > { %v3860_v52 = vpop.permute.xlu1 %3859 }
 0x930   : > { %v3461_v44 = vpop.permute.xlu2 %3460 }
 0x931   : > { %v3466_v56 = vsel %vm2087_vm2, %v3461_v44, 0  ;;  %v3514_v44 = vsel %vm2087_vm2, %v3509_v26, 0 }
 0x933   : > { %v3885_v29 = vpop.permute.xlu1 %3884 }
 0x938   : > { %v3459_v4 = vpop.permute.xlu2 %3458  ;;  %6367 = vmatmul.msk.bf16.vlgmr.msrb.gmra.mxu1 %vm2329_vm10, %v3267_v22 }
 0x939   : > { %3475 = vmatpush.bf16.xpose.msrb.mxu1 %v3466_v56 }
 0x940   : > { %v3760_v9 = vpop.permute.xlu2 %3759 }
 0x941   : > { %3772 = vmatpush.bf16.msra.mxu0 %v3760_v9 }
 0x945   : > { %3872 = vmatpush.bf16.msrb.mxu0 %v3860_v52 }
 0x948   : > { %v3785_v62 = vpop.permute.xlu2 %3784  ;;  %6371 = vmatmul.msk.bf16.vlgmr.msra.gmra.mxu1 %vm2087_vm2, %v8719_v12 }
 0x949   : > { %3797 = vmatpush.bf16.msra.mxu1 %v3785_v62 }
 0x94b   : > { %v3065_v5 = vpop.xlane.xlu0 %3064 }
 0x94c   : > { %6892 = vrcp.f32 %v3065_v5 }
 0x952   : > { %v6893_v7 = vpop.eup %6892 }
 0x953   : > { %v3113_v19 = vmul.f32 %v6893_v7, %v8726_v60  ;;  %v3086_v11 = vpop.xlane.xlu0 %3085 }
 0x954   : > { %6894 = vrcp.f32 %v3086_v11 }
 0x955   : > { %v3129_v55 = vpack.c.bf16 %v3113_v19, %v3113_v19  ;;  %6896 = vrcp.f32 %v3089_v2 }
 0x957   : > { %v3216_v13 = vunpack.c.l.b16 %v3129_v55 }
 0x958   : > { %6375 = vmatmul.msk.bf16.vlgmr.msrb.gmra.mxu1 %vm2087_vm2, %v3459_v4 }
 0x959   : > { %v3217_v12 = vpack.c.b16 %v3216_v13, %v3215_v16  ;;  %3897 = vmatpush.bf16.msrb.mxu1 %v3885_v29 }
 0x95a   : > { %v6895_v47 = vpop.eup %6894  ;;  %v8789_v30 = vpop.f32.mrf.mxu2 }
 0x95b   : > { %6365 = vmatmul.msk.bf16.vlgmr.msrb.gmra.mxu3 %vm2329_vm10, %v3217_v12  ;;  %v6897_v8 = vpop.eup %6896  ;;  %v3120_v60 = vmul.f32 %v6895_v47, %v8738_v38 }
 0x95c   : > { %3427 = vmatpush.bf16.xpose.msrb.mxu3 %v3418_v28  ;;  %v3121_v45 = vmul.f32 %v6897_v8, %v8692_v50 }
 0x95d   : > { %v3136_v54 = vpack.c.bf16 %v3120_v60, %v3120_v60 }
 0x95e   : > { %v3137_v21 = vpack.c.bf16 %v3121_v45, %v3121_v45 }
 0x95f   : > { %v3315_v1 = vunpack.c.l.b16 %v3136_v54 }
 0x960   : > { %v3316_v2 = vunpack.c.l.b16 %v3137_v21 }
 0x962   : > { %v8795_v31 = vpop.f32.mrf.mxu2  ;;  %v3317_v43 = vpack.c.b16 %v3316_v2, %v3315_v1 }
 0x964   : > { %v8797_v49 = vpop.f32.mrf.mxu0 }
 0x966   : > { %v3483_v58 = vpop.permute.xlu0 %3482 }
 0x967   : > { %6376 = vmatmul.msk.bf16.vlgmr.msra.gmra.mxu2 %vm2087_vm2, %v3483_v58 }
 0x96a   : > { %v8800_v18 = vpop.f32.mrf.mxu2 }
 0x96b   : > { %10654 = vst [vmem:[#allocation39_spill] sm:$0xff] %v8800_v18  ;;  %6369 = vmatmul.msk.bf16.vlgmr.msra.gmra.mxu3 %vm2329_vm10, %v3317_v43 }
 0x96c   : > { %3523 = vmatpush.bf16.xpose.msra.mxu3 %v3514_v44  ;;  %v8804_v50 = vpop.f32.mrf.mxu0 }
 0x96e   : > { %v3507_v38 = vpop.permute.xlu0 %3506 }
 0x972   : > { %v8806_v34 = vpop.f32.mrf.mxu2 }
 0x973   : > { %10655 = vst [vmem:[#allocation40_spill] sm:$0xff] %v8806_v34 }
 0x974   : > { %v8808_v61 = vpop.f32.mrf.mxu0 }
 0x976   : > { %v3810_v22 = vpop.permute.xlu0 %3809 }
 0x977   : > { %3822 = vmatpush.bf16.msrb.mxu2 %v3810_v22 }
 0x97a   : > { %v3405_v56 = vpop.f32.mrf.mxu2 }
 0x97b   : > { %v3534_v4 = vmul.f32 0.35355338, %v3405_v56  ;;  %6373 = vmatmul.msk.bf16.vlgmr.msrb.gmra.mxu3 %vm2087_vm2, %v8775_v41 }
 0x97c   : > { %v8812_v9 = vpop.f32.mrf.mxu0 }
 0x97d   : > { %v8815_v26 = vadd.f32 %v3534_v4, %v8201_v48 }
 0x97f   : > { %v3574_v52 = vsel %vm2329_vm10, %v8815_v26, -inf }
 0x980   : > { %3575 = vmax.xlane.f32.xlu2 %v3574_v52 }
 0x982   : > { %v3407_v62 = vpop.f32.mrf.mxu2 }
 0x983   : > { %v3535_v5 = vmul.f32 0.35355338, %v3407_v62 }
 0x984   : > { %v3357_v24 = vpop.f32.mrf.mxu0 }
 0x985   : > { %v3530_v3 = vmul.f32 0.35355338, %v3357_v24  ;;  %v8820_v7 = vadd.f32 %v3535_v5, %v8201_v48 }
 0x987   : > { %v8823_v63 = vadd.f32 %v3530_v3, %v8211_v57  ;;  %v3577_v41 = vsel %vm2329_vm10, %v8820_v7, -inf }
 0x988   : > { %3578 = vmax.xlane.f32.xlu1 %v3577_v41 }
 0x989   : > { %v3562_v19 = vsel %vm2329_vm10, %v8823_v63, -inf }
 0x98a   : > { %3563 = vmax.xlane.f32.xlu2 %v3562_v19 }
 0x98b   : > { %6377 = vmatmul.msk.bf16.vlgmr.msra.gmra.mxu3 %vm2087_vm2, %v3507_v38 }
 0x98c   : > { %v3359_v11 = vpop.f32.mrf.mxu0 }
 0x98d   : > { %v3531_v55 = vmul.f32 0.35355338, %v3359_v11 }
 0x98f   : > { %v8831_v16 = vadd.f32 %v3531_v55, %v8211_v57 }
 0x991   : > { %v3565_v13 = vsel %vm2329_vm10, %v8831_v16, -inf }
 0x992   : > { %3566 = vmax.xlane.f32.xlu1 %v3565_v13  ;;  %v8869_v13 = vpop.permute.xlu2 %3956 }
 0x99e   : > { %v3453_v28 = vpop.f32.mrf.mxu0 }
 0x9a5   : > { %v8835_v29 = vpop.f32.mrf.mxu1 }
 0x9a6   : > { %v3455_v54 = vpop.f32.mrf.mxu0 }
 0x9a7   : > { %v3539_v1 = vmul.f32 0.35355338, %v3455_v54 }
 0x9a9   : > { %v8849_v43 = vadd.f32 %v3539_v1, %v8277_v17 }
 0x9ab   : > { %v3589_v44 = vsel %vm2329_vm10, %v8849_v43, -inf }
 0x9ad   : > { %v8837_v12 = vpop.f32.mrf.mxu1 }
 0x9b5   : > { %v8839_v47 = vpop.f32.mrf.mxu1 }
 0x9bd   : > { %v8841_v8 = vpop.f32.mrf.mxu1 }
 0x9be   : > { %10656 = vst [vmem:[#allocation41_spill] sm:$0xff] %v8841_v8 }
 0x9c5   : > { %v3381_v60 = vpop.f32.mrf.mxu1 }
 0x9c6   : > { %v3532_v45 = vmul.f32 0.35355338, %v3381_v60 }
 0x9c8   : > { %v8844_v21 = vadd.f32 %v3532_v45, %v8161_v39 }
 0x9ca   : > { %v3568_v58 = vsel %vm2329_vm10, %v8844_v21, -inf }
 0x9cb   : > { %3569 = vmax.xlane.f32.xlu0 %v3568_v58  ;;  %v3538_v58 = vmul.f32 0.35355338, %v3453_v28 }
 0x9cd   : > { %v3383_v2 = vpop.f32.mrf.mxu1 }
 0x9ce   : > { %v3533_v19 = vmul.f32 0.35355338, %v3383_v2 }
 0x9d0   : > { %v8872_v45 = vadd.f32 %v3533_v19, %v8161_v39 }
 0x9d3   : > { %3590 = vmax.xlane.f32.xlu0 %v3589_v44 }
 0x9d5   : > { %v3477_v38 = vpop.f32.mrf.mxu1 }
 0x9d6   : > { %v3540_v22 = vmul.f32 0.35355338, %v3477_v38 }
 0x9d8   : > { %v8854_v56 = vadd.f32 %v3540_v22, %v8294_v20  ;;  %v3571_v22 = vsel %vm2329_vm10, %v8872_v45, -inf }
 0x9da   : > { %v3592_v4 = vsel %vm2329_vm10, %v8854_v56, -inf }
 0x9db   : > { %3593 = vmax.xlane.f32.xlu0 %v3592_v4 }
 0x9dd   : > { %v3479_v54 = vpop.f32.mrf.mxu1 }
 0x9de   : > { %v8858_v52 = vpop.f32.mrf.mxu3  ;;  %v3541_v38 = vmul.f32 0.35355338, %v3479_v54 }
 0x9e0   : > { %v8889_v28 = vadd.f32 %v3541_v38, %v8294_v20 }
 0x9e6   : > { %v8860_v62 = vpop.f32.mrf.mxu3 }
 0x9ea   : > { %v3501_v5 = vpop.f32.mrf.mxu2 }
 0x9eb   : > { %v3542_v24 = vmul.f32 0.35355338, %v3501_v5  ;;  %v8886_v5 = vadd.f32 %v3538_v58, %v8277_v17 }
 0x9ed   : > { %v8863_v3 = vadd.f32 %v3542_v24, %v8308_v42  ;;  %v3586_v54 = vsel %vm2329_vm10, %v8886_v5, -inf }
 0x9ee   : > { %v8865_v41 = vpop.f32.mrf.mxu3 }
 0x9ef   : > { %10657 = vst [vmem:[#allocation42_spill] sm:$0xff] %v8865_v41  ;;  %v3598_v11 = vsel %vm2329_vm10, %v8863_v3, -inf }
 0x9f0   : > { %3599 = vmax.xlane.f32.xlu2 %v3598_v11 }
 0x9f2   : > { %v3503_v55 = vpop.f32.mrf.mxu2 }
 0x9f3   : > { %v3543_v60 = vmul.f32 0.35355338, %v3503_v55  ;;  %v3576_v24 = vpop.xlane.xlu2 %3575 }
 0x9f4   : > { %v3614_v19 = vsub.f32 %v8815_v26, %v3576_v24 }
 0x9f5   : > { %v8875_v1 = vadd.f32 %v3543_v60, %v8308_v42  ;;  %v3595_v60 = vsel %vm2329_vm10, %v8889_v28, -inf }
 0x9f6   : > { %v8877_v44 = vpop.f32.mrf.mxu3 }
 0x9f7   : > { %10658 = vst [vmem:[#allocation43_spill] sm:$0xff] %v8877_v44  ;;  %v3601_v4 = vsel %vm2329_vm10, %v8875_v1, -inf }
 0x9f8   : > { %3572 = vmax.xlane.f32.xlu2 %v3571_v22  ;;  %3602 = vmax.xlane.f32.xlu1 %v3601_v4  ;;  %v3634_v22 = vmul.f32 1.442695, %v3614_v19 }
 0x9fa   : > { %6898 = vpow2.f32 %v3634_v22 }
 0x9fb   : > { %v3579_v26 = vpop.xlane.xlu1 %3578 }
 0x9fd   : > { %v3564_v4 = vpop.xlane.xlu2 %3563 }
 0x9fe   : > { %v3429_v11 = vpop.f32.mrf.mxu3  ;;  %v3610_v38 = vsub.f32 %v8823_v63, %v3564_v4 }
 0x9ff   : > { %v3536_v55 = vmul.f32 0.35355338, %v3429_v11 }
 0xa00   : > { %3596 = vmax.xlane.f32.xlu2 %v3595_v60  ;;  %3587 = vmax.xlane.f32.xlu1 %v3586_v54  ;;  %v3615_v60 = vsub.f32 %v8820_v7, %v3579_v26  ;;  %v3626_v19 = vmul.f32 1.442695, %v3610_v38  ;;  %v8908_v54 = vpop.eup %6898 }
 0xa01   : > { %v8897_v58 = vadd.f32 %v3536_v55, %v8226_v53 }
 0xa02   : > { %v3636_v63 = vmul.f32 1.442695, %v3615_v60  ;;  %6900 = vpow2.f32 %v3626_v19 }
 0xa03   : > { %v3580_v11 = vsel %vm2329_vm10, %v8897_v58, -inf }
 0xa04   : > { %6902 = vpow2.f32 %v3636_v63 }
 0xa06   : > { %v3431_v2 = vpop.f32.mrf.mxu3 }
 0xa07   : > { %v3537_v24 = vmul.f32 0.35355338, %v3431_v2  ;;  %v3567_v2 = vpop.xlane.xlu1 %3566 }
 0xa08   : > { %3581 = vmax.xlane.f32.xlu1 %v3580_v11  ;;  %v3670_v11 = vsel %vm2329_vm10, %v8908_v54, 0.0  ;;  %v3611_v7 = vsub.f32 %v8831_v16, %v3567_v2  ;;  %v8918_v26 = vpop.eup %6900 }
 0xa09   : > { %v8903_v35 = vadd.f32 %v3537_v24, %v8226_v53 }
 0xa0a   : > { %v3628_v60 = vmul.f32 1.442695, %v3611_v7  ;;  %v8922_v32 = vpop.eup %6902 }
 0xa0b   : > { %v3583_v55 = vsel %vm2329_vm10, %v8903_v35, -inf  ;;  %v3673_v16 = vsel %vm2329_vm10, %v8922_v32, 0.0 }
 0xa0c   : > { %3584 = vmax.xlane.f32.xlu0 %v3583_v55  ;;  %6904 = vpow2.f32 %v3628_v60 }
 0xa0e   : > { %v3525_v22 = vpop.f32.mrf.mxu3 }
 0xa0f   : > { %v3544_v4 = vmul.f32 0.35355338, %v3525_v22  ;;  %v3658_v22 = vsel %vm2329_vm10, %v8918_v26, 0.0 }
 0xa10   : > { %3671 = vadd.xlane.f32.xlu1 %v3670_v11 }
 0xa11   : > { %v8913_v24 = vadd.f32 %v3544_v4, %v8335_v37 }
 0xa12   : > { %v8931_v2 = vpop.eup %6904 }
 0xa13   : > { %v3604_v38 = vsel %vm2329_vm10, %v8913_v24, -inf  ;;  %v3661_v11 = vsel %vm2329_vm10, %v8931_v2, 0.0 }
 0xa14   : > { %3605 = vmax.xlane.f32.xlu0 %v3604_v38 }
 0xa16   : > { %v3527_v19 = vpop.f32.mrf.mxu3 }
 0xa17   : > { %v3545_v55 = vmul.f32 0.35355338, %v3527_v19 }
 0xa18   : > { %3659 = vadd.xlane.f32.xlu1 %v3658_v22 }
 0xa19   : > { %v8925_v4 = vadd.f32 %v3545_v55, %v8335_v37 }
 0xa1b   : > { %v3607_v63 = vsel %vm2329_vm10, %v8925_v4, -inf }
 0xa1c   : > { %3674 = vadd.xlane.f32.xlu0 %v3673_v16  ;;  %3608 = vmax.xlane.f32.xlu2 %v3607_v63 }
 0xa24   : > { %3662 = vadd.xlane.f32.xlu0 %v3661_v11 }
 0xa3e   : > { %v3570_v7 = vpop.xlane.xlu0 %3569 }
 0xa3f   : > { %v3612_v38 = vsub.f32 %v8844_v21, %v3570_v7 }
 0xa41   : > { %v3630_v19 = vmul.f32 1.442695, %v3612_v38 }
 0xa43   : > { %6906 = vpow2.f32 %v3630_v19 }
 0xa46   : > { %v3591_v36 = vpop.xlane.xlu0 %3590 }
 0xa47   : > { %v3619_v38 = vsub.f32 %v8849_v43, %v3591_v36 }
 0xa49   : > { %v8936_v60 = vpop.eup %6906 }
 0xa4a   : > { %v3664_v55 = vsel %vm2329_vm10, %v8936_v60, 0.0 }
 0xa4b   : > { %3665 = vadd.xlane.f32.xlu1 %v3664_v55 }
 0xa63   : > { %v3600_v22 = vpop.xlane.xlu2 %3599 }
 0xa64   : > { %v3622_v16 = vsub.f32 %v8863_v3, %v3600_v22  ;;  %v3644_v3 = vmul.f32 1.442695, %v3619_v38 }
 0xa66   : > { %v3650_v63 = vmul.f32 1.442695, %v3622_v16 }
 0xa68   : > { %6908 = vpow2.f32 %v3650_v63 }
 0xa6b   : > { %v3573_v59 = vpop.xlane.xlu2 %3572  ;;  %v3603_v14 = vpop.xlane.xlu1 %3602 }
 0xa6c   : > { %v3613_v11 = vsub.f32 %v8872_v45, %v3573_v59  ;;  %v3623_v21 = vsub.f32 %v8875_v1, %v3603_v14  ;;  %v3594_v45 = vpop.xlane.xlu0 %3593 }
 0xa6e   : > { %v8943_v7 = vpop.eup %6908  ;;  %v3632_v19 = vmul.f32 1.442695, %v3613_v11  ;;  %v3652_v23 = vmul.f32 1.442695, %v3623_v21 }
 0xa6f   : > { %v3694_v55 = vsel %vm2329_vm10, %v8943_v7, 0.0 }
 0xa70   : > { %6910 = vpow2.f32 %v3632_v19  ;;  %3695 = vadd.xlane.f32.xlu2 %v3694_v55 }
 0xa71   : > { %6912 = vpow2.f32 %v3652_v23 }
 0xa72   : > { %6914 = vpow2.f32 %v3644_v3 }
 0xa73   : > { %v3588_v22 = vpop.xlane.xlu1 %3587 }
 0xa74   : > { %v3618_v16 = vsub.f32 %v8886_v5, %v3588_v22 }
 0xa76   : > { %v8949_v63 = vpop.eup %6910  ;;  %v3642_v59 = vmul.f32 1.442695, %v3618_v16 }
 0xa77   : > { %v8951_v14 = vpop.eup %6912  ;;  %v3667_v36 = vsel %vm2329_vm10, %v8949_v63, 0.0 }
 0xa78   : > { %3668 = vadd.xlane.f32.xlu0 %v3667_v36  ;;  %v3697_v43 = vsel %vm2329_vm10, %v8951_v14, 0.0  ;;  %6916 = vpow2.f32 %v3642_v59  ;;  %v8959_v1 = vpop.eup %6914 }
 0xa79   : > { %3698 = vadd.xlane.f32.xlu2 %v3697_v43  ;;  %v3685_v21 = vsel %vm2329_vm10, %v8959_v1, 0.0 }
 0xa7b   : > { %v8957_v23 = vpop.xlane.xlu1 %3581 }
 0xa7e   : > { %v8961_v5 = vpop.eup %6916 }
 0xa7f   : > { %v3585_v11 = vpop.xlane.xlu0 %3584  ;;  %v3682_v38 = vsel %vm2329_vm10, %v8961_v5, 0.0 }
 0xa80   : > { %3686 = vadd.xlane.f32.xlu0 %v3685_v21  ;;  %3683 = vadd.xlane.f32.xlu1 %v3682_v38 }
 0xa83   : > { %v3672_v19 = vpop.xlane.xlu1 %3671 }
 0xa84   : > { %6918 = vrcp.f32 %v3672_v19 }
 0xa87   : > { %v3606_v55 = vpop.xlane.xlu0 %3605 }
 0xa8a   : > { %v6919_v16 = vpop.eup %6918 }
 0xa8b   : > { %v3660_v3 = vpop.xlane.xlu1 %3659  ;;  %v3726_v59 = vmul.f32 %v6919_v16, %v8908_v54 }
 0xa8d   : > { %v3742_v43 = vpack.c.bf16 %v3726_v59, %v3726_v59 }
 0xa8f   : > { %v3675_v22 = vpop.xlane.xlu0 %3674 }
 0xa90   : > { %6920 = vrcp.f32 %v3675_v22  ;;  %v3806_v22 = vunpack.c.l.b16 %v3742_v43  ;;  %v3962_v43 = vsel %vm2087_vm2, %v8869_v13, 0  ;;  %v3617_v13 = vsub.f32 %v8903_v35, %v3585_v11 }
 0xa91   : > { %3834 = vrot.lane.b32.xlu2 %v8071_v10, %s7180_s10  ;;  %6922 = vrcp.f32 %v3660_v3 }
 0xa94   : > { %3954 = vrot.lane.b32.xlu0 %v7982_v15, %s7182_s11 }
 0xa96   : > { %v6921_v36 = vpop.eup %6920 }
 0xa97   : > { %v3727_v21 = vmul.f32 %v6921_v36, %v8922_v32  ;;  %v3663_v38 = vpop.xlane.xlu0 %3662  ;;  %v6923_v19 = vpop.eup %6922 }
 0xa98   : > { %6924 = vrcp.f32 %v3663_v38  ;;  %v3722_v3 = vmul.f32 %v6923_v19, %v8918_v26 }
 0xa99   : > { %v3743_v25 = vpack.c.bf16 %v3727_v21, %v3727_v21  ;;  %3909 = vrot.lane.b32.xlu1 %v8133_v51, %s7180_s10  ;;  %v3597_v21 = vpop.xlane.xlu2 %3596 }
 0xa9a   : > { %v3738_v41 = vpack.c.bf16 %v3722_v3, %v3722_v3 }
 0xa9b   : > { %v3807_v0 = vunpack.c.l.b16 %v3743_v25  ;;  %v3621_v25 = vsub.f32 %v8889_v28, %v3597_v21  ;;  %v3640_v28 = vmul.f32 1.442695, %v3617_v13 }
 0xa9c   : > { %v3756_v32 = vunpack.c.l.b16 %v3738_v41  ;;  %v3624_v41 = vsub.f32 %v8913_v24, %v3606_v55 }
 0xa9d   : > { %v3808_v54 = vpack.c.b16 %v3807_v0, %v3806_v22  ;;  %v3620_v0 = vsub.f32 %v8854_v56, %v3594_v45 }
 0xa9e   : > { %v6925_v16 = vpop.eup %6924 }
 0xa9f   : > { %v3723_v44 = vmul.f32 %v6925_v16, %v8931_v2  ;;  %6380 = vmatmul.msk.bf16.vlgmr.msrb.gmra.mxu2 %vm2329_vm10, %v3808_v54  ;;  %v3646_v26 = vmul.f32 1.442695, %v3620_v0  ;;  %v3654_v2 = vmul.f32 1.442695, %v3624_v41 }
 0xaa1   : > { %v3739_v59 = vpack.c.bf16 %v3723_v44, %v3723_v44  ;;  %3980 = vrot.lane.b32.xlu1 %v8017_v40, %s7181_s12  ;;  %v3648_v44 = vmul.f32 1.442695, %v3621_v25  ;;  %v3609_v22 = vpop.xlane.xlu2 %3608 }
 0xaa2   : > { %v3625_v24 = vsub.f32 %v8925_v4, %v3609_v22 }
 0xaa3   : > { %v3757_v36 = vunpack.c.l.b16 %v3739_v59  ;;  %6926 = vpow2.f32 %v3648_v44 }
 0xaa4   : > { %6928 = vpow2.f32 %v3646_v26  ;;  %v3656_v55 = vmul.f32 1.442695, %v3625_v24 }
 0xaa5   : > { %v3758_v38 = vpack.c.b16 %v3757_v36, %v3756_v32  ;;  %6930 = vpow2.f32 %v3654_v2  ;;  %v3616_v32 = vsub.f32 %v8897_v58, %v8957_v23 }
 0xaa6   : > { %6932 = vpow2.f32 %v3640_v28 }
 0xaa7   : > { %6378 = vmatmul.msk.bf16.vlgmr.msra.gmra.mxu0 %vm2329_vm10, %v3758_v38  ;;  %6934 = vpow2.f32 %v3656_v55  ;;  %v3638_v36 = vmul.f32 1.442695, %v3616_v32 }
 0xaa8   : > { %3971 = vmatpush.bf16.xpose.msra.mxu0 %v3962_v43 }
 0xaa9   : > { %4004 = vrot.lane.b32.xlu1 %v8047_v6, %s7181_s12  ;;  %v8991_v19 = vpop.eup %6926  ;;  %6936 = vpow2.f32 %v3638_v36 }
 0xaaa   : > { %v3691_v56 = vsel %vm2329_vm10, %v8991_v19, 0.0  ;;  %v8995_v45 = vpop.eup %6928 }
 0xaab   : > { %v3688_v35 = vsel %vm2329_vm10, %v8995_v45, 0.0  ;;  %v9002_v11 = vpop.eup %6930 }
 0xaac   : > { %v3700_v3 = vsel %vm2329_vm10, %v9002_v11, 0.0  ;;  %v9006_v54 = vpop.eup %6932 }
 0xaad   : > { %v3679_v16 = vsel %vm2329_vm10, %v9006_v54, 0.0  ;;  %v9010_v59 = vpop.eup %6934 }
 0xaae   : > { %v3703_v4 = vsel %vm2329_vm10, %v9010_v59, 0.0 }
 0xaaf   : > { %v9018_v21 = vpop.eup %6936 }
 0xab0   : > { %v3676_v25 = vsel %vm2329_vm10, %v9018_v21, 0.0 }
 0xab1   : > { %3978 = vrot.lane.b32.xlu1 %v8017_v40, %s7182_s11 }
 0xab9   : > { %3934 = vrot.lane.b32.xlu1 %v8173_v46, %s7180_s10  ;;  %s7186_s10 = smov 24  }
 0xaba   : > { %3692 = vadd.xlane.f32.xlu2 %v3691_v56 }
 0xabe   : > { %3689 = vadd.xlane.f32.xlu0 %v3688_v35  ;;  %v3666_v38 = vpop.xlane.xlu1 %3665 }
 0xabf   : > { %6938 = vrcp.f32 %v3666_v38 }
 0xac2   : > { %3701 = vadd.xlane.f32.xlu2 %v3700_v3 }
 0xac5   : > { %v6939_v23 = vpop.eup %6938 }
 0xac6   : > { %3680 = vadd.xlane.f32.xlu0 %v3679_v16  ;;  %v3724_v44 = vmul.f32 %v6939_v23, %v8936_v60 }
 0xac8   : > { %v3740_v41 = vpack.c.bf16 %v3724_v44, %v3724_v44 }
 0xaca   : > { %v3781_v24 = vunpack.c.l.b16 %v3740_v41 }
 0xace   : > { %3704 = vadd.xlane.f32.xlu0 %v3703_v4 }
 0xada   : > { %4028 = vrot.lane.b32.xlu2 %v8071_v10, %s7181_s12 }
 0xae2   : > { %4074 = vrot.lane.b32.xlu2 %v8110_v27, %s7182_s11  ;;  %4026 = vrot.lane.b32.xlu0 %v8071_v10, %s7182_s11 }
 0xae3   : > { %v3696_v43 = vpop.xlane.xlu2 %3695  ;;  %3677 = vadd.xlane.f32.xlu1 %v3676_v25 }
 0xaea   : > { %4122 = vrot.lane.b32.xlu2 %v8173_v46, %s7182_s11  ;;  %4076 = vrot.lane.b32.xlu0 %v8110_v27, %s7181_s12 }
 0xaeb   : > { %v3669_v58 = vpop.xlane.xlu0 %3668 }
 0xaec   : > { %v3699_v0 = vpop.xlane.xlu2 %3698  ;;  %6940 = vrcp.f32 %v3669_v58 }
 0xaf2   : > { %v6941_v26 = vpop.eup %6940  ;;  %4098 = vrot.lane.b32.xlu0 %v8133_v51, %s7182_s11 }
 0xaf3   : > { %v3725_v13 = vmul.f32 %v6941_v26, %v8949_v63  ;;  %v3687_v2 = vpop.xlane.xlu0 %3686  ;;  %v3684_v22 = vpop.xlane.xlu1 %3683 }
 0xaf4   : > { %v3835_v28 = vpop.permute.xlu2 %3834  ;;  %6942 = vrcp.f32 %v3687_v2 }
 0xaf5   : > { %v3741_v56 = vpack.c.bf16 %v3725_v13, %v3725_v13  ;;  %6944 = vrcp.f32 %v3684_v22  ;;  %3847 = vmatpush.bf16.msrb.mxu3 %v3835_v28 }
 0xaf6   : > { %6946 = vrcp.f32 %v3699_v0 }
 0xaf7   : > { %v3782_v35 = vunpack.c.l.b16 %v3741_v56  ;;  %6948 = vrcp.f32 %v3696_v43 }
 0xaf9   : > { %v3783_v55 = vpack.c.b16 %v3782_v35, %v3781_v24 }
 0xafa   : > { %v6943_v3 = vpop.eup %6942  ;;  %4375 = vrot.lane.b32.xlu0 %v7982_v15, %s7183_s2 }
 0xafb   : > { %v6945_v60 = vpop.eup %6944  ;;  %v3731_v63 = vmul.f32 %v6943_v3, %v8959_v1  ;;  %6379 = vmatmul.msk.bf16.vlgmr.msra.gmra.mxu1 %vm2329_vm10, %v3783_v55 }
 0xafc   : > { %v3730_v16 = vmul.f32 %v6945_v60, %v8961_v5  ;;  %4002 = vrot.lane.b32.xlu1 %v8047_v6, %s7182_s11  ;;  %v6947_v36 = vpop.eup %6946 }
 0xafd   : > { %v3747_v4 = vpack.c.bf16 %v3731_v63, %v3731_v63  ;;  %v6949_v58 = vpop.eup %6948  ;;  %v3735_v23 = vmul.f32 %v6947_v36, %v8951_v14 }
 0xafe   : > { %v3746_v32 = vpack.c.bf16 %v3730_v16, %v3730_v16  ;;  %v3734_v1 = vmul.f32 %v6949_v58, %v8943_v7 }
 0xaff   : > { %v3857_v38 = vunpack.c.l.b16 %v3747_v4  ;;  %v3751_v5 = vpack.c.bf16 %v3735_v23, %v3735_v23 }
 0xb00   : > { %v3856_v25 = vunpack.c.l.b16 %v3746_v32  ;;  %v3750_v43 = vpack.c.bf16 %v3734_v1, %v3734_v1 }
 0xb01   : > { %v3907_v0 = vunpack.c.l.b16 %v3751_v5 }
 0xb02   : > { %v3858_v15 = vpack.c.b16 %v3857_v38, %v3856_v25  ;;  %4400 = vrot.lane.b32.xlu0 %v8017_v40, %s7183_s2  ;;  %v3906_v44 = vunpack.c.l.b16 %v3750_v43 }
 0xb04   : > { %6382 = vmatmul.msk.bf16.vlgmr.msrb.gmra.mxu0 %vm2329_vm10, %v3858_v15  ;;  %4052 = vrot.lane.b32.xlu1 %v8101_v33, %s7181_s12  ;;  %v3908_v14 = vpack.c.b16 %v3907_v0, %v3906_v44 }
 0xb06   : > { %v3955_v40 = vpop.permute.xlu0 %3954 }
 0xb0b   : > { %v3910_v26 = vpop.permute.xlu1 %3909 }
 0xb0c   : > { %4050 = vrot.lane.b32.xlu1 %v8101_v33, %s7182_s11  ;;  %3922 = vmatpush.bf16.msra.mxu2 %v3910_v26  ;;  %s6305_s11 = sshll.u32 %s10750_s9, 3 }
 0xb0f   : > { %6384 = vmatmul.msk.bf16.vlgmr.msra.gmra.mxu2 %vm2329_vm10, %v3908_v14 }
 0xb13   : > { %v3981_v41 = vpop.permute.xlu1 %3980 }
 0xb14   : > { %6386 = vmatmul.msk.bf16.vlgmr.msra.gmra.mxu0 %vm2087_vm2, %v3955_v40  ;;  %v3986_v7 = vsel %vm2087_vm2, %v3981_v41, 0  ;;  %4100 = vrot.lane.b32.xlu1 %v8133_v51, %s7181_s12 }
 0xb15   : > { %3995 = vmatpush.bf16.xpose.msra.mxu1 %v3986_v7 }
 0xb1b   : > { %v4005_v13 = vpop.permute.xlu1 %4004 }
 0xb1c   : > { %v4010_v2 = vsel %vm2087_vm2, %v4005_v13, 0  ;;  %4124 = vrot.lane.b32.xlu1 %v8173_v46, %s7181_s12 }
 0xb1d   : > { %4019 = vmatpush.bf16.xpose.msrb.mxu2 %v4010_v2 }
 0xb23   : > { %v3979_v28 = vpop.permute.xlu1 %3978 }
 0xb2b   : > { %v3935_v22 = vpop.permute.xlu1 %3934 }
 0xb2c   : > { %3947 = vmatpush.bf16.msra.mxu3 %v3935_v22 }
 0xb2d   : > { %v3693_v56 = vpop.xlane.xlu2 %3692 }
 0xb2e   : > { %6950 = vrcp.f32 %v3693_v56 }
 0xb31   : > { %v3690_v24 = vpop.xlane.xlu0 %3689 }
 0xb32   : > { %6952 = vrcp.f32 %v3690_v24 }
 0xb34   : > { %v6951_v35 = vpop.eup %6950 }
 0xb35   : > { %v3733_v55 = vmul.f32 %v6951_v35, %v8991_v19  ;;  %v3702_v58 = vpop.xlane.xlu2 %3701 }
 0xb37   : > { %v3749_v60 = vpack.c.bf16 %v3733_v55, %v3733_v55  ;;  %v9070_v55 = vpop.f32.mrf.mxu0 }
 0xb38   : > { %v6953_v3 = vpop.eup %6952 }
 0xb39   : > { %v3732_v63 = vmul.f32 %v6953_v3, %v8995_v45  ;;  %v3882_v4 = vunpack.c.l.b16 %v3749_v60  ;;  %v3681_v38 = vpop.xlane.xlu0 %3680 }
 0xb3a   : > { %6954 = vrcp.f32 %v3681_v38 }
 0xb3b   : > { %v3748_v16 = vpack.c.bf16 %v3732_v63, %v3732_v63 }
 0xb3d   : > { %v3881_v32 = vunpack.c.l.b16 %v3748_v16  ;;  %v4029_v19 = vpop.permute.xlu2 %4028 }
 0xb3f   : > { %v3883_v36 = vpack.c.b16 %v3882_v4, %v3881_v32  ;;  %v9075_v38 = vpop.f32.mrf.mxu0 }
 0xb40   : > { %v6955_v1 = vpop.eup %6954 }
 0xb41   : > { %6383 = vmatmul.msk.bf16.vlgmr.msrb.gmra.mxu1 %vm2329_vm10, %v3883_v36  ;;  %v3705_v25 = vpop.xlane.xlu0 %3704  ;;  %v3729_v5 = vmul.f32 %v6955_v1, %v9006_v54  ;;  %v4034_v54 = vsel %vm2087_vm2, %v4029_v19, 0 }
 0xb43   : > { %v3745_v44 = vpack.c.bf16 %v3729_v5, %v3729_v5 }
 0xb45   : > { %v3832_v40 = vunpack.c.l.b16 %v3745_v44  ;;  %v4075_v7 = vpop.permute.xlu2 %4074 }
 0xb51   : > { %6387 = vmatmul.msk.bf16.vlgmr.msra.gmra.mxu1 %vm2087_vm2, %v3979_v28 }
 0xb54   : > { %v4027_v23 = vpop.permute.xlu0 %4026 }
 0xb56   : > { %v3678_v15 = vpop.xlane.xlu1 %3677 }
 0xb57   : > { %6956 = vrcp.f32 %v3678_v15 }
 0xb58   : > { %6958 = vrcp.f32 %v3705_v25 }
 0xb59   : > { %6960 = vrcp.f32 %v3702_v58 }
 0xb5c   : > { %v4077_v45 = vpop.permute.xlu0 %4076 }
 0xb5d   : > { %v4082_v43 = vsel %vm2087_vm2, %v4077_v45, 0  ;;  %v6957_v0 = vpop.eup %6956 }
 0xb5e   : > { %4091 = vmatpush.bf16.xpose.msrb.mxu1 %v4082_v43  ;;  %v3728_v26 = vmul.f32 %v6957_v0, %v9018_v21  ;;  %v6959_v28 = vpop.eup %6958 }
 0xb5f   : > { %v6961_v22 = vpop.eup %6960  ;;  %v3737_v56 = vmul.f32 %v6959_v28, %v9010_v59 }
 0xb60   : > { %v3744_v14 = vpack.c.bf16 %v3728_v26, %v3728_v26  ;;  %v3736_v21 = vmul.f32 %v6961_v22, %v9002_v11 }
 0xb61   : > { %v3753_v35 = vpack.c.bf16 %v3737_v56, %v3737_v56 }
 0xb62   : > { %v3831_v41 = vunpack.c.l.b16 %v3744_v14  ;;  %v3752_v3 = vpack.c.bf16 %v3736_v21, %v3736_v21 }
 0xb63   : > { %v3932_v63 = vunpack.c.l.b16 %v3753_v35 }
 0xb64   : > { %v4099_v13 = vpop.permute.xlu0 %4098  ;;  %v3833_v2 = vpack.c.b16 %v3832_v40, %v3831_v41  ;;  %v3931_v16 = vunpack.c.l.b16 %v3752_v3 }
 0xb65   : > { %6391 = vmatmul.msk.bf16.vlgmr.msrb.gmra.mxu1 %vm2087_vm2, %v4075_v7 }
 0xb66   : > { %6381 = vmatmul.msk.bf16.vlgmr.msrb.gmra.mxu3 %vm2329_vm10, %v3833_v2  ;;  %v3933_v32 = vpack.c.b16 %v3932_v63, %v3931_v16 }
 0xb67   : > { %4043 = vmatpush.bf16.xpose.msrb.mxu3 %v4034_v54 }
 0xb6c   : > { %v4376_v24 = vpop.permute.xlu0 %4375 }
 0xb6e   : > { %v4003_v60 = vpop.permute.xlu1 %4002 }
 0xb6f   : > { %6388 = vmatmul.msk.bf16.vlgmr.msrb.gmra.mxu2 %vm2087_vm2, %v4003_v60 }
 0xb74   : > { %v4401_v4 = vpop.permute.xlu0 %4400 }
 0xb75   : > { %4413 = vmatpush.bf16.msra.mxu1 %v4401_v4 }
 0xb76   : > { %v4053_v36 = vpop.permute.xlu1 %4052  ;;  %6385 = vmatmul.msk.bf16.vlgmr.msra.gmra.mxu3 %vm2329_vm10, %v3933_v32 }
 0xb77   : > { %v4058_v59 = vsel %vm2087_vm2, %v4053_v36, 0 }
 0xb78   : > { %4067 = vmatpush.bf16.xpose.msrb.mxu0 %v4058_v59  ;;  %v9092_v26 = vpop.f32.mrf.mxu1 }
 0xb7e   : > { %v4051_v11 = vpop.permute.xlu1 %4050 }
 0xb7f   : > { %6390 = vmatmul.msk.bf16.vlgmr.msrb.gmra.mxu0 %vm2087_vm2, %v4051_v11 }
 0xb80   : > { %4388 = vmatpush.bf16.msra.mxu0 %v4376_v24  ;;  %v9094_v14 = vpop.f32.mrf.mxu1 }
 0xb81   : > { %v9078_v25 = vpop.f32.mrf.mxu0 }
 0xb86   : > { %v4101_v58 = vpop.permute.xlu1 %4100  ;;  %6389 = vmatmul.msk.bf16.vlgmr.msrb.gmra.mxu3 %vm2087_vm2, %v4027_v23  ;;  %v4123_v23 = vpop.permute.xlu2 %4122 }
 0xb87   : > { %v4106_v15 = vsel %vm2087_vm2, %v4101_v58, 0 }
 0xb88   : > { %4115 = vmatpush.bf16.xpose.msra.mxu2 %v4106_v15 }
 0xb89   : > { %v9082_v1 = vpop.f32.mrf.mxu0 }
 0xb8e   : > { %v4125_v19 = vpop.permute.xlu1 %4124 }
 0xb8f   : > { %v4130_v5 = vsel %vm2087_vm2, %v4125_v19, 0  ;;  %6392 = vmatmul.msk.bf16.vlgmr.msra.gmra.mxu2 %vm2087_vm2, %v4099_v13  ;;  %v9100_v13 = vpop.f32.mrf.mxu2 }
 0xb90   : > { %4139 = vmatpush.bf16.xpose.msra.mxu3 %v4130_v5 }
 0xb91   : > { %v3973_v45 = vpop.f32.mrf.mxu0 }
 0xb92   : > { %v4146_v43 = vmul.f32 0.35355338, %v3973_v45 }
 0xb94   : > { %v9087_v0 = vadd.f32 %v4146_v43, %v8211_v57 }
 0xb96   : > { %v4178_v44 = vsel %vm2329_vm10, %v9087_v0, -inf }
 0xb97   : > { %4179 = vmax.xlane.f32.xlu0 %v4178_v44  ;;  %6393 = vmatmul.msk.bf16.vlgmr.msra.gmra.mxu3 %vm2087_vm2, %v4123_v23  ;;  %v9102_v54 = vpop.f32.mrf.mxu2 }
 0xb99   : > { %v3975_v4 = vpop.f32.mrf.mxu0 }
 0xb9a   : > { %v4147_v36 = vmul.f32 0.35355338, %v3975_v4 }
 0xb9c   : > { %v9127_v15 = vadd.f32 %v4147_v36, %v8211_v57 }
 0xb9e   : > { %v4181_v44 = vsel %vm2329_vm10, %v9127_v15, -inf }
 0xb9f   : > { %v9109_v21 = vpop.f32.mrf.mxu2 }
 0xba7   : > { %v9113_v35 = vpop.f32.mrf.mxu2 }
 0xbbe   : > { %v9096_v40 = vpop.f32.mrf.mxu1 }
 0xbc6   : > { %v9098_v41 = vpop.f32.mrf.mxu1 }
 0xbce   : > { %v3997_v7 = vpop.f32.mrf.mxu1 }
 0xbcf   : > { %v4148_v45 = vmul.f32 0.35355338, %v3997_v7 }
 0xbd1   : > { %v9141_v57 = vadd.f32 %v4148_v45, %v8161_v39 }
 0xbd6   : > { %v3999_v2 = vpop.f32.mrf.mxu1 }
 0xbd7   : > { %v4149_v28 = vmul.f32 0.35355338, %v3999_v2 }
 0xbd9   : > { %v9105_v22 = vadd.f32 %v4149_v28, %v8161_v39 }
 0xbdb   : > { %v4187_v56 = vsel %vm2329_vm10, %v9105_v22, -inf }
 0xbdc   : > { %4188 = vmax.xlane.f32.xlu0 %v4187_v56 }
 0xbe9   : > { %v9111_v24 = vpop.f32.mrf.mxu3 }
 0xbf1   : > { %v9115_v3 = vpop.f32.mrf.mxu3 }
 0xbf2   : > { %v4021_v63 = vpop.f32.mrf.mxu2 }
 0xbf3   : > { %v4150_v16 = vmul.f32 0.35355338, %v4021_v63 }
 0xbf5   : > { %v9120_v32 = vadd.f32 %v4150_v16, %v8201_v48 }
 0xbf7   : > { %v4190_v59 = vsel %vm2329_vm10, %v9120_v32, -inf }
 0xbf8   : > { %4191 = vmax.xlane.f32.xlu1 %v4190_v59 }
 0xbf9   : > { %v9124_v11 = vpop.f32.mrf.mxu3 }
 0xbfa   : > { %v4023_v58 = vpop.f32.mrf.mxu2 }
 0xbfb   : > { %v4151_v19 = vmul.f32 0.35355338, %v4023_v58 }
 0xbfc   : > { %v4069_v16 = vpop.f32.mrf.mxu0 }
 0xbfd   : > { %v9130_v5 = vadd.f32 %v4151_v19, %v8201_v48  ;;  %v4184_v48 = vsel %vm2329_vm10, %v9141_v57, -inf  ;;  %v4154_v39 = vmul.f32 0.35355338, %v4069_v16  ;;  %v4093_v19 = vpop.f32.mrf.mxu1 }
 0xbff   : > { %v4193_v43 = vsel %vm2329_vm10, %v9130_v5, -inf }
 0xc00   : > { %4194 = vmax.xlane.f32.xlu2 %v4193_v43  ;;  %4182 = vmax.xlane.f32.xlu1 %v4181_v44  ;;  %v9156_v43 = vadd.f32 %v4154_v39, %v8277_v17 }
 0xc01   : > { %v9136_v23 = vpop.f32.mrf.mxu3 }
 0xc08   : > { %4185 = vmax.xlane.f32.xlu2 %v4184_v48  ;;  %v4071_v48 = vpop.f32.mrf.mxu0 }
 0xc09   : > { %v4045_v7 = vpop.f32.mrf.mxu3 }
 0xc0a   : > { %v4152_v28 = vmul.f32 0.35355338, %v4045_v7 }
 0xc0c   : > { %v9146_v56 = vadd.f32 %v4152_v28, %v8226_v53  ;;  %v4156_v28 = vmul.f32 0.35355338, %v4093_v19 }
 0xc0e   : > { %v4196_v63 = vsel %vm2329_vm10, %v9146_v56, -inf }
 0xc0f   : > { %4197 = vmax.xlane.f32.xlu0 %v4196_v63  ;;  %v4155_v63 = vmul.f32 0.35355338, %v4071_v48 }
 0xc11   : > { %v9169_v39 = vadd.f32 %v4155_v63, %v8277_v17 }
 0xc12   : > { %v4117_v4 = vpop.f32.mrf.mxu2 }
 0xc13   : > { %v4158_v36 = vmul.f32 0.35355338, %v4117_v4  ;;  %v4202_v4 = vsel %vm2329_vm10, %v9156_v43, -inf }
 0xc15   : > { %v9151_v59 = vadd.f32 %v4158_v36, %v8308_v42  ;;  %v9166_v36 = vadd.f32 %v4156_v28, %v8294_v20 }
 0xc17   : > { %v4214_v58 = vsel %vm2329_vm10, %v9151_v59, -inf  ;;  %v4208_v2 = vsel %vm2329_vm10, %v9166_v36, -inf }
 0xc18   : > { %4215 = vmax.xlane.f32.xlu1 %v4214_v58  ;;  %v4180_v58 = vpop.xlane.xlu0 %4179 }
 0xc19   : > { %v4226_v19 = vsub.f32 %v9087_v0, %v4180_v58 }
 0xc1a   : > { %v4119_v45 = vpop.f32.mrf.mxu2 }
 0xc1b   : > { %v4159_v44 = vmul.f32 0.35355338, %v4119_v45  ;;  %v4095_v45 = vpop.f32.mrf.mxu1  ;;  %v4242_v28 = vmul.f32 1.442695, %v4226_v19 }
 0xc1d   : > { %v9159_v7 = vadd.f32 %v4159_v44, %v8308_v42  ;;  %v4047_v42 = vpop.f32.mrf.mxu3  ;;  %v4157_v44 = vmul.f32 0.35355338, %v4095_v45  ;;  %6962 = vpow2.f32 %v4242_v28 }
 0xc1e   : > { %v4153_v48 = vmul.f32 0.35355338, %v4047_v42 }
 0xc1f   : > { %v4217_v16 = vsel %vm2329_vm10, %v9159_v7, -inf }
 0xc20   : > { %4203 = vmax.xlane.f32.xlu1 %v4202_v4  ;;  %4218 = vmax.xlane.f32.xlu2 %v4217_v16  ;;  %v4205_v4 = vsel %vm2329_vm10, %v9169_v39, -inf  ;;  %v9177_v16 = vadd.f32 %v4157_v44, %v8294_v20  ;;  %v9180_v17 = vadd.f32 %v4153_v48, %v8226_v53 }
 0xc22   : > { %v4199_v0 = vsel %vm2329_vm10, %v9180_v17, -inf  ;;  %v4211_v63 = vsel %vm2329_vm10, %v9177_v16, -inf }
 0xc23   : > { %v9186_v58 = vpop.eup %6962 }
 0xc25   : > { %v9190_v20 = vpop.f32.mrf.mxu3 }
 0xc28   : > { %4209 = vmax.xlane.f32.xlu1 %v4208_v2  ;;  %4206 = vmax.xlane.f32.xlu2 %v4205_v4  ;;  %v4274_v2 = vsel %vm2329_vm10, %v9186_v58, 0.0 }
 0xc2d   : > { %v4143_v4 = vpop.f32.mrf.mxu3 }
 0xc2e   : > { %v4161_v18 = vmul.f32 0.35355338, %v4143_v4 }
 0xc30   : > { %4200 = vmax.xlane.f32.xlu1 %v4199_v0  ;;  %4212 = vmax.xlane.f32.xlu2 %v4211_v63 }
 0xc38   : > { %4275 = vadd.xlane.f32.xlu2 %v4274_v2 }
 0xc4f   : > { %v4189_v19 = vpop.xlane.xlu0 %4188 }
 0xc50   : > { %v4229_v60 = vsub.f32 %v9105_v22, %v4189_v19 }
 0xc6b   : > { %v4192_v45 = vpop.xlane.xlu1 %4191 }
 0xc6c   : > { %v4230_v53 = vsub.f32 %v9120_v32, %v4192_v45  ;;  %v4248_v45 = vmul.f32 1.442695, %v4229_v60 }
 0xc6e   : > { %v4250_v42 = vmul.f32 1.442695, %v4230_v53  ;;  %v9201_v53 = vadd.f32 %v4161_v18, %v8335_v37 }
 0xc70   : > { %6964 = vpow2.f32 %v4250_v42 }
 0xc73   : > { %v4195_v44 = vpop.xlane.xlu2 %4194  ;;  %v4183_v48 = vpop.xlane.xlu1 %4182 }
 0xc74   : > { %v4231_v28 = vsub.f32 %v9130_v5, %v4195_v44  ;;  %v4227_v0 = vsub.f32 %v9127_v15, %v4183_v48  ;;  %v4223_v44 = vsel %vm2329_vm10, %v9201_v53, -inf }
 0xc76   : > { %v9195_v63 = vpop.eup %6964  ;;  %v4252_v2 = vmul.f32 1.442695, %v4231_v28  ;;  %v4244_v34 = vmul.f32 1.442695, %v4227_v0 }
 0xc77   : > { %v4286_v32 = vsel %vm2329_vm10, %v9195_v63, 0.0 }
 0xc78   : > { %6966 = vpow2.f32 %v4252_v2  ;;  %4287 = vadd.xlane.f32.xlu1 %v4286_v32 }
 0xc79   : > { %6968 = vpow2.f32 %v4244_v34 }
 0xc7a   : > { %6970 = vpow2.f32 %v4248_v45 }
 0xc7b   : > { %v4186_v5 = vpop.xlane.xlu2 %4185 }
 0xc7c   : > { %v4228_v15 = vsub.f32 %v9141_v57, %v4186_v5 }
 0xc7e   : > { %v9204_v42 = vpop.eup %6966  ;;  %v4246_v22 = vmul.f32 1.442695, %v4228_v15 }
 0xc7f   : > { %v9206_v19 = vpop.eup %6968  ;;  %v4289_v48 = vsel %vm2329_vm10, %v9204_v42, 0.0 }
 0xc80   : > { %6972 = vpow2.f32 %v4246_v22  ;;  %v4277_v18 = vsel %vm2329_vm10, %v9206_v19, 0.0  ;;  %4224 = vmax.xlane.f32.xlu1 %v4223_v44  ;;  %4290 = vadd.xlane.f32.xlu2 %v4289_v48  ;;  %v9214_v34 = vpop.eup %6970 }
 0xc81   : > { %4278 = vadd.xlane.f32.xlu0 %v4277_v18  ;;  %v4283_v4 = vsel %vm2329_vm10, %v9214_v34, 0.0 }
 0xc82   : > { %v4198_v15 = vpop.xlane.xlu0 %4197 }
 0xc83   : > { %v4232_v18 = vsub.f32 %v9146_v56, %v4198_v15 }
 0xc86   : > { %v9216_v60 = vpop.eup %6972 }
 0xc87   : > { %v4280_v57 = vsel %vm2329_vm10, %v9216_v60, 0.0 }
 0xc88   : > { %4281 = vadd.xlane.f32.xlu1 %v4280_v57  ;;  %4284 = vadd.xlane.f32.xlu2 %v4283_v4 }
 0xc8b   : > { %v4216_v28 = vpop.xlane.xlu1 %4215 }
 0xc93   : > { %v4204_v0 = vpop.xlane.xlu1 %4203  ;;  %v4219_v2 = vpop.xlane.xlu2 %4218 }
 0xc94   : > { %v4234_v32 = vsub.f32 %v9156_v43, %v4204_v0 }
 0xc95   : > { %4425 = vrot.lane.b32.xlu0 %v8047_v6, %s7183_s2  ;;  %v4254_v6 = vmul.f32 1.442695, %v4232_v18 }
 0xc96   : > { %v4258_v45 = vmul.f32 1.442695, %v4234_v32 }
 0xc98   : > { %6974 = vpow2.f32 %v4258_v45 }
 0xc9b   : > { %v4207_v5 = vpop.xlane.xlu2 %4206  ;;  %v4210_v0 = vpop.xlane.xlu1 %4209 }
 0xc9c   : > { %v4235_v22 = vsub.f32 %v9169_v39, %v4207_v5  ;;  %v4236_v5 = vsub.f32 %v9166_v36, %v4210_v0 }
 0xc9e   : > { %v9226_v44 = vpop.eup %6974  ;;  %v4260_v48 = vmul.f32 1.442695, %v4235_v22 }
 0xc9f   : > { %v4298_v57 = vsel %vm2329_vm10, %v9226_v44, 0.0 }
 0xca0   : > { %4299 = vadd.xlane.f32.xlu1 %v4298_v57  ;;  %4450 = vrot.lane.b32.xlu2 %v8071_v10, %s7183_s2  ;;  %6976 = vpow2.f32 %v4260_v48  ;;  %v4160_v10 = vmul.f32 0.35355338, %v9190_v20  ;;  %v4262_v48 = vmul.f32 1.442695, %v4236_v5  ;;  %v4238_v57 = vsub.f32 %v9151_v59, %v4216_v28 }
 0xca1   : > { %6978 = vpow2.f32 %v4254_v6 }
 0xca2   : > { %v9245_v22 = vadd.f32 %v4160_v10, %v8335_v37 }
 0xca3   : > { %v4213_v32 = vpop.xlane.xlu2 %4212  ;;  %v4201_v18 = vpop.xlane.xlu1 %4200 }
 0xca4   : > { %v4237_v45 = vsub.f32 %v9177_v16, %v4213_v32  ;;  %v4220_v6 = vsel %vm2329_vm10, %v9245_v22, -inf  ;;  %v4266_v16 = vmul.f32 1.442695, %v4238_v57 }
 0xca6   : > { %v9233_v43 = vpop.eup %6976  ;;  %v4264_v15 = vmul.f32 1.442695, %v4237_v45  ;;  %v4239_v45 = vsub.f32 %v9159_v7, %v4219_v2 }
 0xca7   : > { %v4301_v39 = vsel %vm2329_vm10, %v9233_v43, 0.0  ;;  %v9237_v4 = vpop.eup %6978 }
 0xca8   : > { %4302 = vadd.xlane.f32.xlu1 %v4301_v39  ;;  %v4292_v56 = vsel %vm2329_vm10, %v9237_v4, 0.0  ;;  %6980 = vpow2.f32 %v4264_v15  ;;  %v4233_v39 = vsub.f32 %v9180_v17, %v4201_v18  ;;  %v4268_v10 = vmul.f32 1.442695, %v4239_v45 }
 0xca9   : > { %6982 = vpow2.f32 %v4262_v48 }
 0xcaa   : > { %v4256_v36 = vmul.f32 1.442695, %v4233_v39  ;;  %6984 = vpow2.f32 %v4266_v16 }
 0xcac   : > { %6986 = vpow2.f32 %v4256_v36 }
 0xcad   : > { %6988 = vpow2.f32 %v4268_v10 }
 0xcae   : > { %v9251_v20 = vpop.eup %6980 }
 0xcaf   : > { %v4307_v37 = vsel %vm2329_vm10, %v9251_v20, 0.0 }
 0xcb0   : > { %4293 = vadd.xlane.f32.xlu1 %v4292_v56  ;;  %v9253_v56 = vpop.eup %6982 }
 0xcb1   : > { %v4304_v59 = vsel %vm2329_vm10, %v9253_v56, 0.0  ;;  %v9261_v17 = vpop.eup %6984 }
 0xcb2   : > { %v9263_v28 = vpop.eup %6986  ;;  %v4310_v0 = vsel %vm2329_vm10, %v9261_v17, 0.0 }
 0xcb3   : > { %v4295_v32 = vsel %vm2329_vm10, %v9263_v28, 0.0  ;;  %v9274_v15 = vpop.eup %6988 }
 0xcb4   : > { %v4313_v57 = vsel %vm2329_vm10, %v9274_v15, 0.0 }
 0xcbf   : > { %4221 = vmax.xlane.f32.xlu0 %v4220_v6 }
 0xcc7   : > { %4308 = vadd.xlane.f32.xlu0 %v4307_v37 }
 0xcc9   : > { %4305 = vadd.xlane.f32.xlu2 %v4304_v59  ;;  %4475 = vrot.lane.b32.xlu1 %v8101_v33, %s7183_s2  ;;  %v4276_v33 = vpop.xlane.xlu2 %4275 }
 0xcca   : > { %6990 = vrcp.f32 %v4276_v33 }
 0xccf   : > { %4311 = vadd.xlane.f32.xlu0 %v4310_v0 }
 0xcd0   : > { %v6991_v2 = vpop.eup %6990 }
 0xcd1   : > { %4296 = vadd.xlane.f32.xlu2 %v4295_v32 }
 0xce3   : > { %4500 = vrot.lane.b32.xlu0 %v8110_v27, %s7183_s2  ;;  %v4338_v27 = vmul.f32 %v6991_v2, %v9186_v58 }
 0xce5   : > { %v4354_v37 = vpack.c.bf16 %v4338_v27, %v4338_v27 }
 0xce7   : > { %v4372_v10 = vunpack.c.l.b16 %v4354_v37 }
 0xce9   : > { %4525 = vrot.lane.b32.xlu2 %v8133_v51, %s7183_s2 }
 0xceb   : > { %v4288_v5 = vpop.xlane.xlu1 %4287 }
 0xcf3   : > { %v4225_v48 = vpop.xlane.xlu1 %4224  ;;  %v4291_v18 = vpop.xlane.xlu2 %4290  ;;  %4314 = vadd.xlane.f32.xlu1 %v4313_v57 }
 0xcf4   : > { %6992 = vrcp.f32 %v4291_v18  ;;  %v4279_v7 = vpop.xlane.xlu0 %4278  ;;  %v4241_v33 = vsub.f32 %v9201_v53, %v4225_v48 }
 0xcf5   : > { %6994 = vrcp.f32 %v4279_v7 }
 0xcf6   : > { %6996 = vrcp.f32 %v4288_v5 }
 0xcfa   : > { %v6993_v51 = vpop.eup %6992 }
 0xcfb   : > { %v6995_v6 = vpop.eup %6994  ;;  %v4282_v39 = vpop.xlane.xlu1 %4281  ;;  %v4343_v0 = vmul.f32 %v6993_v51, %v9204_v42 }
 0xcfc   : > { %v4285_v16 = vpop.xlane.xlu2 %4284  ;;  %v6997_v36 = vpop.eup %6996  ;;  %v4339_v59 = vmul.f32 %v6995_v6, %v9206_v19  ;;  %6998 = vrcp.f32 %v4282_v39  ;;  %v4272_v19 = vmul.f32 1.442695, %v4241_v33 }
 0xcfd   : > { %7000 = vrcp.f32 %v4285_v16  ;;  %v4342_v45 = vmul.f32 %v6997_v36, %v9195_v63  ;;  %v4359_v58 = vpack.c.bf16 %v4343_v0, %v4343_v0 }
 0xcfe   : > { %v4355_v32 = vpack.c.bf16 %v4339_v59, %v4339_v59  ;;  %7002 = vpow2.f32 %v4272_v19 }
 0xcff   : > { %v4358_v2 = vpack.c.bf16 %v4342_v45, %v4342_v45  ;;  %v4423_v42 = vunpack.c.l.b16 %v4359_v58 }
 0xd00   : > { %v4373_v5 = vunpack.c.l.b16 %v4355_v32  ;;  %v6583_v32 = vpack.i.bf16 %v8837_v12, %v8835_v29 }
 0xd01   : > { %v4422_v39 = vunpack.c.l.b16 %v4358_v2 }
 0xd02   : > { %v6999_v18 = vpop.eup %6998  ;;  %v4374_v57 = vpack.c.b16 %v4373_v5, %v4372_v10 }
 0xd03   : > { %v7001_v7 = vpop.eup %7000  ;;  %v4340_v27 = vmul.f32 %v6999_v18, %v9216_v60  ;;  %v4424_v36 = vpack.c.b16 %v4423_v42, %v4422_v39  ;;  %v6573_v60 = vpack.i.bf16 %v9075_v38, %v9070_v55  ;;  %v10659_v55 = vpack.i.bf16 %v9115_v3, %v9111_v24 }
 0xd04   : > { %v4451_v8 = vpop.permute.xlu2 %4450  ;;  %v4341_v6 = vmul.f32 %v7001_v7, %v9214_v34  ;;  %6394 = vmatmul.msk.bf16.vlgmr.msra.gmra.mxu0 %vm2329_vm10, %v4374_v57  ;;  %v9290_v34 = vpop.eup %7002  ;;  %v6633_v18 = vpack.i.bf16 %v9082_v1, %v9078_v25  ;;  %v6663_v42 = vpack.i.bf16 %v9113_v35, %v9109_v21  ;;  %v6568_v35 = vpack.i.bf16 %v8804_v50, %v8797_v49 }
 0xd05   : > { %4463 = vmatpush.bf16.msrb.mxu3 %v4451_v8  ;;  %v4356_v63 = vpack.c.bf16 %v4340_v27, %v4340_v27  ;;  %v4319_v8 = vsel %vm2329_vm10, %v9290_v34, 0.0 }
 0xd06   : > { %v4357_v51 = vpack.c.bf16 %v4341_v6, %v4341_v6 }
 0xd07   : > { %v4397_v53 = vunpack.c.l.b16 %v4356_v63  ;;  %v4426_v48 = vpop.permute.xlu0 %4425 }
 0xd08   : > { %v4398_v16 = vunpack.c.l.b16 %v4357_v51  ;;  %4438 = vmatpush.bf16.msrb.mxu2 %v4426_v48 }
 0xd0a   : > { %v4399_v37 = vpack.c.b16 %v4398_v16, %v4397_v53 }
 0xd0b   : > { %6396 = vmatmul.msk.bf16.vlgmr.msrb.gmra.mxu2 %vm2329_vm10, %v4424_v36 }
 0xd0c   : > { %6395 = vmatmul.msk.bf16.vlgmr.msra.gmra.mxu1 %vm2329_vm10, %v4399_v37  ;;  %4550 = vrot.lane.b32.xlu1 %v8173_v46, %s7183_s2  ;;  %s6212_s2 = scalar_lea.hbm %s10540_s27, %s8148_s5 }
 0xd12   : > { %4320 = vadd.xlane.f32.xlu2 %v4319_v8 }
 0xd13   : > { %v4300_v59 = vpop.xlane.xlu1 %4299 }
 0xd14   : > { %6574 = vrot.lane.b32.xlu1 %v6573_v60, %s7184_s3 }
 0xd1b   : > { %v4303_v0 = vpop.xlane.xlu1 %4302 }
 0xd1c   : > { %7004 = vrcp.f32 %v4303_v0 }
 0xd1d   : > { %7006 = vrcp.f32 %v4300_v59 }
 0xd22   : > { %v7005_v46 = vpop.eup %7004 }
 0xd23   : > { %v7007_v45 = vpop.eup %7006  ;;  %v4347_v10 = vmul.f32 %v7005_v46, %v9233_v43  ;;  %v4294_v29 = vpop.xlane.xlu1 %4293 }
 0xd24   : > { %v4346_v5 = vmul.f32 %v7007_v45, %v9226_v44 }
 0xd25   : > { %v4363_v58 = vpack.c.bf16 %v4347_v10, %v4347_v10 }
 0xd26   : > { %v4362_v57 = vpack.c.bf16 %v4346_v5, %v4346_v5 }
 0xd27   : > { %v4473_v7 = vunpack.c.l.b16 %v4363_v58 }
 0xd28   : > { %v4472_v43 = vunpack.c.l.b16 %v4362_v57  ;;  %v6588_v57 = vpack.i.bf16 %v9094_v14, %v9092_v26  ;;  %v6613_v26 = vpack.i.bf16 %v8860_v62, %v8858_v52 }
 0xd2a   : > { %6584 = vrot.lane.b32.xlu2 %v6583_v32, %s7185_s0  ;;  %v4474_v3 = vpack.c.b16 %v4473_v7, %v4472_v43  ;;  %v6598_v43 = vpack.i.bf16 %v8795_v31, %v8789_v30  ;;  %v10661_v31 = vld [vmem:[#allocation41_spill] sm:$0xff] }
 0xd32   : > { %v4222_v33 = vpop.xlane.xlu0 %4221  ;;  %6619 = vrot.lane.b32.xlu2 %v10659_v55, %s7184_s3 }
 0xd33   : > { %v4240_v38 = vsub.f32 %v9245_v22, %v4222_v33  ;;  %v6648_v22 = vpack.i.bf16 %v9098_v41, %v9096_v40 }
 0xd35   : > { %v4270_v12 = vmul.f32 1.442695, %v4240_v38 }
 0xd37   : > { %7008 = vpow2.f32 %v4270_v12 }
 0xd38   : > { %7010 = vrcp.f32 %v4294_v29 }
 0xd3a   : > { %6634 = vrot.lane.b32.xlu2 %v6633_v18, %s7184_s3  ;;  %v4309_v25 = vpop.xlane.xlu0 %4308 }
 0xd3b   : > { %v4476_v2 = vpop.permute.xlu1 %4475 }
 0xd3c   : > { %v4306_v27 = vpop.xlane.xlu2 %4305  ;;  %4488 = vmatpush.bf16.msrb.mxu0 %v4476_v2  ;;  %v6603_v2 = vpack.i.bf16 %v9102_v54, %v9100_v13  ;;  %v6643_v13 = vpack.i.bf16 %v10661_v31, %v8839_v47 }
 0xd3d   : > { %v9310_v24 = vpop.eup %7008  ;;  %7012 = vrcp.f32 %v4306_v27 }
 0xd3e   : > { %v4316_v44 = vsel %vm2329_vm10, %v9310_v24, 0.0  ;;  %7014 = vrcp.f32 %v4309_v25  ;;  %v7011_v19 = vpop.eup %7010  ;;  %v10663_v25 = vld [vmem:[#allocation40_spill] sm:$0xff] }
 0xd3f   : > { %4317 = vadd.xlane.f32.xlu0 %v4316_v44  ;;  %6398 = vmatmul.msk.bf16.vlgmr.msrb.gmra.mxu0 %vm2329_vm10, %v4474_v3  ;;  %v4344_v63 = vmul.f32 %v7011_v19, %v9237_v4  ;;  %v6628_v3 = vpack.i.bf16 %v8812_v9, %v8808_v61 }
 0xd41   : > { %v4360_v39 = vpack.c.bf16 %v4344_v63, %v4344_v63  ;;  %v10664_v63 = vld [vmem:[#allocation43_spill] sm:$0xff] }
 0xd42   : > { %6649 = vrot.lane.b32.xlu2 %v6648_v22, %s7184_s3  ;;  %v4312_v36 = vpop.xlane.xlu0 %4311  ;;  %v10662_v22 = vld [vmem:[#allocation39_spill] sm:$0xff] }
 0xd43   : > { %v7013_v6 = vpop.eup %7012  ;;  %v4447_v60 = vunpack.c.l.b16 %v4360_v39 }
 0xd44   : > { %v4297_v1 = vpop.xlane.xlu2 %4296  ;;  %v7015_v51 = vpop.eup %7014  ;;  %v4348_v41 = vmul.f32 %v7013_v6, %v9253_v56  ;;  %v10660_v56 = vpack.i.bf16 %v9136_v23, %v9124_v11 }
 0xd45   : > { %7016 = vrcp.f32 %v4297_v1  ;;  %v4349_v16 = vmul.f32 %v7015_v51, %v9251_v20  ;;  %v6658_v1 = vpack.i.bf16 %v10663_v25, %v10662_v22  ;;  %v10665_v51 = vld [vmem:[#allocation42_spill] sm:$0xff] }
 0xd46   : > { %v4364_v8 = vpack.c.bf16 %v4348_v41, %v4348_v41  ;;  %7018 = vrcp.f32 %v4312_v36 }
 0xd47   : > { %v4365_v4 = vpack.c.bf16 %v4349_v16, %v4349_v16 }
 0xd49   : > { %v4498_v20 = vunpack.c.l.b16 %v4365_v4 }
 0xd4a   : > { %6664 = vrot.lane.b32.xlu2 %v6663_v42, %s7184_s3 }
 0xd4b   : > { %v7017_v40 = vpop.eup %7016 }
 0xd4c   : > { %v4345_v53 = vmul.f32 %v7017_v40, %v9263_v28  ;;  %v4526_v48 = vpop.permute.xlu2 %4525  ;;  %v4497_v28 = vunpack.c.l.b16 %v4364_v8  ;;  %v7019_v50 = vpop.eup %7018  ;;  %v10666_v40 = vpack.i.bf16 %v10664_v63, %v10665_v51 }
 0xd4d   : > { %4538 = vmatpush.bf16.msra.mxu2 %v4526_v48  ;;  %v4350_v46 = vmul.f32 %v7019_v50, %v9261_v17 }
 0xd4e   : > { %v4361_v37 = vpack.c.bf16 %v4345_v53, %v4345_v53  ;;  %v4499_v32 = vpack.c.b16 %v4498_v20, %v4497_v28  ;;  %v10668_v28 = vld [vmem:[#allocation24_spill] sm:$0xff] }
 0xd4f   : > { %v4366_v11 = vpack.c.bf16 %v4350_v46, %v4350_v46 }
 0xd50   : > { %v4448_v21 = vunpack.c.l.b16 %v4361_v37 }
 0xd51   : > { %v4522_v33 = vunpack.c.l.b16 %v4366_v11 }
 0xd52   : > { %v4449_v59 = vpack.c.b16 %v4448_v21, %v4447_v60  ;;  %6679 = vrot.lane.b32.xlu2 %v10660_v56, %s7184_s3 }
 0xd53   : > { %6569 = vrot.lane.b32.xlu0 %v6568_v35, %s7185_s0 }
 0xd54   : > { %6397 = vmatmul.msk.bf16.vlgmr.msrb.gmra.mxu3 %vm2329_vm10, %v4449_v59 }
 0xd55   : > { %v4501_v0 = vpop.permute.xlu0 %4500 }
 0xd56   : > { %4513 = vmatpush.bf16.msrb.mxu1 %v4501_v0  ;;  %v10669_v0 = vld [vmem:[#allocation23_spill] sm:$0xff] }
 0xd59   : > { %6399 = vmatmul.msk.bf16.vlgmr.msrb.gmra.mxu1 %vm2329_vm10, %v4499_v32 }
 0xd66   : > { %v4315_v49 = vpop.xlane.xlu1 %4314 }
 0xd67   : > { %7020 = vrcp.f32 %v4315_v49 }
 0xd6d   : > { %v7021_v45 = vpop.eup %7020 }
 0xd6e   : > { %v4351_v23 = vmul.f32 %v7021_v45, %v9274_v15 }
 0xd70   : > { %v4367_v10 = vpack.c.bf16 %v4351_v23, %v4351_v23 }
 0xd72   : > { %v4523_v55 = vunpack.c.l.b16 %v4367_v10 }
 0xd74   : > { %v4524_v38 = vpack.c.b16 %v4523_v55, %v4522_v33 }
 0xd76   : > { %6400 = vmatmul.msk.bf16.vlgmr.msra.gmra.mxu2 %vm2329_vm10, %v4524_v38 }
 0xd7e   : > { %v4551_v5 = vpop.permute.xlu1 %4550 }
 0xd7f   : > { %4563 = vmatpush.bf16.msra.mxu3 %v4551_v5 }
 0xd81   : > { %v4390_v29 = vpop.f32.mrf.mxu0 }
 0xd85   : > { %v4321_v30 = vpop.xlane.xlu2 %4320 }
 0xd86   : > { %7022 = vrcp.f32 %v4321_v30  ;;  %v6575_v21 = vpop.permute.xlu1 %6574 }
 0xd87   : > { %v6577_v49 = vunpack.i.h.bf16 %v6575_v21  ;;  %v6576_v50 = vunpack.i.l.bf16 %v6575_v21  ;;  %v10674_v21 = vld [vmem:[#allocation33_spill] sm:$0xff] }
 0xd89   : > { %v4392_v12 = vpop.f32.mrf.mxu0  ;;  %v4415_v58 = vpop.f32.mrf.mxu1 }
 0xd8a   : > { %v6578_v18 = vpack.i.bf16 %v4392_v12, %v4390_v29 }
 0xd8c   : > { %6579 = vrot.lane.b32.xlu1 %v6578_v18, %s7186_s10  ;;  %v7023_v44 = vpop.eup %7022 }
 0xd8d   : > { %v4353_v52 = vmul.f32 %v7023_v44, %v9290_v34  ;;  %v6493_v34 = vld [vmem:[%s10667_s13 + $0x8] sm:$0xff]  ;;  %v6585_v12 = vpop.permute.xlu2 %6584 }
 0xd8e   : > { %v4440_v7 = vpop.f32.mrf.mxu2  ;;  %4869 = vmatpush.bf16.msra.mxu0 %v6493_v34  ;;  %v6587_v18 = vunpack.i.h.bf16 %v6585_v12 }
 0xd8f   : > { %v4369_v19 = vpack.c.bf16 %v4353_v52, %v4353_v52 }
 0xd91   : > { %v4417_v17 = vpop.f32.mrf.mxu1  ;;  %v4548_v6 = vunpack.c.l.b16 %v4369_v19 }
 0xd92   : > { %v6593_v15 = vpack.i.bf16 %v4417_v17, %v4415_v58  ;;  %v6586_v17 = vunpack.i.l.bf16 %v6585_v12  ;;  %v10677_v12 = vld [vmem:[#allocation28_spill] sm:$0xff] }
 0xd94   : > { %6589 = vrot.lane.b32.xlu1 %v6588_v57, %s7184_s3  ;;  %6594 = vrot.lane.b32.xlu0 %v6593_v15, %s7186_s10 }
 0xd96   : > { %v4442_v27 = vpop.f32.mrf.mxu2 }
 0xd97   : > { %v6608_v14 = vpack.i.bf16 %v4442_v27, %v4440_v7  ;;  %v10671_v27 = vld [vmem:[#allocation27_spill] sm:$0xff] }
 0xd9c   : > { %6599 = vrot.lane.b32.xlu1 %v6598_v43, %s7185_s0  ;;  %6604 = vrot.lane.b32.xlu0 %v6603_v2, %s7184_s3  ;;  %v10670_v43 = vld [vmem:[#allocation29_spill] sm:$0xff] }
 0xd9d   : > { %v4765_v2 = vsel %vm2087_vm2, %v10670_v43, %v6587_v18 }
 0xda4   : > { %6609 = vrot.lane.b32.xlu1 %v6608_v14, %s7186_s10  ;;  %6614 = vrot.lane.b32.xlu0 %v6613_v26, %s7185_s0  ;;  %v4764_v26 = vsel %vm2087_vm2, %v10671_v27, %v6586_v17 }
 0xdac   : > { %6629 = vrot.lane.b32.xlu0 %v6628_v3, %s7185_s0 }
 0xdb2   : > { %v4318_v54 = vpop.xlane.xlu0 %4317 }
 0xdb3   : > { %7024 = vrcp.f32 %v4318_v54 }
 0xdb4   : > { %6644 = vrot.lane.b32.xlu0 %v6643_v13, %s7185_s0 }
 0xdb9   : > { %v7025_v62 = vpop.eup %7024 }
 0xdba   : > { %v4352_v61 = vmul.f32 %v7025_v62, %v9310_v24  ;;  %v6492_v24 = vld [vmem:[%s10667_s13] sm:$0xff]  ;;  %s837_s13 = sand.u32 1, %s7160_s4  }
 0xdbb   : > { %4870 = vmatpush.bf16.msra.mxu0 %v6492_v24 }
 0xdbc   : > { %v4368_v9 = vpack.c.bf16 %v4352_v61, %v4352_v61  ;;  %6659 = vrot.lane.b32.xlu0 %v6658_v1, %s7185_s0  ;;  %v4490_v39 = vpop.f32.mrf.mxu0 }
 0xdbe   : > { %v4547_v42 = vunpack.c.l.b16 %v4368_v9  ;;  %v10672_v9 = vld [vmem:[#allocation26_spill] sm:$0xff] }
 0xdc0   : > { %v4549_v47 = vpack.c.b16 %v4548_v6, %v4547_v42  ;;  %v10673_v42 = vld [vmem:[#allocation25_spill] sm:$0xff] }
 0xdc2   : > { %6401 = vmatmul.msk.bf16.vlgmr.msra.gmra.mxu3 %vm2329_vm10, %v4549_v47 }
 0xdc4   : > { %6674 = vrot.lane.b32.xlu0 %v10666_v40, %s7185_s0  ;;  %v4492_v36 = vpop.f32.mrf.mxu0  ;;  %s10741_s0 = sld [smem:[#allocation46_spill]] }
 0xdc5   : > { %v6638_v37 = vpack.i.bf16 %v4492_v36, %v4490_v39  ;;  %v6570_v35 = vpop.permute.xlu0 %6569 }
 0xdc6   : > { %v6572_v4 = vunpack.i.h.bf16 %v6570_v35  ;;  %v6571_v59 = vunpack.i.l.bf16 %v6570_v35 }
 0xdc8   : > { %v4763_v20 = vsel %vm2087_vm2, %v10668_v28, %v6572_v4  ;;  %v4762_v32 = vsel %vm2087_vm2, %v10669_v0, %v6571_v59  ;;  %v10675_v4 = vld [vmem:[#allocation31_spill] sm:$0xff] }
 0xdc9   : > { %v4778_v23 = vsel %vm2329_vm10, %v4762_v32, %v6576_v50  ;;  %v4779_v10 = vsel %vm2329_vm10, %v4763_v20, %v6577_v49 }
 0xdd6   : > { %v4515_v16 = vpop.f32.mrf.mxu1 }
 0xdd7   : > { %v4465_v41 = vpop.f32.mrf.mxu3 }
 0xdde   : > { %v4517_v8 = vpop.f32.mrf.mxu1 }
 0xddf   : > { %v4467_v53 = vpop.f32.mrf.mxu3  ;;  %v6653_v60 = vpack.i.bf16 %v4517_v8, %v4515_v16 }
 0xde0   : > { %v6623_v48 = vpack.i.bf16 %v4467_v53, %v4465_v41 }
 0xde2   : > { %6624 = vrot.lane.b32.xlu1 %v6623_v48, %s7186_s10 }
 0xdea   : > { %6639 = vrot.lane.b32.xlu1 %v6638_v37, %s7186_s10 }
 0xdf2   : > { %6654 = vrot.lane.b32.xlu1 %v6653_v60, %s7186_s10  ;;  %v6620_v60 = vpop.permute.xlu2 %6619 }
 0xdf3   : > { %v6621_v28 = vunpack.i.l.bf16 %v6620_v60 }
 0xdf9   : > { %v4540_v56 = vpop.f32.mrf.mxu2 }
 0xdfe   : > { %v6580_v46 = vpop.permute.xlu1 %6579 }
 0xdff   : > { %v6582_v45 = vunpack.i.h.bf16 %v6580_v46  ;;  %v6581_v11 = vunpack.i.l.bf16 %v6580_v46 }
 0xe01   : > { %v4795_v33 = vsel %vm4794_vm4, %v4778_v23, %v6581_v11  ;;  %v4796_v55 = vsel %vm4794_vm4, %v4779_v10, %v6582_v45  ;;  %v4542_v5 = vpop.f32.mrf.mxu2 }
 0xe02   : > { %v4811_v38 = vpack.c.bf16 %v4796_v55, %v4795_v33  ;;  %v6668_v29 = vpack.i.bf16 %v4542_v5, %v4540_v56  ;;  %v6622_v56 = vunpack.i.h.bf16 %v6620_v60  ;;  %v10676_v5 = vld [vmem:[#allocation30_spill] sm:$0xff] }
 0xe04   : > { %6410 = vmatmul.msk.bf16.vlgmr.msra.gmra.mxu0 %vm1000_vm0, %v4811_v38  ;;  %6669 = vrot.lane.b32.xlu1 %v6668_v29, %s7186_s10  ;;  %v6635_v38 = vpop.permute.xlu2 %6634 }
 0xe06   : > { %v6590_v58 = vpop.permute.xlu1 %6589  ;;  %v6595_v7 = vpop.permute.xlu0 %6594 }
 0xe07   : > { %v6592_v57 = vunpack.i.h.bf16 %v6590_v58  ;;  %v6591_v15 = vunpack.i.l.bf16 %v6590_v58  ;;  %v6597_v14 = vunpack.i.h.bf16 %v6595_v7  ;;  %v6596_v3 = vunpack.i.l.bf16 %v6595_v7 }
 0xe09   : > { %v4781_v30 = vsel %vm2329_vm10, %v4765_v2, %v6592_v57  ;;  %v4780_v31 = vsel %vm2329_vm10, %v4764_v26, %v6591_v15  ;;  %v6637_v57 = vunpack.i.h.bf16 %v6635_v38  ;;  %v6636_v15 = vunpack.i.l.bf16 %v6635_v38 }
 0xe0a   : > { %v4798_v54 = vsel %vm4794_vm4, %v4781_v30, %v6597_v14  ;;  %v4797_v44 = vsel %vm4794_vm4, %v4780_v31, %v6596_v3 }
 0xe0b   : > { %v4812_v52 = vpack.c.bf16 %v4798_v54, %v4797_v44  ;;  %v10678_v54 = vld [vmem:[#allocation36_spill] sm:$0xff] }
 0xe0e   : > { %v6600_v13 = vpop.permute.xlu1 %6599  ;;  %v6605_v25 = vpop.permute.xlu0 %6604 }
 0xe0f   : > { %v6602_v62 = vunpack.i.h.bf16 %v6600_v13  ;;  %v6601_v22 = vunpack.i.l.bf16 %v6600_v13  ;;  %v6607_v19 = vunpack.i.h.bf16 %v6605_v25  ;;  %v6606_v61 = vunpack.i.l.bf16 %v6605_v25  ;;  %v6650_v13 = vpop.permute.xlu2 %6649 }
 0xe11   : > { %v4767_v6 = vsel %vm2087_vm2, %v10672_v9, %v6602_v62  ;;  %v4766_v47 = vsel %vm2087_vm2, %v10673_v42, %v6601_v22 }
 0xe12   : > { %v4783_v40 = vsel %vm2329_vm10, %v4767_v6, %v6607_v19  ;;  %v4782_v34 = vsel %vm2329_vm10, %v4766_v47, %v6606_v61  ;;  %v6651_v19 = vunpack.i.l.bf16 %v6650_v13 }
 0xe14   : > { %6411 = vmatmul.msk.bf16.gmra.mxu0 %vm1000_vm0, %v4812_v52  ;;  %v10679_v52 = vld [vmem:[#allocation35_spill] sm:$0xff] }
 0xe16   : > { %v6610_v1 = vpop.permute.xlu1 %6609  ;;  %v6615_v48 = vpop.permute.xlu0 %6614 }
 0xe17   : > { %v6612_v63 = vunpack.i.h.bf16 %v6610_v1  ;;  %v6611_v51 = vunpack.i.l.bf16 %v6610_v1  ;;  %v6617_v37 = vunpack.i.h.bf16 %v6615_v48  ;;  %v6616_v8 = vunpack.i.l.bf16 %v6615_v48  ;;  %v10682_v48 = vld [vmem:[#allocation32_spill] sm:$0xff] }
 0xe18   : > { %v6652_v1 = vunpack.i.h.bf16 %v6650_v13 }
 0xe19   : > { %v4799_v41 = vsel %vm4794_vm4, %v4782_v34, %v6611_v51  ;;  %v4800_v24 = vsel %vm4794_vm4, %v4783_v40, %v6612_v63  ;;  %v4769_v35 = vsel %vm2087_vm2, %v10674_v21, %v6617_v37  ;;  %v4768_v59 = vsel %vm2087_vm2, %v10675_v4, %v6616_v8 }
 0xe1a   : > { %v4813_v39 = vpack.c.bf16 %v4800_v24, %v4799_v41  ;;  %v4784_v49 = vsel %vm2329_vm10, %v4768_v59, %v6621_v28  ;;  %v4785_v50 = vsel %vm2329_vm10, %v4769_v35, %v6622_v56  ;;  %v9436_v41 = vld [vmem:[%s10680_s14] ss:$0 sm:$0xff]  ;;  %v6665_v24 = vpop.permute.xlu2 %6664  ;;  %v10683_v56 = vld [vmem:[#allocation7_spill] sm:$0xff]  ;;  %s6301_s14 = sshll.u32 %s837_s13, 3 }
 0xe1b   : > { %v6667_v60 = vunpack.i.h.bf16 %v6665_v24  ;;  %v6666_v21 = vunpack.i.l.bf16 %v6665_v24  ;;  %v10684_v28 = vmax.f32 %v10683_v56, 0.0  ;;  %v10699_v56 = vld [vmem:[#allocation6_spill] sm:$0xff]  ;;  %s839_s3 = scalar_lea.vmem [#allocation2], %s6301_s14  ;;  %s7126_s14 = scalar_lea.hbm %s10540_s27, 16 }
 0xe1e   : > { %v6630_v23 = vpop.permute.xlu0 %6629 }
 0xe1f   : > { %v6632_v10 = vunpack.i.h.bf16 %v6630_v23  ;;  %v6631_v33 = vunpack.i.l.bf16 %v6630_v23 }
 0xe21   : > { %v4771_v29 = vsel %vm2087_vm2, %v10676_v5, %v6632_v10  ;;  %v4770_v58 = vsel %vm2087_vm2, %v10677_v12, %v6631_v33  ;;  %v10687_v5 = vld [vmem:[#allocation10_spill] sm:$0xff] }
 0xe22   : > { %v4786_v7 = vsel %vm2329_vm10, %v4770_v58, %v6636_v15  ;;  %v4787_v43 = vsel %vm2329_vm10, %v4771_v29, %v6637_v57  ;;  %v10688_v29 = vmax.f32 %v10687_v5, 0.0  ;;  %v10689_v57 = vld [vmem:[#allocation9_spill] sm:$0xff] }
 0xe23   : > { %v10690_v15 = vmax.f32 %v10689_v57, 0.0 }
 0xe24   : > { %6412 = vmatmul.msk.bf16.gmra.mxu0 %vm1000_vm0, %v4813_v39  ;;  %v10681_v39 = vld [vmem:[#allocation34_spill] sm:$0xff] }
 0xe26   : > { %v6645_v14 = vpop.permute.xlu0 %6644 }
 0xe27   : > { %v6647_v3 = vunpack.i.h.bf16 %v6645_v14  ;;  %v6646_v30 = vunpack.i.l.bf16 %v6645_v14 }
 0xe29   : > { %v4773_v44 = vsel %vm2087_vm2, %v10678_v54, %v6647_v3  ;;  %v4772_v62 = vsel %vm2087_vm2, %v10679_v52, %v6646_v30  ;;  %v10693_v54 = vld [vmem:[#allocation12_spill] sm:$0xff] }
 0xe2a   : > { %v4788_v61 = vsel %vm2329_vm10, %v4772_v62, %v6651_v19  ;;  %v4789_v9 = vsel %vm2329_vm10, %v4773_v44, %v6652_v1  ;;  %v10694_v44 = vmax.f32 %v10693_v54, 0.0  ;;  %v6680_v19 = vpop.permute.xlu2 %6679 }
 0xe2e   : > { %v6660_v63 = vpop.permute.xlu0 %6659 }
 0xe2f   : > { %v6662_v51 = vunpack.i.h.bf16 %v6660_v63  ;;  %v6661_v40 = vunpack.i.l.bf16 %v6660_v63  ;;  %v6681_v63 = vunpack.i.l.bf16 %v6680_v19 }
 0xe45   : > { %v4565_v53 = vpop.f32.mrf.mxu3 }
 0xe4d   : > { %v4567_v16 = vpop.f32.mrf.mxu3 }
 0xe4e   : > { %v6683_v36 = vpack.i.bf16 %v4567_v16, %v4565_v53  ;;  %v4775_v53 = vsel %vm2087_vm2, %v10681_v39, %v6662_v51  ;;  %v4774_v16 = vsel %vm2087_vm2, %v10682_v48, %v6661_v40 }
 0xe4f   : > { %v4790_v4 = vsel %vm2329_vm10, %v4774_v16, %v6666_v21  ;;  %v4791_v59 = vsel %vm2329_vm10, %v4775_v53, %v6667_v60 }
 0xe50   : > { %6684 = vrot.lane.b32.xlu1 %v6683_v36, %s7186_s10  ;;  %s854_s10 = scalar_lea.vmem %s10741_s0, %s6305_s11  ;;  %s6214_s0 = sshll.u32 %s839_s3, 4  ;;  %s6215_s0 = int_to_ptr.vmem [resolvable:$true] %s6214_s0 }
 0xe54   : > { %v6625_v20 = vpop.permute.xlu1 %6624 }
 0xe55   : > { %v6627_v0 = vunpack.i.h.bf16 %v6625_v20  ;;  %v6626_v32 = vunpack.i.l.bf16 %v6625_v20 }
 0xe57   : > { %v4801_v46 = vsel %vm4794_vm4, %v4784_v49, %v6626_v32  ;;  %v4802_v45 = vsel %vm4794_vm4, %v4785_v50, %v6627_v0 }
 0xe58   : > { %v4814_v11 = vpack.c.bf16 %v4802_v45, %v4801_v46 }
 0xe5a   : > { %6413 = vmatmul.msk.bf16.gmra.mxu0 %vm1000_vm0, %v4814_v11  ;;  %v10685_v11 = vld [vmem:[#allocation8_spill] sm:$0xff] }
 0xe5b   : > { %v10686_v23 = vmax.f32 %v10685_v11, 0.0 }
 0xe5c   : > { %v6640_v55 = vpop.permute.xlu1 %6639 }
 0xe5d   : > { %v6642_v18 = vunpack.i.h.bf16 %v6640_v55  ;;  %v6641_v17 = vunpack.i.l.bf16 %v6640_v55 }
 0xe5f   : > { %v4803_v2 = vsel %vm4794_vm4, %v4786_v7, %v6641_v17  ;;  %v4804_v27 = vsel %vm4794_vm4, %v4787_v43, %v6642_v18 }
 0xe60   : > { %v4815_v26 = vpack.c.bf16 %v4804_v27, %v4803_v2 }
 0xe64   : > { %v6655_v31 = vpop.permute.xlu1 %6654 }
 0xe65   : > { %v6657_v22 = vunpack.i.h.bf16 %v6655_v31  ;;  %v6656_v25 = vunpack.i.l.bf16 %v6655_v31 }
 0xe67   : > { %v4805_v6 = vsel %vm4794_vm4, %v4788_v61, %v6656_v25  ;;  %v4806_v42 = vsel %vm4794_vm4, %v4789_v9, %v6657_v22  ;;  %v6675_v22 = vpop.permute.xlu0 %6674  ;;  %v10695_v61 = vld [vmem:[#allocation38_spill] sm:$0xff] }
 0xe68   : > { %v4816_v47 = vpack.c.bf16 %v4806_v42, %v4805_v6  ;;  %v6677_v25 = vunpack.i.h.bf16 %v6675_v22  ;;  %v6676_v1 = vunpack.i.l.bf16 %v6675_v22  ;;  %v10696_v6 = vld [vmem:[#allocation37_spill] sm:$0xff] }
 0xe6a   : > { %6414 = vmatmul.msk.bf16.gmra.mxu0 %vm1000_vm0, %v4815_v26  ;;  %v10691_v26 = vld [vmem:[#allocation11_spill] sm:$0xff]  ;;  %v4777_v9 = vsel %vm2087_vm2, %v10695_v61, %v6677_v25  ;;  %v4776_v42 = vsel %vm2087_vm2, %v10696_v6, %v6676_v1 }
 0xe6b   : > { %v10692_v14 = vmax.f32 %v10691_v26, 0.0  ;;  %v4792_v24 = vsel %vm2329_vm10, %v4776_v42, %v6681_v63 }
 0xe76   : > { %v6670_v34 = vpop.permute.xlu1 %6669 }
 0xe77   : > { %v6672_v36 = vunpack.i.h.bf16 %v6670_v34  ;;  %v6671_v37 = vunpack.i.l.bf16 %v6670_v34 }
 0xe79   : > { %v4807_v0 = vsel %vm4794_vm4, %v4790_v4, %v6671_v37  ;;  %v4808_v32 = vsel %vm4794_vm4, %v4791_v59, %v6672_v36 }
 0xe7a   : > { %6415 = vmatmul.msk.bf16.gmra.mxu0 %vm1000_vm0, %v4816_v47  ;;  %v4817_v50 = vpack.c.bf16 %v4808_v32, %v4807_v0  ;;  %v6682_v47 = vunpack.i.h.bf16 %v6680_v19 }
 0xe7c   : > { %v4793_v39 = vsel %vm2329_vm10, %v4777_v9, %v6682_v47  ;;  %v10706_v47 = vld [vmem:[#allocation17_spill] sm:$0xff] }
 0xe7d   : > { %v10707_v63 = vmax.f32 %v10706_v47, 0.0 }
 0xe81   : > { %v4872_v8 = vpop.f32.mrf.mxu0 }
 0xe82   : > { %v4873_v35 = vadd.f32 %v9436_v41, %v4872_v8  ;;  %v10697_v8 = vld [vmem:[#allocation13_spill] sm:$0xff] }
 0xe83   : > { %v10698_v60 = vmax.f32 %v10697_v8, 0.0 }
 0xe84   : > { %v4912_v20 = vadd.f32 %v4873_v35, %v10684_v28 }
 0xe86   : > { %v4930_v49 = vsel %vm1000_vm0, %v4912_v20, 0.0 }
 0xe87   : > { %4931 = vadd.xlane.f32.xlu0 %v4930_v49 }
 0xe89   : > { %v4874_v46 = vpop.f32.mrf.mxu0 }
 0xe8a   : > { %v4875_v45 = vadd.f32 %v9436_v41, %v4874_v46  ;;  %6416 = vmatmul.msk.bf16.gmra.mxu0 %vm1000_vm0, %v4817_v50 }
 0xe8c   : > { %v4913_v10 = vadd.f32 %v4875_v45, %v10686_v23  ;;  %v10700_v23 = vld [vmem:[#allocation14_spill] sm:$0xff] }
 0xe8e   : > { %v4933_v33 = vsel %vm1000_vm0, %v4913_v10, 0.0 }
 0xe8f   : > { %4934 = vadd.xlane.f32.xlu2 %v4933_v33  ;;  %v10701_v33 = vmax.f32 %v10700_v23, 0.0 }
 0xe91   : > { %v4877_v55 = vpop.f32.mrf.mxu0 }
 0xe92   : > { %v4878_v38 = vadd.f32 %v9436_v41, %v4877_v55 }
 0xe94   : > { %v9458_v12 = vadd.f32 %v4878_v38, %v10688_v29 }
 0xe96   : > { %v4936_v58 = vsel %vm1000_vm0, %v9458_v12, 0.0 }
 0xe97   : > { %4937 = vadd.xlane.f32.xlu1 %v4936_v58 }
 0xe99   : > { %v4879_v18 = vpop.f32.mrf.mxu0 }
 0xe9a   : > { %v4880_v17 = vadd.f32 %v9436_v41, %v4879_v18 }
 0xe9c   : > { %v9465_v7 = vadd.f32 %v4880_v17, %v10690_v15  ;;  %v10702_v15 = vld [vmem:[#allocation15_spill] sm:$0xff] }
 0xe9e   : > { %v4939_v43 = vsel %vm1000_vm0, %v9465_v7, 0.0 }
 0xe9f   : > { %4940 = vadd.xlane.f32.xlu0 %v4939_v43  ;;  %v10703_v43 = vmax.f32 %v10702_v15, 0.0 }
 0xea1   : > { %v4882_v2 = vpop.f32.mrf.mxu0 }
 0xea2   : > { %v4883_v27 = vadd.f32 %v9436_v41, %v4882_v2 }
 0xea4   : > { %v9472_v3 = vadd.f32 %v4883_v27, %v10692_v14 }
 0xea6   : > { %v4942_v30 = vsel %vm1000_vm0, %v9472_v3, 0.0 }
 0xea7   : > { %4943 = vadd.xlane.f32.xlu2 %v4942_v30 }
 0xea9   : > { %v4884_v31 = vpop.f32.mrf.mxu0 }
 0xeaa   : > { %v4885_v13 = vadd.f32 %v9436_v41, %v4884_v31 }
 0xeac   : > { %v9479_v52 = vadd.f32 %v4885_v13, %v10694_v44  ;;  %v10704_v44 = vld [vmem:[#allocation16_spill] sm:$0xff] }
 0xeae   : > { %v4945_v62 = vsel %vm1000_vm0, %v9479_v52, 0.0 }
 0xeaf   : > { %4946 = vadd.xlane.f32.xlu1 %v4945_v62  ;;  %v10705_v62 = vmax.f32 %v10704_v44, 0.0 }
 0xec2   : > { %v6685_v51 = vpop.permute.xlu1 %6684 }
 0xec3   : > { %v6687_v40 = vunpack.i.h.bf16 %v6685_v51  ;;  %v6686_v34 = vunpack.i.l.bf16 %v6685_v51 }
 0xec5   : > { %v4809_v53 = vsel %vm4794_vm4, %v4792_v24, %v6686_v34  ;;  %v4810_v48 = vsel %vm4794_vm4, %v4793_v39, %v6687_v40 }
 0xec6   : > { %v4818_v16 = vpack.c.bf16 %v4810_v48, %v4809_v53 }
 0xec8   : > { %6417 = vmatmul.msk.bf16.gmra.mxu0 %vm1000_vm0, %v4818_v16  ;;  %v10708_v16 = vld [vmem:[#allocation18_spill] sm:$0xff] }
 0xed7   : > { %v4887_v36 = vpop.f32.mrf.mxu0 }
 0xed8   : > { %v4888_v37 = vadd.f32 %v9436_v41, %v4887_v36  ;;  %v10709_v36 = vmax.f32 %v10708_v16, 0.0 }
 0xeda   : > { %v9495_v21 = vadd.f32 %v4888_v37, %v10698_v60 }
 0xedc   : > { %v4948_v35 = vsel %vm1000_vm0, %v9495_v21, 0.0 }
 0xedd   : > { %4949 = vadd.xlane.f32.xlu1 %v4948_v35 }
 0xedf   : > { %v4889_v4 = vpop.f32.mrf.mxu0 }
 0xee0   : > { %v4890_v50 = vadd.f32 %v9436_v41, %v4889_v4 }
 0xee2   : > { %v9509_v55 = vadd.f32 %v4890_v50, %v10701_v33 }
 0xee4   : > { %v4951_v18 = vsel %vm1000_vm0, %v9509_v55, 0.0 }
 0xee7   : > { %v4892_v32 = vpop.f32.mrf.mxu0 }
 0xee8   : > { %v4893_v29 = vadd.f32 %v9436_v41, %v4892_v32 }
 0xeef   : > { %v4894_v5 = vpop.f32.mrf.mxu0 }
 0xef0   : > { %v4895_v26 = vadd.f32 %v9436_v41, %v4894_v5  ;;  %v10712_v5 = vld [vmem:[#allocation20_spill] sm:$0xff] }
 0xef7   : > { %v4897_v31 = vpop.f32.mrf.mxu0 }
 0xef8   : > { %v4898_v1 = vadd.f32 %v9436_v41, %v4897_v31  ;;  %v6494_v31 = vld [vmem:[%s10530_s17] sm:$0xff] }
 0xefa   : > { %v4932_v59 = vpop.xlane.xlu0 %4931 }
 0xefb   : > { %v4978_v28 = vmul.f32 %v4932_v59, %v10699_v56 }
 0xefd   : > { %v9500_v0 = vsub.f32 %v4912_v20, %v4978_v28  ;;  %v10710_v28 = vld [vmem:[#allocation19_spill] sm:$0xff] }
 0xefe   : > { %v10711_v32 = vmax.f32 %v10710_v28, 0.0 }
 0xeff   : > { %v5010_v49 = vmul.f32 %v9500_v0, %v9500_v0  ;;  %v4899_v42 = vpop.f32.mrf.mxu0 }
 0xf00   : > { %v4900_v34 = vadd.f32 %v9436_v41, %v4899_v42 }
 0xf01   : > { %v5026_v46 = vsel %vm1000_vm0, %v5010_v49, 0.0 }
 0xf02   : > { %v4935_v45 = vpop.xlane.xlu2 %4934  ;;  %5027 = vadd.xlane.f32.xlu0 %v5026_v46  ;;  %v9564_v37 = vadd.f32 %v4900_v34, %v10709_v36 }
 0xf03   : > { %v4979_v11 = vmul.f32 %v4935_v45, %v10699_v56 }
 0xf04   : > { %v4963_v59 = vsel %vm1000_vm0, %v9564_v37, 0.0 }
 0xf05   : > { %v9511_v38 = vsub.f32 %v4913_v10, %v4979_v11  ;;  %v9522_v10 = vadd.f32 %v4893_v29, %v10703_v43  ;;  %v10713_v29 = vmax.f32 %v10712_v5, 0.0 }
 0xf07   : > { %v5011_v20 = vmul.f32 %v9511_v38, %v9511_v38  ;;  %v4954_v30 = vsel %vm1000_vm0, %v9522_v10, 0.0  ;;  %v4902_v8 = vpop.f32.mrf.mxu0 }
 0xf08   : > { %v4903_v35 = vadd.f32 %v9436_v41, %v4902_v8 }
 0xf09   : > { %v5029_v58 = vsel %vm1000_vm0, %v5011_v20, 0.0 }
 0xf0a   : > { %v4938_v17 = vpop.xlane.xlu1 %4937  ;;  %5030 = vadd.xlane.f32.xlu2 %v5029_v58  ;;  %4952 = vadd.xlane.f32.xlu0 %v4951_v18  ;;  %v9577_v49 = vadd.f32 %v4903_v35, %v10711_v32 }
 0xf0b   : > { %v4980_v57 = vmul.f32 %v4938_v17, %v10699_v56 }
 0xf0d   : > { %v9525_v2 = vsub.f32 %v9458_v12, %v4980_v57  ;;  %v9536_v12 = vadd.f32 %v4895_v26, %v10705_v62  ;;  %v10714_v57 = vld [vmem:[#allocation21_spill] sm:$0xff] }
 0xf0e   : > { %v10715_v15 = vmax.f32 %v10714_v57, 0.0  ;;  %v6495_v26 = vld [vmem:[%s10530_s17 + $0x8] sm:$0xff] }
 0xf0f   : > { %v5012_v27 = vmul.f32 %v9525_v2, %v9525_v2  ;;  %v4957_v19 = vsel %vm1000_vm0, %v9536_v12, 0.0  ;;  %v4904_v11 = vpop.f32.mrf.mxu0  ;;  %5378 = vmatpush.bf16.msra.mxu1 %v6495_v26 }
 0xf10   : > { %v4905_v33 = vadd.f32 %v9436_v41, %v4904_v11 }
 0xf11   : > { %v5032_v14 = vsel %vm1000_vm0, %v5012_v27, 0.0 }
 0xf12   : > { %5033 = vadd.xlane.f32.xlu2 %v5032_v14  ;;  %4955 = vadd.xlane.f32.xlu0 %v4954_v30  ;;  %v4941_v13 = vpop.xlane.xlu0 %4940  ;;  %v9591_v58 = vadd.f32 %v4905_v33, %v10713_v29 }
 0xf13   : > { %v4981_v54 = vmul.f32 %v4941_v13, %v10699_v56  ;;  %5379 = vmatpush.bf16.msra.mxu1 %v6494_v31 }
 0xf15   : > { %v9539_v22 = vsub.f32 %v9465_v7, %v4981_v54  ;;  %v9550_v7 = vadd.f32 %v4898_v1, %v10707_v63 }
 0xf17   : > { %v5013_v25 = vmul.f32 %v9539_v22, %v9539_v22  ;;  %v4960_v24 = vsel %vm1000_vm0, %v9550_v7, 0.0 }
 0xf19   : > { %v5035_v61 = vsel %vm1000_vm0, %v5013_v25, 0.0 }
 0xf1a   : > { %4958 = vadd.xlane.f32.xlu2 %v4957_v19  ;;  %v4944_v9 = vpop.xlane.xlu2 %4943  ;;  %5036 = vadd.xlane.f32.xlu1 %v5035_v61 }
 0xf1b   : > { %v4982_v6 = vmul.f32 %v4944_v9, %v10699_v56 }
 0xf1d   : > { %v9553_v51 = vsub.f32 %v9472_v3, %v4982_v6 }
 0xf1f   : > { %v5014_v40 = vmul.f32 %v9553_v51, %v9553_v51 }
 0xf21   : > { %v5038_v39 = vsel %vm1000_vm0, %v5014_v40, 0.0 }
 0xf22   : > { %v4947_v53 = vpop.xlane.xlu1 %4946  ;;  %4961 = vadd.xlane.f32.xlu2 %v4960_v24  ;;  %5039 = vadd.xlane.f32.xlu1 %v5038_v39 }
 0xf23   : > { %v4983_v48 = vmul.f32 %v4947_v53, %v10699_v56 }
 0xf25   : > { %v9567_v3 = vsub.f32 %v9479_v52, %v4983_v48  ;;  %v4966_v52 = vsel %vm1000_vm0, %v9577_v49, 0.0 }
 0xf27   : > { %v5015_v60 = vmul.f32 %v9567_v3, %v9567_v3 }
 0xf29   : > { %v5041_v4 = vsel %vm1000_vm0, %v5015_v60, 0.0 }
 0xf2a   : > { %5042 = vadd.xlane.f32.xlu0 %v5041_v4  ;;  %4964 = vadd.xlane.f32.xlu1 %v4963_v59 }
 0xf32   : > { %4967 = vadd.xlane.f32.xlu1 %v4966_v52 }
 0xf45   : > { %v4907_v18 = vpop.f32.mrf.mxu0 }
 0xf46   : > { %v4908_v17 = vadd.f32 %v9436_v41, %v4907_v18 }
 0xf48   : > { %v9598_v43 = vadd.f32 %v4908_v17, %v10715_v15 }
 0xf4a   : > { %v4972_v27 = vsel %vm1000_vm0, %v9598_v43, 0.0 }
 0xf4d   : > { %v4909_v36 = vpop.f32.mrf.mxu0 }
 0xf4e   : > { %v4910_v59 = vadd.f32 %v9436_v41, %v4909_v36  ;;  %v9638_v41 = vld [vmem:[%s10718_s15] ss:$0 sm:$0xff] }
 0xf50   : > { %v4950_v50 = vpop.xlane.xlu1 %4949 }
 0xf51   : > { %v4984_v46 = vmul.f32 %v4950_v50, %v10699_v56 }
 0xf53   : > { %v9583_v45 = vsub.f32 %v9495_v21, %v4984_v46  ;;  %v4969_v21 = vsel %vm1000_vm0, %v9591_v58, 0.0 }
 0xf55   : > { %v5016_v23 = vmul.f32 %v9583_v45, %v9583_v45 }
 0xf57   : > { %v5044_v20 = vsel %vm1000_vm0, %v5016_v23, 0.0 }
 0xf58   : > { %5045 = vadd.xlane.f32.xlu0 %v5044_v20  ;;  %v10716_v20 = vld [vmem:[#allocation22_spill] sm:$0xff] }
 0xf59   : > { %v10717_v5 = vmax.f32 %v10716_v20, 0.0 }
 0xf5b   : > { %v9633_v29 = vadd.f32 %v4910_v59, %v10717_v5 }
 0xf60   : > { %4970 = vadd.xlane.f32.xlu0 %v4969_v21 }
 0xf68   : > { %4973 = vadd.xlane.f32.xlu0 %v4972_v27 }
 0xf75   : > { %v5028_v14 = vpop.xlane.xlu0 %5027 }
 0xf76   : > { %v5074_v30 = vmul.f32 %v5028_v14, %v10699_v56 }
 0xf78   : > { %v5090_v13 = vadd.f32 1e-05, %v5074_v30  ;;  %v9650_v30 = vld [vmem:[%s10529_s16] ss:$0 sm:$0xff] }
 0xf7a   : > { %7026 = vrsqrt.f32 %v5090_v13  ;;  %vm5112_vm5 = vweird.f32 %v5090_v13 }
 0xf7d   : > { %v5031_v54 = vpop.xlane.xlu2 %5030  ;;  %v4953_v44 = vpop.xlane.xlu0 %4952 }
 0xf7e   : > { %v5075_v62 = vmul.f32 %v5031_v54, %v10699_v56  ;;  %v4985_v25 = vmul.f32 %v4953_v44, %v10699_v56 }
 0xf80   : > { %v7027_v1 = vpop.eup %7026  ;;  %v5091_v19 = vadd.f32 1e-05, %v5075_v62  ;;  %v9612_v61 = vsub.f32 %v9509_v55, %v4985_v25 }
 0xf81   : > { %v5107_v9 = vmul.f32 %v7027_v1, %v5090_v13  ;;  %vm5113_vm2 = vweird.f32 %v7027_v1  ;;  %v4975_v13 = vsel %vm1000_vm0, %v9633_v29, 0.0 }
 0xf82   : > { %7028 = vrsqrt.f32 %v5091_v19  ;;  %v5017_v6 = vmul.f32 %v9612_v61, %v9612_v61  ;;  %vm5114_vm6 = vmor %vm5112_vm5, %vm5113_vm2  ;;  %vm5122_vm8 = vweird.f32 %v5091_v19 }
 0xf83   : > { %v5108_v42 = vmul.f32 %v7027_v1, %v5107_v9 }
 0xf84   : > { %v5047_v47 = vsel %vm1000_vm0, %v5017_v6, 0.0 }
 0xf85   : > { %v5109_v63 = vmul.f32 0.5, %v5108_v42  ;;  %v5034_v40 = vpop.xlane.xlu2 %5033  ;;  %5048 = vadd.xlane.f32.xlu2 %v5047_v47  ;;  %v4956_v34 = vpop.xlane.xlu0 %4955 }
 0xf86   : > { %v5076_v24 = vmul.f32 %v5034_v40, %v10699_v56  ;;  %v4986_v39 = vmul.f32 %v4956_v34, %v10699_v56 }
 0xf87   : > { %v5110_v53 = vsub.f32 1.5, %v5109_v63 }
 0xf88   : > { %v7029_v48 = vpop.eup %7028  ;;  %v9619_v55 = vadd.f32 1e-05, %v5076_v24  ;;  %v9622_v16 = vsub.f32 %v9522_v10, %v4986_v39 }
 0xf89   : > { %v5111_v8 = vmul.f32 %v7027_v1, %v5110_v53  ;;  %v5117_v60 = vmul.f32 %v7029_v48, %v5091_v19  ;;  %vm5123_vm7 = vweird.f32 %v7029_v48 }
 0xf8a   : > { %7030 = vrsqrt.f32 %v9619_v55  ;;  %v5018_v35 = vmul.f32 %v9622_v16, %v9622_v16  ;;  %vm5124_vm9 = vmor %vm5122_vm8, %vm5123_vm7  ;;  %vm5132_vm12 = vweird.f32 %v9619_v55 }
 0xf8b   : > { %v5118_v4 = vmul.f32 %v7029_v48, %v5117_v60  ;;  %v5115_v32 = vsel %vm5114_vm6, %v7027_v1, %v5111_v8 }
 0xf8c   : > { %v5050_v28 = vsel %vm1000_vm0, %v5018_v35, 0.0  ;;  %v5266_v18 = vmul.f32 %v5115_v32, %v9500_v0 }
 0xf8d   : > { %v5119_v52 = vmul.f32 0.5, %v5118_v4  ;;  %v4959_v10 = vpop.xlane.xlu2 %4958  ;;  %v5037_v50 = vpop.xlane.xlu1 %5036  ;;  %5051 = vadd.xlane.f32.xlu2 %v5050_v28 }
 0xf8e   : > { %v4987_v46 = vmul.f32 %v4959_v10, %v10699_v56  ;;  %v5077_v11 = vmul.f32 %v5037_v50, %v10699_v56  ;;  %v5285_v0 = vmul.f32 %v9638_v41, %v5266_v18 }
 0xf8f   : > { %v5120_v23 = vsub.f32 1.5, %v5119_v52 }
 0xf90   : > { %v7031_v33 = vpop.eup %7030  ;;  %v9642_v17 = vsub.f32 %v9536_v12, %v4987_v46  ;;  %v5093_v21 = vadd.f32 1e-05, %v5077_v11 }
 0xf91   : > { %v5121_v57 = vmul.f32 %v7029_v48, %v5120_v23  ;;  %v5127_v15 = vmul.f32 %v7031_v33, %v9619_v55  ;;  %vm5133_vm11 = vweird.f32 %v7031_v33 }
 0xf92   : > { %7032 = vrsqrt.f32 %v5093_v21  ;;  %v5019_v27 = vmul.f32 %v9642_v17, %v9642_v17  ;;  %vm5134_vm13 = vmor %vm5132_vm12, %vm5133_vm11  ;;  %vm5142_vm15 = vweird.f32 %v5093_v21 }
 0xf93   : > { %v5125_v26 = vsel %vm5124_vm9, %v7029_v48, %v5121_v57  ;;  %v5128_v14 = vmul.f32 %v7031_v33, %v5127_v15 }
 0xf94   : > { %v5267_v12 = vmul.f32 %v5125_v26, %v9511_v38  ;;  %v5053_v31 = vsel %vm1000_vm0, %v5019_v27, 0.0  ;;  %v9661_v38 = vadd.f32 %v9650_v30, %v5285_v0 }
 0xf95   : > { %v5129_v54 = vmul.f32 0.5, %v5128_v14  ;;  %v4962_v44 = vpop.xlane.xlu2 %4961  ;;  %5054 = vadd.xlane.f32.xlu1 %v5053_v31  ;;  %v5040_v62 = vpop.xlane.xlu1 %5039  ;;  %4976 = vadd.xlane.f32.xlu2 %v4975_v13 }
 0xf96   : > { %v5286_v25 = vmul.f32 %v9638_v41, %v5267_v12  ;;  %v4988_v1 = vmul.f32 %v4962_v44, %v10699_v56  ;;  %v5078_v19 = vmul.f32 %v5040_v62, %v10699_v56 }
 0xf97   : > { %v5130_v9 = vsub.f32 1.5, %v5129_v54 }
 0xf98   : > { %v7033_v6 = vpop.eup %7032  ;;  %v9664_v42 = vadd.f32 %v9650_v30, %v5286_v25  ;;  %v9667_v47 = vsub.f32 %v9550_v7, %v4988_v1  ;;  %v5094_v63 = vadd.f32 1e-05, %v5078_v19 }
 0xf99   : > { %v5131_v40 = vmul.f32 %v7031_v33, %v5130_v9  ;;  %v5137_v34 = vmul.f32 %v7033_v6, %v5093_v21  ;;  %vm5143_vm14 = vweird.f32 %v7033_v6 }
 0xf9a   : > { %v5320_v24 = vpack.c.bf16 %v9664_v42, %v9661_v38  ;;  %7034 = vrsqrt.f32 %v5094_v63  ;;  %v5020_v39 = vmul.f32 %v9667_v47, %v9667_v47  ;;  %vm5144_vm1 = vmor %vm5142_vm15, %vm5143_vm14  ;;  %vm5152_vm4 = vweird.f32 %v5094_v63 }
 0xf9b   : > { %v5138_v53 = vmul.f32 %v7033_v6, %v5137_v34  ;;  %v5135_v48 = vsel %vm5134_vm13, %v7031_v33, %v5131_v40 }
 0xf9c   : > { %6426 = vmatmul.msk.bf16.vlgmr.msra.gmra.mxu1 %vm1000_vm0, %v5320_v24  ;;  %v5056_v7 = vsel %vm1000_vm0, %v5020_v39, 0.0  ;;  %v5268_v55 = vmul.f32 %v5135_v48, %v9525_v2 }
 0xf9d   : > { %v5139_v36 = vmul.f32 0.5, %v5138_v53  ;;  %5057 = vadd.xlane.f32.xlu1 %v5056_v7  ;;  %v4965_v8 = vpop.xlane.xlu1 %4964  ;;  %v5043_v60 = vpop.xlane.xlu0 %5042 }
 0xf9e   : > { %v4989_v35 = vmul.f32 %v4965_v8, %v10699_v56  ;;  %v5079_v4 = vmul.f32 %v5043_v60, %v10699_v56  ;;  %v5287_v2 = vmul.f32 %v9638_v41, %v5268_v55  ;;  %v6501_v55 = vld [vmem:[%s10532_s19 + $0x28] sm:$0xff] }
 0xf9f   : > { %v5140_v59 = vsub.f32 1.5, %v5139_v36 }
 0xfa0   : > { %v7035_v28 = vpop.eup %7034  ;;  %v9680_v32 = vsub.f32 %v9564_v37, %v4989_v35  ;;  %v5095_v52 = vadd.f32 1e-05, %v5079_v4  ;;  %v9693_v26 = vadd.f32 %v9650_v30, %v5287_v2  ;;  %v6498_v2 = vld [vmem:[%s10532_s19 + $0x10] sm:$0xff] }
 0xfa1   : > { %v5141_v10 = vmul.f32 %v7033_v6, %v5140_v59  ;;  %v5147_v50 = vmul.f32 %v7035_v28, %v5094_v63  ;;  %vm5153_vm3 = vweird.f32 %v7035_v28 }
 0xfa2   : > { %7036 = vrsqrt.f32 %v5095_v52  ;;  %v5021_v46 = vmul.f32 %v9680_v32, %v9680_v32  ;;  %vm5154_vm2 = vmor %vm5152_vm4, %vm5153_vm3  ;;  %vm5162_vm6 = vweird.f32 %v5095_v52 }
 0xfa3   : > { %v5145_v11 = vsel %vm5144_vm1, %v7033_v6, %v5141_v10  ;;  %v5148_v23 = vmul.f32 %v7035_v28, %v5147_v50  ;;  %v6500_v10 = vld [vmem:[%s10532_s19 + $0x20] sm:$0xff] }
 0xfa4   : > { %v5269_v33 = vmul.f32 %v5145_v11, %v9539_v22  ;;  %v5059_v20 = vsel %vm1000_vm0, %v5021_v46, 0.0  ;;  %v6499_v46 = vld [vmem:[%s10532_s19 + $0x18] sm:$0xff] }
 0xfa5   : > { %v5149_v5 = vmul.f32 0.5, %v5148_v23  ;;  %5060 = vadd.xlane.f32.xlu0 %v5059_v20  ;;  %v4968_v37 = vpop.xlane.xlu1 %4967 }
 0xfa6   : > { %v4990_v18 = vmul.f32 %v4968_v37, %v10699_v56  ;;  %v5288_v21 = vmul.f32 %v9638_v41, %v5269_v33  ;;  %v6497_v37 = vld [vmem:[%s10532_s19 + $0x8] sm:$0xff] }
 0xfa7   : > { %v5150_v57 = vsub.f32 1.5, %v5149_v5 }
 0xfa8   : > { %v7037_v15 = vpop.eup %7036  ;;  %v9690_v27 = vsub.f32 %v9577_v49, %v4990_v18  ;;  %v9696_v22 = vadd.f32 %v9650_v30, %v5288_v21 }
 0xfa9   : > { %v5151_v14 = vmul.f32 %v7035_v28, %v5150_v57  ;;  %v5157_v0 = vmul.f32 %v7037_v15, %v5095_v52  ;;  %vm5163_vm5 = vweird.f32 %v7037_v15 }
 0xfaa   : > { %v5321_v12 = vpack.c.bf16 %v9696_v22, %v9693_v26  ;;  %v5022_v31 = vmul.f32 %v9690_v27, %v9690_v27  ;;  %vm5164_vm7 = vmor %vm5162_vm6, %vm5163_vm5 }
 0xfab   : > { %v5158_v13 = vmul.f32 %v7037_v15, %v5157_v0  ;;  %v5155_v54 = vsel %vm5154_vm2, %v7035_v28, %v5151_v14  ;;  %v6503_v28 = vld [vmem:[%s10532_s19 + $0x38] sm:$0xff]  ;;  %v6496_v0 = vld [vmem:[%s10532_s19] sm:$0xff] }
 0xfac   : > { %6427 = vmatmul.msk.bf16.gmra.mxu1 %vm1000_vm0, %v5321_v12  ;;  %v5062_v49 = vsel %vm1000_vm0, %v5022_v31, 0.0  ;;  %v5270_v25 = vmul.f32 %v5155_v54, %v9553_v51  ;;  %5513 = vmatpush.bf16.msrb.mxu2 %v6503_v28 }
 0xfad   : > { %v5159_v44 = vmul.f32 0.5, %v5158_v13  ;;  %5063 = vadd.xlane.f32.xlu2 %v5062_v49 }
 0xfae   : > { %v5289_v6 = vmul.f32 %v9638_v41, %v5270_v25 }
 0xfaf   : > { %v5160_v62 = vsub.f32 1.5, %v5159_v44 }
 0xfb0   : > { %v9709_v40 = vadd.f32 %v9650_v30, %v5289_v6 }
 0xfb1   : > { %v5161_v1 = vmul.f32 %v7037_v15, %v5160_v62 }
 0xfb3   : > { %v5165_v19 = vsel %vm5164_vm7, %v7037_v15, %v5161_v1 }
 0xfb4   : > { %v5271_v9 = vmul.f32 %v5165_v19, %v9567_v3 }
 0xfb6   : > { %v5290_v63 = vmul.f32 %v9638_v41, %v5271_v9 }
 0xfb8   : > { %v9712_v34 = vadd.f32 %v9650_v30, %v5290_v63 }
 0xfba   : > { %v5322_v24 = vpack.c.bf16 %v9712_v34, %v9709_v40 }
 0xfbc   : > { %6428 = vmatmul.msk.bf16.gmra.mxu1 %vm1000_vm0, %v5322_v24 }
 0xfcb   : > { %v5046_v51 = vpop.xlane.xlu0 %5045 }
 0xfd3   : > { %v4971_v39 = vpop.xlane.xlu0 %4970 }
 0xfd4   : > { %v4991_v53 = vmul.f32 %v4971_v39, %v10699_v56 }
 0xfd6   : > { %v9719_v3 = vsub.f32 %v9591_v58, %v4991_v53  ;;  %v5080_v58 = vmul.f32 %v5046_v51, %v10699_v56 }
 0xfd8   : > { %v5023_v7 = vmul.f32 %v9719_v3, %v9719_v3  ;;  %v5096_v59 = vadd.f32 1e-05, %v5080_v58 }
 0xfda   : > { %v5065_v48 = vsel %vm1000_vm0, %v5023_v7, 0.0  ;;  %7038 = vrsqrt.f32 %v5096_v59  ;;  %vm5172_vm9 = vweird.f32 %v5096_v59 }
 0xfdb   : > { %5066 = vadd.xlane.f32.xlu1 %v5065_v48  ;;  %v4974_v36 = vpop.xlane.xlu0 %4973 }
 0xfdc   : > { %v4992_v8 = vmul.f32 %v4974_v36, %v10699_v56 }
 0xfde   : > { %v9726_v60 = vsub.f32 %v9598_v43, %v4992_v8  ;;  %v6502_v43 = vld [vmem:[%s10532_s19 + $0x30] sm:$0xff] }
 0xfdf   : > { %5514 = vmatpush.bf16.msrb.mxu2 %v6502_v43 }
 0xfe0   : > { %v5024_v35 = vmul.f32 %v9726_v60, %v9726_v60  ;;  %v7039_v52 = vpop.eup %7038 }
 0xfe1   : > { %v5167_v50 = vmul.f32 %v7039_v52, %v5096_v59  ;;  %vm5173_vm8 = vweird.f32 %v7039_v52 }
 0xfe2   : > { %v5068_v4 = vsel %vm1000_vm0, %v5024_v35, 0.0  ;;  %vm5174_vm11 = vmor %vm5172_vm9, %vm5173_vm8 }
 0xfe3   : > { %5069 = vadd.xlane.f32.xlu0 %v5068_v4  ;;  %5515 = vmatpush.bf16.msrb.mxu2 %v6501_v55  ;;  %v5168_v11 = vmul.f32 %v7039_v52, %v5167_v50 }
 0xfe5   : > { %v5169_v5 = vmul.f32 0.5, %v5168_v11 }
 0xfe7   : > { %5516 = vmatpush.bf16.msrb.mxu2 %v6500_v10  ;;  %v5170_v18 = vsub.f32 1.5, %v5169_v5 }
 0xfe9   : > { %v5171_v12 = vmul.f32 %v7039_v52, %v5170_v18 }
 0xfeb   : > { %5517 = vmatpush.bf16.msrb.mxu2 %v6499_v46  ;;  %v5175_v49 = vsel %vm5174_vm11, %v7039_v52, %v5171_v12 }
 0xfec   : > { %v5272_v6 = vmul.f32 %v5175_v49, %v9583_v45 }
 0xfee   : > { %v5291_v45 = vmul.f32 %v9638_v41, %v5272_v6 }
 0xfef   : > { %5518 = vmatpush.bf16.msrb.mxu2 %v6498_v2 }
 0xff0   : > { %v9772_v55 = vadd.f32 %v9650_v30, %v5291_v45 }
 0xff3   : > { %5519 = vmatpush.bf16.msrb.mxu2 %v6497_v37 }
 0xff7   : > { %5520 = vmatpush.bf16.msrb.mxu2 %v6496_v0 }
 0xff8   : > { %v5049_v23 = vpop.xlane.xlu2 %5048 }
 0xff9   : > { %v5081_v33 = vmul.f32 %v5049_v23, %v10699_v56 }
 0xffb   : > { %v5097_v20 = vadd.f32 1e-05, %v5081_v33 }
 0xffd   : > { %7040 = vrsqrt.f32 %v5097_v20  ;;  %vm5182_vm13 = vweird.f32 %v5097_v20 }
0x1000   : > { %v5052_v21 = vpop.xlane.xlu2 %5051 }
0x1001   : > { %v5082_v57 = vmul.f32 %v5052_v21, %v10699_v56 }
0x1003   : > { %v7041_v15 = vpop.eup %7040  ;;  %v5098_v14 = vadd.f32 1e-05, %v5082_v57 }
0x1004   : > { %v5177_v31 = vmul.f32 %v7041_v15, %v5097_v20  ;;  %vm5183_vm12 = vweird.f32 %v7041_v15 }
0x1005   : > { %7042 = vrsqrt.f32 %v5098_v14  ;;  %vm5184_vm14 = vmor %vm5182_vm13, %vm5183_vm12  ;;  %vm5192_vm1 = vweird.f32 %v5098_v14 }
0x1006   : > { %v5178_v13 = vmul.f32 %v7041_v15, %v5177_v31 }
0x1008   : > { %v5179_v54 = vmul.f32 0.5, %v5178_v13  ;;  %v5055_v44 = vpop.xlane.xlu1 %5054  ;;  %v4977_v62 = vpop.xlane.xlu2 %4976 }
0x1009   : > { %v5083_v25 = vmul.f32 %v5055_v44, %v10699_v56  ;;  %v4993_v1 = vmul.f32 %v4977_v62, %v10699_v56 }
0x100a   : > { %v5180_v19 = vsub.f32 1.5, %v5179_v54 }
0x100b   : > { %v7043_v9 = vpop.eup %7042  ;;  %v5099_v63 = vadd.f32 1e-05, %v5083_v25  ;;  %v9762_v24 = vsub.f32 %v9633_v29, %v4993_v1 }
0x100c   : > { %v5181_v51 = vmul.f32 %v7041_v15, %v5180_v19  ;;  %v5187_v39 = vmul.f32 %v7043_v9, %v5098_v14  ;;  %vm5193_vm15 = vweird.f32 %v7043_v9  ;;  %v9785_v14 = vld [vmem:[%s10531_s18] ss:$0 sm:$0xff] }
0x100d   : > { %7044 = vrsqrt.f32 %v5099_v63  ;;  %v5025_v53 = vmul.f32 %v9762_v24, %v9762_v24  ;;  %vm5194_vm3 = vmor %vm5192_vm1, %vm5193_vm15  ;;  %vm5202_vm2 = vweird.f32 %v5099_v63 }
0x100e   : > { %v5185_v7 = vsel %vm5184_vm14, %v7041_v15, %v5181_v51  ;;  %v5188_v48 = vmul.f32 %v7043_v9, %v5187_v39 }
0x100f   : > { %v5273_v36 = vmul.f32 %v5185_v7, %v9612_v61  ;;  %v5071_v8 = vsel %vm1000_vm0, %v5025_v53, 0.0 }
0x1010   : > { %v5189_v35 = vmul.f32 0.5, %v5188_v48  ;;  %v5058_v4 = vpop.xlane.xlu1 %5057  ;;  %5072 = vadd.xlane.f32.xlu2 %v5071_v8 }
0x1011   : > { %v5084_v29 = vmul.f32 %v5058_v4, %v10699_v56  ;;  %v5292_v58 = vmul.f32 %v9638_v41, %v5273_v36 }
0x1012   : > { %v5190_v59 = vsub.f32 1.5, %v5189_v35 }
0x1013   : > { %v7045_v28 = vpop.eup %7044  ;;  %v5100_v43 = vadd.f32 1e-05, %v5084_v29  ;;  %v9775_v52 = vadd.f32 %v9650_v30, %v5292_v58 }
0x1014   : > { %v5191_v61 = vmul.f32 %v7043_v9, %v5190_v59  ;;  %v5197_v10 = vmul.f32 %v7045_v28, %v5099_v63  ;;  %vm5203_vm4 = vweird.f32 %v7045_v28 }
0x1015   : > { %7046 = vrsqrt.f32 %v5100_v43  ;;  %v5323_v50 = vpack.c.bf16 %v9775_v52, %v9772_v55  ;;  %vm5204_vm5 = vmor %vm5202_vm2, %vm5203_vm4  ;;  %vm5212_vm7 = vweird.f32 %v5100_v43 }
0x1016   : > { %v5198_v46 = vmul.f32 %v7045_v28, %v5197_v10  ;;  %v5195_v11 = vsel %vm5194_vm3, %v7043_v9, %v5191_v61 }
0x1017   : > { %6429 = vmatmul.msk.bf16.gmra.mxu1 %vm1000_vm0, %v5323_v50  ;;  %v5274_v18 = vmul.f32 %v5195_v11, %v9622_v16 }
0x1018   : > { %v5199_v23 = vmul.f32 0.5, %v5198_v46  ;;  %v5061_v33 = vpop.xlane.xlu0 %5060 }
0x1019   : > { %v5085_v20 = vmul.f32 %v5061_v33, %v10699_v56  ;;  %v5381_v2 = vpop.f32.mrf.mxu1  ;;  %v5293_v13 = vmul.f32 %v9638_v41, %v5274_v18 }
0x101a   : > { %v5200_v5 = vsub.f32 1.5, %v5199_v23  ;;  %v5382_v16 = vadd.f32 %v9785_v14, %v5381_v2 }
0x101b   : > { %v7047_v37 = vpop.eup %7046  ;;  %v5101_v21 = vadd.f32 1e-05, %v5085_v20  ;;  %v9793_v19 = vadd.f32 %v9650_v30, %v5293_v13 }
0x101c   : > { %v5201_v57 = vmul.f32 %v7045_v28, %v5200_v5  ;;  %v5207_v15 = vmul.f32 %v7047_v37, %v5100_v43  ;;  %vm5213_vm6 = vweird.f32 %v7047_v37  ;;  %v5421_v63 = vmax.f32 %v5382_v16, 0.0 }
0x101d   : > { %7048 = vrsqrt.f32 %v5101_v21  ;;  %vm5214_vm8 = vmor %vm5212_vm7, %vm5213_vm6  ;;  %vm5222_vm11 = vweird.f32 %v5101_v21 }
0x101e   : > { %v5205_v0 = vsel %vm5204_vm5, %v7045_v28, %v5201_v57  ;;  %v5208_v12 = vmul.f32 %v7047_v37, %v5207_v15 }
0x101f   : > { %v5275_v31 = vmul.f32 %v5205_v0, %v9642_v17 }
0x1020   : > { %v5209_v49 = vmul.f32 0.5, %v5208_v12  ;;  %v5064_v23 = vpop.xlane.xlu2 %5063 }
0x1021   : > { %v5383_v54 = vpop.f32.mrf.mxu1  ;;  %v5294_v44 = vmul.f32 %v9638_v41, %v5275_v31  ;;  %v5086_v20 = vmul.f32 %v5064_v23, %v10699_v56 }
0x1022   : > { %v5210_v62 = vsub.f32 1.5, %v5209_v49  ;;  %v5384_v25 = vadd.f32 %v9785_v14, %v5383_v54 }
0x1023   : > { %v7049_v1 = vpop.eup %7048  ;;  %v9796_v9 = vadd.f32 %v9650_v30, %v5294_v44  ;;  %v5102_v5 = vadd.f32 1e-05, %v5086_v20 }
0x1024   : > { %v5211_v17 = vmul.f32 %v7047_v37, %v5210_v62  ;;  %v5217_v6 = vmul.f32 %v7049_v1, %v5101_v21  ;;  %v5422_v51 = vmax.f32 %v5384_v25, 0.0  ;;  %vm5223_vm9 = vweird.f32 %v7049_v1 }
0x1025   : > { %v5324_v39 = vpack.c.bf16 %v9796_v9, %v9793_v19  ;;  %vm5224_vm12 = vmor %vm5222_vm11, %vm5223_vm9  ;;  %7050 = vrsqrt.f32 %v5102_v5  ;;  %vm5232_vm14 = vweird.f32 %v5102_v5  ;;  %vm5993_vm11 = vcmask 122880  }
0x1026   : > { %v5218_v53 = vmul.f32 %v7049_v1, %v5217_v6  ;;  %v5437_v7 = vpack.c.bf16 %v5422_v51, %v5421_v63  ;;  %v5215_v48 = vsel %vm5214_vm8, %v7047_v37, %v5211_v17 }
0x1027   : > { %6430 = vmatmul.msk.bf16.gmra.mxu1 %vm1000_vm0, %v5324_v39  ;;  %v5276_v35 = vmul.f32 %v5215_v48, %v9667_v47 }
0x1028   : > { %v5219_v36 = vmul.f32 0.5, %v5218_v53  ;;  %5521 = vmatmul.bf16.vlgmr.msrb.gmra.mxu2 %v5437_v7 }
0x1029   : > { %v5386_v8 = vpop.f32.mrf.mxu1  ;;  %v5295_v59 = vmul.f32 %v9638_v41, %v5276_v35 }
0x102a   : > { %v5220_v45 = vsub.f32 1.5, %v5219_v36  ;;  %v5387_v28 = vadd.f32 %v9785_v14, %v5386_v8 }
0x102b   : > { %v9808_v50 = vadd.f32 %v9650_v30, %v5295_v59  ;;  %v7051_v12 = vpop.eup %7050 }
0x102c   : > { %v5221_v4 = vmul.f32 %v7049_v1, %v5220_v45  ;;  %v5423_v46 = vmax.f32 %v5387_v28, 0.0  ;;  %v5227_v31 = vmul.f32 %v7051_v12, %v5102_v5  ;;  %vm5233_vm13 = vweird.f32 %v7051_v12 }
0x102d   : > { %vm5234_vm15 = vmor %vm5232_vm14, %vm5233_vm13 }
0x102e   : > { %v5225_v29 = vsel %vm5224_vm12, %v7049_v1, %v5221_v4  ;;  %v5228_v13 = vmul.f32 %v7051_v12, %v5227_v31 }
0x102f   : > { %v5277_v58 = vmul.f32 %v5225_v29, %v9680_v32 }
0x1030   : > { %v5229_v44 = vmul.f32 0.5, %v5228_v13 }
0x1031   : > { %v5388_v43 = vpop.f32.mrf.mxu1  ;;  %v5296_v61 = vmul.f32 %v9638_v41, %v5277_v58 }
0x1032   : > { %v5389_v10 = vadd.f32 %v9785_v14, %v5388_v43  ;;  %v5230_v62 = vsub.f32 1.5, %v5229_v44 }
0x1033   : > { %v9811_v47 = vadd.f32 %v9650_v30, %v5296_v61 }
0x1034   : > { %v5424_v11 = vmax.f32 %v5389_v10, 0.0  ;;  %v5231_v1 = vmul.f32 %v7051_v12, %v5230_v62 }
0x1035   : > { %v5325_v32 = vpack.c.bf16 %v9811_v47, %v9808_v50 }
0x1036   : > { %v5438_v33 = vpack.c.bf16 %v5424_v11, %v5423_v46  ;;  %v5235_v63 = vsel %vm5234_vm15, %v7051_v12, %v5231_v1 }
0x1037   : > { %6431 = vmatmul.msk.bf16.gmra.mxu1 %vm1000_vm0, %v5325_v32  ;;  %v5278_v53 = vmul.f32 %v5235_v63, %v9690_v27 }
0x1038   : > { %5526 = vmatmul.bf16.gmra.mxu2 %v5438_v33 }
0x1039   : > { %v5391_v2 = vpop.f32.mrf.mxu1  ;;  %v5297_v8 = vmul.f32 %v9638_v41, %v5278_v53 }
0x103a   : > { %v5392_v37 = vadd.f32 %v9785_v14, %v5391_v2 }
0x103b   : > { %v9825_v35 = vadd.f32 %v9650_v30, %v5297_v8 }
0x103c   : > { %v5425_v57 = vmax.f32 %v5392_v37, 0.0 }
0x1041   : > { %v5393_v18 = vpop.f32.mrf.mxu1 }
0x1042   : > { %v5394_v21 = vadd.f32 %v9785_v14, %v5393_v18 }
0x1044   : > { %v5426_v15 = vmax.f32 %v5394_v21, 0.0 }
0x1046   : > { %v5439_v0 = vpack.c.bf16 %v5426_v15, %v5425_v57 }
0x1048   : > { %5531 = vmatmul.bf16.gmra.mxu2 %v5439_v0 }
0x104e   : > { %v5067_v49 = vpop.xlane.xlu1 %5066 }
0x104f   : > { %v5087_v16 = vmul.f32 %v5067_v49, %v10699_v56 }
0x1051   : > { %v5103_v54 = vadd.f32 1e-05, %v5087_v16 }
0x1053   : > { %7052 = vrsqrt.f32 %v5103_v54  ;;  %vm5242_vm3 = vweird.f32 %v5103_v54 }
0x1056   : > { %v5070_v29 = vpop.xlane.xlu0 %5069 }
0x1057   : > { %v5088_v58 = vmul.f32 %v5070_v29, %v10699_v56 }
0x1059   : > { %v7053_v25 = vpop.eup %7052  ;;  %v5104_v59 = vadd.f32 1e-05, %v5088_v58 }
0x105a   : > { %v5237_v17 = vmul.f32 %v7053_v25, %v5103_v54  ;;  %vm5243_vm1 = vweird.f32 %v7053_v25 }
0x105b   : > { %vm5244_vm4 = vmor %vm5242_vm3, %vm5243_vm1  ;;  %7054 = vrsqrt.f32 %v5104_v59  ;;  %vm5252_vm5 = vweird.f32 %v5104_v59 }
0x105c   : > { %v5238_v6 = vmul.f32 %v7053_v25, %v5237_v17 }
0x105e   : > { %v5239_v51 = vmul.f32 0.5, %v5238_v6 }
0x1060   : > { %v5240_v39 = vsub.f32 1.5, %v5239_v51 }
0x1062   : > { %v5241_v7 = vmul.f32 %v7053_v25, %v5240_v39 }
0x1064   : > { %v5245_v48 = vsel %vm5244_vm4, %v7053_v25, %v5241_v7 }
0x1065   : > { %v5279_v36 = vmul.f32 %v5245_v48, %v9719_v3  ;;  %v7055_v3 = vpop.eup %7054 }
0x1066   : > { %v5247_v28 = vmul.f32 %v7055_v3, %v5104_v59  ;;  %vm5253_vm2 = vweird.f32 %v7055_v3 }
0x1067   : > { %v5298_v45 = vmul.f32 %v9638_v41, %v5279_v36  ;;  %vm5254_vm6 = vmor %vm5252_vm5, %vm5253_vm2 }
0x1068   : > { %v5248_v43 = vmul.f32 %v7055_v3, %v5247_v28 }
0x1069   : > { %v9828_v4 = vadd.f32 %v9650_v30, %v5298_v45 }
0x106a   : > { %v5249_v11 = vmul.f32 0.5, %v5248_v43 }
0x106b   : > { %v5326_v27 = vpack.c.bf16 %v9828_v4, %v9825_v35 }
0x106c   : > { %v5250_v32 = vsub.f32 1.5, %v5249_v11 }
0x106d   : > { %6432 = vmatmul.msk.bf16.gmra.mxu1 %vm1000_vm0, %v5326_v27 }
0x106e   : > { %v5251_v33 = vmul.f32 %v7055_v3, %v5250_v32 }
0x1070   : > { %v5255_v5 = vsel %vm5254_vm6, %v7055_v3, %v5251_v33 }
0x1071   : > { %v5280_v57 = vmul.f32 %v5255_v5, %v9726_v60 }
0x1073   : > { %v5299_v31 = vmul.f32 %v9638_v41, %v5280_v57 }
0x1075   : > { %v9842_v44 = vadd.f32 %v9650_v30, %v5299_v31 }
0x1083   : > { %v5073_v61 = vpop.xlane.xlu2 %5072 }
0x1084   : > { %v5089_v10 = vmul.f32 %v5073_v61, %v10699_v56 }
0x1086   : > { %v5105_v46 = vadd.f32 1e-05, %v5089_v10 }
0x1088   : > { %7056 = vrsqrt.f32 %v5105_v46  ;;  %vm5262_vm8 = vweird.f32 %v5105_v46 }
0x108e   : > { %v7057_v23 = vpop.eup %7056 }
0x108f   : > { %v5257_v20 = vmul.f32 %v7057_v23, %v5105_v46  ;;  %vm5263_vm7 = vweird.f32 %v7057_v23 }
0x1090   : > { %vm5264_vm9 = vmor %vm5262_vm8, %vm5263_vm7 }
0x1091   : > { %v5258_v2 = vmul.f32 %v7057_v23, %v5257_v20 }
0x1093   : > { %v5259_v37 = vmul.f32 0.5, %v5258_v2 }
0x1094   : > { %v5396_v18 = vpop.f32.mrf.mxu1 }
0x1095   : > { %v5260_v21 = vsub.f32 1.5, %v5259_v37  ;;  %v5397_v13 = vadd.f32 %v9785_v14, %v5396_v18 }
0x1097   : > { %v5261_v15 = vmul.f32 %v7057_v23, %v5260_v21  ;;  %v5427_v62 = vmax.f32 %v5397_v13, 0.0  ;;  %v9869_v13 = vld [vmem:[%s10533_s20] ss:$0 sm:$0xff] }
0x1099   : > { %v5265_v0 = vsel %vm5264_vm9, %v7057_v23, %v5261_v15 }
0x109a   : > { %v5281_v12 = vmul.f32 %v5265_v0, %v9762_v24 }
0x109c   : > { %v5398_v49 = vpop.f32.mrf.mxu1  ;;  %v5300_v16 = vmul.f32 %v9638_v41, %v5281_v12 }
0x109d   : > { %v5399_v54 = vadd.f32 %v9785_v14, %v5398_v49 }
0x109e   : > { %v9845_v60 = vadd.f32 %v9650_v30, %v5300_v16 }
0x109f   : > { %v5428_v25 = vmax.f32 %v5399_v54, 0.0 }
0x10a0   : > { %v5327_v24 = vpack.c.bf16 %v9845_v60, %v9842_v44 }
0x10a1   : > { %v5440_v1 = vpack.c.bf16 %v5428_v25, %v5427_v62 }
0x10a2   : > { %6433 = vmatmul.msk.bf16.gmra.mxu1 %vm1000_vm0, %v5327_v24 }
0x10a3   : > { %5536 = vmatmul.bf16.gmra.mxu2 %v5440_v1 }
0x10a4   : > { %v5401_v17 = vpop.f32.mrf.mxu1 }
0x10a5   : > { %v5402_v41 = vadd.f32 %v9785_v14, %v5401_v17 }
0x10a7   : > { %v5429_v51 = vmax.f32 %v5402_v41, 0.0 }
0x10ab   : > { %v5522_v58 = vpop.f32.mrf.mxu2 }
0x10ac   : > { %v5403_v6 = vpop.f32.mrf.mxu1 }
0x10ad   : > { %v5404_v63 = vadd.f32 %v9785_v14, %v5403_v6 }
0x10af   : > { %v5430_v39 = vmax.f32 %v5404_v63, 0.0 }
0x10b1   : > { %v5441_v53 = vpack.c.bf16 %v5430_v39, %v5429_v51 }
0x10b3   : > { %5541 = vmatmul.bf16.gmra.mxu2 %v5441_v53  ;;  %v9856_v10 = vpop.f32.mrf.mxu2 }
0x10b4   : > { %v5406_v30 = vpop.f32.mrf.mxu1 }
0x10b5   : > { %v5407_v7 = vadd.f32 %v9785_v14, %v5406_v30 }
0x10b7   : > { %v5431_v8 = vmax.f32 %v5407_v7, 0.0 }
0x10bb   : > { %v9858_v11 = vpop.f32.mrf.mxu2 }
0x10bc   : > { %v5408_v48 = vpop.f32.mrf.mxu1 }
0x10bd   : > { %v5409_v36 = vadd.f32 %v9785_v14, %v5408_v48 }
0x10bf   : > { %v5432_v45 = vmax.f32 %v5409_v36, 0.0 }
0x10c1   : > { %v5442_v29 = vpack.c.bf16 %v5432_v45, %v5431_v8 }
0x10c3   : > { %5546 = vmatmul.bf16.gmra.mxu2 %v5442_v29  ;;  %v9860_v32 = vpop.f32.mrf.mxu2 }
0x10cb   : > { %v9862_v23 = vpop.f32.mrf.mxu2 }
0x10d3   : > { %v5534_v33 = vpop.f32.mrf.mxu2 }
0x10d4   : > { %v5535_v30 = vadd.f32 %v9869_v13, %v5534_v33 }
0x10d6   : > { %v9900_v48 = vadd.f32 %v5535_v30, %v9712_v34 }
0x10d8   : > { %v5595_v36 = vsel %vm1000_vm0, %v9900_v48, 0.0 }
0x10ea   : > { %v5411_v27 = vpop.f32.mrf.mxu1 }
0x10eb   : > { %v5412_v59 = vadd.f32 %v9785_v14, %v5411_v27 }
0x10ed   : > { %v5433_v43 = vmax.f32 %v5412_v59, 0.0 }
0x10f2   : > { %v5413_v3 = vpop.f32.mrf.mxu1 }
0x10f3   : > { %v5414_v28 = vadd.f32 %v9785_v14, %v5413_v3 }
0x10f5   : > { %v5434_v61 = vmax.f32 %v5414_v28, 0.0 }
0x10f7   : > { %v5443_v46 = vpack.c.bf16 %v5434_v61, %v5433_v43 }
0x10f9   : > { %5551 = vmatmul.bf16.gmra.mxu2 %v5443_v46 }
0x111f   : > { %v5416_v20 = vpop.f32.mrf.mxu1 }
0x1120   : > { %v5417_v2 = vadd.f32 %v9785_v14, %v5416_v20 }
0x1122   : > { %v5435_v21 = vmax.f32 %v5417_v2, 0.0 }
0x1126   : > { %v5537_v5 = vpop.f32.mrf.mxu2 }
0x1127   : > { %v5418_v37 = vpop.f32.mrf.mxu1 }
0x1128   : > { %v5419_v18 = vadd.f32 %v9785_v14, %v5418_v37  ;;  %v5528_v37 = vadd.f32 %v9869_v13, %v9858_v11  ;;  %v5525_v11 = vadd.f32 %v9869_v13, %v9856_v10 }
0x112a   : > { %v5436_v57 = vmax.f32 %v5419_v18, 0.0  ;;  %v5533_v18 = vadd.f32 %v9869_v13, %v9862_v23  ;;  %v5530_v23 = vadd.f32 %v9869_v13, %v9860_v32 }
0x112c   : > { %v5444_v15 = vpack.c.bf16 %v5436_v57, %v5435_v21  ;;  %v9951_v57 = vadd.f32 %v5528_v37, %v9693_v26  ;;  %v9965_v26 = vadd.f32 %v5525_v11, %v9664_v42 }
0x112e   : > { %v5539_v0 = vpop.f32.mrf.mxu2  ;;  %5556 = vmatmul.bf16.gmra.mxu2 %v5444_v15  ;;  %v9954_v15 = vadd.f32 %v5533_v18, %v9709_v40  ;;  %v9968_v40 = vadd.f32 %v5530_v23, %v9696_v22 }
0x112f   : > { %v5540_v43 = vadd.f32 %v9869_v13, %v5539_v0 }
0x1130   : > { %v5592_v0 = vsel %vm1000_vm0, %v9954_v15, 0.0  ;;  %v5589_v32 = vsel %vm1000_vm0, %v9968_v40, 0.0 }
0x1131   : > { %v9932_v20 = vadd.f32 %v5540_v43, %v9775_v52 }
0x1133   : > { %v5601_v52 = vsel %vm1000_vm0, %v9932_v20, 0.0 }
0x1136   : > { %v5542_v12 = vpop.f32.mrf.mxu2 }
0x1137   : > { %v5543_v34 = vadd.f32 %v9869_v13, %v5542_v12  ;;  %v5586_v12 = vsel %vm1000_vm0, %v9951_v57, 0.0 }
0x113e   : > { %v5544_v31 = vpop.f32.mrf.mxu2 }
0x1146   : > { %v5547_v49 = vpop.f32.mrf.mxu2 }
0x1147   : > { %v5548_v16 = vadd.f32 %v9869_v13, %v5547_v49 }
0x1149   : > { %v5572_v54 = vadd.f32 %v5548_v16, %v9808_v50  ;;  %v5538_v50 = vadd.f32 %v9869_v13, %v5537_v5 }
0x114b   : > { %v5610_v62 = vsel %vm1000_vm0, %v5572_v54, 0.0 }
0x114c   : > { %5611 = vadd.xlane.f32.xlu0 %v5610_v62 }
0x114e   : > { %v5549_v14 = vpop.f32.mrf.mxu2 }
0x114f   : > { %v5550_v25 = vadd.f32 %v9869_v13, %v5549_v14 }
0x1151   : > { %v9876_v24 = vadd.f32 %v5550_v25, %v9811_v47  ;;  %v9888_v47 = vadd.f32 %v5538_v50, %v9772_v55  ;;  %v5523_v55 = vadd.f32 %v9869_v13, %v5522_v58 }
0x1153   : > { %v5613_v1 = vsel %vm1000_vm0, %v9876_v24, 0.0  ;;  %v5598_v7 = vsel %vm1000_vm0, %v9888_v47, 0.0 }
0x1154   : > { %5614 = vadd.xlane.f32.xlu2 %v5613_v1 }
0x117c   : > { %v5552_v17 = vpop.f32.mrf.mxu2 }
0x117d   : > { %v5553_v41 = vadd.f32 %v9869_v13, %v5552_v17 }
0x117f   : > { %v9882_v6 = vadd.f32 %v5553_v41, %v9825_v35 }
0x1181   : > { %v5616_v63 = vsel %vm1000_vm0, %v9882_v6, 0.0 }
0x1182   : > { %5617 = vadd.xlane.f32.xlu2 %v5616_v63 }
0x1184   : > { %v5554_v51 = vpop.f32.mrf.mxu2 }
0x1185   : > { %v5555_v39 = vadd.f32 %v9869_v13, %v5554_v51 }
0x1187   : > { %v9892_v53 = vadd.f32 %v5555_v39, %v9828_v4  ;;  %v9906_v4 = vadd.f32 %v5523_v55, %v9661_v38  ;;  %v9918_v38 = vadd.f32 %v5543_v34, %v9793_v19 }
0x1189   : > { %v5619_v35 = vsel %vm1000_vm0, %v9892_v53, 0.0  ;;  %v5580_v8 = vsel %vm1000_vm0, %v9906_v4, 0.0  ;;  %v5604_v46 = vsel %vm1000_vm0, %v9918_v38, 0.0 }
0x118a   : > { %5620 = vadd.xlane.f32.xlu1 %v5619_v35  ;;  %5599 = vadd.xlane.f32.xlu2 %v5598_v7 }
0x1192   : > { %5596 = vadd.xlane.f32.xlu2 %v5595_v36 }
0x119a   : > { %5581 = vadd.xlane.f32.xlu2 %v5580_v8 }
0x11b1   : > { %v5557_v45 = vpop.f32.mrf.mxu2 }
0x11b2   : > { %v5558_v29 = vadd.f32 %v9869_v13, %v5557_v45 }
0x11b4   : > { %v9912_v27 = vadd.f32 %v5558_v29, %v9842_v44  ;;  %v5545_v44 = vadd.f32 %v9869_v13, %v5544_v31 }
0x11b6   : > { %v5622_v58 = vsel %vm1000_vm0, %v9912_v27, 0.0 }
0x11b7   : > { %5623 = vadd.xlane.f32.xlu1 %v5622_v58 }
0x11b9   : > { %v5559_v59 = vpop.f32.mrf.mxu2 }
0x11ba   : > { %v5560_v3 = vadd.f32 %v9869_v13, %v5559_v59  ;;  %v5583_v13 = vsel %vm1000_vm0, %v9965_v26, 0.0 }
0x11bc   : > { %v9922_v28 = vadd.f32 %v5560_v3, %v9845_v60  ;;  %v9935_v60 = vadd.f32 %v5545_v44, %v9796_v9 }
0x11be   : > { %v5625_v61 = vsel %vm1000_vm0, %v9922_v28, 0.0  ;;  %v5607_v21 = vsel %vm1000_vm0, %v9935_v60, 0.0 }
0x11bf   : > { %5626 = vadd.xlane.f32.xlu0 %v5625_v61  ;;  %5605 = vadd.xlane.f32.xlu1 %v5604_v46  ;;  %v5612_v33 = vpop.xlane.xlu0 %5611 }
0x11c0   : > { %v5638_v19 = vmul.f32 %v5612_v33, %v10699_v56 }
0x11c2   : > { %v9937_v2 = vsub.f32 %v5572_v54, %v5638_v19 }
0x11c4   : > { %v5670_v5 = vmul.f32 %v9937_v2, %v9937_v2 }
0x11c6   : > { %v5706_v9 = vsel %vm1000_vm0, %v5670_v5, 0.0 }
0x11c7   : > { %5608 = vadd.xlane.f32.xlu0 %v5607_v21  ;;  %5602 = vadd.xlane.f32.xlu1 %v5601_v52  ;;  %v5615_v31 = vpop.xlane.xlu2 %5614 }
0x11c8   : > { %5707 = vadd.xlane.f32.xlu2 %v5706_v9  ;;  %v5639_v10 = vmul.f32 %v5615_v31, %v10699_v56 }
0x11ca   : > { %v9972_v49 = vsub.f32 %v9876_v24, %v5639_v10 }
0x11cc   : > { %v5671_v42 = vmul.f32 %v9972_v49, %v9972_v49 }
0x11ce   : > { %v5709_v16 = vsel %vm1000_vm0, %v5671_v42, 0.0 }
0x11cf   : > { %5593 = vadd.xlane.f32.xlu0 %v5592_v0  ;;  %5587 = vadd.xlane.f32.xlu1 %v5586_v12 }
0x11d7   : > { %5590 = vadd.xlane.f32.xlu0 %v5589_v32  ;;  %5584 = vadd.xlane.f32.xlu1 %v5583_v13 }
0x11df   : > { %5710 = vadd.xlane.f32.xlu1 %v5709_v16 }
0x11f5   : > { %v5618_v22 = vpop.xlane.xlu2 %5617 }
0x11f6   : > { %v5640_v54 = vmul.f32 %v5618_v22, %v10699_v56 }
0x11f8   : > { %v9983_v62 = vsub.f32 %v9882_v6, %v5640_v54 }
0x11fa   : > { %v5672_v14 = vmul.f32 %v9983_v62, %v9983_v62 }
0x11fc   : > { %v5712_v25 = vsel %vm1000_vm0, %v5672_v14, 0.0 }
0x11fd   : > { %v5621_v24 = vpop.xlane.xlu1 %5620  ;;  %v5600_v1 = vpop.xlane.xlu2 %5599  ;;  %5713 = vadd.xlane.f32.xlu1 %v5712_v25 }
0x11fe   : > { %v5641_v17 = vmul.f32 %v5621_v24, %v10699_v56  ;;  %v5634_v41 = vmul.f32 %v5600_v1, %v10699_v56 }
0x1200   : > { %v9991_v50 = vsub.f32 %v9892_v53, %v5641_v17  ;;  %v9994_v63 = vsub.f32 %v9888_v47, %v5634_v41 }
0x1202   : > { %v5673_v6 = vmul.f32 %v9991_v50, %v9991_v50  ;;  %v5666_v51 = vmul.f32 %v9994_v63, %v9994_v63 }
0x1204   : > { %v5715_v39 = vsel %vm1000_vm0, %v5673_v6, 0.0  ;;  %v5694_v30 = vsel %vm1000_vm0, %v5666_v51, 0.0 }
0x1205   : > { %v5597_v35 = vpop.xlane.xlu2 %5596  ;;  %5716 = vadd.xlane.f32.xlu0 %v5715_v39  ;;  %5695 = vadd.xlane.f32.xlu1 %v5694_v30 }
0x1206   : > { %v5633_v7 = vmul.f32 %v5597_v35, %v10699_v56 }
0x1208   : > { %v10004_v53 = vsub.f32 %v9900_v48, %v5633_v7 }
0x120a   : > { %v5665_v47 = vmul.f32 %v10004_v53, %v10004_v53 }
0x120c   : > { %v5691_v55 = vsel %vm1000_vm0, %v5665_v47, 0.0 }
0x120d   : > { %v5582_v36 = vpop.xlane.xlu2 %5581  ;;  %5692 = vadd.xlane.f32.xlu1 %v5691_v55 }
0x120e   : > { %v5628_v8 = vmul.f32 %v5582_v36, %v10699_v56 }
0x1210   : > { %v10011_v45 = vsub.f32 %v9906_v4, %v5628_v8 }
0x1212   : > { %v5660_v29 = vmul.f32 %v10011_v45, %v10011_v45 }
0x1214   : > { %v5676_v34 = vsel %vm1000_vm0, %v5660_v29, 0.0 }
0x1215   : > { %5677 = vadd.xlane.f32.xlu1 %v5676_v34 }
0x122a   : > { %v5624_v48 = vpop.xlane.xlu1 %5623 }
0x122b   : > { %v5642_v58 = vmul.f32 %v5624_v48, %v10699_v56 }
0x122d   : > { %v10018_v59 = vsub.f32 %v9912_v27, %v5642_v58 }
0x122f   : > { %v5674_v3 = vmul.f32 %v10018_v59, %v10018_v59 }
0x1231   : > { %v5718_v43 = vsel %vm1000_vm0, %v5674_v3, 0.0 }
0x1232   : > { %5719 = vadd.xlane.f32.xlu0 %v5718_v43  ;;  %v5606_v4 = vpop.xlane.xlu1 %5605  ;;  %v5627_v44 = vpop.xlane.xlu0 %5626 }
0x1233   : > { %v5636_v61 = vmul.f32 %v5606_v4, %v10699_v56  ;;  %v5643_v46 = vmul.f32 %v5627_v44, %v10699_v56 }
0x1235   : > { %v10026_v33 = vsub.f32 %v9918_v38, %v5636_v61  ;;  %v10029_v19 = vsub.f32 %v9922_v28, %v5643_v46  ;;  %v7098_v61 = vld [vmem:[%s8155_s29] sm:$0x1] }
0x1236   : > { %v5994_v46 = vsel %vm5993_vm11, %v7098_v61, 0.0 }
0x1237   : > { %v5668_v27 = vmul.f32 %v10026_v33, %v10026_v33  ;;  %v5675_v5 = vmul.f32 %v10029_v19, %v10029_v19 }
0x1239   : > { %v5700_v37 = vsel %vm1000_vm0, %v5668_v27, 0.0  ;;  %v5721_v18 = vsel %vm1000_vm0, %v5675_v5, 0.0  ;;  %v7099_v27 = vld [vmem:[%s8155_s29 + $0x1] sm:$0x1] }
0x123a   : > { %5701 = vadd.xlane.f32.xlu0 %v5700_v37  ;;  %v5603_v21 = vpop.xlane.xlu1 %5602  ;;  %5722 = vadd.xlane.f32.xlu2 %v5721_v18  ;;  %v5609_v52 = vpop.xlane.xlu0 %5608  ;;  %v5997_v5 = vsel %vm5993_vm11, %v7099_v27, 0.0 }
0x123b   : > { %v5635_v38 = vmul.f32 %v5603_v21, %v10699_v56  ;;  %v5637_v9 = vmul.f32 %v5609_v52, %v10699_v56  ;;  %v5708_v35 = vpop.xlane.xlu2 %5707  ;;  %5998 = vadd.xlane.f32.xlu1 %v5997_v5 }
0x123c   : > { %v5734_v7 = vmul.f32 %v5708_v35, %v10699_v56 }
0x123d   : > { %v10040_v28 = vsub.f32 %v9932_v20, %v5635_v38  ;;  %v10043_v11 = vsub.f32 %v9935_v60, %v5637_v9 }
0x123e   : > { %v10083_v47 = vadd.f32 1e-05, %v5734_v7 }
0x123f   : > { %v5667_v23 = vmul.f32 %v10040_v28, %v10040_v28  ;;  %v5669_v0 = vmul.f32 %v10043_v11, %v10043_v11 }
0x1240   : > { %vm5862_vm15 = vweird.f32 %v10083_v47 }
0x1241   : > { %v5697_v12 = vsel %vm1000_vm0, %v5667_v23, 0.0  ;;  %v5703_v31 = vsel %vm1000_vm0, %v5669_v0, 0.0 }
0x1242   : > { %5698 = vadd.xlane.f32.xlu0 %v5697_v12  ;;  %v5588_v10 = vpop.xlane.xlu1 %5587  ;;  %5704 = vadd.xlane.f32.xlu2 %v5703_v31  ;;  %v5594_v32 = vpop.xlane.xlu0 %5593 }
0x1243   : > { %v5630_v20 = vmul.f32 %v5588_v10, %v10699_v56  ;;  %v5632_v13 = vmul.f32 %v5594_v32, %v10699_v56  ;;  %v7100_v10 = vld [vmem:[%s8155_s29 + $0x2] sm:$0x1] }
0x1244   : > { %v6000_v32 = vsel %vm5993_vm11, %v7100_v10, 0.0 }
0x1245   : > { %v10054_v60 = vsub.f32 %v9951_v57, %v5630_v20  ;;  %v10057_v42 = vsub.f32 %v9954_v15, %v5632_v13 }
0x1247   : > { %v5662_v16 = vmul.f32 %v10054_v60, %v10054_v60  ;;  %v5664_v22 = vmul.f32 %v10057_v42, %v10057_v42 }
0x1249   : > { %v5682_v54 = vsel %vm1000_vm0, %v5662_v16, 0.0  ;;  %v5688_v14 = vsel %vm1000_vm0, %v5664_v22, 0.0  ;;  %v7101_v16 = vld [vmem:[%s8155_s29 + $0x3] sm:$0x1] }
0x124a   : > { %5683 = vadd.xlane.f32.xlu0 %v5682_v54  ;;  %v5585_v25 = vpop.xlane.xlu1 %5584  ;;  %5689 = vadd.xlane.f32.xlu2 %v5688_v14  ;;  %v5591_v24 = vpop.xlane.xlu0 %5590  ;;  %v6003_v22 = vsel %vm5993_vm11, %v7101_v16, 0.0 }
0x124b   : > { %v5629_v57 = vmul.f32 %v5585_v25, %v10699_v56  ;;  %v5631_v1 = vmul.f32 %v5591_v24, %v10699_v56  ;;  %v7102_v25 = vld [vmem:[%s8155_s29 + $0x4] sm:$0x1] }
0x124c   : > { %v6006_v24 = vsel %vm5993_vm11, %v7102_v25, 0.0 }
0x124d   : > { %v10068_v15 = vsub.f32 %v9965_v26, %v5629_v57  ;;  %v10071_v17 = vsub.f32 %v9968_v40, %v5631_v1  ;;  %6007 = vadd.xlane.f32.xlu1 %v6006_v24 }
0x124f   : > { %v5661_v41 = vmul.f32 %v10068_v15, %v10068_v15  ;;  %v5663_v6 = vmul.f32 %v10071_v17, %v10071_v17 }
0x1251   : > { %v5679_v51 = vsel %vm1000_vm0, %v5661_v41, 0.0  ;;  %v5685_v39 = vsel %vm1000_vm0, %v5663_v6, 0.0 }
0x1252   : > { %5680 = vadd.xlane.f32.xlu0 %v5679_v51  ;;  %5686 = vadd.xlane.f32.xlu2 %v5685_v39  ;;  %v5711_v30 = vpop.xlane.xlu1 %5710 }
0x1253   : > { %v5735_v26 = vmul.f32 %v5711_v30, %v10699_v56 }
0x1255   : > { %v10081_v40 = vadd.f32 1e-05, %v5735_v26 }
0x1257   : > { %7058 = vrsqrt.f32 %v10081_v40  ;;  %vm5872_vm14 = vweird.f32 %v10081_v40 }
0x1258   : > { %7060 = vrsqrt.f32 %v10083_v47 }
0x125a   : > { %5995 = vadd.xlane.f32.xlu2 %v5994_v46  ;;  %6001 = vadd.xlane.f32.xlu0 %v6000_v32 }
0x125d   : > { %v10091_v48 = vpop.eup %7058 }
0x125e   : > { %v10093_v58 = vpop.eup %7060  ;;  %v5867_v43 = vmul.f32 %v10091_v48, %v10081_v40  ;;  %vm5873_vm12 = vweird.f32 %v10091_v48 }
0x125f   : > { %v5857_v44 = vmul.f32 %v10093_v58, %v10083_v47  ;;  %vm5863_vm13 = vweird.f32 %v10093_v58  ;;  %vm10144_vm1 = vmor %vm5872_vm14, %vm5873_vm12 }
0x1260   : > { %v5868_v37 = vmul.f32 %v10091_v48, %v5867_v43  ;;  %v7104_v43 = vld [vmem:[%s8155_s29 + $0x6] sm:$0x1]  ;;  %vm10155_vm3 = vmor %vm5862_vm15, %vm5863_vm13 }
0x1261   : > { %v5858_v18 = vmul.f32 %v10093_v58, %v5857_v44  ;;  %v6012_v44 = vsel %vm5993_vm11, %v7104_v43, 0.0 }
0x1262   : > { %v5869_v38 = vmul.f32 0.5, %v5868_v37  ;;  %6004 = vadd.xlane.f32.xlu2 %v6003_v22 }
0x1263   : > { %v5859_v23 = vmul.f32 0.5, %v5858_v18 }
0x1264   : > { %v5870_v54 = vsub.f32 1.5, %v5869_v38 }
0x1265   : > { %v5860_v57 = vsub.f32 1.5, %v5859_v23 }
0x1266   : > { %v5871_v39 = vmul.f32 %v10091_v48, %v5870_v54 }
0x1267   : > { %v5861_v30 = vmul.f32 %v10093_v58, %v5860_v57 }
0x1268   : > { %v5875_v47 = vsel %vm10144_vm1, %v10091_v48, %v5871_v39 }
0x1269   : > { %v5865_v5 = vsel %vm10155_vm3, %v10093_v58, %v5861_v30  ;;  %v5927_v10 = vmul.f32 %v5875_v47, %v9972_v49  ;;  %v10192_v49 = vld [vmem:[%s10534_s21] ss:$0 sm:$0xff] }
0x126a   : > { %6013 = vadd.xlane.f32.xlu2 %v6012_v44 }
0x1270   : > { %v5714_v55 = vpop.xlane.xlu1 %5713 }
0x1271   : > { %v5736_v36 = vmul.f32 %v5714_v55, %v10699_v56  ;;  %v7103_v55 = vld [vmem:[%s8155_s29 + $0x5] sm:$0x1] }
0x1273   : > { %v10088_v29 = vadd.f32 1e-05, %v5736_v36  ;;  %v6009_v36 = vsel %vm5993_vm11, %v7103_v55, 0.0 }
0x1274   : > { %6010 = vadd.xlane.f32.xlu0 %v6009_v36 }
0x1275   : > { %7062 = vrsqrt.f32 %v10088_v29  ;;  %vm5882_vm2 = vweird.f32 %v10088_v29 }
0x1278   : > { %v5717_v8 = vpop.xlane.xlu0 %5716  ;;  %v5696_v3 = vpop.xlane.xlu1 %5695 }
0x1279   : > { %v5737_v34 = vmul.f32 %v5717_v8, %v10699_v56  ;;  %v5730_v52 = vmul.f32 %v5696_v3, %v10699_v56 }
0x127b   : > { %v10098_v4 = vadd.f32 1e-05, %v5737_v34  ;;  %v10109_v21 = vpop.eup %7062  ;;  %v10116_v31 = vadd.f32 1e-05, %v5730_v52  ;;  %v7105_v52 = vld [vmem:[%s8155_s29 + $0x7] sm:$0x1] }
0x127c   : > { %v5877_v0 = vmul.f32 %v10109_v21, %v10088_v29  ;;  %v6015_v38 = vsel %vm5993_vm11, %v7105_v52, 0.0  ;;  %vm5883_vm4 = vweird.f32 %v10109_v21  ;;  %s6202_s29 = scalar_lea.sflag [#allocation3], %s837_s13 }
0x127d   : > { %7064 = vrsqrt.f32 %v10098_v4  ;;  %6016 = vadd.xlane.f32.xlu1 %v6015_v38  ;;  %vm10201_vm5 = vmor %vm5882_vm2, %vm5883_vm4  ;;  %vm5892_vm7 = vweird.f32 %v10098_v4  ;;  %vm5822_vm15 = vweird.f32 %v10116_v31 }
0x127e   : > { %v5878_v1 = vmul.f32 %v10109_v21, %v5877_v0  ;;  %7066 = vrsqrt.f32 %v10116_v31 }
0x1280   : > { %v5693_v9 = vpop.xlane.xlu1 %5692  ;;  %v5879_v35 = vmul.f32 0.5, %v5878_v1  ;;  %v5946_v1 = vmul.f32 %v10192_v49, %v5927_v10 }
0x1281   : > { %v5729_v20 = vmul.f32 %v5693_v9, %v10699_v56 }
0x1282   : > { %v5880_v37 = vsub.f32 1.5, %v5879_v35 }
0x1283   : > { %v10114_v12 = vpop.eup %7064  ;;  %v10132_v51 = vadd.f32 1e-05, %v5729_v20  ;;  %v5926_v20 = vmul.f32 %v5865_v5, %v9937_v2 }
0x1284   : > { %v5887_v41 = vmul.f32 %v10114_v12, %v10098_v4  ;;  %v10151_v40 = vpop.eup %7066  ;;  %v5881_v16 = vmul.f32 %v10109_v21, %v5880_v37  ;;  %vm5893_vm6 = vweird.f32 %v10114_v12 }
0x1285   : > { %v5817_v32 = vmul.f32 %v10151_v40, %v10116_v31  ;;  %v5945_v55 = vmul.f32 %v10192_v49, %v5926_v20  ;;  %vm10239_vm8 = vmor %vm5892_vm7, %vm5893_vm6  ;;  %vm5823_vm11 = vweird.f32 %v10151_v40  ;;  %vm5812_vm7 = vweird.f32 %v10132_v51 }
0x1286   : > { %v5888_v26 = vmul.f32 %v10114_v12, %v5887_v41  ;;  %v5885_v35 = vsel %vm10201_vm5, %v10109_v21, %v5881_v16 }
0x1287   : > { %v5818_v2 = vmul.f32 %v10151_v40, %v5817_v32 }
0x1288   : > { %v5678_v7 = vpop.xlane.xlu1 %5677  ;;  %v5889_v18 = vmul.f32 0.5, %v5888_v26 }
0x1289   : > { %v5724_v23 = vmul.f32 %v5678_v7, %v10699_v56  ;;  %v10217_v7 = vld [vmem:[%s10535_s22] ss:$0 sm:$0xff]  ;;  %v5819_v43 = vmul.f32 0.5, %v5818_v2 }
0x128a   : > { %v5890_v22 = vsub.f32 1.5, %v5889_v18  ;;  %v10229_v61 = vadd.f32 %v10217_v7, %v5946_v1  ;;  %v10245_v4 = vadd.f32 %v10217_v7, %v5945_v55 }
0x128b   : > { %v5820_v38 = vsub.f32 1.5, %v5819_v43 }
0x128c   : > { %v5891_v26 = vmul.f32 %v10114_v12, %v5890_v22 }
0x128e   : > { %v5895_v18 = vsel %vm10239_vm8, %v10114_v12, %v5891_v26  ;;  %v10289_v26 = vmul.f32 %v10151_v40, %v5820_v38  ;;  %vm10325_vm8 = vmor %vm5822_vm15, %vm5823_vm11 }
0x12a5   : > { %v5720_v13 = vpop.xlane.xlu0 %5719 }
0x12a6   : > { %v5738_v14 = vmul.f32 %v5720_v13, %v10699_v56 }
0x12a8   : > { %v10130_v6 = vadd.f32 1e-05, %v5738_v14  ;;  %v10194_v14 = vadd.f32 1e-05, %v5724_v23 }
0x12aa   : > { %7068 = vrsqrt.f32 %v10130_v6  ;;  %vm5902_vm12 = vweird.f32 %v10130_v6 }
0x12ab   : > { %7070 = vrsqrt.f32 %v10132_v51 }
0x12ad   : > { %v5723_v34 = vpop.xlane.xlu2 %5722  ;;  %v5702_v3 = vpop.xlane.xlu0 %5701 }
0x12ae   : > { %v5739_v46 = vmul.f32 %v5723_v34, %v10699_v56  ;;  %v5732_v27 = vmul.f32 %v5702_v3, %v10699_v56 }
0x12b0   : > { %v10169_v9 = vpop.eup %7068  ;;  %v10172_v0 = vadd.f32 1e-05, %v5739_v46  ;;  %v10174_v48 = vadd.f32 1e-05, %v5732_v27  ;;  %v5928_v27 = vmul.f32 %v5885_v35, %v9983_v62 }
0x12b1   : > { %v5897_v58 = vmul.f32 %v10169_v9, %v10130_v6  ;;  %v10184_v13 = vpop.eup %7070  ;;  %vm5903_vm9 = vweird.f32 %v10169_v9 }
0x12b2   : > { %7072 = vrsqrt.f32 %v10172_v0  ;;  %v5807_v39 = vmul.f32 %v10184_v13, %v10132_v51  ;;  %vm10264_vm13 = vmor %vm5902_vm12, %vm5903_vm9  ;;  %vm5912_vm1 = vweird.f32 %v10172_v0  ;;  %vm5842_vm4 = vweird.f32 %v10174_v48 }
0x12b3   : > { %v5898_v54 = vmul.f32 %v10169_v9, %v5897_v58  ;;  %7074 = vrsqrt.f32 %v10174_v48  ;;  %v5977_v58 = vpack.c.bf16 %v10229_v61, %v10245_v4  ;;  %vm5813_vm15 = vweird.f32 %v10184_v13 }
0x12b4   : > { %7076 = vrsqrt.f32 %v10194_v14  ;;  %v5808_v47 = vmul.f32 %v10184_v13, %v5807_v39 }
0x12b5   : > { %v5899_v25 = vmul.f32 0.5, %v5898_v54  ;;  %v5705_v24 = vpop.xlane.xlu2 %5704  ;;  %v5699_v57 = vpop.xlane.xlu0 %5698  ;;  %v5929_v54 = vmul.f32 %v5895_v18, %v9991_v50 }
0x12b6   : > { %v5733_v30 = vmul.f32 %v5705_v24, %v10699_v56  ;;  %v5731_v29 = vmul.f32 %v5699_v57, %v10699_v56  ;;  %v10258_v16 = vmul.f32 0.5, %v5808_v47  ;;  %v10269_v24 = vmul.f32 %v10192_v49, %v5928_v27 }
0x12b7   : > { %v5900_v8 = vsub.f32 1.5, %v5899_v25  ;;  %v5948_v27 = vmul.f32 %v10192_v49, %v5929_v54 }
0x12b8   : > { %v7073_v36 = vpop.eup %7072  ;;  %v10221_v34 = vadd.f32 1e-05, %v5733_v30  ;;  %v10223_v3 = vadd.f32 1e-05, %v5731_v29 }
0x12b9   : > { %v10225_v21 = vpop.eup %7074  ;;  %v5907_v44 = vmul.f32 %v7073_v36, %v10172_v0  ;;  %v5901_v52 = vmul.f32 %v10169_v9, %v5900_v8  ;;  %vm5913_vm14 = vweird.f32 %v7073_v36 }
0x12ba   : > { %v5837_v46 = vmul.f32 %v10225_v21, %v10174_v48  ;;  %7078 = vrsqrt.f32 %v10221_v34  ;;  %v10255_v20 = vpop.eup %7076  ;;  %vm5914_vm3 = vmor %vm5912_vm1, %vm5913_vm14  ;;  %vm5843_vm2 = vweird.f32 %v10225_v21  ;;  %vm5852_vm5 = vweird.f32 %v10221_v34 }
0x12bb   : > { %v5908_v37 = vmul.f32 %v7073_v36, %v5907_v44  ;;  %7080 = vrsqrt.f32 %v10223_v3  ;;  %v5905_v6 = vsel %vm10264_vm13, %v10169_v9, %v5901_v52  ;;  %v5757_v30 = vmul.f32 %v10255_v20, %v10194_v14  ;;  %vm10345_vm11 = vmor %vm5842_vm4, %vm5843_vm2 }
0x12bc   : > { %v5838_v62 = vmul.f32 %v10225_v21, %v5837_v46  ;;  %v5810_v9 = vsub.f32 1.5, %v10258_v16  ;;  %v5930_v8 = vmul.f32 %v5905_v6, %v10018_v59  ;;  %vm5832_vm13 = vweird.f32 %v10223_v3 }
0x12bd   : > { %v5909_v23 = vmul.f32 0.5, %v5908_v37  ;;  %v5690_v10 = vpop.xlane.xlu2 %5689  ;;  %v5684_v32 = vpop.xlane.xlu0 %5683  ;;  %v5758_v5 = vmul.f32 %v10255_v20, %v5757_v30 }
0x12be   : > { %v5728_v12 = vmul.f32 %v5690_v10, %v10699_v56  ;;  %v5726_v22 = vmul.f32 %v5684_v32, %v10699_v56  ;;  %v5839_v1 = vmul.f32 0.5, %v5838_v62 }
0x12bf   : > { %v5910_v25 = vsub.f32 1.5, %v5909_v23  ;;  %v5949_v23 = vmul.f32 %v10192_v49, %v5930_v8 }
0x12c0   : > { %v10271_v57 = vpop.eup %7078  ;;  %v10277_v41 = vadd.f32 1e-05, %v5728_v12  ;;  %v10279_v50 = vadd.f32 1e-05, %v5726_v22  ;;  %v5840_v47 = vsub.f32 1.5, %v5839_v1 }
0x12c1   : > { %v10281_v39 = vpop.eup %7080  ;;  %v5911_v29 = vmul.f32 %v7073_v36, %v5910_v25  ;;  %v5847_v35 = vmul.f32 %v10271_v57, %v10221_v34  ;;  %vm5853_vm6 = vweird.f32 %v10271_v57 }
0x12c2   : > { %v5827_v55 = vmul.f32 %v10281_v39, %v10223_v3  ;;  %7082 = vrsqrt.f32 %v10277_v41  ;;  %v5841_v32 = vmul.f32 %v10225_v21, %v5840_v47  ;;  %vm5833_vm9 = vweird.f32 %v10281_v39  ;;  %vm5854_vm12 = vmor %vm5852_vm5, %vm5853_vm6 }
0x12c3   : > { %v5915_v43 = vsel %vm5914_vm3, %v7073_v36, %v5911_v29  ;;  %v5848_v0 = vmul.f32 %v10271_v57, %v5847_v35  ;;  %7084 = vrsqrt.f32 %v10279_v50  ;;  %v5968_v3 = vadd.f32 %v10217_v7, %v5949_v23  ;;  %vm10362_vm14 = vmor %vm5832_vm13, %vm5833_vm9 }
0x12c4   : > { %v5931_v44 = vmul.f32 %v5915_v43, %v10029_v19  ;;  %v5828_v46 = vmul.f32 %v10281_v39, %v5827_v55  ;;  %v5825_v55 = vsel %vm10325_vm8, %v10151_v40, %v10289_v26  ;;  %v5845_v48 = vsel %vm10345_vm11, %v10225_v21, %v5841_v32  ;;  %vm10382_vm3 = vmor %vm5812_vm7, %vm5813_vm15 }
0x12c5   : > { %v5849_v37 = vmul.f32 0.5, %v5848_v0  ;;  %v5687_v59 = vpop.xlane.xlu2 %5686  ;;  %v5681_v36 = vpop.xlane.xlu0 %5680  ;;  %v5967_v43 = vadd.f32 %v10217_v7, %v5948_v27  ;;  %v5811_v21 = vmul.f32 %v10184_v13, %v5810_v9  ;;  %vm5802_vm4 = vweird.f32 %v10277_v41 }
0x12c6   : > { %v5829_v18 = vmul.f32 0.5, %v5828_v46  ;;  %v5727_v52 = vmul.f32 %v5687_v59, %v10699_v56  ;;  %v5725_v62 = vmul.f32 %v5681_v36, %v10699_v56  ;;  %v5950_v19 = vmul.f32 %v10192_v49, %v5931_v44 }
0x12c7   : > { %v5850_v38 = vsub.f32 1.5, %v5849_v37  ;;  %v5966_v46 = vadd.f32 %v10217_v7, %v10269_v24  ;;  %v5759_v37 = vmul.f32 0.5, %v5758_v5  ;;  %v5924_v59 = vmul.f32 %v5845_v48, %v10026_v33 }
0x12c8   : > { %v10311_v10 = vpop.eup %7082  ;;  %v5830_v16 = vsub.f32 1.5, %v5829_v18  ;;  %v10315_v12 = vadd.f32 1e-05, %v5727_v52  ;;  %v10317_v22 = vadd.f32 1e-05, %v5725_v62  ;;  %v5969_v1 = vadd.f32 %v10217_v7, %v5950_v19 }
0x12c9   : > { %v10319_v54 = vpop.eup %7084  ;;  %v5851_v25 = vmul.f32 %v10271_v57, %v5850_v38  ;;  %v5797_v6 = vmul.f32 %v10311_v10, %v10277_v41  ;;  %vm5803_vm1 = vweird.f32 %v10311_v10  ;;  %v5978_v9 = vpack.c.bf16 %v5967_v43, %v5966_v46 }
0x12ca   : > { %v5831_v30 = vmul.f32 %v10281_v39, %v5830_v16  ;;  %v5777_v31 = vmul.f32 %v10319_v54, %v10279_v50  ;;  %7086 = vrsqrt.f32 %v10315_v12  ;;  %v5979_v44 = vpack.c.bf16 %v5969_v1, %v5968_v3  ;;  %vm5804_vm2 = vmor %vm5802_vm4, %vm5803_vm1 }
0x12cb   : > { %v5855_v34 = vsel %vm5854_vm12, %v10271_v57, %v5851_v25  ;;  %v5798_v35 = vmul.f32 %v10311_v10, %v5797_v6  ;;  %7088 = vrsqrt.f32 %v10317_v22  ;;  %vm5783_vm5 = vweird.f32 %v10319_v54 }
0x12cc   : > { %v5778_v57 = vmul.f32 %v10319_v54, %v5777_v31  ;;  %v5925_v0 = vmul.f32 %v5855_v34, %v10043_v11  ;;  %v5835_v40 = vsel %vm10362_vm14, %v10281_v39, %v5831_v30  ;;  %5980 = vmatpush.bf16.msrb.mxu3 %v5979_v44  ;;  %v5922_v39 = vmul.f32 %v5825_v55, %v9994_v63 }
0x12cd   : > { %v5799_v26 = vmul.f32 0.5, %v5798_v35  ;;  %v5923_v36 = vmul.f32 %v5835_v40, %v10040_v28  ;;  %v5815_v63 = vsel %vm10382_vm3, %v10184_v13, %v5811_v21  ;;  %v5760_v19 = vsub.f32 1.5, %v5759_v37 }
0x12ce   : > { %v5779_v47 = vmul.f32 0.5, %v5778_v57  ;;  %v5944_v5 = vmul.f32 %v10192_v49, %v5925_v0  ;;  %v5943_v41 = vmul.f32 %v10192_v49, %v5924_v59  ;;  %vm5762_vm6 = vweird.f32 %v10194_v14  ;;  %v5970_v59 = vld [vmem:[%s854_s10] sm:$0xff]  ;;  %s6216_s10 = sshll.u32 %s6212_s2, 4  ;;  %s6217_s10 = int_to_ptr.hbm [resolvable:$true] %s6216_s10 }
0x12cf   : > { %v5800_v27 = vsub.f32 1.5, %v5799_v26  ;;  %vm5782_vm7 = vweird.f32 %v10279_v50  ;;  %v5942_v13 = vmul.f32 %v10192_v49, %v5923_v36  ;;  %v5941_v6 = vmul.f32 %v10192_v49, %v5922_v39  ;;  %v6505_v39 = vld [vmem:[%s10536_s23 + $0x8] sm:$0xff]  ;;  %v5996_v36 = vpop.xlane.xlu2 %5995  ;;  %s7120_s9 = sshra.s32 %s6217_s10, 4  ;;  %s7121_s9 = int_to_ptr.hbm [resolvable:$true] %s7120_s9 }
0x12d0   : > { %v7087_v11 = vpop.eup %7086  ;;  %v5780_v18 = vsub.f32 1.5, %v5779_v47  ;;  %5981 = vmatpush.bf16.msrb.mxu3 %v5978_v9  ;;  %vm10402_vm8 = vmor %vm5782_vm7, %vm5783_vm5  ;;  %v5921_v1 = vmul.f32 %v5815_v63, %v10004_v53  ;;  %vm5763_vm9 = vweird.f32 %v10255_v20  ;;  %v5962_v29 = vadd.f32 %v10217_v7, %v5943_v41  ;;  %v6002_v9 = vpop.xlane.xlu0 %6001  ;;  %s7122_s15 = scalar_lea.hbm %s7121_s9, 8  ;;  %p7127_p2 = scmp.lt.s32.totalorder %s7121_s9, %s10540_s27 }
0x12d1   : > { %v7089_v52 = vpop.eup %7088  ;;  %v5801_v33 = vmul.f32 %v10311_v10, %v5800_v27  ;;  %v5787_v24 = vmul.f32 %v7087_v11, %v10315_v12  ;;  %vm5793_vm12 = vweird.f32 %v7087_v11  ;;  %vm5792_vm13 = vweird.f32 %v10315_v12  ;;  %vm10422_vm14 = vmor %vm5762_vm6, %vm5763_vm9  ;;  %p7123_p13 = scmp.ne.s32.totalorder %s7121_s9, %s7122_s15  ;;  %p7128_p3 = scmp.lt.s32.totalorder %s7126_s14, %s7122_s15 }
0x12d2   : > { %v5781_v28 = vmul.f32 %v10319_v54, %v5780_v18  ;;  %v5767_v51 = vmul.f32 %v7089_v52, %v10317_v22  ;;  %vm5773_vm11 = vweird.f32 %v7089_v52  ;;  %v5961_v34 = vadd.f32 %v10217_v7, %v5942_v13  ;;  %vm5794_vm15 = vmor %vm5792_vm13, %vm5793_vm12  ;;  %v5999_v18 = vpop.xlane.xlu1 %5998 }
0x12d3   : > { %v5805_v38 = vsel %vm5804_vm2, %v10311_v10, %v5801_v33  ;;  %v5788_v23 = vmul.f32 %v7087_v11, %v5787_v24  ;;  %v5963_v10 = vadd.f32 %v10217_v7, %v5944_v5  ;;  %vm5772_vm1 = vweird.f32 %v10317_v22  ;;  %p7124_p0 = pnand %p7123_p13, %p7366_p5  ;;  %p7129_p4 = por %p7128_p3, %p7127_p2 }
0x12d4   : > { %v5768_v32 = vmul.f32 %v7089_v52, %v5767_v51  ;;  %v5920_v16 = vmul.f32 %v5805_v38, %v10057_v42  ;;  %v5785_v50 = vsel %vm10402_vm8, %v10319_v54, %v5781_v28  ;;  %v5761_v42 = vmul.f32 %v10255_v20, %v5760_v19  ;;  %5982 = vmatpush.bf16.msrb.mxu3 %v5977_v58  ;;  %vm5774_vm3 = vmor %vm5772_vm1, %vm5773_vm11 }
0x12d5   : > { %v5789_v25 = vmul.f32 0.5, %v5788_v23  ;;  %v5918_v35 = vmul.f32 %v5785_v50, %v10054_v60  ;;  %v5976_v55 = vpack.c.bf16 %v5963_v10, %v5962_v29  ;;  %v5960_v14 = vadd.f32 %v10217_v7, %v5941_v6  ;;  %p7125_p1 = pneg %p7124_p0 }
0x12d6   : > { %v5769_v30 = vmul.f32 0.5, %v5768_v32  ;;  %v5939_v61 = vmul.f32 %v10192_v49, %v5920_v16  ;;  %v5940_v12 = vmul.f32 %v10192_v49, %v5921_v1  ;;  %v5765_v60 = vsel %vm10422_vm14, %v10255_v20, %v5761_v42 }
0x12d7   : > { %v5790_v31 = vsub.f32 1.5, %v5789_v25  ;;  %v5975_v43 = vpack.c.bf16 %v5961_v34, %v5960_v14  ;;  %v5937_v22 = vmul.f32 %v10192_v49, %v5918_v35  ;;  %v5916_v26 = vmul.f32 %v5765_v60, %v10011_v45  ;;  %v6005_v62 = vpop.xlane.xlu2 %6004  ;;  %p7130_p7 = pnand %p7129_p4, %p7125_p1 }
0x12d8   : > { %v5770_v53 = vsub.f32 1.5, %v5769_v30  ;;  %5983 = vmatpush.bf16.msrb.mxu3 %v5976_v55  ;;  %v5958_v0 = vadd.f32 %v10217_v7, %v5939_v61  ;;  %v5959_v44 = vadd.f32 %v10217_v7, %v5940_v12  ;;  %v6020_v33 = vadd.f32 1e-08, %v6002_v9 }
0x12d9   : > { %v5791_v3 = vmul.f32 %v7087_v11, %v5790_v31  ;;  %v5956_v21 = vadd.f32 %v10217_v7, %v5937_v22  ;;  %v5935_v46 = vmul.f32 %v10192_v49, %v5916_v26  ;;  %vm6042_vm4 = vcmask 1041409  }
0x12da   : > { %v5771_v4 = vmul.f32 %v7089_v52, %v5770_v53  ;;  %v6008_v63 = vpop.xlane.xlu1 %6007  ;;  %v6021_v28 = vadd.f32 1e-08, %v6005_v62  ;;  %v6028_v51 = vperm.slane %v6020_v33, 0  ;;  %vm6044_vm2 = vcmask 1042434  }
0x12db   : > { %v5795_v58 = vsel %vm5794_vm15, %v7087_v11, %v5791_v3  ;;  %v5954_v37 = vadd.f32 %v10217_v7, %v5935_v46  ;;  %v5971_v11 = vpack.c.bf16 %v5970_v59, %v5970_v59  ;;  %v6022_v38 = vadd.f32 1e-08, %v6008_v63  ;;  %v6507_v46 = vld [vmem:[%s10538_s25 + $0x8] sm:$0xff] }
0x12dc   : > { %v5919_v48 = vmul.f32 %v5795_v58, %v10071_v17  ;;  %v5775_v8 = vsel %vm5774_vm3, %v7089_v52, %v5771_v4  ;;  %5984 = vmatpush.bf16.msrb.mxu3 %v5975_v43  ;;  %v5974_v17 = vpack.c.bf16 %v5959_v44, %v5958_v0  ;;  %v6018_v52 = vadd.f32 1e-08, %v5996_v36  ;;  %v6702_v0 = vld [vmem:[%s10537_s24] ss:$0 sm:$0xff] }
0x12dd   : > { %v5917_v57 = vmul.f32 %v5775_v8, %v10068_v15  ;;  %v6029_v41 = vperm.slane %v6021_v28, 0  ;;  %vm6046_vm5 = vcmask 1043459   ;;  %v6030_v2 = vperm.slane %v6022_v38, 0 }
0x12de   : > { %v5938_v40 = vmul.f32 %v10192_v49, %v5919_v48  ;;  %v6026_v24 = vperm.slane %v6018_v52, 0  ;;  %vm6048_vm6 = vcmask 1044484   ;;  %vm6050_vm7 = vcmask 1045509  }
0x12df   : > { %v5936_v15 = vmul.f32 %v10192_v49, %v5917_v57  ;;  %v6504_v49 = vld [vmem:[%s10536_s23] sm:$0xff]  ;;  %v6014_v16 = vpop.xlane.xlu2 %6013  ;;  %vm6052_vm8 = vcmask 1046534   ;;  %vm6054_vm9 = vcmask 1047559  }
0x12e0   : > { %v5957_v20 = vadd.f32 %v10217_v7, %v5938_v40  ;;  %5985 = vmatpush.bf16.msrb.mxu3 %v5974_v17  ;;  %v6024_v10 = vadd.f32 1e-08, %v6014_v16 }
0x12e1   : > { %v5955_v45 = vadd.f32 %v10217_v7, %v5936_v15  ;;  %v6019_v7 = vadd.f32 1e-08, %v5999_v18 }
0x12e2   : > { %v5973_v47 = vpack.c.bf16 %v5957_v20, %v5956_v21  ;;  %v6032_v42 = vperm.slane %v6024_v10, 0 }
0x12e3   : > { %v5972_v27 = vpack.c.bf16 %v5955_v45, %v5954_v37  ;;  %v6027_v5 = vperm.slane %v6019_v7, 0  ;;  %v6506_v45 = vld [vmem:[%s10538_s25] sm:$0xff] }
0x12e4   : > { %5986 = vmatpush.bf16.msrb.mxu3 %v5973_v47 }
0x12e5   : > { %v6043_v19 = vsel %vm6042_vm4, %v6027_v5, %v6026_v24 }
0x12e6   : > { %v6045_v32 = vsel %vm6044_vm2, %v6028_v51, %v6043_v19  ;;  %v7187_v51 = vmov 16.0  }
0x12e7   : > { %v6011_v23 = vpop.xlane.xlu0 %6010  ;;  %v6047_v25 = vsel %vm6046_vm5, %v6029_v41, %v6045_v32 }
0x12e8   : > { %5987 = vmatpush.bf16.msrb.mxu3 %v5972_v27  ;;  %v6023_v13 = vadd.f32 1e-08, %v6011_v23  ;;  %v6049_v50 = vsel %vm6048_vm6, %v6030_v2, %v6047_v25 }
0x12ea   : > { %v6031_v1 = vperm.slane %v6023_v13, 0 }
0x12eb   : > { %5988 = vmatmul.bf16.vlgmr.msrb.gmra.mxu3 %v5971_v11 }
0x12ec   : > { %6102 = vmatpush.bf16.msra.mxu3 %v6505_v39  ;;  %v6051_v31 = vsel %vm6050_vm7, %v6031_v1, %v6049_v50 }
0x12ed   : > { %v6053_v53 = vsel %vm6052_vm8, %v6032_v42, %v6051_v31 }
0x12f0   : > { %6103 = vmatpush.bf16.msra.mxu3 %v6504_v49  ;;  %v6017_v6 = vpop.xlane.xlu1 %6016 }
0x12f1   : > { %v6025_v30 = vadd.f32 1e-08, %v6017_v6 }
0x12f3   : > { %v6033_v29 = vperm.slane %v6025_v30, 0 }
0x12f4   : > { %6162 = vmatpush.bf16.msrb.mxu3 %v6507_v46 }
0x12f5   : > { %v6055_v34 = vsel %vm6054_vm9, %v6033_v29, %v6053_v53 }
0x12f6   : > { %7090 = vrcp.f32 %v6055_v34  ;;  %vm6062_vm12 = vweird.f32 %v6055_v34  ;;  %v6068_v61 = vand.u32 2147483648, %v6055_v34  ;;  %v6066_v58 = vand.u32 2147483647, %v6055_v34 }
0x12f8   : > { %v6069_v14 = vor.u32 1.1754944e-38, %v6068_v61  ;;  %vm6067_vm14 = vcmp.eq.f32.partialorder %v6066_v58, 8.507059e+37  ;;  %6163 = vmatpush.bf16.msrb.mxu3 %v6506_v45 }
0x12fc   : > { %v7091_v54 = vpop.eup %7090 }
0x12fd   : > { %v6058_v35 = vmul.f32 %v7091_v54, %v6055_v34  ;;  %vm6063_vm13 = vweird.f32 %v7091_v54 }
0x12fe   : > { %vm6064_vm11 = vmor %vm6062_vm12, %vm6063_vm13 }
0x12ff   : > { %v6059_v3 = vsub.f32 1.0, %v6058_v35 }
0x1301   : > { %v6060_v55 = vmul.f32 %v7091_v54, %v6059_v3 }
0x1303   : > { %v6061_v4 = vadd.f32 %v7091_v54, %v6060_v55 }
0x1305   : > { %v6065_v12 = vsel %vm6064_vm11, %v7091_v54, %v6061_v4 }
0x1306   : > { %v6070_v48 = vsel %vm6067_vm14, %v6069_v14, %v6065_v12 }
0x136e   : > { %v5989_v60 = vpop.f32.mrf.mxu3 }
0x136f   : > { %v6071_v8 = vmul.f32 %v6070_v48, %v5989_v60 }
0x1371   : > { %v6072_v57 = vpack.c.bf16 %v6071_v8, %v6071_v8 }
0x1373   : > { %6474 = vmatmul.msk.bf16.vlgmr.msra.gmra.mxu3 %vm1000_vm0, %v6072_v57 }
0x1376   : > { %v5991_v43 = vpop.f32.mrf.mxu3 }
0x13f6   : > { %v6105_v22 = vpop.f32.mrf.mxu3 }
0x13f7   : > { %v6106_v40 = vadd.f32 %v6702_v0, %v6105_v22 }
0x13f9   : > { %v6109_v26 = vsel %vm1000_vm0, %v6106_v40, 0.0 }
0x13fa   : > { %6110 = vadd.xlane.f32.xlu0 %v6109_v26 }
0x13fe   : > { %v6107_v44 = vpop.f32.mrf.mxu3 }
0x146d   : > { %v6111_v20 = vpop.xlane.xlu0 %6110 }
0x146e   : > { %v6112_v17 = vmul.f32 %v6111_v20, %v10699_v56 }
0x1470   : > { %v6113_v21 = vsub.f32 %v6106_v40, %v6112_v17 }
0x1472   : > { %v6114_v15 = vmul.f32 %v6113_v21, %v6113_v21 }
0x1474   : > { %v6115_v47 = vsel %vm1000_vm0, %v6114_v15, 0.0 }
0x1475   : > { %6116 = vadd.xlane.f32.xlu2 %v6115_v47 }
0x14e8   : > { %v6117_v37 = vpop.xlane.xlu2 %6116 }
0x14e9   : > { %v6118_v59 = vmul.f32 %v6117_v37, %v10699_v56  ;;  %v6703_v56 = vld [vmem:[%s10539_s26] ss:$0 sm:$0xff] }
0x14eb   : > { %v6119_v27 = vadd.f32 1e-05, %v6118_v59 }
0x14ed   : > { %7092 = vrsqrt.f32 %v6119_v27  ;;  %vm6126_vm1 = vweird.f32 %v6119_v27 }
0x14ee   : > { %7094 = vrcp.f32 %v7187_v51 }
0x14f3   : > { %v7093_v11 = vpop.eup %7092 }
0x14f4   : > { %v6121_v39 = vmul.f32 %v7093_v11, %v6119_v27  ;;  %vm6127_vm15 = vweird.f32 %v7093_v11  ;;  %v7095_v19 = vpop.eup %7094 }
0x14f5   : > { %vm6128_vm3 = vmor %vm6126_vm1, %vm6127_vm15  ;;  %v6173_v38 = vmul.f32 16.0, %v7095_v19  ;;  %vm6177_vm4 = vweird.f32 %v7095_v19 }
0x14f6   : > { %v6122_v49 = vmul.f32 %v7093_v11, %v6121_v39 }
0x14f7   : > { %v6174_v23 = vsub.f32 1.0, %v6173_v38 }
0x14f8   : > { %v6123_v36 = vmul.f32 0.5, %v6122_v49 }
0x14f9   : > { %v6175_v41 = vmul.f32 %v7095_v19, %v6174_v23 }
0x14fa   : > { %v6124_v18 = vsub.f32 1.5, %v6123_v36 }
0x14fb   : > { %v6176_v32 = vadd.f32 %v7095_v19, %v6175_v41 }
0x14fc   : > { %v6125_v9 = vmul.f32 %v7093_v11, %v6124_v18 }
0x14fd   : > { %v6178_v13 = vsel %vm6177_vm4, %v7095_v19, %v6176_v32 }
0x14fe   : > { %v6129_v52 = vsel %vm6128_vm3, %v7093_v11, %v6125_v9 }
0x14ff   : > { %v6130_v7 = vmul.f32 %v6129_v52, %v6113_v21 }
0x1501   : > { %v6131_v62 = vmax.f32 %v6130_v7, 0.0 }
0x1503   : > { %v6132_v33 = vpack.c.bf16 %v6131_v62, %v6131_v62 }
0x1505   : > { %6483 = vmatmul.msk.bf16.vlgmr.msrb.gmra.mxu3 %vm1000_vm0, %v6132_v33 }
0x1588   : > { %v6165_v24 = vpop.f32.mrf.mxu3 }
0x1589   : > { %v6166_v5 = vadd.f32 %v6703_v56, %v6165_v24 }
0x158b   : > { %v6169_v63 = vsel %vm2329_vm10, %v6166_v5, 0.0 }
0x158c   : > { %6170 = vadd.xlane.f32.xlu1 %v6169_v63 }
0x1590   : > { %v6167_v28 = vpop.f32.mrf.mxu3 }
0x15ff   : > { %v6171_v16 = vpop.xlane.xlu1 %6170 }
0x1600   : > { %v6179_v2 = vmul.f32 %v6178_v13, %v6171_v16 }
0x1602   : > { %v6180_v25 = vsub.f32 %v6166_v5, %v6179_v2 }
0x1604   : > { %v6181_v10 = vmul.f32 %v6180_v25, %v6180_v25 }
0x1606   : > { %v6182_v6 = vsel %vm2329_vm10, %v6181_v10, 0.0 }
0x1607   : > { %6183 = vadd.xlane.f32.xlu0 %v6182_v6 }
0x167a   : > { %v6184_v1 = vpop.xlane.xlu0 %6183 }
0x167b   : > { %v6185_v50 = vmul.f32 %v6184_v1, %v6178_v13 }
0x167d   : > { %v6186_v30 = vadd.f32 1e-05, %v6185_v50 }
0x167f   : > { %7096 = vrsqrt.f32 %v6186_v30  ;;  %vm6193_vm2 = vweird.f32 %v6186_v30 }
0x1685   : > { %v7097_v42 = vpop.eup %7096 }
0x1686   : > { %v6188_v31 = vmul.f32 %v7097_v42, %v6186_v30  ;;  %vm6194_vm0 = vweird.f32 %v7097_v42 }
0x1687   : > { %vm6195_vm5 = vmor %vm6193_vm2, %vm6194_vm0 }
0x1688   : > { %v6189_v29 = vmul.f32 %v7097_v42, %v6188_v31 }
0x168a   : > { %v6190_v53 = vmul.f32 0.5, %v6189_v29 }
0x168c   : > { %v6191_v34 = vsub.f32 1.5, %v6190_v53 }
0x168e   : > { %v6192_v54 = vmul.f32 %v7097_v42, %v6191_v34 }
0x1690   : > { %v6196_v35 = vsel %vm6195_vm5, %v7097_v42, %v6192_v54 }
0x1691   : > { %v6197_v3 = vmul.f32 %v6196_v35, %v6180_v25 }
0x1693   : > { %v6198_v55 = vmax.f32 %v6197_v3, 0.0 }
0x1695   : > { %v6199_v61 = vsel %vm2329_vm10, %v6198_v55, 0.0 }
0x1696   : > { %6200 = vst [vmem:[%s839_s3] sm:$0xff] %v6199_v61 }
0x1697   : > { %7133 = shalt.err (!%p7130_p7)
}
0x1698   : > { %6508 = dma.vmem_to_hbm [thread:$0]  (%p7366_p5), %s6215_s0, 128, %s6217_s10, %s6202_s29  }
0x1699 PF: > { %p6514_p8 = scmp.ge.s32.totalorder %s7168_s30, 2  ;;  %s6228_s13 = sand.u32 1, %s7156_s7  }
0x169a   : > { %s6229_s3 = scalar_lea.sflag [#allocation3], %s6228_s13 }
0x169b   : > { %p6511_p9 = pnand %p6514_p8, %p7370_p6 }
0x169d   : > { %p6512_p10 = pneg %p6511_p9 }
0x169f   : > { %7151 = dma.done.wait (%p6512_p10), %s6229_s3, 128  }
0x16a0   : > { %7153 = vsyncadd (%p6512_p10), %s6229_s3, 4294967168  ;;  %s10742_s15 = sld [smem:[#allocation5_spill]]  ;;  %p37_p11 = scmp.ge.s32.totalorder %s7353_s28, 4  }
0x16a1   : > { %s10743_s7 = smov %s7160_s4  ;;  %s10744_s4 = smov %s7164_s8 }
0x16a2   : > { %s10746_s30 = smov %s7353_s28  ;;  %39 = sbr.rel (!%p37_p11) target bundleno = 20 (0x14), region = 169 }
0x16a6   : > { %s10745_s8 = smov %s10742_s15 }
0x16a7   :  { %6235 = vsyncpa [#allocation3], 1 }
0x16a8   :  { %6237 = vsyncpa [#allocation3 + $0x1], 1 }

</bundles_post_ra>
